<compile_context>
chip_gen: v6e
topology: v6e:2x2x1
jax: 0.10.0
libtpu: 0.0.40
codegen_flags: <defaults>
</compile_context>

<pallas_src>
import functools
import math

import numpy as np
import jax
import jax.numpy as jnp
from jax import lax
from jax.experimental import pallas as pl
from jax.experimental.pallas import tpu as pltpu


C0, C1, C2 = 16, 32, 64
NUM_CLASSES = 416
VISION_DIM = 512
CLS_PAD = 512            # 416 padded to 4*128 lanes (unmasked vector stores)
FRAME_LENGTH = 16        # small analogue of the default 50
FRAMES_PER_BLOCK = 8     # F: F*C0 = 128, F*C1 = 256, F*C2 = 512 lanes


# ----------------------------------------------------------------------------
# Constant selection / embedding matrices (tiny, 0/1, built once per shape)
# ----------------------------------------------------------------------------
def _conv_out(size, stride):
    return (size + 2 - 3) // stride + 1


def _stride2_embed_matrix(h_in, w_in, h_out, w_out):
    """Full-conv values on the padded (h_in+2, w_in+2) grid -> stride-2 samples
    embedded into the zero-extended flattened padded (h_out+2, w_out+2) grid."""
    wp_in = w_in + 2
    hp_out, wp_out = h_out + 2, w_out + 2
    src_n = (h_in + 2) * wp_in
    dst_n = hp_out * wp_out + 2 * (wp_out + 1)
    s = np.zeros((dst_n, src_n), np.float32)
    for i in range(h_out):
        for j in range(w_out):
            r = (wp_out + 1) + (i + 1) * wp_out + (j + 1)
            q = (2 * i + 1) * wp_in + (2 * j + 1)
            s[r, q] = 1.0
    return jnp.asarray(s)


def _interior_embed_matrix(h, w):
    """Embed the (h+2)*(w+2) padded grid into its zero-extended flat form,
    keeping only interior positions (zeroes the pad ring + extension)."""
    hp, wp = h + 2, w + 2
    n = hp * wp
    s = np.zeros((n + 2 * (wp + 1), n), np.float32)
    for i in range(h):
        for j in range(w):
            q = (i + 1) * wp + (j + 1)
            s[(wp + 1) + q, q] = 1.0
    return jnp.asarray(s)


def _stride2_select_matrix(h_in, w_in, h_out, w_out):
    """Pick the stride-2 sample points of the padded (h_in+2, w_in+2) grid."""
    wp_in = w_in + 2
    s = np.zeros((h_out * w_out, (h_in + 2) * wp_in), np.float32)
    for i in range(h_out):
        for j in range(w_out):
            s[i * w_out + j, (2 * i + 1) * wp_in + (2 * j + 1)] = 1.0
    return jnp.asarray(s)


# ----------------------------------------------------------------------------
# The fused Pallas kernel (one grid step == F frames, packed into lanes)
# ----------------------------------------------------------------------------
def _fused_kernel(x_ref, r_ref, w0_ref, b0_ref, s0_ref,
                  d1w_ref, d1b_ref, w1_ref, p1b_ref, m1_ref,
                  d2w_ref, d2b_ref, s2_ref, w2_ref, p2b_ref,
                  clsw_ref, vadd_ref, out_ref, feat_ref, pf_ref,
                  *, F, C2, wp0, np0, wp1, np1):
    f32, bf16 = jnp.float32, jnp.bfloat16
    relu6 = lambda v: jnp.clip(v, 0.0, 6.0)

    def bdot(a, b):
        # bf16 MXU matmul, f32 accumulation.
        return jnp.dot(a.astype(bf16), b.astype(bf16), preferred_element_type=f32)

    def tap_conv(xe, w, wrow, npos):
        """3x3 tap-weighted sum on a zero-extended flat map (VPU MACs).
        xe: (npos + 2*(wrow+1), L), w: (9, L) -> (npos, L)."""
        off = wrow + 1
        terms = []
        t = 0
        for dy in range(3):
            for dx in range(3):
                d = (dy - 1) * wrow + (dx - 1)
                terms.append(xe[off + d:off + d + npos, :] * w[t:t + 1, :])
                t += 1
        while len(terms) > 1:                       # pairwise tree-sum
            nxt = [terms[a] + terms[a + 1] for a in range(0, len(terms) - 1, 2)]
            if len(terms) % 2:
                nxt.append(terms[-1])
            terms = nxt
        return terms[0]

    # conv0: broadcast each frame lane to its C0 channel lanes (tiny MXU matmul
    # with a 0/1 matrix), then 3x3 taps on the VPU with frame-tiled weights.
    x128 = bdot(x_ref[0], r_ref[...])                                  # (ext0, F*C0)
    h = relu6(tap_conv(x128, w0_ref[...], wp0, np0) + b0_ref[...])     # (np0, F*C0)
    # stride-2 sample + embed into the next padded/extended grid (0/1 bf16 MXU).
    h = bdot(s0_ref[...], h)                                           # (ext1, F*C0)

    # dw1 (VPU taps) -> pw1 (block-diag bf16 MXU) -> interior re-embed (0/1 MXU)
    h = relu6(tap_conv(h, d1w_ref[...], wp1, np1) + d1b_ref[...])      # (np1, F*C0)
    h = relu6(bdot(h, w1_ref[...]) + p1b_ref[...])                     # (np1, F*C1)
    h = bdot(m1_ref[...], h)                                           # (ext1, F*C1)

    # dw2 (VPU taps) -> stride-2 select (0/1 MXU) -> bias/ReLU6 -> pw2 (MXU)
    h = tap_conv(h, d2w_ref[...], wp1, np1)                            # (np1, F*C1)
    h = relu6(bdot(s2_ref[...], h) + d2b_ref[...])                     # (npos2, F*C1)
    h = relu6(bdot(h, w2_ref[...]) + p2b_ref[...])                     # (npos2, F*C2)

    # adaptive_avg_pool2d(.,1): frames stay packed in lanes -> lane-dense store.
    pooled = jnp.mean(h, axis=0, keepdims=True)                        # (1, F*C2)
    feat_ref[...] = pooled[None]

    # Regroup frames from lanes to sublanes via a tiny scratch, then one M=F
    # classifier matmul.  cw1 is folded into clsw on the host; the hoisted
    # vision@cw2 + biases arrive as the per-frame vadd block -> single VPU add.
    for f in range(F):
        pf_ref[f:f + 1, :] = pooled[:, f * C2:(f + 1) * C2]
    out_ref[...] = bdot(pf_ref[...], clsw_ref[...]) + vadd_ref[...]    # (F, CLS_PAD)


# ----------------------------------------------------------------------------
# Parameters (deterministic synthetic init; PyTorch layouts, BN folded)
# ----------------------------------------------------------------------------
def init_params(key):
    ks = jax.random.split(key, 14)

    def w(k, shape, fan_in):
        return jax.random.normal(k, shape, jnp.float32) / math.sqrt(fan_in)

    def b(k, shape):
        return 0.01 * jax.random.normal(k, shape, jnp.float32)

    return {
        "conv0_w": w(ks[0], (C0, 1, 3, 3), 9),        # OIHW
        "conv0_b": b(ks[1], (C0,)),
        "dw1_w": w(ks[2], (C0, 1, 3, 3), 9),          # depthwise (groups=C0)
        "dw1_b": b(ks[3], (C0,)),
        "pw1_w": w(ks[4], (C1, C0, 1, 1), C0),
        "pw1_b": b(ks[5], (C1,)),
        "dw2_w": w(ks[6], (C1, 1, 3, 3), 9),
        "dw2_b": b(ks[7], (C1,)),
        "pw2_w": w(ks[8], (C2, C1, 1, 1), C1),
        "pw2_b": b(ks[9], (C2,)),
        "cls_w": w(ks[10], (NUM_CLASSES, C2), C2),    # torch Linear (out, in)
        "cls_b": b(ks[11], (NUM_CLASSES,)),
        "cond_w": w(ks[12], (NUM_CLASSES, NUM_CLASSES + VISION_DIM),
                    NUM_CLASSES + VISION_DIM),
        "cond_b": b(ks[13], (NUM_CLASSES,)),
    }


def _kernel_weights(params, F, use_vision):
    """PyTorch-layout weights -> frame-packed kernel layouts.

    Tap weights are tiled across F frames (lane = f*C + c); pointwise weights
    become block-diagonal; classifier is folded with cond_w's first block when
    vision is used (exact: no nonlinearity between the two Linears)."""
    bf16 = jnp.bfloat16

    def tapw(w_oihw):                    # (C,1,3,3) -> (9, C), row = dy*3+dx
        return jnp.transpose(w_oihw[:, 0], (1, 2, 0)).reshape(9, -1)

    p1w = params["pw1_w"][:, :, 0, 0].T                      # (C0, C1)
    p2w = params["pw2_w"][:, :, 0, 0].T                      # (C1, C2)
    A = params["cls_w"].T                                    # (C2, 416)
    bias = params["cls_b"]                                   # (416,)
    if use_vision:
        W1 = params["cond_w"][:, :NUM_CLASSES].T             # (416, 416)
        A = A @ W1                                           # fold cw1 (exact)
        bias = bias @ W1 + params["cond_b"]

    pad_n = CLS_PAD - NUM_CLASSES
    eyeF = jnp.eye(F, dtype=jnp.float32)
    return {
        "R": jnp.kron(eyeF, jnp.ones((1, C0), jnp.float32)).astype(bf16),  # (F, F*C0)
        "w0": jnp.tile(tapw(params["conv0_w"]), (1, F)),                   # (9, F*C0)
        "b0": jnp.tile(params["conv0_b"].reshape(1, C0), (1, F)),
        "d1w": jnp.tile(tapw(params["dw1_w"]), (1, F)),
        "d1b": jnp.tile(params["dw1_b"].reshape(1, C0), (1, F)),
        "w1bd": jnp.kron(eyeF, p1w).astype(bf16),                          # (F*C0, F*C1)
        "p1b": jnp.tile(params["pw1_b"].reshape(1, C1), (1, F)),
        "d2w": jnp.tile(tapw(params["dw2_w"]), (1, F)),
        "d2b": jnp.tile(params["dw2_b"].reshape(1, C1), (1, F)),
        "w2bd": jnp.kron(eyeF, p2w).astype(bf16),                          # (F*C1, F*C2)
        "p2b": jnp.tile(params["pw2_b"].reshape(1, C2), (1, F)),
        "clsw": jnp.pad(A, ((0, 0), (0, pad_n))).astype(bf16),             # (C2, 512)
        "cls_bias": bias,                                                  # (416,) f32
    }


# ----------------------------------------------------------------------------
# Frame_MobileNet forward
# ----------------------------------------------------------------------------
def frame_mobilenet_forward(params, x, vision=None, frame_length=FRAME_LENGTH,
                            frames_per_block=FRAMES_PER_BLOCK):
    """Mirrors Frame_MobileNet.forward.  x: (B, C, Freq, T) NCHW, vision: (B, 512)."""
    # TODO(synk): return_fmaps=True path not exposed (reference forward() never uses it).
    B, C, Freq, T = x.shape
    _T = T // frame_length
    n = B * _T
    F = frames_per_block
    n_pad = ((n + F - 1) // F) * F
    nb = n_pad // F
    use_vision = vision is not None

    H, W = Freq, frame_length
    Ho, Wo = _conv_out(H, 2), _conv_out(W, 2)       # after conv0 (stride 2)
    Ho2, Wo2 = _conv_out(Ho, 2), _conv_out(Wo, 2)   # after dw2 (stride 2)
    wp0, np0 = W + 2, (H + 2) * (W + 2)
    wp1, np1 = Wo + 2, (Ho + 2) * (Wo + 2)
    ext0 = np0 + 2 * (wp0 + 1)

    # Input frames: zero-pad by 1, flatten, zero-extend by (Wp+1) on both ends,
    # pack F frames per block into the lane dimension.
    xf = x.reshape(n, 1, H, W)                       # same semantics as torch .view
    xp = jnp.pad(xf[:, 0], ((0, 0), (1, 1), (1, 1)))                      # (n, H+2, W+2)
    x_ext = jnp.pad(xp.reshape(n, np0),
                    ((0, n_pad - n), (wp0 + 1, wp0 + 1)))                 # (n_pad, ext0)
    x_pack = x_ext.reshape(nb, F, ext0).transpose(0, 2, 1)                # (nb, ext0, F)

    kw = _kernel_weights(params, F, use_vision)
    s0 = _stride2_embed_matrix(H, W, Ho, Wo).astype(jnp.bfloat16)         # (ext1, np0)
    m1 = _interior_embed_matrix(Ho, Wo).astype(jnp.bfloat16)              # (ext1, np1)
    s2 = _stride2_select_matrix(Ho, Wo, Ho2, Wo2).astype(jnp.bfloat16)    # (npos2, np1)

    # Hoisted conditioning: per-frame additive vector (folded classifier bias
    # + vision @ cw2 + cond bias) computed once in XLA, gathered per block.
    bias = kw.pop("cls_bias")
    if use_vision:
        W2 = params["cond_w"][:, NUM_CLASSES:].T                          # (512, 416)
        rep = n // vision.shape[0]                   # torch repeat_interleave(dim=0)
        vadd = bias[None, :] + jnp.repeat(vision @ W2, rep, axis=0)       # (n, 416)
    else:
        vadd = jnp.broadcast_to(bias[None, :], (n, NUM_CLASSES))
    vadd = jnp.pad(vadd, ((0, n_pad - n), (0, CLS_PAD - NUM_CLASSES)))    # (n_pad, 512)

    def full(a):
        nd = a.ndim
        return pl.BlockSpec(a.shape, lambda i, nd=nd: (0,) * nd)

    weight_args = [kw["R"], kw["w0"], kw["b0"], s0,
                   kw["d1w"], kw["d1b"], kw["w1bd"], kw["p1b"], m1,
                   kw["d2w"], kw["d2b"], s2, kw["w2bd"], kw["p2b"], kw["clsw"]]
    args = [x_pack] + weight_args + [vadd]
    in_specs = ([pl.BlockSpec((1, ext0, F), lambda i: (i, 0, 0))]
                + [full(a) for a in weight_args]
                + [pl.BlockSpec((F, CLS_PAD), lambda i: (i, 0))])

    out_pad, feat_pack = pl.pallas_call(
        functools.partial(_fused_kernel, F=F, C2=C2,
                          wp0=wp0, np0=np0, wp1=wp1, np1=np1),
        out_shape=(jax.ShapeDtypeStruct((n_pad, CLS_PAD), jnp.float32),
                   jax.ShapeDtypeStruct((nb, 1, F * C2), jnp.float32)),
        grid_spec=pltpu.PrefetchScalarGridSpec(
            num_scalar_prefetch=0,
            grid=(nb,),
            in_specs=in_specs,
            out_specs=[pl.BlockSpec((F, CLS_PAD), lambda i: (i, 0)),
                       pl.BlockSpec((1, 1, F * C2), lambda i: (i, 0, 0))],
            scratch_shapes=[pltpu.VMEM((F, C2), jnp.float32)]),
        compiler_params=pltpu.CompilerParams(dimension_semantics=("parallel",)),
    )(*args)

    out = out_pad[:n, :NUM_CLASSES].reshape(B, _T, NUM_CLASSES)
    features = feat_pack.reshape(n_pad, C2)[:n].reshape(B, _T, C2)
    return out, features


# ----------------------------------------------------------------------------
# Independent plain-JAX reference (lax.conv) for numerical validation
# ----------------------------------------------------------------------------
def reference_forward(params, x, vision=None, frame_length=FRAME_LENGTH):
    B, C, Freq, T = x.shape
    _T = T // frame_length
    n = B * _T
    h = x.reshape(n, 1, Freq, frame_length)
    relu6 = lambda v: jnp.clip(v, 0.0, 6.0)

    def conv(v, w, b, stride, pad, groups=1):
        y = lax.conv_general_dilated(
            v, w, (stride, stride), ((pad, pad), (pad, pad)),
            feature_group_count=groups,
            dimension_numbers=("NCHW", "OIHW", "NCHW"))
        return y + b.reshape(1, -1, 1, 1)

    h = relu6(conv(h, params["conv0_w"], params["conv0_b"], 2, 1))
    h = relu6(conv(h, params["dw1_w"], params["dw1_b"], 1, 1, groups=C0))
    h = relu6(conv(h, params["pw1_w"], params["pw1_b"], 1, 0))
    h = relu6(conv(h, params["dw2_w"], params["dw2_b"], 2, 1, groups=C1))
    h = relu6(conv(h, params["pw2_w"], params["pw2_b"], 1, 0))
    features = jnp.mean(h, axis=(2, 3))                               # (n, 64)
    logits = features @ params["cls_w"].T + params["cls_b"]           # (n, 416)
    if vision is not None:
        rep = n // vision.shape[0]
        v = jnp.repeat(vision, rep, axis=0)
        logits = jnp.concatenate([logits, v], axis=1) @ params["cond_w"].T + params["cond_b"]
    return logits.reshape(B, _T, -1), features.reshape(B, _T, -1)


# ----------------------------------------------------------------------------
if __name__ == "__main__":
    key = jax.random.PRNGKey(0)
    k_param, k_x, k_v = jax.random.split(key, 3)

    params = init_params(k_param)

    B, C, Freq = 2, 1, 16
    _T = 2
    T = _T * FRAME_LENGTH
    x = jax.random.normal(k_x, (B, C, Freq, T), jnp.float32)          # (2, 1, 16, 32)
    vision = jax.random.normal(k_v, (B, VISION_DIM), jnp.float32)     # (2, 512)

    fwd = jax.jit(functools.partial(frame_mobilenet_forward, frame_length=FRAME_LENGTH))
    out, features = fwd(params, x, vision)
    jax.block_until_ready((out, features))

    assert out.shape == (B, _T, NUM_CLASSES), out.shape
    assert features.shape == (B, _T, C2), features.shape
    assert bool(jnp.all(jnp.isfinite(out))) and bool(jnp.all(jnp.isfinite(features)))

    # Validate against the independent lax.conv reference (bf16-MXU tolerance).
    ref_out, ref_feat = reference_forward(params, x, vision, FRAME_LENGTH)
    assert jnp.allclose(out, ref_out, atol=3e-2, rtol=3e-2), \
        float(jnp.max(jnp.abs(out - ref_out)))
    assert jnp.allclose(features, ref_feat, atol=3e-2, rtol=3e-2), \
        float(jnp.max(jnp.abs(features - ref_feat)))

    # Also exercise the no-vision path (plain classifier, no conditioning).
    out2, feat2 = fwd(params, x)
    jax.block_until_ready((out2, feat2))
    ref_out2, ref_feat2 = reference_forward(params, x, None, FRAME_LENGTH)
    assert jnp.allclose(out2, ref_out2, atol=3e-2, rtol=3e-2), \
        float(jnp.max(jnp.abs(out2 - ref_out2)))
    assert jnp.allclose(feat2, ref_feat2, atol=3e-2, rtol=3e-2), \
        float(jnp.max(jnp.abs(feat2 - ref_feat2)))

    print("KERNEL_OK")
</pallas_src>

<mosaic_0001>
module attributes {stable_mosaic.version = 11 : i64} {
  func.func @_fused_kernel(%arg0: i32, %arg1: memref<1x362x8xf32, #tpu.memory_space<vmem>>, %arg2: memref<8x128xbf16, #tpu.memory_space<vmem>>, %arg3: memref<9x128xf32, #tpu.memory_space<vmem>>, %arg4: memref<1x128xf32, #tpu.memory_space<vmem>>, %arg5: memref<122x324xbf16, #tpu.memory_space<vmem>>, %arg6: memref<9x128xf32, #tpu.memory_space<vmem>>, %arg7: memref<1x128xf32, #tpu.memory_space<vmem>>, %arg8: memref<128x256xbf16, #tpu.memory_space<vmem>>, %arg9: memref<1x256xf32, #tpu.memory_space<vmem>>, %arg10: memref<122x100xbf16, #tpu.memory_space<vmem>>, %arg11: memref<9x256xf32, #tpu.memory_space<vmem>>, %arg12: memref<1x256xf32, #tpu.memory_space<vmem>>, %arg13: memref<16x100xbf16, #tpu.memory_space<vmem>>, %arg14: memref<256x512xbf16, #tpu.memory_space<vmem>>, %arg15: memref<1x512xf32, #tpu.memory_space<vmem>>, %arg16: memref<64x512xbf16, #tpu.memory_space<vmem>>, %arg17: memref<8x512xf32, #tpu.memory_space<vmem>>, %arg18: memref<8x512xf32, #tpu.memory_space<vmem>>, %arg19: memref<1x1x512xf32, #tpu.memory_space<vmem>>, %arg20: memref<8x64xf32, #tpu.memory_space<vmem>>) attributes {dimension_semantics = [#tpu.dimension_semantics<parallel>], iteration_bounds = array<i64: 1>, scalar_prefetch = 0 : i64, scratch_operands = 1 : i64, tpu.core_type = #tpu.core_type<tc>, window_params = [{transform_indices = @transform_0, window_bounds = array<i64: 1, 362, 8>}, {pipeline_mode = #tpu.pipeline_mode<synchronous>, transform_indices = @transform_1, window_bounds = array<i64: 8, 128>}, {pipeline_mode = #tpu.pipeline_mode<synchronous>, transform_indices = @transform_2, window_bounds = array<i64: 9, 128>}, {pipeline_mode = #tpu.pipeline_mode<synchronous>, transform_indices = @transform_3, window_bounds = array<i64: 1, 128>}, {pipeline_mode = #tpu.pipeline_mode<synchronous>, transform_indices = @transform_4, window_bounds = array<i64: 122, 324>}, {pipeline_mode = #tpu.pipeline_mode<synchronous>, transform_indices = @transform_5, window_bounds = array<i64: 9, 128>}, {pipeline_mode = #tpu.pipeline_mode<synchronous>, transform_indices = @transform_6, window_bounds = array<i64: 1, 128>}, {pipeline_mode = #tpu.pipeline_mode<synchronous>, transform_indices = @transform_7, window_bounds = array<i64: 128, 256>}, {pipeline_mode = #tpu.pipeline_mode<synchronous>, transform_indices = @transform_8, window_bounds = array<i64: 1, 256>}, {pipeline_mode = #tpu.pipeline_mode<synchronous>, transform_indices = @transform_9, window_bounds = array<i64: 122, 100>}, {pipeline_mode = #tpu.pipeline_mode<synchronous>, transform_indices = @transform_10, window_bounds = array<i64: 9, 256>}, {pipeline_mode = #tpu.pipeline_mode<synchronous>, transform_indices = @transform_11, window_bounds = array<i64: 1, 256>}, {pipeline_mode = #tpu.pipeline_mode<synchronous>, transform_indices = @transform_12, window_bounds = array<i64: 16, 100>}, {pipeline_mode = #tpu.pipeline_mode<synchronous>, transform_indices = @transform_13, window_bounds = array<i64: 256, 512>}, {pipeline_mode = #tpu.pipeline_mode<synchronous>, transform_indices = @transform_14, window_bounds = array<i64: 1, 512>}, {pipeline_mode = #tpu.pipeline_mode<synchronous>, transform_indices = @transform_15, window_bounds = array<i64: 64, 512>}, {transform_indices = @transform_16, window_bounds = array<i64: 8, 512>}, {transform_indices = @transform_17, window_bounds = array<i64: 8, 512>}, {transform_indices = @transform_18, window_bounds = array<i64: 1, 1, 512>}]} {
    %c0 = arith.constant 0 : index
    %c0_0 = arith.constant 0 : index
    %c0_1 = arith.constant 0 : index
    %0 = vector.load %arg1[%c0, %c0_0, %c0_1] : memref<1x362x8xf32, #tpu.memory_space<vmem>>, vector<1x362x8xf32>
    %1 = vector.shape_cast %0 : vector<1x362x8xf32> to vector<362x8xf32>
    %c0_2 = arith.constant 0 : index
    %c0_3 = arith.constant 0 : index
    %2 = vector.load %arg2[%c0_2, %c0_3] : memref<8x128xbf16, #tpu.memory_space<vmem>>, vector<8x128xbf16>
    %3 = arith.truncf %1 : vector<362x8xf32> to vector<362x8xbf16>
    %cst = arith.constant dense<0.000000e+00> : vector<362x128xf32>
    %4 = tpu.matmul %3, %2, %cst {dimension_numbers = #tpu.dot_dimension_numbers<[1], [0], [0], [1], [0, 0, 1, 1], [], []>} : vector<362x8xbf16>, vector<8x128xbf16>, vector<362x128xf32> -> vector<362x128xf32>
    %c0_4 = arith.constant 0 : index
    %c0_5 = arith.constant 0 : index
    %5 = vector.load %arg3[%c0_4, %c0_5] : memref<9x128xf32, #tpu.memory_space<vmem>>, vector<9x128xf32>
    %6 = vector.extract_strided_slice %4 {offsets = [0, 0], sizes = [324, 128], strides = [1, 1]} : vector<362x128xf32> to vector<324x128xf32>
    %7 = vector.extract_strided_slice %5 {offsets = [0, 0], sizes = [1, 128], strides = [1, 1]} : vector<9x128xf32> to vector<1x128xf32>
    %8 = vector.broadcast %7 : vector<1x128xf32> to vector<324x128xf32>
    %9 = arith.mulf %6, %8 : vector<324x128xf32>
    %10 = vector.extract_strided_slice %4 {offsets = [1, 0], sizes = [324, 128], strides = [1, 1]} : vector<362x128xf32> to vector<324x128xf32>
    %11 = vector.extract_strided_slice %5 {offsets = [1, 0], sizes = [1, 128], strides = [1, 1]} : vector<9x128xf32> to vector<1x128xf32>
    %12 = vector.broadcast %11 : vector<1x128xf32> to vector<324x128xf32>
    %13 = arith.mulf %10, %12 : vector<324x128xf32>
    %14 = vector.extract_strided_slice %4 {offsets = [2, 0], sizes = [324, 128], strides = [1, 1]} : vector<362x128xf32> to vector<324x128xf32>
    %15 = vector.extract_strided_slice %5 {offsets = [2, 0], sizes = [1, 128], strides = [1, 1]} : vector<9x128xf32> to vector<1x128xf32>
    %16 = vector.broadcast %15 : vector<1x128xf32> to vector<324x128xf32>
    %17 = arith.mulf %14, %16 : vector<324x128xf32>
    %18 = vector.extract_strided_slice %4 {offsets = [18, 0], sizes = [324, 128], strides = [1, 1]} : vector<362x128xf32> to vector<324x128xf32>
    %19 = vector.extract_strided_slice %5 {offsets = [3, 0], sizes = [1, 128], strides = [1, 1]} : vector<9x128xf32> to vector<1x128xf32>
    %20 = vector.broadcast %19 : vector<1x128xf32> to vector<324x128xf32>
    %21 = arith.mulf %18, %20 : vector<324x128xf32>
    %22 = vector.extract_strided_slice %4 {offsets = [19, 0], sizes = [324, 128], strides = [1, 1]} : vector<362x128xf32> to vector<324x128xf32>
    %23 = vector.extract_strided_slice %5 {offsets = [4, 0], sizes = [1, 128], strides = [1, 1]} : vector<9x128xf32> to vector<1x128xf32>
    %24 = vector.broadcast %23 : vector<1x128xf32> to vector<324x128xf32>
    %25 = arith.mulf %22, %24 : vector<324x128xf32>
    %26 = vector.extract_strided_slice %4 {offsets = [20, 0], sizes = [324, 128], strides = [1, 1]} : vector<362x128xf32> to vector<324x128xf32>
    %27 = vector.extract_strided_slice %5 {offsets = [5, 0], sizes = [1, 128], strides = [1, 1]} : vector<9x128xf32> to vector<1x128xf32>
    %28 = vector.broadcast %27 : vector<1x128xf32> to vector<324x128xf32>
    %29 = arith.mulf %26, %28 : vector<324x128xf32>
    %30 = vector.extract_strided_slice %4 {offsets = [36, 0], sizes = [324, 128], strides = [1, 1]} : vector<362x128xf32> to vector<324x128xf32>
    %31 = vector.extract_strided_slice %5 {offsets = [6, 0], sizes = [1, 128], strides = [1, 1]} : vector<9x128xf32> to vector<1x128xf32>
    %32 = vector.broadcast %31 : vector<1x128xf32> to vector<324x128xf32>
    %33 = arith.mulf %30, %32 : vector<324x128xf32>
    %34 = vector.extract_strided_slice %4 {offsets = [37, 0], sizes = [324, 128], strides = [1, 1]} : vector<362x128xf32> to vector<324x128xf32>
    %35 = vector.extract_strided_slice %5 {offsets = [7, 0], sizes = [1, 128], strides = [1, 1]} : vector<9x128xf32> to vector<1x128xf32>
    %36 = vector.broadcast %35 : vector<1x128xf32> to vector<324x128xf32>
    %37 = arith.mulf %34, %36 : vector<324x128xf32>
    %38 = vector.extract_strided_slice %4 {offsets = [38, 0], sizes = [324, 128], strides = [1, 1]} : vector<362x128xf32> to vector<324x128xf32>
    %39 = vector.extract_strided_slice %5 {offsets = [8, 0], sizes = [1, 128], strides = [1, 1]} : vector<9x128xf32> to vector<1x128xf32>
    %40 = vector.broadcast %39 : vector<1x128xf32> to vector<324x128xf32>
    %41 = arith.mulf %38, %40 : vector<324x128xf32>
    %42 = arith.addf %9, %13 : vector<324x128xf32>
    %43 = arith.addf %17, %21 : vector<324x128xf32>
    %44 = arith.addf %25, %29 : vector<324x128xf32>
    %45 = arith.addf %33, %37 : vector<324x128xf32>
    %46 = arith.addf %42, %43 : vector<324x128xf32>
    %47 = arith.addf %44, %45 : vector<324x128xf32>
    %48 = arith.addf %46, %47 : vector<324x128xf32>
    %49 = arith.addf %48, %41 : vector<324x128xf32>
    %c0_6 = arith.constant 0 : index
    %c0_7 = arith.constant 0 : index
    %50 = vector.load %arg4[%c0_6, %c0_7] : memref<1x128xf32, #tpu.memory_space<vmem>>, vector<1x128xf32>
    %51 = vector.broadcast %50 : vector<1x128xf32> to vector<324x128xf32>
    %52 = arith.addf %49, %51 : vector<324x128xf32>
    %cst_8 = arith.constant 0.000000e+00 : f32
    %cst_9 = arith.constant 6.000000e+00 : f32
    %53 = vector.broadcast %cst_8 : f32 to vector<324x128xf32>
    %54 = arith.maximumf %53, %52 : vector<324x128xf32>
    %55 = vector.broadcast %cst_9 : f32 to vector<324x128xf32>
    %56 = arith.minimumf %55, %54 : vector<324x128xf32>
    %c0_10 = arith.constant 0 : index
    %c0_11 = arith.constant 0 : index
    %57 = vector.load %arg5[%c0_10, %c0_11] : memref<122x324xbf16, #tpu.memory_space<vmem>>, vector<122x324xbf16>
    %58 = arith.truncf %56 : vector<324x128xf32> to vector<324x128xbf16>
    %cst_12 = arith.constant dense<0.000000e+00> : vector<122x128xf32>
    %59 = tpu.matmul %57, %58, %cst_12 {dimension_numbers = #tpu.dot_dimension_numbers<[1], [0], [0], [1], [0, 0, 1, 1], [], []>} : vector<122x324xbf16>, vector<324x128xbf16>, vector<122x128xf32> -> vector<122x128xf32>
    %c0_13 = arith.constant 0 : index
    %c0_14 = arith.constant 0 : index
    %60 = vector.load %arg6[%c0_13, %c0_14] : memref<9x128xf32, #tpu.memory_space<vmem>>, vector<9x128xf32>
    %61 = vector.extract_strided_slice %59 {offsets = [0, 0], sizes = [100, 128], strides = [1, 1]} : vector<122x128xf32> to vector<100x128xf32>
    %62 = vector.extract_strided_slice %60 {offsets = [0, 0], sizes = [1, 128], strides = [1, 1]} : vector<9x128xf32> to vector<1x128xf32>
    %63 = vector.broadcast %62 : vector<1x128xf32> to vector<100x128xf32>
    %64 = arith.mulf %61, %63 : vector<100x128xf32>
    %65 = vector.extract_strided_slice %59 {offsets = [1, 0], sizes = [100, 128], strides = [1, 1]} : vector<122x128xf32> to vector<100x128xf32>
    %66 = vector.extract_strided_slice %60 {offsets = [1, 0], sizes = [1, 128], strides = [1, 1]} : vector<9x128xf32> to vector<1x128xf32>
    %67 = vector.broadcast %66 : vector<1x128xf32> to vector<100x128xf32>
    %68 = arith.mulf %65, %67 : vector<100x128xf32>
    %69 = vector.extract_strided_slice %59 {offsets = [2, 0], sizes = [100, 128], strides = [1, 1]} : vector<122x128xf32> to vector<100x128xf32>
    %70 = vector.extract_strided_slice %60 {offsets = [2, 0], sizes = [1, 128], strides = [1, 1]} : vector<9x128xf32> to vector<1x128xf32>
    %71 = vector.broadcast %70 : vector<1x128xf32> to vector<100x128xf32>
    %72 = arith.mulf %69, %71 : vector<100x128xf32>
    %73 = vector.extract_strided_slice %59 {offsets = [10, 0], sizes = [100, 128], strides = [1, 1]} : vector<122x128xf32> to vector<100x128xf32>
    %74 = vector.extract_strided_slice %60 {offsets = [3, 0], sizes = [1, 128], strides = [1, 1]} : vector<9x128xf32> to vector<1x128xf32>
    %75 = vector.broadcast %74 : vector<1x128xf32> to vector<100x128xf32>
    %76 = arith.mulf %73, %75 : vector<100x128xf32>
    %77 = vector.extract_strided_slice %59 {offsets = [11, 0], sizes = [100, 128], strides = [1, 1]} : vector<122x128xf32> to vector<100x128xf32>
    %78 = vector.extract_strided_slice %60 {offsets = [4, 0], sizes = [1, 128], strides = [1, 1]} : vector<9x128xf32> to vector<1x128xf32>
    %79 = vector.broadcast %78 : vector<1x128xf32> to vector<100x128xf32>
    %80 = arith.mulf %77, %79 : vector<100x128xf32>
    %81 = vector.extract_strided_slice %59 {offsets = [12, 0], sizes = [100, 128], strides = [1, 1]} : vector<122x128xf32> to vector<100x128xf32>
    %82 = vector.extract_strided_slice %60 {offsets = [5, 0], sizes = [1, 128], strides = [1, 1]} : vector<9x128xf32> to vector<1x128xf32>
    %83 = vector.broadcast %82 : vector<1x128xf32> to vector<100x128xf32>
    %84 = arith.mulf %81, %83 : vector<100x128xf32>
    %85 = vector.extract_strided_slice %59 {offsets = [20, 0], sizes = [100, 128], strides = [1, 1]} : vector<122x128xf32> to vector<100x128xf32>
    %86 = vector.extract_strided_slice %60 {offsets = [6, 0], sizes = [1, 128], strides = [1, 1]} : vector<9x128xf32> to vector<1x128xf32>
    %87 = vector.broadcast %86 : vector<1x128xf32> to vector<100x128xf32>
    %88 = arith.mulf %85, %87 : vector<100x128xf32>
    %89 = vector.extract_strided_slice %59 {offsets = [21, 0], sizes = [100, 128], strides = [1, 1]} : vector<122x128xf32> to vector<100x128xf32>
    %90 = vector.extract_strided_slice %60 {offsets = [7, 0], sizes = [1, 128], strides = [1, 1]} : vector<9x128xf32> to vector<1x128xf32>
    %91 = vector.broadcast %90 : vector<1x128xf32> to vector<100x128xf32>
    %92 = arith.mulf %89, %91 : vector<100x128xf32>
    %93 = vector.extract_strided_slice %59 {offsets = [22, 0], sizes = [100, 128], strides = [1, 1]} : vector<122x128xf32> to vector<100x128xf32>
    %94 = vector.extract_strided_slice %60 {offsets = [8, 0], sizes = [1, 128], strides = [1, 1]} : vector<9x128xf32> to vector<1x128xf32>
    %95 = vector.broadcast %94 : vector<1x128xf32> to vector<100x128xf32>
    %96 = arith.mulf %93, %95 : vector<100x128xf32>
    %97 = arith.addf %64, %68 : vector<100x128xf32>
    %98 = arith.addf %72, %76 : vector<100x128xf32>
    %99 = arith.addf %80, %84 : vector<100x128xf32>
    %100 = arith.addf %88, %92 : vector<100x128xf32>
    %101 = arith.addf %97, %98 : vector<100x128xf32>
    %102 = arith.addf %99, %100 : vector<100x128xf32>
    %103 = arith.addf %101, %102 : vector<100x128xf32>
    %104 = arith.addf %103, %96 : vector<100x128xf32>
    %c0_15 = arith.constant 0 : index
    %c0_16 = arith.constant 0 : index
    %105 = vector.load %arg7[%c0_15, %c0_16] : memref<1x128xf32, #tpu.memory_space<vmem>>, vector<1x128xf32>
    %106 = vector.broadcast %105 : vector<1x128xf32> to vector<100x128xf32>
    %107 = arith.addf %104, %106 : vector<100x128xf32>
    %cst_17 = arith.constant 0.000000e+00 : f32
    %cst_18 = arith.constant 6.000000e+00 : f32
    %108 = vector.broadcast %cst_17 : f32 to vector<100x128xf32>
    %109 = arith.maximumf %108, %107 : vector<100x128xf32>
    %110 = vector.broadcast %cst_18 : f32 to vector<100x128xf32>
    %111 = arith.minimumf %110, %109 : vector<100x128xf32>
    %c0_19 = arith.constant 0 : index
    %c0_20 = arith.constant 0 : index
    %112 = vector.load %arg8[%c0_19, %c0_20] : memref<128x256xbf16, #tpu.memory_space<vmem>>, vector<128x256xbf16>
    %113 = arith.truncf %111 : vector<100x128xf32> to vector<100x128xbf16>
    %cst_21 = arith.constant dense<0.000000e+00> : vector<100x256xf32>
    %114 = tpu.matmul %113, %112, %cst_21 {dimension_numbers = #tpu.dot_dimension_numbers<[1], [0], [0], [1], [0, 0, 1, 1], [], []>} : vector<100x128xbf16>, vector<128x256xbf16>, vector<100x256xf32> -> vector<100x256xf32>
    %c0_22 = arith.constant 0 : index
    %c0_23 = arith.constant 0 : index
    %115 = vector.load %arg9[%c0_22, %c0_23] : memref<1x256xf32, #tpu.memory_space<vmem>>, vector<1x256xf32>
    %116 = vector.broadcast %115 : vector<1x256xf32> to vector<100x256xf32>
    %117 = arith.addf %114, %116 : vector<100x256xf32>
    %cst_24 = arith.constant 0.000000e+00 : f32
    %cst_25 = arith.constant 6.000000e+00 : f32
    %118 = vector.broadcast %cst_24 : f32 to vector<100x256xf32>
    %119 = arith.maximumf %118, %117 : vector<100x256xf32>
    %120 = vector.broadcast %cst_25 : f32 to vector<100x256xf32>
    %121 = arith.minimumf %120, %119 : vector<100x256xf32>
    %c0_26 = arith.constant 0 : index
    %c0_27 = arith.constant 0 : index
    %122 = vector.load %arg10[%c0_26, %c0_27] : memref<122x100xbf16, #tpu.memory_space<vmem>>, vector<122x100xbf16>
    %123 = arith.truncf %121 : vector<100x256xf32> to vector<100x256xbf16>
    %cst_28 = arith.constant dense<0.000000e+00> : vector<122x256xf32>
    %124 = tpu.matmul %122, %123, %cst_28 {dimension_numbers = #tpu.dot_dimension_numbers<[1], [0], [0], [1], [0, 0, 1, 1], [], []>} : vector<122x100xbf16>, vector<100x256xbf16>, vector<122x256xf32> -> vector<122x256xf32>
    %c0_29 = arith.constant 0 : index
    %c0_30 = arith.constant 0 : index
    %125 = vector.load %arg11[%c0_29, %c0_30] : memref<9x256xf32, #tpu.memory_space<vmem>>, vector<9x256xf32>
    %126 = vector.extract_strided_slice %124 {offsets = [0, 0], sizes = [100, 256], strides = [1, 1]} : vector<122x256xf32> to vector<100x256xf32>
    %127 = vector.extract_strided_slice %125 {offsets = [0, 0], sizes = [1, 256], strides = [1, 1]} : vector<9x256xf32> to vector<1x256xf32>
    %128 = vector.broadcast %127 : vector<1x256xf32> to vector<100x256xf32>
    %129 = arith.mulf %126, %128 : vector<100x256xf32>
    %130 = vector.extract_strided_slice %124 {offsets = [1, 0], sizes = [100, 256], strides = [1, 1]} : vector<122x256xf32> to vector<100x256xf32>
    %131 = vector.extract_strided_slice %125 {offsets = [1, 0], sizes = [1, 256], strides = [1, 1]} : vector<9x256xf32> to vector<1x256xf32>
    %132 = vector.broadcast %131 : vector<1x256xf32> to vector<100x256xf32>
    %133 = arith.mulf %130, %132 : vector<100x256xf32>
    %134 = vector.extract_strided_slice %124 {offsets = [2, 0], sizes = [100, 256], strides = [1, 1]} : vector<122x256xf32> to vector<100x256xf32>
    %135 = vector.extract_strided_slice %125 {offsets = [2, 0], sizes = [1, 256], strides = [1, 1]} : vector<9x256xf32> to vector<1x256xf32>
    %136 = vector.broadcast %135 : vector<1x256xf32> to vector<100x256xf32>
    %137 = arith.mulf %134, %136 : vector<100x256xf32>
    %138 = vector.extract_strided_slice %124 {offsets = [10, 0], sizes = [100, 256], strides = [1, 1]} : vector<122x256xf32> to vector<100x256xf32>
    %139 = vector.extract_strided_slice %125 {offsets = [3, 0], sizes = [1, 256], strides = [1, 1]} : vector<9x256xf32> to vector<1x256xf32>
    %140 = vector.broadcast %139 : vector<1x256xf32> to vector<100x256xf32>
    %141 = arith.mulf %138, %140 : vector<100x256xf32>
    %142 = vector.extract_strided_slice %124 {offsets = [11, 0], sizes = [100, 256], strides = [1, 1]} : vector<122x256xf32> to vector<100x256xf32>
    %143 = vector.extract_strided_slice %125 {offsets = [4, 0], sizes = [1, 256], strides = [1, 1]} : vector<9x256xf32> to vector<1x256xf32>
    %144 = vector.broadcast %143 : vector<1x256xf32> to vector<100x256xf32>
    %145 = arith.mulf %142, %144 : vector<100x256xf32>
    %146 = vector.extract_strided_slice %124 {offsets = [12, 0], sizes = [100, 256], strides = [1, 1]} : vector<122x256xf32> to vector<100x256xf32>
    %147 = vector.extract_strided_slice %125 {offsets = [5, 0], sizes = [1, 256], strides = [1, 1]} : vector<9x256xf32> to vector<1x256xf32>
    %148 = vector.broadcast %147 : vector<1x256xf32> to vector<100x256xf32>
    %149 = arith.mulf %146, %148 : vector<100x256xf32>
    %150 = vector.extract_strided_slice %124 {offsets = [20, 0], sizes = [100, 256], strides = [1, 1]} : vector<122x256xf32> to vector<100x256xf32>
    %151 = vector.extract_strided_slice %125 {offsets = [6, 0], sizes = [1, 256], strides = [1, 1]} : vector<9x256xf32> to vector<1x256xf32>
    %152 = vector.broadcast %151 : vector<1x256xf32> to vector<100x256xf32>
    %153 = arith.mulf %150, %152 : vector<100x256xf32>
    %154 = vector.extract_strided_slice %124 {offsets = [21, 0], sizes = [100, 256], strides = [1, 1]} : vector<122x256xf32> to vector<100x256xf32>
    %155 = vector.extract_strided_slice %125 {offsets = [7, 0], sizes = [1, 256], strides = [1, 1]} : vector<9x256xf32> to vector<1x256xf32>
    %156 = vector.broadcast %155 : vector<1x256xf32> to vector<100x256xf32>
    %157 = arith.mulf %154, %156 : vector<100x256xf32>
    %158 = vector.extract_strided_slice %124 {offsets = [22, 0], sizes = [100, 256], strides = [1, 1]} : vector<122x256xf32> to vector<100x256xf32>
    %159 = vector.extract_strided_slice %125 {offsets = [8, 0], sizes = [1, 256], strides = [1, 1]} : vector<9x256xf32> to vector<1x256xf32>
    %160 = vector.broadcast %159 : vector<1x256xf32> to vector<100x256xf32>
    %161 = arith.mulf %158, %160 : vector<100x256xf32>
    %162 = arith.addf %129, %133 : vector<100x256xf32>
    %163 = arith.addf %137, %141 : vector<100x256xf32>
    %164 = arith.addf %145, %149 : vector<100x256xf32>
    %165 = arith.addf %153, %157 : vector<100x256xf32>
    %166 = arith.addf %162, %163 : vector<100x256xf32>
    %167 = arith.addf %164, %165 : vector<100x256xf32>
    %168 = arith.addf %166, %167 : vector<100x256xf32>
    %169 = arith.addf %168, %161 : vector<100x256xf32>
    %c0_31 = arith.constant 0 : index
    %c0_32 = arith.constant 0 : index
    %170 = vector.load %arg13[%c0_31, %c0_32] : memref<16x100xbf16, #tpu.memory_space<vmem>>, vector<16x100xbf16>
    %171 = arith.truncf %169 : vector<100x256xf32> to vector<100x256xbf16>
    %cst_33 = arith.constant dense<0.000000e+00> : vector<16x256xf32>
    %172 = tpu.matmul %170, %171, %cst_33 {dimension_numbers = #tpu.dot_dimension_numbers<[1], [0], [0], [1], [0, 0, 1, 1], [], []>} : vector<16x100xbf16>, vector<100x256xbf16>, vector<16x256xf32> -> vector<16x256xf32>
    %c0_34 = arith.constant 0 : index
    %c0_35 = arith.constant 0 : index
    %173 = vector.load %arg12[%c0_34, %c0_35] : memref<1x256xf32, #tpu.memory_space<vmem>>, vector<1x256xf32>
    %174 = vector.broadcast %173 : vector<1x256xf32> to vector<16x256xf32>
    %175 = arith.addf %172, %174 : vector<16x256xf32>
    %cst_36 = arith.constant 0.000000e+00 : f32
    %cst_37 = arith.constant 6.000000e+00 : f32
    %176 = vector.broadcast %cst_36 : f32 to vector<16x256xf32>
    %177 = arith.maximumf %176, %175 : vector<16x256xf32>
    %178 = vector.broadcast %cst_37 : f32 to vector<16x256xf32>
    %179 = arith.minimumf %178, %177 : vector<16x256xf32>
    %c0_38 = arith.constant 0 : index
    %c0_39 = arith.constant 0 : index
    %180 = vector.load %arg14[%c0_38, %c0_39] : memref<256x512xbf16, #tpu.memory_space<vmem>>, vector<256x512xbf16>
    %181 = arith.truncf %179 : vector<16x256xf32> to vector<16x256xbf16>
    %cst_40 = arith.constant dense<0.000000e+00> : vector<16x512xf32>
    %182 = tpu.matmul %181, %180, %cst_40 {dimension_numbers = #tpu.dot_dimension_numbers<[1], [0], [0], [1], [0, 0, 1, 1], [], []>} : vector<16x256xbf16>, vector<256x512xbf16>, vector<16x512xf32> -> vector<16x512xf32>
    %c0_41 = arith.constant 0 : index
    %c0_42 = arith.constant 0 : index
    %183 = vector.load %arg15[%c0_41, %c0_42] : memref<1x512xf32, #tpu.memory_space<vmem>>, vector<1x512xf32>
    %184 = vector.broadcast %183 : vector<1x512xf32> to vector<16x512xf32>
    %185 = arith.addf %182, %184 : vector<16x512xf32>
    %cst_43 = arith.constant 0.000000e+00 : f32
    %cst_44 = arith.constant 6.000000e+00 : f32
    %186 = vector.broadcast %cst_43 : f32 to vector<16x512xf32>
    %187 = arith.maximumf %186, %185 : vector<16x512xf32>
    %188 = vector.broadcast %cst_44 : f32 to vector<16x512xf32>
    %189 = arith.minimumf %188, %187 : vector<16x512xf32>
    %cst_45 = arith.constant dense<0.000000e+00> : vector<512xf32>
    %190 = vector.multi_reduction <add>, %189, %cst_45 [0] : vector<16x512xf32> to vector<512xf32>
    %191 = vector.shape_cast %190 : vector<512xf32> to vector<1x512xf32>
    %cst_46 = arith.constant 1.600000e+01 : f32
    %192 = vector.broadcast %cst_46 : f32 to vector<1x512xf32>
    %193 = arith.divf %191, %192 : vector<1x512xf32>
    %194 = vector.shape_cast %193 : vector<1x512xf32> to vector<1x1x512xf32>
    %c0_47 = arith.constant 0 : index
    %c0_48 = arith.constant 0 : index
    %c0_49 = arith.constant 0 : index
    %195 = vector.load %arg19[%c0_47, %c0_48, %c0_49] : memref<1x1x512xf32, #tpu.memory_space<vmem>>, vector<1x1x512xf32>
    tpu.vector_store %arg19[%c0_47, %c0_48, %c0_49], %194 {strides = array<i32>} : memref<1x1x512xf32, #tpu.memory_space<vmem>>, vector<1x1x512xf32>,
    %196 = vector.extract_strided_slice %193 {offsets = [0, 0], sizes = [1, 64], strides = [1, 1]} : vector<1x512xf32> to vector<1x64xf32>
    %c0_50 = arith.constant 0 : index
    %c0_51 = arith.constant 0 : index
    %197 = vector.load %arg20[%c0_50, %c0_51] : memref<8x64xf32, #tpu.memory_space<vmem>>, vector<1x64xf32>
    tpu.vector_store %arg20[%c0_50, %c0_51], %196 {strides = array<i32>} : memref<8x64xf32, #tpu.memory_space<vmem>>, vector<1x64xf32>,
    %198 = vector.extract_strided_slice %193 {offsets = [0, 64], sizes = [1, 64], strides = [1, 1]} : vector<1x512xf32> to vector<1x64xf32>
    %c1 = arith.constant 1 : index
    %c0_52 = arith.constant 0 : index
    %199 = vector.load %arg20[%c1, %c0_52] : memref<8x64xf32, #tpu.memory_space<vmem>>, vector<1x64xf32>
    tpu.vector_store %arg20[%c1, %c0_52], %198 {strides = array<i32>} : memref<8x64xf32, #tpu.memory_space<vmem>>, vector<1x64xf32>,
    %200 = vector.extract_strided_slice %193 {offsets = [0, 128], sizes = [1, 64], strides = [1, 1]} : vector<1x512xf32> to vector<1x64xf32>
    %c2 = arith.constant 2 : index
    %c0_53 = arith.constant 0 : index
    %201 = vector.load %arg20[%c2, %c0_53] : memref<8x64xf32, #tpu.memory_space<vmem>>, vector<1x64xf32>
    tpu.vector_store %arg20[%c2, %c0_53], %200 {strides = array<i32>} : memref<8x64xf32, #tpu.memory_space<vmem>>, vector<1x64xf32>,
    %202 = vector.extract_strided_slice %193 {offsets = [0, 192], sizes = [1, 64], strides = [1, 1]} : vector<1x512xf32> to vector<1x64xf32>
    %c3 = arith.constant 3 : index
    %c0_54 = arith.constant 0 : index
    %203 = vector.load %arg20[%c3, %c0_54] : memref<8x64xf32, #tpu.memory_space<vmem>>, vector<1x64xf32>
    tpu.vector_store %arg20[%c3, %c0_54], %202 {strides = array<i32>} : memref<8x64xf32, #tpu.memory_space<vmem>>, vector<1x64xf32>,
    %204 = vector.extract_strided_slice %193 {offsets = [0, 256], sizes = [1, 64], strides = [1, 1]} : vector<1x512xf32> to vector<1x64xf32>
    %c4 = arith.constant 4 : index
    %c0_55 = arith.constant 0 : index
    %205 = vector.load %arg20[%c4, %c0_55] : memref<8x64xf32, #tpu.memory_space<vmem>>, vector<1x64xf32>
    tpu.vector_store %arg20[%c4, %c0_55], %204 {strides = array<i32>} : memref<8x64xf32, #tpu.memory_space<vmem>>, vector<1x64xf32>,
    %206 = vector.extract_strided_slice %193 {offsets = [0, 320], sizes = [1, 64], strides = [1, 1]} : vector<1x512xf32> to vector<1x64xf32>
    %c5 = arith.constant 5 : index
    %c0_56 = arith.constant 0 : index
    %207 = vector.load %arg20[%c5, %c0_56] : memref<8x64xf32, #tpu.memory_space<vmem>>, vector<1x64xf32>
    tpu.vector_store %arg20[%c5, %c0_56], %206 {strides = array<i32>} : memref<8x64xf32, #tpu.memory_space<vmem>>, vector<1x64xf32>,
    %208 = vector.extract_strided_slice %193 {offsets = [0, 384], sizes = [1, 64], strides = [1, 1]} : vector<1x512xf32> to vector<1x64xf32>
    %c6 = arith.constant 6 : index
    %c0_57 = arith.constant 0 : index
    %209 = vector.load %arg20[%c6, %c0_57] : memref<8x64xf32, #tpu.memory_space<vmem>>, vector<1x64xf32>
    tpu.vector_store %arg20[%c6, %c0_57], %208 {strides = array<i32>} : memref<8x64xf32, #tpu.memory_space<vmem>>, vector<1x64xf32>,
    %210 = vector.extract_strided_slice %193 {offsets = [0, 448], sizes = [1, 64], strides = [1, 1]} : vector<1x512xf32> to vector<1x64xf32>
    %c7 = arith.constant 7 : index
    %c0_58 = arith.constant 0 : index
    %211 = vector.load %arg20[%c7, %c0_58] : memref<8x64xf32, #tpu.memory_space<vmem>>, vector<1x64xf32>
    tpu.vector_store %arg20[%c7, %c0_58], %210 {strides = array<i32>} : memref<8x64xf32, #tpu.memory_space<vmem>>, vector<1x64xf32>,
    %c0_59 = arith.constant 0 : index
    %c0_60 = arith.constant 0 : index
    %212 = vector.load %arg20[%c0_59, %c0_60] : memref<8x64xf32, #tpu.memory_space<vmem>>, vector<8x64xf32>
    %c0_61 = arith.constant 0 : index
    %c0_62 = arith.constant 0 : index
    %213 = vector.load %arg16[%c0_61, %c0_62] : memref<64x512xbf16, #tpu.memory_space<vmem>>, vector<64x512xbf16>
    %214 = arith.truncf %212 : vector<8x64xf32> to vector<8x64xbf16>
    %cst_63 = arith.constant dense<0.000000e+00> : vector<8x512xf32>
    %215 = tpu.matmul %214, %213, %cst_63 {dimension_numbers = #tpu.dot_dimension_numbers<[1], [0], [0], [1], [0, 0, 1, 1], [], []>} : vector<8x64xbf16>, vector<64x512xbf16>, vector<8x512xf32> -> vector<8x512xf32>
    %c0_64 = arith.constant 0 : index
    %c0_65 = arith.constant 0 : index
    %216 = vector.load %arg17[%c0_64, %c0_65] : memref<8x512xf32, #tpu.memory_space<vmem>>, vector<8x512xf32>
    %217 = arith.addf %215, %216 : vector<8x512xf32>
    %c0_66 = arith.constant 0 : index
    %c0_67 = arith.constant 0 : index
    %218 = vector.load %arg18[%c0_66, %c0_67] : memref<8x512xf32, #tpu.memory_space<vmem>>, vector<8x512xf32>
    tpu.vector_store %arg18[%c0_66, %c0_67], %217 {strides = array<i32>} : memref<8x512xf32, #tpu.memory_space<vmem>>, vector<8x512xf32>,
    return
  }
  func.func @transform_0(%arg0: i32) -> (i32, i32, i32) {
    %c0_i32 = arith.constant 0 : i32
    %c0_i32_0 = arith.constant 0 : i32
    %c0_i32_1 = arith.constant 0 : i32
    return %arg0, %c0_i32, %c0_i32_0 : i32, i32, i32
  }
  func.func @transform_1(%arg0: i32) -> (i32, i32) {
    %c0_i32 = arith.constant 0 : i32
    %c0_i32_0 = arith.constant 0 : i32
    %c0_i32_1 = arith.constant 0 : i32
    return %c0_i32, %c0_i32_0 : i32, i32
  }
  func.func @transform_2(%arg0: i32) -> (i32, i32) {
    %c0_i32 = arith.constant 0 : i32
    %c0_i32_0 = arith.constant 0 : i32
    %c0_i32_1 = arith.constant 0 : i32
    return %c0_i32, %c0_i32_0 : i32, i32
  }
  func.func @transform_3(%arg0: i32) -> (i32, i32) {
    %c0_i32 = arith.constant 0 : i32
    %c0_i32_0 = arith.constant 0 : i32
    %c0_i32_1 = arith.constant 0 : i32
    return %c0_i32, %c0_i32_0 : i32, i32
  }
  func.func @transform_4(%arg0: i32) -> (i32, i32) {
    %c0_i32 = arith.constant 0 : i32
    %c0_i32_0 = arith.constant 0 : i32
    %c0_i32_1 = arith.constant 0 : i32
    return %c0_i32, %c0_i32_0 : i32, i32
  }
  func.func @transform_5(%arg0: i32) -> (i32, i32) {
    %c0_i32 = arith.constant 0 : i32
    %c0_i32_0 = arith.constant 0 : i32
    %c0_i32_1 = arith.constant 0 : i32
    return %c0_i32, %c0_i32_0 : i32, i32
  }
  func.func @transform_6(%arg0: i32) -> (i32, i32) {
    %c0_i32 = arith.constant 0 : i32
    %c0_i32_0 = arith.constant 0 : i32
    %c0_i32_1 = arith.constant 0 : i32
    return %c0_i32, %c0_i32_0 : i32, i32
  }
  func.func @transform_7(%arg0: i32) -> (i32, i32) {
    %c0_i32 = arith.constant 0 : i32
    %c0_i32_0 = arith.constant 0 : i32
    %c0_i32_1 = arith.constant 0 : i32
    return %c0_i32, %c0_i32_0 : i32, i32
  }
  func.func @transform_8(%arg0: i32) -> (i32, i32) {
    %c0_i32 = arith.constant 0 : i32
    %c0_i32_0 = arith.constant 0 : i32
    %c0_i32_1 = arith.constant 0 : i32
    return %c0_i32, %c0_i32_0 : i32, i32
  }
  func.func @transform_9(%arg0: i32) -> (i32, i32) {
    %c0_i32 = arith.constant 0 : i32
    %c0_i32_0 = arith.constant 0 : i32
    %c0_i32_1 = arith.constant 0 : i32
    return %c0_i32, %c0_i32_0 : i32, i32
  }
  func.func @transform_10(%arg0: i32) -> (i32, i32) {
    %c0_i32 = arith.constant 0 : i32
    %c0_i32_0 = arith.constant 0 : i32
    %c0_i32_1 = arith.constant 0 : i32
    return %c0_i32, %c0_i32_0 : i32, i32
  }
  func.func @transform_11(%arg0: i32) -> (i32, i32) {
    %c0_i32 = arith.constant 0 : i32
    %c0_i32_0 = arith.constant 0 : i32
    %c0_i32_1 = arith.constant 0 : i32
    return %c0_i32, %c0_i32_0 : i32, i32
  }
  func.func @transform_12(%arg0: i32) -> (i32, i32) {
    %c0_i32 = arith.constant 0 : i32
    %c0_i32_0 = arith.constant 0 : i32
    %c0_i32_1 = arith.constant 0 : i32
    return %c0_i32, %c0_i32_0 : i32, i32
  }
  func.func @transform_13(%arg0: i32) -> (i32, i32) {
    %c0_i32 = arith.constant 0 : i32
    %c0_i32_0 = arith.constant 0 : i32
    %c0_i32_1 = arith.constant 0 : i32
    return %c0_i32, %c0_i32_0 : i32, i32
  }
  func.func @transform_14(%arg0: i32) -> (i32, i32) {
    %c0_i32 = arith.constant 0 : i32
    %c0_i32_0 = arith.constant 0 : i32
    %c0_i32_1 = arith.constant 0 : i32
    return %c0_i32, %c0_i32_0 : i32, i32
  }
  func.func @transform_15(%arg0: i32) -> (i32, i32) {
    %c0_i32 = arith.constant 0 : i32
    %c0_i32_0 = arith.constant 0 : i32
    %c0_i32_1 = arith.constant 0 : i32
    return %c0_i32, %c0_i32_0 : i32, i32
  }
  func.func @transform_16(%arg0: i32) -> (i32, i32) {
    %c0_i32 = arith.constant 0 : i32
    %c0_i32_0 = arith.constant 0 : i32
    return %arg0, %c0_i32 : i32, i32
  }
  func.func @transform_17(%arg0: i32) -> (i32, i32) {
    %c0_i32 = arith.constant 0 : i32
    %c0_i32_0 = arith.constant 0 : i32
    return %arg0, %c0_i32 : i32, i32
  }
  func.func @transform_18(%arg0: i32) -> (i32, i32, i32) {
    %c0_i32 = arith.constant 0 : i32
    %c0_i32_0 = arith.constant 0 : i32
    %c0_i32_1 = arith.constant 0 : i32
    return %arg0, %c0_i32, %c0_i32_0 : i32, i32, i32
  }
}

</mosaic_0001>

<bundles_post_ra>
// kernel: tile.55
= control target key start
LH: loop header
LB: loop body
LE: loop exit
PB: predicated region body
PF: predicated region fallthrough
CT: control target
= control target key end

     0   :  { %vm32_vm0 = vcmask 1047556   ;;  %s50_s6 = smov 3  ;;  %s149_s15 = smov 96   ;;  %vm3_vm1 = vcmask 261120   ;;  %vm36_vm2 = vcmask 1048320   ;;  %vm65_vm3 = vcmask 785920   ;;  %s285_s0 = inlined_call_operand.vmem [shape: f32[9,8,32], index: 0, kind: input, shape index: {}]   ;;  %s286_s1 = inlined_call_operand.vmem [shape: f32[9,256], index: 1, kind: output, shape index: {}]  }
   0x1   :  { %v125_v0 = vld [vmem:[%s285_s0 + $0x3] ss:$8 sm:$0xf]   ;;  %v127_v4 = vld [vmem:[%s285_s0 + $0x7] ss:$8 sm:$0xf]  }
   0x2   :  { %v126_v1 = vld [vmem:[%s285_s0 + $0x3] ss:$8 sm:$0xf0]   ;;  %v128_v5 = vld [vmem:[%s285_s0 + $0x7] ss:$8 sm:$0xf0]  }
   0x3   :  { %v33_v2 = vsel %vm32_vm0, %v126_v1, %v125_v0  ;;  %v130_v3 = vld [vmem:[%s285_s0 + $0x43] ss:$4 sm:%s50_s6]   ;;  %v132_v6 = vld [vmem:[%s285_s0 + $0x2] ss:$8 sm:$0xf]   ;;  %v43_v7 = vsel %vm32_vm0, %v128_v5, %v127_v4  ;;  %s79_s26 = smov 3 }
   0x4   :  { %34 = vrot.lane.b32.xlu0 %v33_v2, %s149_s15  ;;  %52 = vrot.lane.b32.xlu1 %v130_v3, %s149_s15  ;;  %v133_v8 = vld [vmem:[%s285_s0 + $0x2] ss:$8 sm:$0xf0]   ;;  %v134_v9 = vld [vmem:[%s285_s0 + $0x6] ss:$8 sm:$0xf]  }
   0x5   :  { %v62_v10 = vsel %vm32_vm0, %v133_v8, %v132_v6  ;;  %v135_v11 = vld [vmem:[%s285_s0 + $0x6] ss:$8 sm:$0xf0]   ;;  %s150_s27 = smov 64   ;;  %s23_s9 = smov 3  ;;  %vm94_vm4 = vcmask 523520  }
   0x6   :  { %v139_v12 = vld [vmem:[%s285_s0 + $0x1] ss:$8 sm:$0xf]   ;;  %v141_v14 = vld [vmem:[%s285_s0 + $0x5] ss:$8 sm:$0xf]   ;;  %v72_v15 = vsel %vm32_vm0, %v135_v11, %v134_v9 }
   0x7   :  { %v140_v13 = vld [vmem:[%s285_s0 + $0x1] ss:$8 sm:$0xf0]   ;;  %v137_v16 = vld [vmem:[%s285_s0 + $0x42] ss:$4 sm:%s79_s26]   ;;  %s151_s6 = smov 32  }
   0x8   :  { %44 = vrot.lane.b32.xlu0 %v43_v7, %s149_s15  ;;  %63 = vrot.lane.b32.xlu1 %v62_v10, %s150_s27  ;;  %v142_v17 = vld [vmem:[%s285_s0 + $0x5] ss:$8 sm:$0xf0]   ;;  %v2_v19 = vld [vmem:[%s285_s0] ss:$4 sm:$0xff]   ;;  %v91_v21 = vsel %vm32_vm0, %v140_v13, %v139_v12 }
   0x9   :  { %v123_v18 = vld [vmem:[%s285_s0 + $0x40] ss:$4 sm:%s23_s9]   ;;  %4 = vst.msk [vmem:[%s286_s1] ss:$8 sm:$0x3] %vm3_vm1, %v2_v19   ;;  %v101_v22 = vsel %vm32_vm0, %v142_v17, %v141_v14 }
   0xa   :  { %v118_v20 = vld [vmem:[%s285_s0 + $0x20] ss:$4 sm:$0xff]   ;;  %124 = vst.msk [vmem:[%s286_s1 + $0x10] ss:$8 sm:$0x3] %vm3_vm1, %v123_v18  }
   0xb   :  { %115 = vst.msk [vmem:[%s286_s1 - $0xf] ss:$8 sm:$0xc] %vm3_vm1, %v2_v19   ;;  %116 = vst.msk [vmem:[%s286_s1 - $0x1e] ss:$8 sm:$0x30] %vm3_vm1, %v2_v19  }
   0xc   :  { %117 = vst.msk [vmem:[%s286_s1 - $0x2d] ss:$8 sm:$0xc0] %vm3_vm1, %v2_v19   ;;  %119 = vst.msk [vmem:[%s286_s1 + $0x4] ss:$8 sm:$0x3] %vm3_vm1, %v118_v20   ;;  %73 = vrot.lane.b32.xlu0 %v72_v15, %s150_s27  ;;  %81 = vrot.lane.b32.xlu1 %v137_v16, %s150_s27 }
   0xd   :  { %120 = vst.msk [vmem:[%s286_s1 - $0xb] ss:$8 sm:$0xc] %vm3_vm1, %v118_v20   ;;  %121 = vst.msk [vmem:[%s286_s1 - $0x1a] ss:$8 sm:$0x30] %vm3_vm1, %v118_v20  }
   0xe   :  { %122 = vst.msk [vmem:[%s286_s1 - $0x29] ss:$8 sm:$0xc0] %vm3_vm1, %v118_v20   ;;  %s108_s27 = smov 3 }
   0xf   :  { %v144_v23 = vld [vmem:[%s285_s0 + $0x41] ss:$4 sm:%s108_s27]  }
  0x10   :  { %92 = vrot.lane.b32.xlu0 %v91_v21, %s151_s6  ;;  %102 = vrot.lane.b32.xlu1 %v101_v22, %s151_s6 }
  0x14   :  { %110 = vrot.lane.b32.xlu0 %v144_v23, %s151_s6 }
  0x76   :  { %v35_v24 = vpop.permute.xlu0 %34   ;;  %v53_v25 = vpop.permute.xlu1 %52  }
  0x77   :  { %131 = vst.msk [vmem:[%s286_s1 + $0x10] ss:$8 sm:$0x3] %vm36_vm2, %v53_v25   ;;  %37 = vst.msk [vmem:[%s286_s1] sm:$0xff] %vm36_vm2, %v35_v24  }
  0x7a   :  { %v45_v26 = vpop.permute.xlu0 %44   ;;  %v64_v27 = vpop.permute.xlu1 %63  }
  0x7b   :  { %66 = vst.msk [vmem:[%s286_s1] sm:$0xff] %vm65_vm3, %v64_v27  }
  0x7c   :  { %129 = vst.msk [vmem:[%s286_s1 + $0x8] sm:$0xff] %vm36_vm2, %v45_v26  }
  0x7e   :  { %v74_v28 = vpop.permute.xlu0 %73   ;;  %v82_v29 = vpop.permute.xlu1 %81  }
  0x7f   :  { %136 = vst.msk [vmem:[%s286_s1 + $0x8] sm:$0xff] %vm65_vm3, %v74_v28   ;;  %138 = vst.msk [vmem:[%s286_s1 + $0x10] ss:$8 sm:$0x3] %vm65_vm3, %v82_v29  }
  0x82   :  { %v93_v30 = vpop.permute.xlu0 %92   ;;  %v103_v31 = vpop.permute.xlu1 %102  }
  0x83   :  { %95 = vst.msk [vmem:[%s286_s1] sm:$0xff] %vm94_vm4, %v93_v30   ;;  %143 = vst.msk [vmem:[%s286_s1 + $0x8] sm:$0xff] %vm94_vm4, %v103_v31  }
  0x86   :  { %v111_v32 = vpop.permute.xlu0 %110  }
  0x87   :  { %145 = vst.msk [vmem:[%s286_s1 + $0x10] ss:$8 sm:$0x3] %vm94_vm4, %v111_v32  }

// kernel: tile.35
= control target key start
LH: loop header
LB: loop body
LE: loop exit
PB: predicated region body
PF: predicated region fallthrough
CT: control target
= control target key end

     0   :  { %vm4_vm0 = vcmask 1047556   ;;  %s169_s14 = smov 96   ;;  %s170_s15 = smov 112   ;;  %vm6_vm1 = vcmask 130048   ;;  %vm21_vm2 = vcmask 1048448   ;;  %vm38_vm3 = vcmask 917248   ;;  %s314_s0 = inlined_call_operand.vmem [shape: f32[9,8,16], index: 0, kind: input, shape index: {}]   ;;  %s315_s1 = inlined_call_operand.vmem [shape: f32[9,128], index: 1, kind: output, shape index: {}]  }
   0x1   :  { %v138_v0 = vld [vmem:[%s314_s0 + $0x6] ss:$8 sm:$0xf]   ;;  %v134_v3 = vld [vmem:[%s314_s0 + $0x7] ss:$8 sm:$0xf]  }
   0x2   :  { %v139_v1 = vld [vmem:[%s314_s0 + $0x6] ss:$8 sm:$0xf0]   ;;  %v135_v4 = vld [vmem:[%s314_s0 + $0x7] ss:$8 sm:$0xf0]  }
   0x3   :  { %v35_v2 = vsel %vm4_vm0, %v139_v1, %v138_v0  ;;  %v18_v5 = vsel %vm4_vm0, %v135_v4, %v134_v3  ;;  %v140_v6 = vld [vmem:[%s314_s0 + $0x46] sm:$0x1]   ;;  %v136_v7 = vld [vmem:[%s314_s0 + $0x47] sm:$0x1]   ;;  %v144_v10 = vld [vmem:[%s314_s0 + $0x45] sm:$0x1]  }
   0x4   :  { %36 = vrot.lane.b32.xlu1 %v35_v2, %s169_s14  ;;  %19 = vrot.lane.b32.xlu0 %v18_v5, %s170_s15  ;;  %v142_v8 = vld [vmem:[%s314_s0 + $0x5] ss:$8 sm:$0xf]   ;;  %v146_v12 = vld [vmem:[%s314_s0 + $0x4] ss:$8 sm:$0xf]  }
   0x5   :  { %v143_v9 = vld [vmem:[%s314_s0 + $0x5] ss:$8 sm:$0xf0]   ;;  %v147_v13 = vld [vmem:[%s314_s0 + $0x4] ss:$8 sm:$0xf0]  }
   0x6   :  { %v52_v11 = vsel %vm4_vm0, %v143_v9, %v142_v8  ;;  %s171_s30 = smov 80   ;;  %v148_v14 = vld [vmem:[%s314_s0 + $0x44] sm:$0x1]   ;;  %v2_v15 = vld [vmem:[%s314_s0] ss:$8 sm:$0xf]   ;;  %v69_v18 = vsel %vm4_vm0, %v147_v13, %v146_v12 }
   0x7   :  { %v3_v16 = vld [vmem:[%s314_s0] ss:$8 sm:$0xf0]   ;;  %v150_v20 = vld [vmem:[%s314_s0 + $0x3] ss:$8 sm:$0xf]  }
   0x8   :  { %42 = vrot.lane.b32.xlu1 %v140_v6, %s169_s14  ;;  %25 = vrot.lane.b32.xlu0 %v136_v7, %s170_s15  ;;  %v132_v17 = vld [vmem:[%s314_s0 + $0x40] sm:$0x1]   ;;  %v5_v19 = vsel %vm4_vm0, %v3_v16, %v2_v15  ;;  %v151_v21 = vld [vmem:[%s314_s0 + $0x3] ss:$8 sm:$0xf0]   ;;  %s172_s18 = smov 64  }
   0x9   :  { %133 = vst.msk [vmem:[%s315_s1 + $0x8] sm:$0x1] %vm6_vm1, %v132_v17   ;;  %7 = vst.msk [vmem:[%s315_s1] sm:$0xff] %vm6_vm1, %v5_v19   ;;  %v152_v22 = vld [vmem:[%s314_s0 + $0x43] sm:$0x1]   ;;  %v86_v23 = vsel %vm4_vm0, %v151_v21, %v150_v20  ;;  %s173_s25 = smov 48  }
   0xa   :  { %v154_v24 = vld [vmem:[%s314_s0 + $0x2] ss:$8 sm:$0xf]   ;;  %v158_v28 = vld [vmem:[%s314_s0 + $0x1] ss:$8 sm:$0xf]  }
   0xb   :  { %v155_v25 = vld [vmem:[%s314_s0 + $0x2] ss:$8 sm:$0xf0]   ;;  %v159_v29 = vld [vmem:[%s314_s0 + $0x1] ss:$8 sm:$0xf0]  }
   0xc   :  { %59 = vrot.lane.b32.xlu1 %v144_v10, %s171_s30  ;;  %53 = vrot.lane.b32.xlu0 %v52_v11, %s171_s30  ;;  %v156_v26 = vld [vmem:[%s314_s0 + $0x42] sm:$0x1]   ;;  %v103_v27 = vsel %vm4_vm0, %v155_v25, %v154_v24  ;;  %s174_s3 = smov 32   ;;  %v160_v30 = vld [vmem:[%s314_s0 + $0x41] sm:$0x1]   ;;  %v120_v31 = vsel %vm4_vm0, %v159_v29, %v158_v28  ;;  %s175_s0 = smov 16  }
   0xd   :  { %vm55_vm4 = vcmask 786048   ;;  %vm72_vm5 = vcmask 654848   ;;  %vm89_vm6 = vcmask 523648   ;;  %vm106_vm7 = vcmask 392448  }
   0xe   :  { %vm123_vm8 = vcmask 261248  }
  0x10   :  { %76 = vrot.lane.b32.xlu1 %v148_v14, %s172_s18  ;;  %70 = vrot.lane.b32.xlu0 %v69_v18, %s172_s18 }
  0x14   :  { %93 = vrot.lane.b32.xlu1 %v152_v22, %s173_s25  ;;  %87 = vrot.lane.b32.xlu0 %v86_v23, %s173_s25 }
  0x18   :  { %110 = vrot.lane.b32.xlu1 %v156_v26, %s174_s3  ;;  %104 = vrot.lane.b32.xlu0 %v103_v27, %s174_s3 }
  0x1c   :  { %127 = vrot.lane.b32.xlu1 %v160_v30, %s175_s0  ;;  %121 = vrot.lane.b32.xlu0 %v120_v31, %s175_s0 }
  0x76   :  { %v37_v32 = vpop.permute.xlu1 %36   ;;  %v20_v33 = vpop.permute.xlu0 %19  }
  0x77   :  { %22 = vst.msk [vmem:[%s315_s1] sm:$0xff] %vm21_vm2, %v20_v33  }
  0x78   :  { %39 = vst.msk [vmem:[%s315_s1] sm:$0xff] %vm38_vm3, %v37_v32  }
  0x7a   :  { %v43_v34 = vpop.permute.xlu1 %42   ;;  %v26_v35 = vpop.permute.xlu0 %25  }
  0x7b   :  { %137 = vst.msk [vmem:[%s315_s1 + $0x8] sm:$0x1] %vm21_vm2, %v26_v35  }
  0x7c   :  { %141 = vst.msk [vmem:[%s315_s1 + $0x8] sm:$0x1] %vm38_vm3, %v43_v34  }
  0x7e   :  { %v60_v36 = vpop.permute.xlu1 %59   ;;  %v54_v37 = vpop.permute.xlu0 %53  }
  0x7f   :  { %145 = vst.msk [vmem:[%s315_s1 + $0x8] sm:$0x1] %vm55_vm4, %v60_v36   ;;  %56 = vst.msk [vmem:[%s315_s1] sm:$0xff] %vm55_vm4, %v54_v37  }
  0x82   :  { %v77_v38 = vpop.permute.xlu1 %76   ;;  %v71_v39 = vpop.permute.xlu0 %70  }
  0x83   :  { %149 = vst.msk [vmem:[%s315_s1 + $0x8] sm:$0x1] %vm72_vm5, %v77_v38   ;;  %73 = vst.msk [vmem:[%s315_s1] sm:$0xff] %vm72_vm5, %v71_v39  }
  0x86   :  { %v94_v40 = vpop.permute.xlu1 %93   ;;  %v88_v41 = vpop.permute.xlu0 %87  }
  0x87   :  { %153 = vst.msk [vmem:[%s315_s1 + $0x8] sm:$0x1] %vm89_vm6, %v94_v40   ;;  %90 = vst.msk [vmem:[%s315_s1] sm:$0xff] %vm89_vm6, %v88_v41  }
  0x8a   :  { %v111_v42 = vpop.permute.xlu1 %110   ;;  %v105_v43 = vpop.permute.xlu0 %104  }
  0x8b   :  { %157 = vst.msk [vmem:[%s315_s1 + $0x8] sm:$0x1] %vm106_vm7, %v111_v42   ;;  %107 = vst.msk [vmem:[%s315_s1] sm:$0xff] %vm106_vm7, %v105_v43  }
  0x8e   :  { %v128_v44 = vpop.permute.xlu1 %127   ;;  %v122_v45 = vpop.permute.xlu0 %121  }
  0x8f   :  { %161 = vst.msk [vmem:[%s315_s1 + $0x8] sm:$0x1] %vm123_vm8, %v128_v44   ;;  %124 = vst.msk [vmem:[%s315_s1] sm:$0xff] %vm123_vm8, %v122_v45  }

// kernel: frame_mobilenet_forward.1
= control target key start
LH: loop header
LB: loop body
LE: loop exit
PB: predicated region body
PF: predicated region fallthrough
CT: control target
= control target key end

     0   :  { %vm199_vm0 = vcmask 1043456   ;;  %v6721_v0 = vmov 0.0   ;;  %vm6722_vm1 = vmmov 0   ;;  %vm129_vm2 = vcmask 64512   ;;  %s6725_s28 = smov 64   ;;  %s12318_s1 = inlined_call_operand.vmem [shape: bf16[8,128], index: 1, kind: input, shape index: {}]   ;;  %s12319_s0 = inlined_call_operand.vmem [shape: f32[1,362,8], index: 0, kind: input, shape index: {}]   ;;  %s12320_s2 = inlined_call_operand.vmem [shape: f32[9,128], index: 2, kind: input, shape index: {}]   ;;  %s12321_s3 = inlined_call_operand.vmem [shape: f32[1,128], index: 3, kind: input, shape index: {}]   ;;  %s12322_s4 = inlined_call_operand.vmem [shape: bf16[122,324], index: 4, kind: input, shape index: {}]   ;;  %s12323_s7 = inlined_call_operand.vmem [shape: bf16[128,256], index: 7, kind: input, shape index: {}]   ;;  %s12324_s5 = inlined_call_operand.vmem [shape: f32[9,128], index: 5, kind: input, shape index: {}]   ;;  %s12325_s6 = inlined_call_operand.vmem [shape: f32[1,128], index: 6, kind: input, shape index: {}]   ;;  %s12326_s8 = inlined_call_operand.vmem [shape: f32[1,256], index: 8, kind: input, shape index: {}]   ;;  %s12327_s9 = inlined_call_operand.vmem [shape: bf16[122,100], index: 9, kind: input, shape index: {}]   ;;  %s12328_s10 = inlined_call_operand.vmem [shape: f32[9,256], index: 10, kind: input, shape index: {}]   ;;  %s12329_s12 = inlined_call_operand.vmem [shape: bf16[16,100], index: 12, kind: input, shape index: {}]   ;;  %s12330_s13 = inlined_call_operand.vmem [shape: bf16[256,512], index: 13, kind: input, shape index: {}]   ;;  %s12331_s11 = inlined_call_operand.vmem [shape: f32[1,256], index: 11, kind: input, shape index: {}]   ;;  %s12332_s15 = inlined_call_operand.vmem [shape: bf16[64,512], index: 15, kind: input, shape index: {}]   ;;  %s12333_s14 = inlined_call_operand.vmem [shape: f32[1,512], index: 14, kind: input, shape index: {}]   ;;  %s12334_s18 = inlined_call_operand.vmem [shape: f32[1,1,512], index: 18, kind: output, shape index: {1}]   ;;  %s12335_s16 = inlined_call_operand.vmem [shape: f32[8,512], index: 16, kind: input, shape index: {}]   ;;  %s12336_s17 = inlined_call_operand.vmem [shape: f32[8,512], index: 17, kind: output, shape index: {0}]  }
   0x1   :  { %12740 = sst [smem:[#allocation176_spill]] %s12318_s1  ;;  %6404 = vmatprep.subr.bf16.mxu0 %v6721_v0  ;;  %6406 = vmatprep.mubr.msk.bf16.mxu0 %vm6722_vm1, %v6721_v0  ;;  %vm870_vm3 = vcmask 1046528   ;;  %vm1527_vm4 = vcmask 1045504   ;;  %vm2142_vm5 = vcmask 1041408   ;;  %vm1936_vm6 = vcmask 1044480  }
   0x2   :  { %12741 = sst [smem:[#allocation177_spill]] %s12319_s0  ;;  %vm2611_vm7 = vcmask 556032   ;;  %vm3841_vm8 = vcmask 818176   ;;  %vm5903_vm9 = vcmask 516096   ;;  %vm6026_vm11 = vcmask 523264  }
   0x3   :  { %12742 = sst [smem:[#allocation178_spill]] %s12320_s2 }
   0x4   :  { %s12743_s29 = sld [smem:[#allocation176_spill]] }
   0x5   :  { %s12744_s19 = sld [smem:[#allocation177_spill]] }
   0x6   :  { %s12747_s26 = sld [smem:[#allocation178_spill]] }
   0xa   :  { %v105_v1 = vld [vmem:[%s12743_s29] sm:$0xf] }
   0xb   :  { %v59_v2 = vld [vmem:[%s12744_s19] sm:$0xff]  ;;  %v60_v3 = vld [vmem:[%s12744_s19 + $0x8] sm:$0xff]  ;;  %v201_v4 = vsel %vm199_vm0, %v105_v1, 0  ;;  %v61_v6 = vld [vmem:[%s12744_s19 + $0x10] sm:$0xff] }
   0xc   :  { %v106_v5 = vpack.c.bf16 %v60_v3, %v59_v2  ;;  %6405 = vmatpush3.bf16.msra.mxu0 %v201_v4  ;;  %v62_v7 = vld [vmem:[%s12744_s19 + $0x18] sm:$0xff]  ;;  %v63_v9 = vld [vmem:[%s12744_s19 + $0x20] sm:$0xff]  ;;  %v64_v10 = vld [vmem:[%s12744_s19 + $0x28] sm:$0xff] }
   0xd   :  { %v107_v8 = vpack.c.bf16 %v62_v7, %v61_v6  ;;  %v108_v11 = vpack.c.bf16 %v64_v10, %v63_v9  ;;  %v65_v12 = vld [vmem:[%s12744_s19 + $0x30] sm:$0xff]  ;;  %v66_v13 = vld [vmem:[%s12744_s19 + $0x38] sm:$0xff]  ;;  %v67_v15 = vld [vmem:[%s12744_s19 + $0x40] sm:$0xff]  ;;  %v12339_v9 = vlaneseq }
   0xe   :  { %v109_v14 = vpack.c.bf16 %v66_v13, %v65_v12  ;;  %v68_v16 = vld [vmem:[%s12744_s19 + $0x48] sm:$0xff]  ;;  %v69_v18 = vld [vmem:[%s12744_s19 + $0x50] sm:$0xff]  ;;  %v70_v19 = vld [vmem:[%s12744_s19 + $0x58] sm:$0xff] }
   0xf   :  { %6407 = vmatmul.mubr.msk.bf16.vlgmr.msra.gmra.mxu0 %vm129_vm2, %v106_v5  ;;  %v110_v17 = vpack.c.bf16 %v68_v16, %v67_v15  ;;  %v111_v20 = vpack.c.bf16 %v70_v19, %v69_v18  ;;  %v71_v21 = vld [vmem:[%s12744_s19 + $0x60] sm:$0xff]  ;;  %v72_v22 = vld [vmem:[%s12744_s19 + $0x68] sm:$0xff]  ;;  %v73_v24 = vld [vmem:[%s12744_s19 + $0x70] sm:$0xff]  ;;  %v7033_v10 = vshrl.u32 %v12339_v9, 7 }
  0x10   :  { %6410 = vmatprep.mubr.msk.bf16.mxu0 %vm6722_vm1, %v6721_v0  ;;  %v112_v23 = vpack.c.bf16 %v72_v22, %v71_v21  ;;  %v74_v25 = vld [vmem:[%s12744_s19 + $0x78] sm:$0xff]  ;;  %v75_v27 = vld [vmem:[%s12744_s19 + $0x80] sm:$0xff]  ;;  %v76_v28 = vld [vmem:[%s12744_s19 + $0x88] sm:$0xff] }
  0x11   :  { %v113_v26 = vpack.c.bf16 %v74_v25, %v73_v24  ;;  %v114_v29 = vpack.c.bf16 %v76_v28, %v75_v27  ;;  %v77_v30 = vld [vmem:[%s12744_s19 + $0x90] sm:$0xff]  ;;  %v78_v31 = vld [vmem:[%s12744_s19 + $0x98] sm:$0xff]  ;;  %v79_v33 = vld [vmem:[%s12744_s19 + $0xa0] sm:$0xff]  ;;  %12745 = vst [vmem:[#allocation3_spill] sm:$0xff] %v7033_v10  ;;  %v7048_v15 = vsub.s32 2, %v7033_v10  ;;  %v7058_v21 = vsub.s32 5, %v7033_v10 }
  0x12   :  { %v115_v32 = vpack.c.bf16 %v78_v31, %v77_v30  ;;  %v80_v34 = vld [vmem:[%s12744_s19 + $0xa8] sm:$0xff]  ;;  %v81_v36 = vld [vmem:[%s12744_s19 + $0xb0] sm:$0xff]  ;;  %v82_v37 = vld [vmem:[%s12744_s19 + $0xb8] sm:$0xff] }
  0x13   :  { %v116_v35 = vpack.c.bf16 %v80_v34, %v79_v33  ;;  %v117_v38 = vpack.c.bf16 %v82_v37, %v81_v36  ;;  %v83_v39 = vld [vmem:[%s12744_s19 + $0xc0] sm:$0xff]  ;;  %v84_v40 = vld [vmem:[%s12744_s19 + $0xc8] sm:$0xff]  ;;  %v85_v42 = vld [vmem:[%s12744_s19 + $0xd0] sm:$0xff]  ;;  %12749 = vst [vmem:[#allocation6_spill] sm:$0xff] %v7048_v15 }
  0x14   :  { %v118_v41 = vpack.c.bf16 %v84_v40, %v83_v39  ;;  %v86_v43 = vld [vmem:[%s12744_s19 + $0xd8] sm:$0xff]  ;;  %v87_v45 = vld [vmem:[%s12744_s19 + $0xe0] sm:$0xff]  ;;  %v88_v46 = vld [vmem:[%s12744_s19 + $0xe8] sm:$0xff]  ;;  %12751 = vst [vmem:[#allocation8_spill] sm:$0xff] %v7058_v21 }
  0x15   :  { %v119_v44 = vpack.c.bf16 %v86_v43, %v85_v42  ;;  %v120_v47 = vpack.c.bf16 %v88_v46, %v87_v45  ;;  %v89_v48 = vld [vmem:[%s12744_s19 + $0xf0] sm:$0xff]  ;;  %v90_v49 = vld [vmem:[%s12744_s19 + $0xf8] sm:$0xff]  ;;  %v91_v51 = vld [vmem:[%s12744_s19 + $0x100] sm:$0xff] }
  0x16   :  { %v121_v50 = vpack.c.bf16 %v90_v49, %v89_v48  ;;  %v92_v52 = vld [vmem:[%s12744_s19 + $0x108] sm:$0xff]  ;;  %v93_v54 = vld [vmem:[%s12744_s19 + $0x110] sm:$0xff]  ;;  %v94_v55 = vld [vmem:[%s12744_s19 + $0x118] sm:$0xff] }
  0x17   :  { %6411 = vmatmul.mubr.msk.bf16.gmra.mxu0 %vm129_vm2, %v107_v8  ;;  %v122_v53 = vpack.c.bf16 %v92_v52, %v91_v51  ;;  %v123_v56 = vpack.c.bf16 %v94_v55, %v93_v54  ;;  %v95_v57 = vld [vmem:[%s12744_s19 + $0x120] sm:$0xff]  ;;  %v96_v58 = vld [vmem:[%s12744_s19 + $0x128] sm:$0xff]  ;;  %v97_v60 = vld [vmem:[%s12744_s19 + $0x130] sm:$0xff]  ;;  %v7109_v55 = vsub.s32 7, %v7033_v10 }
  0x18   :  { %6414 = vmatprep.mubr.msk.bf16.mxu0 %vm6722_vm1, %v6721_v0  ;;  %v124_v59 = vpack.c.bf16 %v96_v58, %v95_v57  ;;  %v98_v61 = vld [vmem:[%s12744_s19 + $0x138] sm:$0xff]  ;;  %v99_v63 = vld [vmem:[%s12744_s19 + $0x140] sm:$0xff]  ;;  %v100_v1 = vld [vmem:[%s12744_s19 + $0x148] sm:$0xff]  ;;  %v7114_v58 = vsub.s32 6, %v7033_v10 }
  0x19   :  { %v125_v62 = vpack.c.bf16 %v98_v61, %v97_v60  ;;  %v126_v2 = vpack.c.bf16 %v100_v1, %v99_v63  ;;  %v101_v3 = vld [vmem:[%s12744_s19 + $0x150] sm:$0xff]  ;;  %v102_v4 = vld [vmem:[%s12744_s19 + $0x158] sm:$0xff]  ;;  %v103_v6 = vld [vmem:[%s12744_s19 + $0x160] sm:$0xff]  ;;  %12763 = vst [vmem:[#allocation20_spill] sm:$0xff] %v7109_v55 }
  0x1a   :  { %v127_v5 = vpack.c.bf16 %v102_v4, %v101_v3  ;;  %v104_v7 = vld [vmem:[%s12744_s19 + $0x168] sm:$0x3]  ;;  %12765 = vst [vmem:[#allocation22_spill] sm:$0xff] %v7114_v58 }
  0x1b   :  { %v128_v8 = vpack.c.bf16 %v104_v7, %v103_v6 }
  0x1f   :  { %6415 = vmatmul.mubr.msk.bf16.gmra.mxu0 %vm129_vm2, %v108_v11  ;;  %v7036_v11 = vsub.s32 1, %v7033_v10 }
  0x20   :  { %6418 = vmatprep.mubr.msk.bf16.mxu0 %vm6722_vm1, %v6721_v0 }
  0x21   :  { %12746 = vst [vmem:[#allocation4_spill] sm:$0xff] %v7036_v11 }
  0x27   :  { %6419 = vmatmul.mubr.msk.bf16.gmra.mxu0 %vm129_vm2, %v109_v14  ;;  %v7045_v14 = vsub.s32 0, %v7033_v10 }
  0x28   :  { %6422 = vmatprep.mubr.msk.bf16.mxu0 %vm6722_vm1, %v6721_v0 }
  0x29   :  { %12748 = vst [vmem:[#allocation5_spill] sm:$0xff] %v7045_v14 }
  0x2f   :  { %6423 = vmatmul.mubr.msk.bf16.gmra.mxu0 %vm129_vm2, %v110_v17  ;;  %v7051_v17 = vsub.s32 3, %v7033_v10 }
  0x30   :  { %6426 = vmatprep.mubr.msk.bf16.mxu0 %vm6722_vm1, %v6721_v0 }
  0x31   :  { %12750 = vst [vmem:[#allocation7_spill] sm:$0xff] %v7051_v17 }
  0x37   :  { %6427 = vmatmul.mubr.msk.bf16.gmra.mxu0 %vm129_vm2, %v111_v20 }
  0x38   :  { %6430 = vmatprep.mubr.msk.bf16.mxu0 %vm6722_vm1, %v6721_v0 }
  0x3f   :  { %6431 = vmatmul.mubr.msk.bf16.gmra.mxu0 %vm129_vm2, %v112_v23 }
  0x40   :  { %6434 = vmatprep.mubr.msk.bf16.mxu0 %vm6722_vm1, %v6721_v0 }
  0x47   :  { %6435 = vmatmul.mubr.msk.bf16.gmra.mxu0 %vm129_vm2, %v113_v26 }
  0x48   :  { %6438 = vmatprep.mubr.msk.bf16.mxu0 %vm6722_vm1, %v6721_v0 }
  0x4f   :  { %6439 = vmatmul.mubr.msk.bf16.gmra.mxu0 %vm129_vm2, %v114_v29 }
  0x50   :  { %6442 = vmatprep.mubr.msk.bf16.mxu0 %vm6722_vm1, %v6721_v0 }
  0x57   :  { %6443 = vmatmul.mubr.msk.bf16.gmra.mxu0 %vm129_vm2, %v115_v32  ;;  %v7078_v32 = vsub.s32 4, %v7033_v10 }
  0x58   :  { %6446 = vmatprep.mubr.msk.bf16.mxu0 %vm6722_vm1, %v6721_v0 }
  0x59   :  { %12754 = vst [vmem:[#allocation11_spill] sm:$0xff] %v7078_v32 }
  0x5f   :  { %6447 = vmatmul.mubr.msk.bf16.gmra.mxu0 %vm129_vm2, %v116_v35 }
  0x60   :  { %6450 = vmatprep.mubr.msk.bf16.mxu0 %vm6722_vm1, %v6721_v0 }
  0x67   :  { %6451 = vmatmul.mubr.msk.bf16.gmra.mxu0 %vm129_vm2, %v117_v38 }
  0x68   :  { %6454 = vmatprep.mubr.msk.bf16.mxu0 %vm6722_vm1, %v6721_v0 }
  0x6f   :  { %6455 = vmatmul.mubr.msk.bf16.gmra.mxu0 %vm129_vm2, %v118_v41 }
  0x70   :  { %6458 = vmatprep.mubr.msk.bf16.mxu0 %vm6722_vm1, %v6721_v0 }
  0x77   :  { %6459 = vmatmul.mubr.msk.bf16.gmra.mxu0 %vm129_vm2, %v119_v44 }
  0x78   :  { %6462 = vmatprep.mubr.msk.bf16.mxu0 %vm6722_vm1, %v6721_v0 }
  0x7f   :  { %6463 = vmatmul.mubr.msk.bf16.gmra.mxu0 %vm129_vm2, %v120_v47 }
  0x80   :  { %6466 = vmatprep.mubr.msk.bf16.mxu0 %vm6722_vm1, %v6721_v0 }
  0x87   :  { %6467 = vmatmul.mubr.msk.bf16.gmra.mxu0 %vm129_vm2, %v121_v50 }
  0x88   :  { %6470 = vmatprep.mubr.msk.bf16.mxu0 %vm6722_vm1, %v6721_v0 }
  0x8f   :  { %6471 = vmatmul.mubr.msk.bf16.gmra.mxu0 %vm129_vm2, %v122_v53 }
  0x90   :  { %6474 = vmatprep.mubr.msk.bf16.mxu0 %vm6722_vm1, %v6721_v0 }
  0x97   :  { %6475 = vmatmul.mubr.msk.bf16.gmra.mxu0 %vm129_vm2, %v123_v56 }
  0x98   :  { %6478 = vmatprep.mubr.msk.bf16.mxu0 %vm6722_vm1, %v6721_v0 }
  0x9f   :  { %6479 = vmatmul.mubr.msk.bf16.gmra.mxu0 %vm129_vm2, %v124_v59 }
  0xa0   :  { %6482 = vmatprep.mubr.msk.bf16.mxu0 %vm6722_vm1, %v6721_v0 }
  0xa7   :  { %6483 = vmatmul.mubr.msk.bf16.gmra.mxu0 %vm129_vm2, %v125_v62 }
  0xa8   :  { %6486 = vmatprep.mubr.msk.bf16.mxu0 %vm6722_vm1, %v6721_v0 }
  0xaf   :  { %6487 = vmatmul.mubr.msk.bf16.gmra.mxu0 %vm129_vm2, %v126_v2 }
  0xb0   :  { %6490 = vmatprep.mubr.msk.bf16.mxu0 %vm6722_vm1, %v6721_v0 }
  0xb7   :  { %6491 = vmatmul.mubr.msk.bf16.gmra.mxu0 %vm129_vm2, %v127_v5 }
  0xb8   :  { %6494 = vmatprep.mubr.msk.bf16.mxu0 %vm6722_vm1, %v6721_v0  ;;  %v420_v0 = vld [vmem:[%s12747_s26] sm:$0xff] }
  0xb9   :  { %v7042_v12 = vrot.slane %v420_v0, %v7036_v11  ;;  %v7055_v19 = vrot.slane %v420_v0, %v7045_v14  ;;  %v7064_v23 = vrot.slane %v420_v0, %v7048_v15  ;;  %v7067_v25 = vrot.slane %v420_v0, %v7051_v17 }
  0xba   :  { %v7072_v30 = vrot.slane %v420_v0, %v7058_v21  ;;  %v7089_v41 = vrot.slane %v420_v0, %v7078_v32  ;;  %v7117_v59 = vrot.slane %v420_v0, %v7109_v55  ;;  %v7128_v1 = vrot.slane %v420_v0, %v7114_v58 }
  0xbb   :  { %12753 = vst [vmem:[#allocation10_spill] sm:$0xff] %v7067_v25 }
  0xbc   :  { %12757 = vst [vmem:[#allocation14_spill] sm:$0xff] %v7089_v41 }
  0xbf   :  { %6495 = vmatmul.mubr.msk.bf16.gmra.mxu0 %vm129_vm2, %v128_v8 }
  0xcf   :  { %v237_v13 = vpop.f32.mrf.mxu0 }
  0xd0   :  { %v471_v18 = vmul.f32 %v7042_v12, %v237_v13  ;;  %v426_v28 = vmul.f32 %v7055_v19, %v237_v13  ;;  %v516_v33 = vmul.f32 %v7064_v23, %v237_v13 }
  0xd1   :  { %v6408_v16 = vpop.f32.mrf.mxu0 }
  0xd2   :  { %v871_v26 = vrot.slane %v471_v18, 1 }
  0xd3   :  { %v240_v20 = vpop.f32.mrf.mxu0 }
  0xd4   :  { %v7061_v22 = vmul.f32 %v7042_v12, %v240_v20  ;;  %v517_v40 = vmul.f32 %v7064_v23, %v240_v20  ;;  %v7137_v4 = vmul.f32 %v7055_v19, %v240_v20 }
  0xd5   :  { %v6409_v24 = vpop.f32.mrf.mxu0 }
  0xd6   :  { %12752 = vst [vmem:[#allocation9_spill] sm:$0xff] %v7061_v22  ;;  %v12341_v27 = vrot.slane %v7061_v22, 1  ;;  %12771 = vst [vmem:[#allocation28_spill] sm:$0xff] %v7137_v4 }
  0xd7   :  { %v245_v29 = vpop.f32.mrf.mxu0 }
  0xd8   :  { %v873_v31 = vsel %vm870_vm3, %v871_v26, %v12341_v27  ;;  %v561_v35 = vmul.f32 %v7067_v25, %v245_v29  ;;  %v651_v37 = vmul.f32 %v7072_v30, %v245_v29  ;;  %v606_v49 = vmul.f32 %v7089_v41, %v245_v29 }
  0xd9   :  { %v7081_v34 = vadd.f32 %v873_v31, %v426_v28  ;;  %v6412_v36 = vpop.f32.mrf.mxu0  ;;  %v7122_v61 = vmul.f32 %v7042_v12, %v245_v29  ;;  %v7140_v5 = vmul.f32 %v7055_v19, %v245_v29  ;;  %v7143_v6 = vmul.f32 %v7064_v23, %v245_v29 }
  0xda   :  { %v7085_v38 = vadd.f32 %v561_v35, %v516_v33  ;;  %v1116_v46 = vrot.slane %v651_v37, 1 }
  0xdb   :  { %12755 = vst [vmem:[#allocation12_spill] sm:$0xff] %v7081_v34  ;;  %v248_v39 = vpop.f32.mrf.mxu0  ;;  %12767 = vst [vmem:[#allocation24_spill] sm:$0xff] %v7122_v61 }
  0xdc   :  { %12756 = vst [vmem:[#allocation13_spill] sm:$0xff] %v7085_v38  ;;  %v562_v42 = vmul.f32 %v7067_v25, %v248_v39  ;;  %v7093_v43 = vmul.f32 %v7072_v30, %v248_v39  ;;  %v7125_v63 = vmul.f32 %v7042_v12, %v248_v39  ;;  %12772 = vst [vmem:[#allocation29_spill] sm:$0xff] %v7140_v5 }
  0xdd   :  { %v6413_v44 = vpop.f32.mrf.mxu0  ;;  %12773 = vst [vmem:[#allocation30_spill] sm:$0xff] %v7143_v6  ;;  %v7148_v0 = vmul.f32 %v7055_v19, %v248_v39  ;;  %v7151_v13 = vmul.f32 %v7064_v23, %v248_v39  ;;  %v7158_v20 = vmul.f32 %v7089_v41, %v248_v39 }
  0xde   :  { %12758 = vst [vmem:[#allocation15_spill] sm:$0xff] %v7093_v43  ;;  %v7095_v45 = vadd.f32 %v562_v42, %v517_v40  ;;  %v12340_v47 = vrot.slane %v7093_v43, 1  ;;  %12768 = vst [vmem:[#allocation25_spill] sm:$0xff] %v7125_v63 }
  0xdf   :  { %v7098_v48 = vpop.f32.mrf.mxu0  ;;  %12774 = vst [vmem:[#allocation31_spill] sm:$0xff] %v7148_v0  ;;  %12775 = vst [vmem:[#allocation32_spill] sm:$0xff] %v7151_v13 }
  0xe0   :  { %12759 = vst [vmem:[#allocation16_spill] sm:$0xff] %v7095_v45  ;;  %12760 = vst [vmem:[#allocation17_spill] sm:$0xff] %v7098_v48  ;;  %v1118_v50 = vsel %vm870_vm3, %v1116_v46, %v12340_v47  ;;  %v7132_v2 = vmul.f32 %v7117_v59, %v7098_v48  ;;  %v7172_v31 = vmul.f32 %v7072_v30, %v7098_v48 }
  0xe1   :  { %v6416_v51 = vpop.f32.mrf.mxu0  ;;  %v7104_v52 = vadd.f32 %v1118_v50, %v606_v49  ;;  %12777 = vst [vmem:[#allocation34_spill] sm:$0xff] %v7158_v20  ;;  %v7176_v33 = vmul.f32 %v7128_v1, %v7098_v48 }
  0xe2   :  { %12769 = vst [vmem:[#allocation26_spill] sm:$0xff] %v7132_v2  ;;  %12780 = vst [vmem:[#allocation37_spill] sm:$0xff] %v7172_v31 }
  0xe3   :  { %12761 = vst [vmem:[#allocation18_spill] sm:$0xff] %v7104_v52  ;;  %v7106_v53 = vpop.f32.mrf.mxu0  ;;  %12781 = vst [vmem:[#allocation38_spill] sm:$0xff] %v7176_v33 }
  0xe4   :  { %12762 = vst [vmem:[#allocation19_spill] sm:$0xff] %v7106_v53  ;;  %v7155_v16 = vmul.f32 %v7117_v59, %v7106_v53  ;;  %v7183_v37 = vmul.f32 %v7072_v30, %v7106_v53  ;;  %v7187_v39 = vmul.f32 %v7128_v1, %v7106_v53 }
  0xe5   :  { %v6417_v54 = vpop.f32.mrf.mxu0 }
  0xe6   :  { %12776 = vst [vmem:[#allocation33_spill] sm:$0xff] %v7155_v16  ;;  %12783 = vst [vmem:[#allocation40_spill] sm:$0xff] %v7183_v37 }
  0xe7   :  { %v7111_v56 = vpop.f32.mrf.mxu0  ;;  %12784 = vst [vmem:[#allocation41_spill] sm:$0xff] %v7187_v39 }
  0xe8   :  { %12764 = vst [vmem:[#allocation21_spill] sm:$0xff] %v7111_v56  ;;  %v7163_v26 = vmul.f32 %v7117_v59, %v7111_v56  ;;  %v7200_v46 = vmul.f32 %v7072_v30, %v7111_v56  ;;  %v7204_v49 = vmul.f32 %v7128_v1, %v7111_v56 }
  0xe9   :  { %v6420_v57 = vpop.f32.mrf.mxu0 }
  0xea   :  { %12778 = vst [vmem:[#allocation35_spill] sm:$0xff] %v7163_v26  ;;  %12787 = vst [vmem:[#allocation44_spill] sm:$0xff] %v7200_v46 }
  0xeb   :  { %v7119_v60 = vpop.f32.mrf.mxu0  ;;  %12788 = vst [vmem:[#allocation45_spill] sm:$0xff] %v7204_v49 }
  0xec   :  { %12766 = vst [vmem:[#allocation23_spill] sm:$0xff] %v7119_v60  ;;  %v7167_v28 = vmul.f32 %v7117_v59, %v7119_v60  ;;  %v7211_v57 = vmul.f32 %v7072_v30, %v7119_v60 }
  0xed   :  { %v6421_v62 = vpop.f32.mrf.mxu0 }
  0xee   :  { %12779 = vst [vmem:[#allocation36_spill] sm:$0xff] %v7167_v28  ;;  %12789 = vst [vmem:[#allocation46_spill] sm:$0xff] %v7211_v57  ;;  %v7215_v62 = vmul.f32 %v7128_v1, %v7119_v60 }
  0xef   :  { %v7134_v3 = vpop.f32.mrf.mxu0 }
  0xf0   :  { %12770 = vst [vmem:[#allocation27_spill] sm:$0xff] %v7134_v3  ;;  %v7191_v40 = vmul.f32 %v7117_v59, %v7134_v3  ;;  %v7195_v42 = vmul.f32 %v7042_v12, %v7134_v3  ;;  %12790 = vst [vmem:[#allocation47_spill] sm:$0xff] %v7215_v62  ;;  %v7220_v9 = vmul.f32 %v7072_v30, %v7134_v3 }
  0xf1   :  { %v6424_v18 = vpop.f32.mrf.mxu0  ;;  %v434_v47 = vmul.f32 %v7055_v19, %v7134_v3  ;;  %v524_v27 = vmul.f32 %v7064_v23, %v7134_v3 }
  0xf2   :  { %12785 = vst [vmem:[#allocation42_spill] sm:$0xff] %v7191_v40  ;;  %12786 = vst [vmem:[#allocation43_spill] sm:$0xff] %v7195_v42  ;;  %v12801_v21 = vrot.slane %v7195_v42, 1 }
  0xf3   :  { %v7179_v36 = vpop.f32.mrf.mxu0  ;;  %12791 = vst [vmem:[#allocation48_spill] sm:$0xff] %v7220_v9 }
  0xf4   :  { %12782 = vst [vmem:[#allocation39_spill] sm:$0xff] %v7179_v36  ;;  %v480_v51 = vmul.f32 %v7042_v12, %v7179_v36  ;;  %v7228_v8 = vmul.f32 %v7117_v59, %v7179_v36  ;;  %v7240_v18 = vmul.f32 %v7072_v30, %v7179_v36  ;;  %v7254_v10 = vmul.f32 %v7128_v1, %v7179_v36 }
  0xf5   :  { %v6425_v50 = vpop.f32.mrf.mxu0  ;;  %v435_v54 = vmul.f32 %v7055_v19, %v7179_v36  ;;  %v525_v14 = vmul.f32 %v7064_v23, %v7179_v36 }
  0xf6   :  { %v7224_v50 = vmul.f32 %v7128_v1, %v7134_v3  ;;  %12793 = vst [vmem:[#allocation50_spill] sm:$0xff] %v7228_v8  ;;  %v888_v35 = vrot.slane %v480_v51, 1  ;;  %12795 = vst [vmem:[#allocation52_spill] sm:$0xff] %v7240_v18 }
  0xf7   :  { %v7230_v29 = vpop.f32.mrf.mxu0  ;;  %12798 = vst [vmem:[#allocation55_spill] sm:$0xff] %v7254_v10 }
  0xf8   :  { %12792 = vst [vmem:[#allocation49_spill] sm:$0xff] %v7224_v50  ;;  %12794 = vst [vmem:[#allocation51_spill] sm:$0xff] %v7230_v29  ;;  %v7244_v7 = vmul.f32 %v7072_v30, %v7230_v29  ;;  %v7248_v51 = vmul.f32 %v7117_v59, %v7230_v29  ;;  %v481_v44 = vmul.f32 %v7042_v12, %v7230_v29 }
  0xf9   :  { %v6428_v24 = vpop.f32.mrf.mxu0  ;;  %v569_v55 = vmul.f32 %v7067_v25, %v7230_v29  ;;  %v889_v17 = vsel %vm870_vm3, %v12801_v21, %v888_v35  ;;  %v436_v52 = vmul.f32 %v7055_v19, %v7230_v29  ;;  %v526_v58 = vmul.f32 %v7064_v23, %v7230_v29 }
  0xfa   :  { %12796 = vst [vmem:[#allocation53_spill] sm:$0xff] %v7244_v7  ;;  %12797 = vst [vmem:[#allocation54_spill] sm:$0xff] %v7248_v51  ;;  %v7265_v24 = vmul.f32 %v7128_v1, %v7230_v29  ;;  %v890_v15 = vrot.slane %v481_v44, 1  ;;  %v7282_v34 = vmul.f32 %v7089_v41, %v7230_v29  ;;  %v7295_v4 = vadd.f32 %v889_v17, %v434_v47 }
  0xfb   :  { %v7267_v32 = vpop.f32.mrf.mxu0  ;;  %v7297_v2 = vadd.f32 %v569_v55, %v524_v27 }
  0xfc   :  { %12799 = vst [vmem:[#allocation56_spill] sm:$0xff] %v7265_v24  ;;  %12800 = vst [vmem:[#allocation57_spill] sm:$0xff] %v7267_v32  ;;  %v7274_v11 = vmul.f32 %v7117_v59, %v7267_v32  ;;  %v7287_v38 = vmul.f32 %v7072_v30, %v7267_v32  ;;  %v482_v45 = vmul.f32 %v7042_v12, %v7267_v32 }
  0xfd   :  { %12803 = vst [vmem:[#allocation59_spill] sm:$0xff] %v7282_v34  ;;  %v6429_v21 = vpop.f32.mrf.mxu0  ;;  %v570_v33 = vmul.f32 %v7067_v25, %v7267_v32  ;;  %v891_v20 = vsel %vm870_vm3, %v888_v35, %v890_v15  ;;  %12805 = vst [vmem:[#allocation61_spill] sm:$0xff] %v7295_v4  ;;  %v7301_v44 = vmul.f32 %v7128_v1, %v7267_v32 }
  0xfe   :  { %12802 = vst [vmem:[#allocation58_spill] sm:$0xff] %v7274_v11  ;;  %12804 = vst [vmem:[#allocation60_spill] sm:$0xff] %v7287_v38  ;;  %v437_v21 = vmul.f32 %v7055_v19, %v7267_v32  ;;  %v527_v39 = vmul.f32 %v7064_v23, %v7267_v32  ;;  %v892_v43 = vrot.slane %v482_v45, 1  ;;  %v7316_v27 = vmul.f32 %v7089_v41, %v7267_v32 }
  0xff   :  { %12806 = vst [vmem:[#allocation62_spill] sm:$0xff] %v7297_v2  ;;  %12807 = vst [vmem:[#allocation63_spill] sm:$0xff] %v7301_v44  ;;  %v285_v16 = vpop.f32.mrf.mxu0  ;;  %v7320_v49 = vadd.f32 %v891_v20, %v435_v54  ;;  %v7328_v37 = vadd.f32 %v570_v33, %v525_v14  ;;  %v7344_v14 = vld [vmem:[%s12747_s26 + $0x8] ss:$0 sm:$0xff] }
 0x100   :  { %v7309_v35 = vmul.f32 %v7072_v30, %v285_v16  ;;  %v7312_v17 = vmul.f32 %v7117_v59, %v285_v16  ;;  %12810 = vst [vmem:[#allocation66_spill] sm:$0xff] %v7316_v27  ;;  %v483_v55 = vmul.f32 %v7042_v12, %v285_v16  ;;  %v571_v62 = vmul.f32 %v7067_v25, %v285_v16 }
 0x101   :  { %v6432_v47 = vpop.f32.mrf.mxu0  ;;  %12811 = vst [vmem:[#allocation67_spill] sm:$0xff] %v7320_v49  ;;  %v7324_v22 = vmul.f32 %v7128_v1, %v285_v16  ;;  %v438_v26 = vmul.f32 %v7055_v19, %v285_v16  ;;  %v893_v28 = vsel %vm870_vm3, %v890_v15, %v892_v43  ;;  %12813 = vst [vmem:[#allocation69_spill] sm:$0xff] %v7328_v37 }
 0x102   :  { %12808 = vst [vmem:[#allocation64_spill] sm:$0xff] %v7309_v35  ;;  %12809 = vst [vmem:[#allocation65_spill] sm:$0xff] %v7312_v17  ;;  %v528_v0 = vmul.f32 %v7064_v23, %v285_v16  ;;  %v894_v13 = vrot.slane %v483_v55, 1  ;;  %v7333_v20 = vmul.f32 %v7089_v41, %v285_v16  ;;  %v7346_v15 = vadd.f32 %v571_v62, %v526_v58 }
 0x103   :  { %12812 = vst [vmem:[#allocation68_spill] sm:$0xff] %v7324_v22  ;;  %v288_v47 = vpop.f32.mrf.mxu0  ;;  %v7351_v5 = vadd.f32 %v893_v28, %v436_v52  ;;  %v7354_v61 = vmul.f32 %v7344_v14, %v285_v16  ;;  %v12818_v62 = vrot.slane %v7287_v38, 1  ;;  %v12824_v24 = vrot.slane %v7309_v35, 1 }
 0x104   :  { %v7336_v54 = vmul.f32 %v7072_v30, %v288_v47  ;;  %v7339_v45 = vmul.f32 %v7117_v59, %v288_v47  ;;  %12815 = vst [vmem:[#allocation71_spill] sm:$0xff] %v7346_v15  ;;  %v484_v55 = vmul.f32 %v7042_v12, %v288_v47  ;;  %v572_v6 = vmul.f32 %v7067_v25, %v288_v47 }
 0x105   :  { %v6433_v31 = vpop.f32.mrf.mxu0  ;;  %12816 = vst [vmem:[#allocation72_spill] sm:$0xff] %v7354_v61  ;;  %v7357_v63 = vmul.f32 %v7128_v1, %v288_v47  ;;  %v439_v10 = vmul.f32 %v7055_v19, %v288_v47  ;;  %v895_v58 = vsel %vm870_vm3, %v892_v43, %v894_v13  ;;  %v529_v52 = vmul.f32 %v7064_v23, %v288_v47 }
 0x106   :  { %12814 = vst [vmem:[#allocation70_spill] sm:$0xff] %v7339_v45  ;;  %v12819_v31 = vrot.slane %v7244_v7, 1  ;;  %v896_v28 = vrot.slane %v484_v55, 1  ;;  %v7370_v16 = vmul.f32 %v7089_v41, %v288_v47  ;;  %v7374_v57 = vadd.f32 %v895_v58, %v437_v21 }
 0x107   :  { %12817 = vst [vmem:[#allocation73_spill] sm:$0xff] %v7357_v63  ;;  %v293_v50 = vpop.f32.mrf.mxu0  ;;  %v7376_v43 = vadd.f32 %v572_v6, %v527_v39  ;;  %v7393_v39 = vmul.f32 %v7344_v14, %v288_v47 }
 0x108   :  { %v7366_v33 = vsel %vm870_vm3, %v12819_v31, %v12818_v62  ;;  %v7380_v62 = vmul.f32 %v7072_v30, %v293_v50  ;;  %v7383_v31 = vmul.f32 %v7117_v59, %v293_v50  ;;  %v485_v53 = vmul.f32 %v7042_v12, %v293_v50 }
 0x109   :  { %12820 = vst [vmem:[#allocation74_spill] sm:$0xff] %v7366_v33  ;;  %v6436_v55 = vpop.f32.mrf.mxu0  ;;  %v573_v48 = vmul.f32 %v7067_v25, %v293_v50  ;;  %v7388_v40 = vmul.f32 %v7128_v1, %v293_v50  ;;  %v440_v21 = vmul.f32 %v7055_v19, %v293_v50  ;;  %v897_v6 = vsel %vm870_vm3, %v894_v13, %v896_v28 }
 0x10a   :  { %12821 = vst [vmem:[#allocation75_spill] sm:$0xff] %v7383_v31  ;;  %12822 = vst [vmem:[#allocation76_spill] sm:$0xff] %v7393_v39  ;;  %v898_v8 = vrot.slane %v485_v53, 1  ;;  %v7395_v46 = vadd.f32 %v897_v6, %v438_v26  ;;  %v12823_v55 = vrot.slane %v7336_v54, 1  ;;  %v530_v47 = vmul.f32 %v7064_v23, %v293_v50 }
 0x10b   :  { %v296_v58 = vpop.f32.mrf.mxu0  ;;  %v7397_v44 = vadd.f32 %v573_v48, %v528_v0  ;;  %v618_v53 = vmul.f32 %v7089_v41, %v293_v50  ;;  %v7422_v18 = vmul.f32 %v7344_v14, %v293_v50  ;;  %v12830_v4 = vrot.slane %v7380_v62, 1 }
 0x10c   :  { %v7404_v7 = vsel %vm870_vm3, %v12824_v24, %v12823_v55  ;;  %v664_v42 = vmul.f32 %v7072_v30, %v296_v58  ;;  %v7408_v13 = vmul.f32 %v7117_v59, %v296_v58  ;;  %v486_v0 = vmul.f32 %v7042_v12, %v296_v58 }
 0x10d   :  { %v6437_v48 = vpop.f32.mrf.mxu0  ;;  %v574_v6 = vmul.f32 %v7067_v25, %v296_v58  ;;  %v7417_v24 = vmul.f32 %v7128_v1, %v296_v58  ;;  %v441_v55 = vmul.f32 %v7055_v19, %v296_v58  ;;  %v899_v11 = vsel %vm870_vm3, %v896_v28, %v898_v8  ;;  %12825 = vst [vmem:[#allocation77_spill] sm:$0xff] %v7422_v18 }
 0x10e   :  { %v900_v48 = vrot.slane %v486_v0, 1  ;;  %v7426_v26 = vadd.f32 %v899_v11, %v439_v10  ;;  %v1141_v29 = vrot.slane %v664_v42, 1  ;;  %v531_v3 = vmul.f32 %v7064_v23, %v296_v58 }
 0x10f   :  { %v7424_v9 = vpop.f32.mrf.mxu0  ;;  %v1047_v32 = vadd.f32 %v574_v6, %v529_v52  ;;  %v619_v28 = vmul.f32 %v7089_v41, %v296_v58  ;;  %v7447_v51 = vmul.f32 %v7344_v14, %v296_v58  ;;  %v12833_v45 = vrot.slane %v7397_v44, 2 }
 0x110   :  { %12826 = vst [vmem:[#allocation78_spill] sm:$0xff] %v7424_v9  ;;  %v7431_v36 = vmul.f32 %v7042_v12, %v7424_v9  ;;  %v7437_v50 = vmul.f32 %v7117_v59, %v7424_v9  ;;  %v575_v10 = vmul.f32 %v7067_v25, %v7424_v9  ;;  %v665_v11 = vmul.f32 %v7072_v30, %v7424_v9 }
 0x111   :  { %v6440_v60 = vpop.f32.mrf.mxu0  ;;  %v901_v42 = vsel %vm870_vm3, %v898_v8, %v900_v48  ;;  %12828 = vst [vmem:[#allocation80_spill] sm:$0xff] %v7447_v51  ;;  %v1142_v39 = vsel %vm870_vm3, %v12830_v4, %v1141_v29  ;;  %v1553_v61 = vrot.slane %v1047_v32, 2  ;;  %v708_v8 = vmul.f32 %v7128_v1, %v7424_v9 }
 0x112   :  { %12827 = vst [vmem:[#allocation79_spill] sm:$0xff] %v7431_v36  ;;  %v12409_v52 = vrot.slane %v7431_v36, 1  ;;  %v1007_v0 = vadd.f32 %v901_v42, %v440_v21  ;;  %v1048_v49 = vadd.f32 %v575_v10, %v530_v47  ;;  %v1143_v60 = vrot.slane %v665_v11, 1 }
 0x113   :  { %v7449_v56 = vpop.f32.mrf.mxu0  ;;  %v532_v42 = vmul.f32 %v7064_v23, %v7424_v9  ;;  %v620_v11 = vmul.f32 %v7089_v41, %v7424_v9  ;;  %v7469_v4 = vmul.f32 %v7344_v14, %v7424_v9  ;;  %v7479_v17 = vadd.f32 %v1142_v39, %v618_v53 }
 0x114   :  { %12829 = vst [vmem:[#allocation81_spill] sm:$0xff] %v7449_v56  ;;  %v754_v21 = vmul.f32 %v7117_v59, %v7449_v56  ;;  %v576_v58 = vmul.f32 %v7067_v25, %v7449_v56  ;;  %v666_v32 = vmul.f32 %v7072_v30, %v7449_v56  ;;  %v709_v6 = vmul.f32 %v7128_v1, %v7449_v56 }
 0x115   :  { %v6441_v10 = vpop.f32.mrf.mxu0  ;;  %12831 = vst [vmem:[#allocation82_spill] sm:$0xff] %v7469_v4  ;;  %v903_v63 = vsel %vm870_vm3, %v900_v48, %v12409_v52  ;;  %v1555_v47 = vrot.slane %v1048_v49, 2  ;;  %v1144_v22 = vsel %vm870_vm3, %v1141_v29, %v1143_v60  ;;  %v1554_v9 = vsel %vm1527_vm4, %v12833_v45, %v1553_v61 }
 0x116   :  { %v1049_v37 = vadd.f32 %v576_v58, %v531_v3  ;;  %v1145_v2 = vrot.slane %v666_v32, 1  ;;  %v1346_v27 = vrot.slane %v754_v21, 1  ;;  %v621_v29 = vmul.f32 %v7089_v41, %v7449_v56 }
 0x117   :  { %v7476_v10 = vpop.f32.mrf.mxu0  ;;  %v1008_v39 = vadd.f32 %v903_v63, %v441_v55  ;;  %v7494_v58 = vmul.f32 %v7344_v14, %v7449_v56  ;;  %v7498_v52 = vadd.f32 %v1144_v22, %v619_v28  ;;  %v1556_v55 = vsel %vm1527_vm4, %v1553_v61, %v1555_v47 }
 0x118   :  { %12832 = vst [vmem:[#allocation83_spill] sm:$0xff] %v7476_v10  ;;  %v755_v33 = vmul.f32 %v7117_v59, %v7476_v10  ;;  %v577_v48 = vmul.f32 %v7067_v25, %v7476_v10  ;;  %v667_v3 = vmul.f32 %v7072_v30, %v7476_v10  ;;  %v1557_v53 = vrot.slane %v1049_v37, 2 }
 0x119   :  { %v6444_v49 = vpop.f32.mrf.mxu0  ;;  %v1146_v63 = vsel %vm870_vm3, %v1143_v60, %v1145_v2  ;;  %v710_v38 = vmul.f32 %v7128_v1, %v7476_v10  ;;  %v7537_v61 = vadd.f32 %v1554_v9, %v7395_v46 }
 0x11a   :  { %v1348_v45 = vrot.slane %v755_v33, 1  ;;  %v7496_v21 = vadd.f32 %v577_v48, %v532_v42  ;;  %v1147_v32 = vrot.slane %v667_v3, 1  ;;  %v7504_v49 = vmul.f32 %v7344_v14, %v7476_v10 }
 0x11b   :  { %v7500_v36 = vpop.f32.mrf.mxu0  ;;  %v1558_v37 = vsel %vm1527_vm4, %v1555_v47, %v1557_v53  ;;  %v12837_v42 = vrot.slane %v7437_v50, 1  ;;  %v622_v3 = vmul.f32 %v7089_v41, %v7476_v10 }
 0x11c   :  { %12834 = vst [vmem:[#allocation84_spill] sm:$0xff] %v7496_v21  ;;  %12835 = vst [vmem:[#allocation85_spill] sm:$0xff] %v7500_v36  ;;  %v756_v33 = vmul.f32 %v7117_v59, %v7500_v36  ;;  %v7513_v22 = vmul.f32 %v7072_v30, %v7500_v36  ;;  %v7517_v28 = vmul.f32 %v7344_v14, %v7500_v36  ;;  %v12840_v9 = vrot.slane %v7496_v21, 2 }
 0x11d   :  { %v1347_v48 = vsel %vm870_vm3, %v12837_v42, %v1346_v27  ;;  %v6445_v60 = vpop.f32.mrf.mxu0  ;;  %v7525_v47 = vadd.f32 %v1558_v37, %v1007_v0  ;;  %v1349_v56 = vsel %vm870_vm3, %v1346_v27, %v1348_v45  ;;  %v1148_v35 = vsel %vm870_vm3, %v1145_v2, %v1147_v32 }
 0x11e   :  { %12836 = vst [vmem:[#allocation86_spill] sm:$0xff] %v7513_v22  ;;  %v1350_v34 = vrot.slane %v756_v33, 1  ;;  %v12420_v25 = vrot.slane %v7513_v22, 1  ;;  %v1252_v42 = vadd.f32 %v1146_v63, %v620_v11  ;;  %v7534_v60 = vadd.f32 %v1347_v48, %v708_v8 }
 0x11f   :  { %v7532_v51 = vpop.f32.mrf.mxu0  ;;  %v1458_v41 = vadd.f32 %v1349_v56, %v709_v6  ;;  %v711_v0 = vmul.f32 %v7128_v1, %v7500_v36  ;;  %v2172_v2 = vrot.slane %v7517_v28, 6  ;;  %v1253_v11 = vadd.f32 %v1148_v35, %v621_v29 }
 0x120   :  { %12838 = vst [vmem:[#allocation87_spill] sm:$0xff] %v7532_v51  ;;  %v757_v27 = vmul.f32 %v7117_v59, %v7532_v51  ;;  %v7547_v33 = vmul.f32 %v7072_v30, %v7532_v51  ;;  %v1351_v56 = vsel %vm870_vm3, %v1348_v45, %v1350_v34  ;;  %v1560_v46 = vsel %vm1527_vm4, %v1557_v53, %v12840_v9 }
 0x121   :  { %v6448_v8 = vpop.f32.mrf.mxu0  ;;  %v7555_v63 = vmul.f32 %v7344_v14, %v7532_v51  ;;  %v1150_v28 = vsel %vm870_vm3, %v1147_v32, %v12420_v25  ;;  %v1459_v48 = vadd.f32 %v1351_v56, %v710_v38  ;;  %v712_v35 = vmul.f32 %v7128_v1, %v7532_v51 }
 0x122   :  { %12839 = vst [vmem:[#allocation88_spill] sm:$0xff] %v7547_v33  ;;  %v1352_v6 = vrot.slane %v757_v27, 1  ;;  %v7565_v29 = vadd.f32 %v1556_v55, %v7426_v26  ;;  %v12424_v53 = vrot.slane %v7534_v60, 1  ;;  %v1757_v45 = vrot.slane %v1458_v41, 1 }
 0x123   :  { %12841 = vst [vmem:[#allocation89_spill] sm:$0xff] %v7555_v63  ;;  %v7560_v37 = vpop.f32.mrf.mxu0  ;;  %v7571_v9 = vadd.f32 %v1560_v46, %v1008_v39  ;;  %v12843_v38 = vrot.slane %v7504_v49, 6  ;;  %v1254_v25 = vadd.f32 %v1150_v28, %v622_v3  ;;  %v1759_v55 = vrot.slane %v1459_v48, 1 }
 0x124   :  { %12842 = vst [vmem:[#allocation90_spill] sm:$0xff] %v7560_v37  ;;  %v758_v27 = vmul.f32 %v7117_v59, %v7560_v37  ;;  %v1353_v8 = vsel %vm870_vm3, %v1350_v34, %v1352_v6  ;;  %v1758_v41 = vsel %vm870_vm3, %v12424_v53, %v1757_v45  ;;  %v12423_v22 = vrot.slane %v7555_v63, 6 }
 0x125   :  { %v7576_v32 = vsel %vm2142_vm5, %v12843_v38, %v2172_v2  ;;  %v6449_v56 = vpop.f32.mrf.mxu0  ;;  %v1460_v26 = vadd.f32 %v1353_v8, %v711_v0  ;;  %v7583_v34 = vadd.f32 %v1758_v41, %v7479_v17  ;;  %v12845_v39 = vrot.slane %v7380_v62, 1 }
 0x126   :  { %v1354_v21 = vrot.slane %v758_v27, 1  ;;  %v12846_v46 = vrot.slane %v7336_v54, 1  ;;  %v1760_v0 = vsel %vm870_vm3, %v1757_v45, %v1759_v55  ;;  %v7595_v28 = vadd.f32 %v7404_v7, %v7333_v20 }
 0x127   :  { %12844 = vst [vmem:[#allocation91_spill] sm:$0xff] %v7583_v34  ;;  %v7590_v56 = vpop.f32.mrf.mxu0  ;;  %v1761_v3 = vrot.slane %v1460_v26, 1  ;;  %v7602_v17 = vmul.f32 %v7072_v30, %v7560_v37  ;;  %v713_v7 = vmul.f32 %v7128_v1, %v7560_v37  ;;  %v1867_v8 = vadd.f32 %v1760_v0, %v7498_v52 }
 0x128   :  { %v1140_v38 = vsel %vm870_vm3, %v12846_v46, %v12845_v39  ;;  %12847 = vst [vmem:[#allocation92_spill] sm:$0xff] %v7590_v56  ;;  %v7606_v54 = vmul.f32 %v7117_v59, %v7590_v56  ;;  %v1355_v62 = vsel %vm870_vm3, %v1352_v6, %v1354_v21  ;;  %v7618_v39 = vsel %vm2142_vm5, %v2172_v2, %v12423_v22 }
 0x129   :  { %v7598_v48 = vadd.f32 %v1140_v38, %v7370_v16  ;;  %12848 = vst [vmem:[#allocation93_spill] sm:$0xff] %v7602_v17  ;;  %v6452_v45 = vpop.f32.mrf.mxu0  ;;  %v1461_v20 = vadd.f32 %v1355_v62, %v712_v35  ;;  %v1762_v16 = vsel %vm870_vm3, %v1759_v55, %v1761_v3  ;;  %v2168_v6 = vrot.slane %v7494_v58, 6 }
 0x12a   :  { %12849 = vst [vmem:[#allocation94_spill] sm:$0xff] %v7606_v54  ;;  %v12428_v26 = vrot.slane %v7606_v54, 1  ;;  %v1868_v41 = vadd.f32 %v1762_v16, %v1252_v42  ;;  %v12430_v45 = vrot.slane %v7583_v34, 3  ;;  %v1962_v35 = vrot.slane %v1867_v8, 3 }
 0x12b   :  { %v7621_v46 = vpop.f32.mrf.mxu0  ;;  %v1763_v38 = vrot.slane %v1461_v20, 1  ;;  %v12851_v55 = vrot.slane %v7408_v13, 1  ;;  %v12852_v52 = vrot.slane %v7383_v31, 1  ;;  %v7631_v42 = vmul.f32 %v7072_v30, %v7590_v56 }
 0x12c   :  { %12850 = vst [vmem:[#allocation95_spill] sm:$0xff] %v7621_v46  ;;  %v7635_v2 = vmul.f32 %v7128_v1, %v7590_v56  ;;  %v1357_v58 = vsel %vm870_vm3, %v1354_v21, %v12428_v26  ;;  %v12855_v62 = vrot.slane %v7437_v50, 1  ;;  %v1964_v22 = vrot.slane %v1868_v41, 3 }
 0x12d   :  { %v1343_v0 = vsel %vm870_vm3, %v12852_v52, %v12851_v55  ;;  %12853 = vst [vmem:[#allocation96_spill] sm:$0xff] %v7631_v42  ;;  %v12856_v20 = vmov %v12851_v55  ;;  %v6453_v8 = vpop.f32.mrf.mxu0  ;;  %v7645_v55 = vadd.f32 %v1357_v58, %v713_v7  ;;  %v1764_v52 = vsel %vm870_vm3, %v1761_v3, %v1763_v38 }
 0x12e   :  { %12854 = vst [vmem:[#allocation97_spill] sm:$0xff] %v7635_v2  ;;  %v1345_v16 = vsel %vm870_vm3, %v12856_v20, %v12855_v62  ;;  %v1963_v53 = vsel %vm1936_vm6, %v12430_v45, %v1962_v35  ;;  %v1869_v27 = vadd.f32 %v1764_v52, %v1253_v11  ;;  %v12858_v21 = vrot.slane %v7469_v4, 6 }
 0x12f   :  { %12857 = vst [vmem:[#allocation98_spill] sm:$0xff] %v7645_v55  ;;  %v2071_v63 = vadd.f32 %v1963_v53, %v7537_v61  ;;  %v7656_v13 = vadd.f32 %v1343_v0, %v7388_v40  ;;  %v7658_v62 = vpop.f32.mrf.mxu0  ;;  %v12427_v7 = vrot.slane %v7645_v55, 1  ;;  %v1965_v3 = vsel %vm1936_vm6, %v1962_v35, %v1964_v22 }
 0x130   :  { %v2169_v50 = vsel %vm2142_vm5, %v12858_v21, %v2168_v6  ;;  %12860 = vst [vmem:[#allocation100_spill] sm:$0xff] %v7658_v62  ;;  %v12861_v41 = vrot.slane %v7504_v49, 6  ;;  %v1549_v11 = vrot.slane %v7376_v43, 2  ;;  %v7668_v61 = vmul.f32 %v7072_v30, %v7621_v46 }
 0x131   :  { %12859 = vst [vmem:[#allocation99_spill] sm:$0xff] %v7656_v13  ;;  %v7672_v40 = vmul.f32 %v7117_v59, %v7621_v46  ;;  %v1966_v53 = vrot.slane %v1869_v27, 3  ;;  %v1456_v0 = vadd.f32 %v1345_v16, %v7417_v24  ;;  %v6456_v20 = vpop.f32.mrf.mxu0  ;;  %v1766_v49 = vsel %vm870_vm3, %v1763_v38, %v12427_v7  ;;  %v7689_v24 = vld [vmem:[%s12321_s3] ss:$0 sm:$0xff] }
 0x132   :  { %v2171_v58 = vsel %vm2142_vm5, %v2168_v6, %v12861_v41  ;;  %12862 = vst [vmem:[#allocation101_spill] sm:$0xff] %v7668_v61  ;;  %v2072_v6 = vadd.f32 %v1965_v3, %v7565_v29  ;;  %v2279_v35 = vadd.f32 %v2169_v50, %v2071_v63  ;;  %v12864_v43 = vrot.slane %v7346_v15, 2  ;;  %v12903_v61 = vld [vmem:[#allocation14_spill] sm:$0xff] }
 0x133   :  { %12863 = vst [vmem:[#allocation102_spill] sm:$0xff] %v7672_v40  ;;  %v7684_v52 = vmul.f32 %v7117_v59, %v7658_v62  ;;  %v7691_v27 = vadd.f32 %v1766_v49, %v1254_v25  ;;  %v1967_v38 = vsel %vm1936_vm6, %v1964_v22, %v1966_v53  ;;  %v12867_v29 = vrot.slane %v7397_v44, 2  ;;  %v7701_v21 = vpop.f32.mrf.mxu0 }
 0x134   :  { %v1550_v8 = vsel %vm1527_vm4, %v12864_v43, %v1549_v11  ;;  %v7699_v16 = vmul.f32 %v7128_v1, %v7621_v46  ;;  %12869 = vst [vmem:[#allocation106_spill] sm:$0xff] %v7701_v21  ;;  %v2073_v50 = vadd.f32 %v1967_v38, %v7525_v47  ;;  %v2280_v3 = vadd.f32 %v2171_v58, %v2072_v6 }
 0x135   :  { %12865 = vst [vmem:[#allocation103_spill] sm:$0xff] %v7684_v52  ;;  %12866 = vst [vmem:[#allocation104_spill] sm:$0xff] %v7691_v27  ;;  %v1552_v63 = vsel %vm1527_vm4, %v1549_v11, %v12867_v29  ;;  %v2327_v41 = vadd.f32 %v7689_v24, %v2279_v35  ;;  %v7708_v22 = vmul.f32 %v7072_v30, %v7658_v62  ;;  %v12426_v11 = vrot.slane %v7691_v27, 3  ;;  %v6457_v20 = vpop.f32.mrf.mxu0 }
 0x136   :  { %12868 = vst [vmem:[#allocation105_spill] sm:$0xff] %v7699_v16  ;;  %v7712_v44 = vmul.f32 %v7128_v1, %v7658_v62  ;;  %v2281_v49 = vadd.f32 %v7576_v32, %v2073_v50  ;;  %v2328_v47 = vadd.f32 %v7689_v24, %v2280_v3  ;;  %v7718_v6 = vadd.f32 %v1552_v63, %v7374_v57  ;;  %v12897_v16 = vld [vmem:[#allocation10_spill] sm:$0xff] }
 0x137   :  { %12870 = vst [vmem:[#allocation107_spill] sm:$0xff] %v7708_v22  ;;  %v2368_v58 = vmax.f32 %v2327_v41, 0.0  ;;  %v7723_v43 = vmul.f32 %v7117_v59, %v7701_v21  ;;  %v1969_v38 = vsel %vm1936_vm6, %v1966_v53, %v12426_v11  ;;  %v1753_v29 = vrot.slane %v1456_v0, 1  ;;  %v7728_v20 = vpop.f32.mrf.mxu0 }
 0x138   :  { %12871 = vst [vmem:[#allocation108_spill] sm:$0xff] %v7712_v44  ;;  %12872 = vst [vmem:[#allocation109_spill] sm:$0xff] %v7718_v6  ;;  %v2074_v32 = vadd.f32 %v1969_v38, %v7571_v9  ;;  %v2329_v50 = vadd.f32 %v7689_v24, %v2281_v49  ;;  %v2369_v3 = vmax.f32 %v2328_v47, 0.0  ;;  %v7733_v57 = vadd.f32 %v1550_v8, %v7351_v5 }
 0x139   :  { %12873 = vst [vmem:[#allocation110_spill] sm:$0xff] %v7723_v43  ;;  %12874 = vst [vmem:[#allocation111_spill] sm:$0xff] %v7728_v20  ;;  %v7737_v63 = vmul.f32 %v7072_v30, %v7701_v21  ;;  %v7741_v41 = vmul.f32 %v7128_v1, %v7701_v21  ;;  %v7745_v53 = vmul.f32 %v7117_v59, %v7728_v20  ;;  %v12429_v9 = vrot.slane %v7656_v13, 1  ;;  %v6460_v0 = vpop.f32.mrf.mxu0 }
 0x13a   :  { %12875 = vst [vmem:[#allocation112_spill] sm:$0xff] %v7733_v57  ;;  %v2282_v49 = vadd.f32 %v7618_v39, %v2074_v32  ;;  %v2370_v47 = vmax.f32 %v2329_v50, 0.0  ;;  %v7749_v5 = vmin.f32 %v2368_v58, 6.0  ;;  %v7751_v8 = vmin.f32 %v2369_v3, 6.0 }
 0x13b   :  { %12876 = vst [vmem:[#allocation113_spill] sm:$0xff] %v7737_v63  ;;  %12877 = vst [vmem:[#allocation114_spill] sm:$0xff] %v7741_v41  ;;  %v7756_v11 = vmul.f32 %v7072_v30, %v7728_v20  ;;  %v7760_v7 = vmul.f32 %v7042_v12, %v7728_v20  ;;  %v1754_v0 = vsel %vm870_vm3, %v12429_v9, %v1753_v29  ;;  %v7769_v58 = vpop.f32.mrf.mxu0  ;;  %v12885_v3 = vrot.slane %v7534_v60, 1 }
 0x13c   :  { %12878 = vst [vmem:[#allocation115_spill] sm:$0xff] %v7745_v53  ;;  %12879 = vst [vmem:[#allocation116_spill] sm:$0xff] %v7749_v5  ;;  %v7767_v39 = vmul.f32 %v7128_v1, %v7728_v20  ;;  %v2330_v32 = vadd.f32 %v7689_v24, %v2282_v49  ;;  %v7780_v35 = vmul.f32 %v7117_v59, %v7769_v58  ;;  %v7786_v27 = vmin.f32 %v2370_v47, 6.0 }
 0x13d   :  { %12880 = vst [vmem:[#allocation117_spill] sm:$0xff] %v7751_v8  ;;  %12881 = vst [vmem:[#allocation118_spill] sm:$0xff] %v7756_v11  ;;  %v1756_v26 = vsel %vm870_vm3, %v1753_v29, %v12885_v3  ;;  %v452_v38 = vmul.f32 %v7055_v19, %v7728_v20  ;;  %v542_v9 = vmul.f32 %v7064_v23, %v7728_v20  ;;  %v6461_v49 = vpop.f32.mrf.mxu0 }
 0x13e   :  { %12882 = vst [vmem:[#allocation119_spill] sm:$0xff] %v7760_v7  ;;  %12883 = vst [vmem:[#allocation120_spill] sm:$0xff] %v7767_v39  ;;  %v2371_v45 = vmax.f32 %v2330_v32, 0.0  ;;  %v498_v60 = vmul.f32 %v7042_v12, %v7769_v58  ;;  %v7791_v29 = vadd.f32 %v1754_v0, %v7595_v28  ;;  %v7795_v3 = vmul.f32 %v7072_v30, %v7769_v58 }
 0x13f   :  { %12884 = vst [vmem:[#allocation121_spill] sm:$0xff] %v7769_v58  ;;  %12886 = vst [vmem:[#allocation122_spill] sm:$0xff] %v7780_v35  ;;  %v7799_v25 = vmul.f32 %v7128_v1, %v7769_v58  ;;  %v7803_v32 = vadd.f32 %v1756_v26, %v7598_v48  ;;  %v7805_v47 = vpop.f32.mrf.mxu0  ;;  %v453_v28 = vmul.f32 %v7055_v19, %v7769_v58  ;;  %v12899_v48 = vrot.slane %v7760_v7, 1 }
 0x140   :  { %12887 = vst [vmem:[#allocation123_spill] sm:$0xff] %v7786_v27  ;;  %12888 = vst [vmem:[#allocation124_spill] sm:$0xff] %v7791_v29  ;;  %v7807_v49 = vmin.f32 %v2371_v45, 6.0  ;;  %v543_v0 = vmul.f32 %v7064_v23, %v7769_v58  ;;  %v924_v55 = vrot.slane %v498_v60, 1  ;;  %v7816_v2 = vmul.f32 %v7117_v59, %v7805_v47 }
 0x141   :  { %12889 = vst [vmem:[#allocation125_spill] sm:$0xff] %v7795_v3  ;;  %12890 = vst [vmem:[#allocation126_spill] sm:$0xff] %v7799_v25  ;;  %v7822_v45 = vmul.f32 %v7072_v30, %v7805_v47  ;;  %v6464_v54 = vpop.f32.mrf.mxu0  ;;  %v499_v60 = vmul.f32 %v7042_v12, %v7805_v47  ;;  %v587_v17 = vmul.f32 %v12897_v16, %v7805_v47  ;;  %v12907_v43 = vrot.slane %v7791_v29, 3 }
 0x142   :  { %12891 = vst [vmem:[#allocation127_spill] sm:$0xff] %v7803_v32  ;;  %12892 = vst [vmem:[#allocation128_spill] sm:$0xff] %v7805_v47  ;;  %v7832_v33 = vmul.f32 %v7128_v1, %v7805_v47  ;;  %v925_v50 = vsel %vm870_vm3, %v12899_v48, %v924_v55  ;;  %v7840_v54 = vmul.f32 %v7055_v19, %v7658_v62 }
 0x143   :  { %12893 = vst [vmem:[#allocation129_spill] sm:$0xff] %v7807_v49  ;;  %12894 = vst [vmem:[#allocation130_spill] sm:$0xff] %v7816_v2  ;;  %v7842_v40 = vpop.f32.mrf.mxu0  ;;  %v454_v10 = vmul.f32 %v7055_v19, %v7805_v47  ;;  %v544_v41 = vmul.f32 %v7064_v23, %v7805_v47  ;;  %v926_v44 = vrot.slane %v499_v60, 1  ;;  %v7860_v42 = vmul.f32 %v12903_v61, %v7805_v47 }
 0x144   :  { %12896 = vst [vmem:[#allocation131_spill] sm:$0xff] %v7822_v45  ;;  %12898 = vst [vmem:[#allocation10_spill] sm:$0xff] %v7832_v33  ;;  %v7852_v48 = vmul.f32 %v7072_v30, %v7842_v40  ;;  %v7856_v36 = vmul.f32 %v7117_v59, %v7842_v40  ;;  %v500_v60 = vmul.f32 %v7042_v12, %v7842_v40 }
 0x145   :  { %12900 = vst [vmem:[#allocation132_spill] sm:$0xff] %v7840_v54  ;;  %12901 = vst [vmem:[#allocation133_spill] sm:$0xff] %v7842_v40  ;;  %v6465_v37 = vpop.f32.mrf.mxu0  ;;  %v7864_v51 = vadd.f32 %v925_v50, %v452_v38  ;;  %v7866_v52 = vadd.f32 %v587_v17, %v542_v9  ;;  %v7871_v25 = vmul.f32 %v7128_v1, %v7842_v40  ;;  %v12906_v50 = vrot.slane %v7803_v32, 3 }
 0x146   :  { %12902 = vst [vmem:[#allocation134_spill] sm:$0xff] %v7856_v36  ;;  %v455_v39 = vmul.f32 %v7055_v19, %v7842_v40  ;;  %v588_v53 = vmul.f32 %v12897_v16, %v7842_v40  ;;  %v927_v37 = vsel %vm870_vm3, %v924_v55, %v926_v44  ;;  %v545_v38 = vmul.f32 %v7064_v23, %v7842_v40 }
 0x147   :  { %12904 = vst [vmem:[#allocation14_spill] sm:$0xff] %v7864_v51  ;;  %12905 = vst [vmem:[#allocation135_spill] sm:$0xff] %v7871_v25  ;;  %v357_v35 = vpop.f32.mrf.mxu0  ;;  %v928_v17 = vrot.slane %v500_v60, 1  ;;  %v7882_v9 = vmul.f32 %v12903_v61, %v7842_v40  ;;  %v7889_v63 = vsel %vm1936_vm6, %v12907_v43, %v12906_v50  ;;  %v7901_v31 = vadd.f32 %v927_v37, %v453_v28 }
 0x148   :  { %12908 = vst [vmem:[#allocation136_spill] sm:$0xff] %v7889_v63  ;;  %v7893_v55 = vmul.f32 %v7072_v30, %v357_v35  ;;  %v7896_v13 = vmul.f32 %v7117_v59, %v357_v35  ;;  %v501_v56 = vmul.f32 %v7042_v12, %v357_v35  ;;  %v589_v15 = vmul.f32 %v12897_v16, %v357_v35 }
 0x149   :  { %v6468_v46 = vpop.f32.mrf.mxu0  ;;  %12909 = vst [vmem:[#allocation137_spill] sm:$0xff] %v7901_v31  ;;  %v7905_v50 = vmul.f32 %v7128_v1, %v357_v35  ;;  %v456_v22 = vmul.f32 %v7055_v19, %v357_v35  ;;  %v929_v29 = vsel %vm870_vm3, %v926_v44, %v928_v17  ;;  %v7909_v25 = vadd.f32 %v588_v53, %v543_v0 }
 0x14a   :  { %v546_v33 = vmul.f32 %v7064_v23, %v357_v35  ;;  %v930_v54 = vrot.slane %v501_v56, 1  ;;  %v7914_v28 = vmul.f32 %v12903_v61, %v357_v35  ;;  %v7920_v2 = vadd.f32 %v589_v15, %v544_v41 }
 0x14b   :  { %v360_v46 = vpop.f32.mrf.mxu0  ;;  %v7925_v36 = vadd.f32 %v929_v29, %v454_v10  ;;  %v7928_v56 = vmul.f32 %v7344_v14, %v357_v35  ;;  %v12912_v41 = vrot.slane %v7852_v48, 1  ;;  %v12918_v18 = vrot.slane %v7893_v55, 1 }
 0x14c   :  { %v680_v37 = vmul.f32 %v7072_v30, %v360_v46  ;;  %v7918_v43 = vmul.f32 %v7117_v59, %v360_v46  ;;  %12910 = vst [vmem:[#allocation138_spill] sm:$0xff] %v7920_v2  ;;  %v502_v0 = vmul.f32 %v7042_v12, %v360_v46  ;;  %v590_v60 = vmul.f32 %v12897_v16, %v360_v46 }
 0x14d   :  { %v6469_v53 = vpop.f32.mrf.mxu0  ;;  %12911 = vst [vmem:[#allocation139_spill] sm:$0xff] %v7928_v56  ;;  %v7931_v3 = vmul.f32 %v7128_v1, %v360_v46  ;;  %v457_v7 = vmul.f32 %v7055_v19, %v360_v46  ;;  %v547_v15 = vmul.f32 %v7064_v23, %v360_v46  ;;  %v635_v11 = vmul.f32 %v12903_v61, %v360_v46 }
 0x14e   :  { %v12913_v53 = vrot.slane %v7822_v45, 1  ;;  %v932_v35 = vrot.slane %v502_v0, 1  ;;  %v931_v40 = vsel %vm870_vm3, %v928_v17, %v930_v54  ;;  %v1173_v45 = vrot.slane %v680_v37, 1 }
 0x14f   :  { %v7943_v29 = vpop.f32.mrf.mxu0  ;;  %v7961_v20 = vadd.f32 %v590_v60, %v545_v38  ;;  %v7966_v5 = vadd.f32 %v931_v40, %v455_v39  ;;  %v7969_v37 = vmul.f32 %v7344_v14, %v360_v46 }
 0x150   :  { %v7940_v44 = vsel %vm870_vm3, %v12913_v53, %v12912_v41  ;;  %12914 = vst [vmem:[#allocation140_spill] sm:$0xff] %v7943_v29  ;;  %v7949_v47 = vmul.f32 %v7117_v59, %v7943_v29  ;;  %v7953_v58 = vmul.f32 %v7042_v12, %v7943_v29  ;;  %v591_v10 = vmul.f32 %v12897_v16, %v7943_v29 }
 0x151   :  { %v6472_v53 = vpop.f32.mrf.mxu0  ;;  %v681_v0 = vmul.f32 %v7072_v30, %v7943_v29  ;;  %v933_v17 = vsel %vm870_vm3, %v930_v54, %v932_v35  ;;  %v724_v62 = vmul.f32 %v7128_v1, %v7943_v29  ;;  %12916 = vst [vmem:[#allocation142_spill] sm:$0xff] %v7969_v37  ;;  %v548_v8 = vmul.f32 %v7064_v23, %v7943_v29 }
 0x152   :  { %12915 = vst [vmem:[#allocation141_spill] sm:$0xff] %v7953_v58  ;;  %v636_v54 = vmul.f32 %v12903_v61, %v7943_v29  ;;  %v1064_v38 = vadd.f32 %v591_v10, %v546_v33  ;;  %v1023_v39 = vadd.f32 %v933_v17, %v456_v22  ;;  %v7986_v4 = vmul.f32 %v7344_v14, %v7943_v29 }
 0x153   :  { %v7972_v41 = vpop.f32.mrf.mxu0  ;;  %v1175_v46 = vrot.slane %v681_v0, 1  ;;  %v1174_v33 = vsel %vm870_vm3, %v12918_v18, %v1173_v45  ;;  %v1585_v10 = vrot.slane %v7961_v20, 2 }
 0x154   :  { %12917 = vst [vmem:[#allocation143_spill] sm:$0xff] %v7972_v41  ;;  %v770_v60 = vmul.f32 %v7117_v59, %v7972_v41  ;;  %v592_v40 = vmul.f32 %v12897_v16, %v7972_v41  ;;  %v682_v53 = vmul.f32 %v7072_v30, %v7972_v41  ;;  %v725_v26 = vmul.f32 %v7128_v1, %v7972_v41 }
 0x155   :  { %v6473_v21 = vpop.f32.mrf.mxu0  ;;  %v637_v22 = vmul.f32 %v12903_v61, %v7972_v41  ;;  %v1587_v57 = vrot.slane %v1064_v38, 2  ;;  %v8003_v18 = vmul.f32 %v7344_v14, %v7972_v41 }
 0x156   :  { %v12919_v21 = vrot.slane %v7953_v58, 1  ;;  %v1065_v17 = vadd.f32 %v592_v40, %v547_v15  ;;  %v1378_v6 = vrot.slane %v770_v60, 1  ;;  %v1177_v63 = vrot.slane %v682_v53, 1 }
 0x157   :  { %v7999_v29 = vpop.f32.mrf.mxu0  ;;  %v1176_v15 = vsel %vm870_vm3, %v1173_v45, %v1175_v46  ;;  %v8017_v40 = vadd.f32 %v1174_v33, %v7914_v28 }
 0x158   :  { %v935_v0 = vsel %vm870_vm3, %v932_v35, %v12919_v21  ;;  %12920 = vst [vmem:[#allocation144_spill] sm:$0xff] %v7999_v29  ;;  %v771_v20 = vmul.f32 %v7117_v59, %v7999_v29  ;;  %v593_v31 = vmul.f32 %v12897_v16, %v7999_v29  ;;  %v683_v58 = vmul.f32 %v7072_v30, %v7999_v29 }
 0x159   :  { %v6476_v35 = vpop.f32.mrf.mxu0  ;;  %v8014_v53 = vmul.f32 %v7344_v14, %v7999_v29  ;;  %v1024_v38 = vadd.f32 %v935_v0, %v457_v7  ;;  %v1589_v60 = vrot.slane %v1065_v17, 2  ;;  %v1178_v41 = vsel %vm870_vm3, %v1175_v46, %v1177_v63 }
 0x15a   :  { %v8019_v21 = vadd.f32 %v593_v31, %v548_v8  ;;  %v1179_v27 = vrot.slane %v683_v58, 1  ;;  %v1380_v49 = vrot.slane %v771_v20, 1  ;;  %v638_v45 = vmul.f32 %v12903_v61, %v7999_v29 }
 0x15b   :  { %v8022_v32 = vpop.f32.mrf.mxu0  ;;  %v726_v35 = vmul.f32 %v7128_v1, %v7999_v29  ;;  %v8028_v34 = vadd.f32 %v1176_v15, %v635_v11  ;;  %v12923_v7 = vrot.slane %v7920_v2, 2  ;;  %v12925_v46 = vrot.slane %v7949_v47, 1 }
 0x15c   :  { %12921 = vst [vmem:[#allocation145_spill] sm:$0xff] %v8019_v21  ;;  %12922 = vst [vmem:[#allocation146_spill] sm:$0xff] %v8022_v32  ;;  %v772_v31 = vmul.f32 %v7117_v59, %v8022_v32  ;;  %v8037_v8 = vmul.f32 %v7072_v30, %v8022_v32  ;;  %v818_v58 = vmul.f32 %v7344_v14, %v8022_v32  ;;  %v12497_v20 = vrot.slane %v8019_v21, 2 }
 0x15d   :  { %v1586_v28 = vsel %vm1527_vm4, %v12923_v7, %v1585_v10  ;;  %v1379_v33 = vsel %vm870_vm3, %v12925_v46, %v1378_v6  ;;  %v6477_v11 = vpop.f32.mrf.mxu0  ;;  %v1268_v0 = vadd.f32 %v1178_v41, %v636_v54  ;;  %v1590_v17 = vsel %vm1527_vm4, %v1587_v57, %v1589_v60 }
 0x15e   :  { %12924 = vst [vmem:[#allocation147_spill] sm:$0xff] %v8037_v8  ;;  %v1381_v15 = vsel %vm870_vm3, %v1378_v6, %v1380_v49  ;;  %v1180_v7 = vsel %vm870_vm3, %v1177_v63, %v1179_v27  ;;  %v1382_v51 = vrot.slane %v772_v31, 1  ;;  %v727_v46 = vmul.f32 %v7128_v1, %v8022_v32 }
 0x15f   :  { %v8050_v56 = vpop.f32.mrf.mxu0  ;;  %v8054_v11 = vadd.f32 %v1379_v33, %v724_v62  ;;  %v1474_v41 = vadd.f32 %v1381_v15, %v725_v26  ;;  %v1588_v54 = vsel %vm1527_vm4, %v1585_v10, %v1587_v57  ;;  %v1592_v63 = vsel %vm1527_vm4, %v1589_v60, %v12497_v20 }
 0x160   :  { %12926 = vst [vmem:[#allocation148_spill] sm:$0xff] %v8050_v56  ;;  %v773_v6 = vmul.f32 %v7117_v59, %v8050_v56  ;;  %v8062_v31 = vadd.f32 %v1590_v17, %v1023_v39  ;;  %v2204_v37 = vrot.slane %v818_v58, 6  ;;  %v8066_v2 = vmul.f32 %v7344_v14, %v8050_v56 }
 0x161   :  { %v6480_v29 = vpop.f32.mrf.mxu0  ;;  %v12928_v62 = vrot.slane %v8037_v8, 1  ;;  %v8071_v57 = vadd.f32 %v1180_v7, %v637_v22  ;;  %v1383_v10 = vsel %vm870_vm3, %v1380_v49, %v1382_v51  ;;  %v8076_v33 = vmul.f32 %v7072_v30, %v8050_v56  ;;  %v8241_v8 = vld [vmem:[%s12747_s26 + $0x8] ss:$0 sm:$0xff] }
 0x162   :  { %12927 = vst [vmem:[#allocation149_spill] sm:$0xff] %v8066_v2  ;;  %v1384_v39 = vrot.slane %v773_v6, 1  ;;  %v1475_v60 = vadd.f32 %v1383_v10, %v726_v35  ;;  %v8079_v29 = vadd.f32 %v1586_v28, %v7925_v36  ;;  %v728_v14 = vmul.f32 %v7128_v1, %v8050_v56 }
 0x163   :  { %v1182_v26 = vsel %vm870_vm3, %v1179_v27, %v12928_v62  ;;  %12929 = vst [vmem:[#allocation150_spill] sm:$0xff] %v8076_v33  ;;  %v8081_v58 = vpop.f32.mrf.mxu0  ;;  %v8085_v17 = vadd.f32 %v1592_v63, %v1024_v38  ;;  %v12498_v27 = vrot.slane %v8054_v11, 1  ;;  %v1789_v22 = vrot.slane %v1474_v41, 1 }
 0x164   :  { %12930 = vst [vmem:[#allocation151_spill] sm:$0xff] %v8081_v58  ;;  %v774_v49 = vmul.f32 %v7117_v59, %v8081_v58  ;;  %v8090_v15 = vadd.f32 %v1182_v26, %v638_v45  ;;  %v1385_v35 = vsel %vm870_vm3, %v1382_v51, %v1384_v39  ;;  %v12931_v36 = vrot.slane %v8014_v53, 6 }
 0x165   :  { %v6481_v7 = vpop.f32.mrf.mxu0  ;;  %v1476_v6 = vadd.f32 %v1385_v35, %v727_v46  ;;  %v1791_v62 = vrot.slane %v1475_v60, 1  ;;  %v12499_v38 = vrot.slane %v8066_v2, 6  ;;  %v1790_v41 = vsel %vm870_vm3, %v12498_v27, %v1789_v22 }
 0x166   :  { %v8096_v28 = vsel %vm2142_vm5, %v12931_v36, %v2204_v37  ;;  %v8104_v45 = vmul.f32 %v7072_v30, %v8081_v58  ;;  %v1386_v63 = vrot.slane %v774_v49, 1  ;;  %v1679_v51 = vadd.f32 %v1588_v54, %v7966_v5 }
 0x167   :  { %v8108_v10 = vpop.f32.mrf.mxu0  ;;  %v729_v46 = vmul.f32 %v7128_v1, %v8081_v58  ;;  %v1793_v60 = vrot.slane %v1476_v6, 1  ;;  %v1792_v35 = vsel %vm870_vm3, %v1789_v22, %v1791_v62  ;;  %v12934_v36 = vrot.slane %v7893_v55, 1 }
 0x168   :  { %12932 = vst [vmem:[#allocation152_spill] sm:$0xff] %v8104_v45  ;;  %12933 = vst [vmem:[#allocation153_spill] sm:$0xff] %v8108_v10  ;;  %v12935_v7 = vrot.slane %v7852_v48, 1  ;;  %v8120_v49 = vmul.f32 %v7117_v59, %v8108_v10  ;;  %v1387_v5 = vsel %vm870_vm3, %v1384_v39, %v1386_v63  ;;  %v8124_v54 = vadd.f32 %v1790_v41, %v8017_v40 }
 0x169   :  { %v2200_v27 = vrot.slane %v8003_v18, 6  ;;  %v6484_v6 = vpop.f32.mrf.mxu0  ;;  %v1477_v26 = vadd.f32 %v1387_v5, %v728_v14  ;;  %v1794_v22 = vsel %vm870_vm3, %v1791_v62, %v1793_v60  ;;  %v8131_v48 = vsel %vm2142_vm5, %v2204_v37, %v12499_v38 }
 0x16a   :  { %v1172_v20 = vsel %vm870_vm3, %v12935_v7, %v12934_v36  ;;  %12936 = vst [vmem:[#allocation154_spill] sm:$0xff] %v8120_v49  ;;  %v1883_v55 = vadd.f32 %v1792_v35, %v8028_v34  ;;  %v12500_v36 = vrot.slane %v8120_v49, 1  ;;  %v8135_v7 = vadd.f32 %v1794_v22, %v1268_v0 }
 0x16b   :  { %v8139_v40 = vadd.f32 %v7940_v44, %v7860_v42  ;;  %v8142_v18 = vadd.f32 %v1172_v20, %v7882_v9  ;;  %v8146_v39 = vmul.f32 %v7072_v30, %v8108_v10  ;;  %v8150_v37 = vmul.f32 %v7128_v1, %v8108_v10  ;;  %v8152_v34 = vpop.f32.mrf.mxu0 }
 0x16c   :  { %12939 = vst [vmem:[#allocation157_spill] sm:$0xff] %v8152_v34  ;;  %v1795_v14 = vrot.slane %v1477_v26, 1  ;;  %v1994_v0 = vrot.slane %v1883_v55, 3  ;;  %v12501_v62 = vrot.slane %v8124_v54, 3  ;;  %v12940_v42 = vrot.slane %v7986_v4, 6 }
 0x16d   :  { %12937 = vst [vmem:[#allocation155_spill] sm:$0xff] %v8146_v39  ;;  %12938 = vst [vmem:[#allocation156_spill] sm:$0xff] %v8150_v37  ;;  %v12941_v9 = vrot.slane %v8014_v53, 6  ;;  %v12942_v41 = vrot.slane %v7918_v43, 1  ;;  %v12943_v35 = vrot.slane %v7896_v13, 1  ;;  %v6485_v6 = vpop.f32.mrf.mxu0  ;;  %v8170_v26 = vmul.f32 %v7072_v30, %v8152_v34 }
 0x16e   :  { %v2201_v44 = vsel %vm2142_vm5, %v12940_v42, %v2200_v27  ;;  %v1389_v22 = vsel %vm870_vm3, %v1386_v63, %v12500_v36  ;;  %v1796_v53 = vsel %vm870_vm3, %v1793_v60, %v1795_v14  ;;  %v8179_v55 = vmul.f32 %v7128_v1, %v8152_v34 }
 0x16f   :  { %v8161_v20 = vsel %vm2142_vm5, %v2200_v27, %v12941_v9  ;;  %v1375_v5 = vsel %vm870_vm3, %v12943_v35, %v12942_v41  ;;  %12944 = vst [vmem:[#allocation158_spill] sm:$0xff] %v8170_v26  ;;  %v1996_v27 = vrot.slane %v8135_v7, 3  ;;  %v8181_v42 = vadd.f32 %v1389_v22, %v729_v46  ;;  %v8195_v7 = vpop.f32.mrf.mxu0 }
 0x170   :  { %12945 = vst [vmem:[#allocation159_spill] sm:$0xff] %v8179_v55  ;;  %v1995_v9 = vsel %vm1936_vm6, %v12501_v62, %v1994_v0  ;;  %v12947_v41 = vrot.slane %v7949_v47, 1  ;;  %v12948_v35 = vrot.slane %v7918_v43, 1  ;;  %v8193_v60 = vmul.f32 %v7117_v59, %v8152_v34  ;;  %12950 = vst [vmem:[#allocation162_spill] sm:$0xff] %v8195_v7 }
 0x171   :  { %12946 = vst [vmem:[#allocation160_spill] sm:$0xff] %v8181_v42  ;;  %v555_v46 = vmul.f32 %v7064_v23, %v8152_v34  ;;  %v643_v6 = vmul.f32 %v12903_v61, %v8152_v34  ;;  %v8202_v22 = vadd.f32 %v1796_v53, %v8071_v57  ;;  %v689_v47 = vmul.f32 %v7072_v30, %v8195_v7  ;;  %v6488_v38 = vpop.f32.mrf.mxu0  ;;  %v13059_v34 = vld [vmem:[#allocation113_spill] sm:$0xff] }
 0x172   :  { %v1377_v63 = vsel %vm870_vm3, %v12948_v35, %v12947_v41  ;;  %12949 = vst [vmem:[#allocation161_spill] sm:$0xff] %v8193_v60  ;;  %v8208_v43 = vmul.f32 %v7117_v59, %v8195_v7  ;;  %v1997_v35 = vsel %vm1936_vm6, %v1994_v0, %v1996_v27  ;;  %v8214_v36 = vmul.f32 %v7042_v12, %v8195_v7 }
 0x173   :  { %v2087_v57 = vadd.f32 %v1995_v9, %v8079_v29  ;;  %v8219_v53 = vadd.f32 %v1375_v5, %v7905_v50  ;;  %v732_v2 = vmul.f32 %v7128_v1, %v8195_v7  ;;  %v1191_v21 = vrot.slane %v689_v47, 1  ;;  %v400_v0 = vpop.f32.mrf.mxu0 }
 0x174   :  { %12951 = vst [vmem:[#allocation163_spill] sm:$0xff] %v8208_v43  ;;  %12952 = vst [vmem:[#allocation164_spill] sm:$0xff] %v8214_v36  ;;  %v556_v41 = vmul.f32 %v7064_v23, %v8195_v7  ;;  %v644_v38 = vmul.f32 %v12903_v61, %v8195_v7  ;;  %v466_v62 = vmul.f32 %v7055_v19, %v8195_v7  ;;  %v1998_v29 = vrot.slane %v8202_v22, 3 }
 0x175   :  { %v2088_v50 = vadd.f32 %v1997_v35, %v1679_v51  ;;  %v600_v5 = vmul.f32 %v12897_v16, %v400_v0  ;;  %v690_v9 = vmul.f32 %v7072_v30, %v400_v0  ;;  %v12953_v55 = vrot.slane %v8181_v42, 1  ;;  %v6489_v51 = vpop.f32.mrf.mxu0 }
 0x176   :  { %v778_v49 = vmul.f32 %v7117_v59, %v400_v0  ;;  %v8244_v22 = vmul.f32 %v8241_v8, %v400_v0  ;;  %v12955_v35 = vrot.slane %v8170_v26, 1  ;;  %v2295_v47 = vadd.f32 %v2201_v44, %v2087_v57 }
 0x177   :  { %v1798_v37 = vsel %vm870_vm3, %v1795_v14, %v12953_v55  ;;  %v645_v42 = vmul.f32 %v12903_v61, %v400_v0  ;;  %v8250_v45 = vadd.f32 %v600_v5, %v555_v46  ;;  %v1193_v14 = vrot.slane %v690_v9, 1  ;;  %v405_v39 = vpop.f32.mrf.mxu0 }
 0x178   :  { %12954 = vst [vmem:[#allocation165_spill] sm:$0xff] %v8244_v22  ;;  %v1192_v33 = vsel %vm870_vm3, %v12955_v35, %v1191_v21  ;;  %v8253_v55 = vadd.f32 %v1377_v63, %v7931_v3  ;;  %v733_v32 = vmul.f32 %v7128_v1, %v400_v0  ;;  %v1394_v60 = vrot.slane %v778_v49, 1 }
 0x179   :  { %12956 = vst [vmem:[#allocation166_spill] sm:$0xff] %v8250_v45  ;;  %v12957_v56 = vrot.slane %v8214_v36, 1  ;;  %v8261_v26 = vadd.f32 %v1798_v37, %v8090_v15  ;;  %v601_v46 = vmul.f32 %v12897_v16, %v405_v39  ;;  %v8265_v57 = vadd.f32 %v1192_v33, %v643_v6  ;;  %v6492_v15 = vpop.f32.mrf.mxu0  ;;  %v13058_v45 = vld [vmem:[#allocation107_spill] sm:$0xff] }
 0x17a   :  { %v1999_v3 = vsel %vm1936_vm6, %v1996_v27, %v1998_v29  ;;  %v12959_v63 = vrot.slane %v8208_v43, 1  ;;  %v691_v0 = vmul.f32 %v7072_v30, %v405_v39  ;;  %v1194_v37 = vsel %vm870_vm3, %v1191_v21, %v1193_v14 }
 0x17b   :  { %v8258_v51 = vadd.f32 %v12957_v56, %v466_v62  ;;  %12958 = vst [vmem:[#allocation167_spill] sm:$0xff] %v8261_v26  ;;  %v779_v56 = vmul.f32 %v7117_v59, %v405_v39  ;;  %v8274_v62 = vmul.f32 %v8241_v8, %v405_v39  ;;  %v646_v33 = vmul.f32 %v12903_v61, %v405_v39 }
 0x17c   :  { %v1395_v49 = vsel %vm870_vm3, %v12959_v63, %v1394_v60  ;;  %v2296_v27 = vadd.f32 %v8161_v20, %v2088_v50  ;;  %v1195_v9 = vrot.slane %v691_v0, 1  ;;  %v408_v63 = vpop.f32.mrf.mxu0  ;;  %v12518_v30 = vrot.slane %v8261_v26, 3 }
 0x17d   :  { %12960 = vst [vmem:[#allocation168_spill] sm:$0xff] %v8274_v62  ;;  %v8280_v6 = vadd.f32 %v1395_v49, %v732_v2  ;;  %v1396_v35 = vrot.slane %v779_v56, 1  ;;  %v8283_v44 = vadd.f32 %v601_v46, %v556_v41  ;;  %v734_v43 = vmul.f32 %v7128_v1, %v405_v39 }
 0x17e   :  { %v780_v15 = vmul.f32 %v7117_v59, %v408_v63  ;;  %v826_v21 = vmul.f32 %v8241_v8, %v408_v63  ;;  %v12519_v22 = vrot.slane %v8274_v62, 6  ;;  %v6493_v20 = vpop.f32.mrf.mxu0  ;;  %v1276_v2 = vadd.f32 %v1194_v37, %v644_v38 }
 0x17f   :  { %12961 = vst [vmem:[#allocation169_spill] sm:$0xff] %v8280_v6  ;;  %12962 = vst [vmem:[#allocation170_spill] sm:$0xff] %v8283_v44  ;;  %v1397_v5 = vsel %vm870_vm3, %v1394_v60, %v1396_v35  ;;  %v1196_v50 = vsel %vm870_vm3, %v1193_v14, %v1195_v9  ;;  %v735_v39 = vmul.f32 %v7128_v1, %v408_v63 }
 0x180   :  { %v8291_v49 = vadd.f32 %v1397_v5, %v733_v32  ;;  %v1398_v0 = vrot.slane %v780_v15, 1  ;;  %v2220_v56 = vrot.slane %v826_v21, 6  ;;  %v8293_v41 = vadd.f32 %v1196_v50, %v645_v42  ;;  %v413_v46 = vpop.f32.mrf.mxu0 }
 0x181   :  { %v2001_v58 = vsel %vm1936_vm6, %v1998_v29, %v12518_v30  ;;  %v2089_v60 = vadd.f32 %v1999_v3, %v8062_v31  ;;  %v2343_v20 = vadd.f32 %v7689_v24, %v2295_v47  ;;  %v1278_v14 = vadd.f32 %v1195_v9, %v646_v33 }
 0x182   :  { %12963 = vst [vmem:[#allocation171_spill] sm:$0xff] %v8291_v49  ;;  %v12520_v38 = vrot.slane %v8291_v49, 1  ;;  %v1399_v32 = vsel %vm870_vm3, %v1396_v35, %v1398_v0  ;;  %v8306_v42 = vsel %vm2142_vm5, %v12519_v22, %v2220_v56  ;;  %v781_v5 = vmul.f32 %v7117_v59, %v413_v46  ;;  %v6496_v29 = vpop.f32.mrf.mxu0  ;;  %v13052_v49 = vld [vmem:[#allocation95_spill] sm:$0xff] }
 0x183   :  { %12964 = vst [vmem:[#allocation172_spill] sm:$0xff] %v8306_v42  ;;  %v1483_v37 = vadd.f32 %v1399_v32, %v734_v43  ;;  %v827_v63 = vmul.f32 %v8241_v8, %v413_v46  ;;  %v2090_v31 = vadd.f32 %v2001_v58, %v8085_v17  ;;  %v736_v47 = vmul.f32 %v7128_v1, %v413_v46 }
 0x184   :  { %v2297_v3 = vadd.f32 %v8096_v28, %v2089_v60  ;;  %v2344_v35 = vadd.f32 %v7689_v24, %v2296_v27  ;;  %v2384_v15 = vmax.f32 %v2343_v20, 0.0  ;;  %v1400_v50 = vrot.slane %v781_v5, 1  ;;  %v416_v22 = vpop.f32.mrf.mxu0 }
 0x185   :  { %v1807_v21 = vrot.slane %v1483_v37, 1  ;;  %v2222_v30 = vrot.slane %v827_v63, 6  ;;  %v2298_v43 = vadd.f32 %v8131_v48, %v2090_v31  ;;  %v782_v33 = vmul.f32 %v7117_v59, %v416_v22 }
 0x186   :  { %v828_v9 = vmul.f32 %v8241_v8, %v416_v22  ;;  %v2345_v32 = vadd.f32 %v7689_v24, %v2297_v3  ;;  %v2385_v58 = vmax.f32 %v2344_v35, 0.0  ;;  %v1401_v17 = vsel %vm870_vm3, %v1398_v0, %v1400_v50  ;;  %v6497_v46 = vpop.f32.mrf.mxu0 }
 0x187   :  { %v1808_v1 = vsel %vm870_vm3, %v12520_v38, %v1807_v21  ;;  %v8323_v28 = vsel %vm2142_vm5, %v2220_v56, %v2222_v30  ;;  %v2346_v27 = vadd.f32 %v7689_v24, %v2298_v43  ;;  %v1484_v48 = vadd.f32 %v1401_v17, %v735_v39 }
 0x188   :  { %12965 = vst [vmem:[#allocation173_spill] sm:$0xff] %v8323_v28  ;;  %v1402_v60 = vrot.slane %v782_v33, 1  ;;  %v2224_v59 = vrot.slane %v828_v9, 6  ;;  %v1581_v22 = vrot.slane %v7909_v25, 2  ;;  %v12522_v20 = vrot.slane %v8283_v44, 2 }
 0x189   :  { %v2386_v37 = vmax.f32 %v2345_v32, 0.0  ;;  %v2387_v5 = vmax.f32 %v2346_v27, 0.0  ;;  %v2426_v63 = vmin.f32 %v2385_v58, 6.0  ;;  %v1809_v29 = vrot.slane %v1484_v48, 1 }
 0x18a   :  { %v1403_v31 = vsel %vm870_vm3, %v1400_v50, %v1402_v60  ;;  %v2225_v0 = vsel %vm2142_vm5, %v2222_v30, %v2224_v59  ;;  %v2425_v56 = vmin.f32 %v2384_v15, 6.0  ;;  %v1690_v39 = vadd.f32 %v12522_v20, %v8258_v51  ;;  %v12969_v15 = vld [vmem:[#allocation138_spill] sm:$0xff] }
 0x18b   :  { %v1485_v3 = vadd.f32 %v1403_v31, %v736_v47  ;;  %v2427_v35 = vmin.f32 %v2386_v37, 6.0  ;;  %v2428_v43 = vmin.f32 %v2387_v5, 6.0  ;;  %v8334_v25 = vadd.f32 %v1808_v1, %v8265_v57  ;;  %v12971_v1 = vld [vmem:[#allocation139_spill] sm:$0xff] }
 0x18c   :  { %v1810_v33 = vsel %vm870_vm3, %v1807_v21, %v1809_v29  ;;  %v2484_v9 = vpack.c.bf16 %v2426_v63, %v2425_v56  ;;  %v12967_v32 = vrot.slane %v7866_v52, 2  ;;  %v12970_v17 = vrot.slane %v12969_v15, 2  ;;  %v12972_v21 = vld [vmem:[#allocation142_spill] sm:$0xff]  ;;  %v12975_v5 = vld [vmem:[#allocation91_spill] sm:$0xff] }
 0x18d   :  { %12966 = vst [vmem:[#allocation174_spill] sm:$0xff] %v8334_v25  ;;  %v8340_v58 = vadd.f32 %v1810_v33, %v1276_v2  ;;  %v1811_v30 = vrot.slane %v1485_v3, 1  ;;  %v2485_v47 = vpack.c.bf16 %v2428_v43, %v2427_v35  ;;  %v12525_v27 = vrot.slane %v8219_v53, 1  ;;  %v12974_v2 = vld [vmem:[#allocation14_spill] sm:$0xff]  ;;  %v12977_v31 = vld [vmem:[#allocation127_spill] sm:$0xff] }
 0x18e   :  { %v1582_v50 = vsel %vm1527_vm4, %v12967_v32, %v1581_v22  ;;  %v1584_v51 = vsel %vm1527_vm4, %v1581_v22, %v12970_v17  ;;  %v1785_v57 = vrot.slane %v8253_v55, 1  ;;  %v12524_v46 = vrot.slane %v12971_v1, 6  ;;  %v12980_v55 = vld [vmem:[#allocation129_spill] sm:$0xff]  ;;  %v12981_v35 = vld [vmem:[#allocation123_spill] sm:$0xff] }
 0x18f   :  { %12968 = vst [vmem:[#allocation175_spill] sm:$0xff] %v8340_v58  ;;  %v2196_v48 = vrot.slane %v12972_v21, 6  ;;  %v1812_v60 = vsel %vm870_vm3, %v1809_v29, %v1811_v30  ;;  %v8350_v59 = vadd.f32 %v1811_v30, %v1278_v14  ;;  %6327 = vmatprep.subr.bf16.mxu1 %v2485_v47  ;;  %v1676_v37 = vadd.f32 %v1582_v50, %v12974_v2  ;;  %v12986_v21 = vld [vmem:[#allocation112_spill] sm:$0xff]  ;;  %v12988_v2 = vld [vmem:[#allocation109_spill] sm:$0xff]  ;;  %v13122_v58 = vld [vmem:[#allocation42_spill] sm:$0xff] }
 0x190   :  { %v12976_v63 = vrot.slane %v12975_v5, 3  ;;  %v12978_v56 = vrot.slane %v12977_v31, 3  ;;  %v8359_v3 = vadd.f32 %v1812_v60, %v8293_v41  ;;  %v12982_v43 = vpack.c.bf16 %v12980_v55, %v12981_v35  ;;  %v12984_v41 = vld [vmem:[#allocation137_spill] sm:$0xff] }
 0x191   :  { %12973 = vst [vmem:[#allocation138_spill] sm:$0xff] %v8350_v59  ;;  %v1786_v14 = vsel %vm870_vm3, %v12525_v27, %v1785_v57  ;;  %v12983_v29 = vrot.slane %v8054_v11, 1  ;;  %v2197_v32 = vsel %vm2142_vm5, %v12524_v46, %v2196_v48  ;;  %v12521_v50 = vrot.slane %v8350_v59, 3 }
 0x192   :  { %v1961_v22 = vsel %vm1936_vm6, %v12978_v56, %v12976_v63  ;;  %12979 = vst [vmem:[#allocation139_spill] sm:$0xff] %v8359_v3  ;;  %6328 = vmatpush3.bf16.msra.mxu1 %v12982_v43  ;;  %v1677_v30 = vadd.f32 %v1584_v51, %v12984_v41  ;;  %v8376_v47 = vadd.f32 %v1786_v14, %v8139_v40  ;;  %v12985_v17 = vrot.slane %v7986_v4, 6  ;;  %v12989_v63 = vld [vmem:[#allocation80_spill] sm:$0xff]  ;;  %v12991_v56 = vld [vmem:[#allocation77_spill] sm:$0xff]  ;;  %v12993_v4 = vld [vmem:[#allocation82_spill] sm:$0xff] }
 0x193   :  { %v1788_v33 = vsel %vm870_vm3, %v1785_v57, %v12983_v29  ;;  %6329 = vmatprep.subr.bf16.mxu1 %v2484_v9  ;;  %v12987_v57 = vld [vmem:[#allocation136_spill] sm:$0xff]  ;;  %v2070_v5 = vadd.f32 %v1961_v22, %v12988_v2  ;;  %v12990_v31 = vrot.slane %v12989_v63, 6  ;;  %v12992_v9 = vrot.slane %v12991_v56, 6  ;;  %v12996_v14 = vld [vmem:[#allocation117_spill] sm:$0xff] }
 0x194   :  { %v1881_v15 = vadd.f32 %v1788_v33, %v8142_v18  ;;  %v2199_v11 = vsel %vm2142_vm5, %v2196_v48, %v12985_v17  ;;  %v2069_v60 = vadd.f32 %v12987_v57, %v12986_v21  ;;  %v2099_v40 = vadd.f32 %v12521_v50, %v1690_v39  ;;  %v12997_v22 = vld [vmem:[#allocation116_spill] sm:$0xff]  ;;  %v12999_v17 = vld [vmem:[#allocation106_spill] sm:$0xff] }
 0x195   :  { %v2165_v51 = vsel %vm2142_vm5, %v12992_v9, %v12990_v31  ;;  %v12523_v18 = vrot.slane %v8376_v47, 3  ;;  %v12994_v35 = vrot.slane %v12993_v4, 6  ;;  %v12995_v48 = vmov %v12990_v31  ;;  %v13000_v57 = vld [vmem:[#allocation100_spill] sm:$0xff] }
 0x196   :  { %v1990_v55 = vrot.slane %v1881_v15, 3  ;;  %v12998_v29 = vpack.c.bf16 %v12996_v14, %v12997_v22  ;;  %v2277_v33 = vadd.f32 %v2165_v51, %v2069_v60  ;;  %v451_v21 = vmul.f32 %v7055_v19, %v12999_v17 }
 0x197   :  { %v2167_v43 = vsel %vm2142_vm5, %v12995_v48, %v12994_v35  ;;  %v8405_v39 = vmul.f32 %v7042_v12, %v13000_v57  ;;  %v8407_v15 = vadd.f32 %v2225_v0, %v2099_v40  ;;  %v13001_v63 = vrot.slane %v8124_v54, 3  ;;  %v13002_v35 = vld [vmem:[#allocation111_spill] sm:$0xff]  ;;  %v13003_v48 = vld [vmem:[#allocation121_spill] sm:$0xff] }
 0x198   :  { %6330 = vmatpush3.bf16.msra.mxu1 %v12998_v29  ;;  %v2278_v41 = vadd.f32 %v2167_v43, %v2070_v5  ;;  %v1991_v2 = vsel %vm1936_vm6, %v12523_v18, %v1990_v55  ;;  %v496_v60 = vmul.f32 %v7042_v12, %v12999_v17  ;;  %v2325_v51 = vadd.f32 %v7689_v24, %v2277_v33  ;;  %v13004_v33 = vld [vmem:[#allocation128_spill] sm:$0xff] }
 0x199   :  { %v1993_v31 = vsel %vm1936_vm6, %v1990_v55, %v13001_v63  ;;  %v2085_v5 = vadd.f32 %v1991_v2, %v1676_v37  ;;  %v540_v0 = vmul.f32 %v7064_v23, %v13000_v57  ;;  %v541_v40 = vmul.f32 %v7064_v23, %v12999_v17  ;;  %v13005_v2 = vld [vmem:[#allocation133_spill] sm:$0xff] }
 0x19a   :  { %v2086_v9 = vadd.f32 %v1993_v31, %v1677_v30  ;;  %v2326_v4 = vadd.f32 %v7689_v24, %v2278_v41  ;;  %v585_v54 = vmul.f32 %v12897_v16, %v13002_v35  ;;  %v586_v55 = vmul.f32 %v12897_v16, %v13003_v48 }
 0x19b   :  { %v2293_v43 = vadd.f32 %v2197_v32, %v2085_v5  ;;  %v2366_v37 = vmax.f32 %v2325_v51, 0.0  ;;  %v630_v22 = vmul.f32 %v12903_v61, %v13002_v35  ;;  %v631_v29 = vmul.f32 %v12903_v61, %v13003_v48 }
 0x19c   :  { %v2294_v14 = vadd.f32 %v2199_v11, %v2086_v9  ;;  %v2367_v30 = vmax.f32 %v2326_v4, 0.0  ;;  %v8433_v41 = vmul.f32 %v8241_v8, %v13004_v33  ;;  %v812_v63 = vmul.f32 %v8241_v8, %v13005_v2  ;;  %v13006_v33 = vld [vmem:[#allocation118_spill] sm:$0xff] }
 0x19d   :  { %v2341_v31 = vadd.f32 %v7689_v24, %v2293_v43  ;;  %v2407_v11 = vmin.f32 %v2366_v37, 6.0  ;;  %v12526_v9 = vrot.slane %v8405_v39, 1  ;;  %v920_v51 = vrot.slane %v496_v60, 1  ;;  %v13007_v43 = vld [vmem:[#allocation119_spill] sm:$0xff] }
 0x19e   :  { %v2342_v32 = vadd.f32 %v7689_v24, %v2294_v14  ;;  %v2408_v5 = vmin.f32 %v2367_v30, 6.0  ;;  %v8440_v4 = vadd.f32 %v585_v54, %v540_v0  ;;  %v1059_v38 = vadd.f32 %v586_v55, %v541_v40  ;;  %v13009_v14 = vld [vmem:[#allocation125_spill] sm:$0xff]  ;;  %v13010_v30 = vld [vmem:[#allocation134_spill] sm:$0xff] }
 0x19f   :  { %v2382_v50 = vmax.f32 %v2341_v31, 0.0  ;;  %v12529_v46 = vrot.slane %v13006_v33, 1  ;;  %v921_v2 = vsel %vm870_vm3, %v12526_v9, %v920_v51  ;;  %v13008_v27 = vrot.slane %v13007_v43, 1  ;;  %v13012_v0 = vld [vmem:[#allocation130_spill] sm:$0xff]  ;;  %v13015_v43 = vld [vmem:[#allocation131_spill] sm:$0xff] }
 0x1a0   :  { %v2383_v20 = vmax.f32 %v2342_v32, 0.0  ;;  %v2475_v18 = vpack.c.bf16 %v2408_v5, %v2407_v11  ;;  %v1165_v37 = vrot.slane %v13009_v14, 1  ;;  %v13011_v60 = vrot.slane %v13010_v30, 1  ;;  %v13014_v32 = vld [vmem:[#allocation132_spill] sm:$0xff] }
 0x1a1   :  { %v923_v24 = vsel %vm870_vm3, %v920_v51, %v13008_v27  ;;  %v13013_v54 = vrot.slane %v13012_v0, 1  ;;  %v2423_v55 = vmin.f32 %v2382_v50, 6.0  ;;  %v1017_v11 = vadd.f32 %v921_v2, %v13014_v32  ;;  %v13021_v30 = vld [vmem:[#allocation64_spill] sm:$0xff] }
 0x1a2   :  { %v2424_v31 = vmin.f32 %v2383_v20, 6.0  ;;  %v1018_v5 = vadd.f32 %v923_v24, %v451_v21  ;;  %v1166_v9 = vsel %vm870_vm3, %v12529_v46, %v1165_v37  ;;  %v13016_v26 = vrot.slane %v13015_v43, 1  ;;  %v13020_v24 = vld [vmem:[#allocation135_spill] sm:$0xff] }
 0x1a3   :  { %v1371_v40 = vsel %vm870_vm3, %v13013_v54, %v13011_v60  ;;  %v13017_v51 = vrot.slane %v7896_v13, 1  ;;  %v13018_v14 = vmov %v13011_v60  ;;  %v13019_v60 = vld [vmem:[#allocation10_spill] sm:$0xff]  ;;  %v1262_v2 = vadd.f32 %v1166_v9, %v630_v22  ;;  %v13025_v22 = vld [vmem:[#allocation59_spill] sm:$0xff] }
 0x1a4   :  { %v1168_v27 = vsel %vm870_vm3, %v1165_v37, %v13016_v26  ;;  %v8468_v50 = vadd.f32 %v1371_v40, %v13019_v60  ;;  %v2483_v20 = vpack.c.bf16 %v2424_v31, %v2423_v55  ;;  %v12533_v32 = vrot.slane %v8440_v4, 2  ;;  %v13029_v60 = vld [vmem:[#allocation70_spill] sm:$0xff] }
 0x1a5   :  { %v1373_v62 = vsel %vm870_vm3, %v13018_v14, %v13017_v51  ;;  %v1263_v21 = vadd.f32 %v1168_v27, %v631_v29  ;;  %v1577_v46 = vrot.slane %v1059_v38, 2  ;;  %v12530_v26 = vrot.slane %v8433_v41, 6  ;;  %v13023_v14 = vld [vmem:[#allocation60_spill] sm:$0xff]  ;;  %v13026_v29 = vld [vmem:[#allocation74_spill] sm:$0xff] }
 0x1a6   :  { %v1470_v54 = vadd.f32 %v1373_v62, %v13020_v24  ;;  %v12531_v43 = vrot.slane %v8468_v50, 1  ;;  %6331 = vmatprep.subr.bf16.mxu1 %v2483_v20  ;;  %v2192_v37 = vrot.slane %v812_v63, 6  ;;  %v13022_v51 = vrot.slane %v13021_v30, 1  ;;  %v13028_v27 = vld [vmem:[#allocation66_spill] sm:$0xff]  ;;  %v13031_v24 = vld [vmem:[#allocation65_spill] sm:$0xff] }
 0x1a7   :  { %v13024_v40 = vrot.slane %v13023_v14, 1  ;;  %v1246_v9 = vadd.f32 %v13026_v29, %v13025_v22  ;;  %6332 = vmatpush3.bf16.msra.mxu1 %v2475_v18  ;;  %v1578_v62 = vsel %vm1527_vm4, %v12533_v32, %v1577_v46  ;;  %v13027_v38 = vrot.slane %v7866_v52, 2 }
 0x1a8   :  { %v1781_v13 = vrot.slane %v1470_v54, 1  ;;  %v13030_v20 = vrot.slane %v13029_v60, 1  ;;  %v13032_v54 = vrot.slane %v13031_v24, 1  ;;  %v13034_v29 = vrot.slane %v12971_v1, 6 }
 0x1a9   :  { %v1136_v55 = vsel %vm870_vm3, %v13024_v40, %v13022_v51  ;;  %v1580_v31 = vsel %vm1527_vm4, %v1577_v46, %v13027_v38  ;;  %v1674_v51 = vadd.f32 %v1578_v62, %v1017_v11  ;;  %v13033_v40 = vrot.slane %v8219_v53, 1  ;;  %v13038_v53 = vld [vmem:[#allocation68_spill] sm:$0xff] }
 0x1aa   :  { %v1247_v63 = vadd.f32 %v1136_v55, %v13028_v27  ;;  %v1339_v30 = vsel %vm870_vm3, %v13032_v54, %v13030_v20  ;;  %v1675_v14 = vadd.f32 %v1580_v31, %v1018_v5  ;;  %v1782_v18 = vsel %vm870_vm3, %v12531_v43, %v1781_v13  ;;  %v13035_v5 = vld [vmem:[#allocation75_spill] sm:$0xff] }
 0x1ab   :  { %v1784_v52 = vsel %vm870_vm3, %v1781_v13, %v13033_v40  ;;  %v8499_v22 = vadd.f32 %v1782_v18, %v1262_v2  ;;  %v2193_v55 = vsel %vm2142_vm5, %v12530_v26, %v2192_v37  ;;  %v2195_v11 = vsel %vm2142_vm5, %v2192_v37, %v13034_v29  ;;  %v13039_v2 = vld [vmem:[#allocation62_spill] sm:$0xff]  ;;  %v13041_v40 = vld [vmem:[#allocation73_spill] sm:$0xff]  ;;  %v13043_v29 = vld [vmem:[#allocation71_spill] sm:$0xff] }
 0x1ac   :  { %v1879_v46 = vadd.f32 %v1784_v52, %v1263_v21  ;;  %v13036_v62 = vrot.slane %v13035_v5, 1  ;;  %v13037_v38 = vmov %v13030_v20  ;;  %v8513_v27 = vadd.f32 %v1339_v30, %v13038_v53  ;;  %v13040_v21 = vld [vmem:[#allocation69_spill] sm:$0xff]  ;;  %v13042_v52 = vld [vmem:[#allocation72_spill] sm:$0xff]  ;;  %v13048_v43 = vld [vmem:[#allocation67_spill] sm:$0xff] }
 0x1ad   :  { %v12532_v13 = vrot.slane %v13039_v2, 2  ;;  %v1545_v20 = vrot.slane %v13040_v21, 2  ;;  %v12534_v54 = vrot.slane %v8499_v22, 3  ;;  %v13044_v5 = vrot.slane %v13043_v29, 2 }
 0x1ae   :  { %v1341_v31 = vsel %vm870_vm3, %v13037_v38, %v13036_v62  ;;  %v1986_v18 = vrot.slane %v1879_v46, 3  ;;  %v13045_v38 = vld [vmem:[#allocation76_spill] sm:$0xff]  ;;  %v12551_v44 = vrot.slane %v13058_v45, 1 }
 0x1af   :  { %v1454_v1 = vadd.f32 %v1341_v31, %v13041_v40  ;;  %v1546_v60 = vsel %vm1527_vm4, %v12532_v13, %v1545_v20  ;;  %v1548_v30 = vsel %vm1527_vm4, %v1545_v20, %v13044_v5  ;;  %v2160_v53 = vrot.slane %v13045_v38, 6  ;;  %v13047_v40 = vld [vmem:[#allocation61_spill] sm:$0xff] }
 0x1b0   :  { %v1987_v46 = vsel %vm1936_vm6, %v12534_v54, %v1986_v18  ;;  %v13046_v31 = vrot.slane %v8376_v47, 3  ;;  %v1658_v26 = vadd.f32 %v1546_v60, %v13047_v40  ;;  %v1659_v13 = vadd.f32 %v1548_v30, %v13048_v43  ;;  %v13051_v54 = vld [vmem:[#allocation92_spill] sm:$0xff]  ;;  %v13054_v30 = vld [vmem:[#allocation99_spill] sm:$0xff] }
 0x1b1   :  { %v2083_v32 = vadd.f32 %v1987_v46, %v1674_v51  ;;  %v1749_v37 = vrot.slane %v1454_v1, 1  ;;  %v13049_v20 = vrot.slane %v13042_v52, 6  ;;  %v13050_v38 = vrot.slane %v12991_v56, 6 }
 0x1b2   :  { %v1989_v21 = vsel %vm1936_vm6, %v1986_v18, %v13046_v31  ;;  %v448_v47 = vmul.f32 %v7055_v19, %v13051_v54  ;;  %v449_v18 = vmul.f32 %v7055_v19, %v13052_v49  ;;  %v8548_v43 = vmul.f32 %v7042_v12, %v13051_v54 }
 0x1b3   :  { %v2084_v29 = vadd.f32 %v1989_v21, %v1675_v14  ;;  %v2161_v5 = vsel %vm2142_vm5, %v13049_v20, %v2160_v53  ;;  %v2163_v62 = vsel %vm2142_vm5, %v2160_v53, %v13050_v38  ;;  %v2291_v51 = vadd.f32 %v2193_v55, %v2083_v32  ;;  %v6532_v32 = vld [vmem:[%s12322_s4 + $0x4] ss:$12 sps:$4 sm:$0xff]   ;;  %v8568_v55 = vld [vmem:[%s12321_s3] ss:$0 sm:$0xff] }
 0x1b4   :  { %v13053_v1 = vrot.slane %v8513_v27, 1  ;;  %v13055_v56 = vrot.slane %v13054_v30, 1  ;;  %v494_v21 = vmul.f32 %v7042_v12, %v13052_v49  ;;  %v538_v40 = vmul.f32 %v7064_v23, %v13051_v54  ;;  %2671 = vmatprep.mubr.bf16.mxu1 %v6532_v32 }
 0x1b5   :  { %v2292_v14 = vadd.f32 %v2195_v11, %v2084_v29  ;;  %v2339_v11 = vadd.f32 %v8568_v55, %v2291_v51  ;;  %v584_v38 = vmul.f32 %v12897_v16, %v12999_v17  ;;  %v8585_v30 = vmul.f32 %v8241_v8, %v13002_v35 }
 0x1b6   :  { %v1750_v60 = vsel %vm870_vm3, %v13053_v1, %v1749_v37  ;;  %v1752_v53 = vsel %vm870_vm3, %v1749_v37, %v13055_v56  ;;  %v583_v37 = vmul.f32 %v12897_v16, %v13000_v57  ;;  %v628_v1 = vmul.f32 %v12903_v61, %v13000_v57 }
 0x1b7   :  { %v8556_v46 = vadd.f32 %v1750_v60, %v1246_v9  ;;  %v1863_v31 = vadd.f32 %v1752_v53, %v1247_v63  ;;  %v2340_v9 = vadd.f32 %v8568_v55, %v2292_v14  ;;  %v539_v63 = vmul.f32 %v7064_v23, %v13052_v49  ;;  %v13056_v53 = vld [vmem:[#allocation124_spill] sm:$0xff] }
 0x1b8   :  { %v2380_v60 = vmax.f32 %v2339_v11, 0.0  ;;  %v629_v14 = vmul.f32 %v12903_v61, %v12999_v17  ;;  %v810_v32 = vmul.f32 %v8241_v8, %v13003_v48  ;;  %v12552_v11 = vrot.slane %v8548_v43, 1 }
 0x1b9   :  { %v12543_v29 = vrot.slane %v8556_v46, 3  ;;  %v1954_v20 = vrot.slane %v1863_v31, 3  ;;  %v2381_v51 = vmax.f32 %v2340_v9, 0.0  ;;  %v13057_v31 = vrot.slane %v13056_v53, 3 }
 0x1ba   :  { %v2421_v9 = vmin.f32 %v2380_v60, 6.0  ;;  %v916_v6 = vrot.slane %v494_v21, 1  ;;  %v8596_v35 = vadd.f32 %v583_v37, %v538_v40  ;;  %v1057_v59 = vadd.f32 %v584_v38, %v539_v63  ;;  %v13063_v21 = vld [vmem:[#allocation115_spill] sm:$0xff] }
 0x1bb   :  { %v1955_v56 = vsel %vm1936_vm6, %v12543_v29, %v1954_v20  ;;  %v1957_v28 = vsel %vm1936_vm6, %v1954_v20, %v13057_v31  ;;  %v2422_v42 = vmin.f32 %v2381_v51, 6.0  ;;  %v1161_v20 = vrot.slane %v13059_v34, 1 }
 0x1bc   :  { %v2067_v25 = vadd.f32 %v1955_v56, %v1658_v26  ;;  %v2068_v36 = vadd.f32 %v1957_v28, %v1659_v13  ;;  %v917_v48 = vsel %vm870_vm3, %v12552_v11, %v916_v6  ;;  %v13060_v60 = vrot.slane %v8405_v39, 1  ;;  %v13061_v28 = vld [vmem:[#allocation122_spill] sm:$0xff] }
 0x1bd   :  { %v2482_v29 = vpack.c.bf16 %v2422_v42, %v2421_v9  ;;  %v13062_v13 = vrot.slane %v13061_v28, 1  ;;  %v13064_v40 = vrot.slane %v13063_v21, 1  ;;  %v13065_v42 = vrot.slane %v13012_v0, 1  ;;  %v13068_v0 = vld [vmem:[#allocation120_spill] sm:$0xff]  ;;  %v13069_v56 = vld [vmem:[#allocation126_spill] sm:$0xff] }
 0x1be   :  { %v2275_v7 = vadd.f32 %v2161_v5, %v2067_v25  ;;  %v2276_v53 = vadd.f32 %v2163_v62, %v2068_v36  ;;  %v919_v26 = vsel %vm870_vm3, %v916_v6, %v13060_v60  ;;  %v1015_v39 = vadd.f32 %v917_v48, %v448_v47 }
 0x1bf   :  { %v1367_v63 = vsel %vm870_vm3, %v13064_v40, %v13062_v13  ;;  %v13066_v36 = vmov %v13062_v13  ;;  %6333 = vmatprep.subr.bf16.mxu1 %v2482_v29  ;;  %v1016_v5 = vadd.f32 %v919_v26, %v449_v18  ;;  %v1162_v6 = vsel %vm870_vm3, %v12551_v44, %v1161_v20  ;;  %v13081_v44 = vld [vmem:[#allocation52_spill] sm:$0xff] }
 0x1c0   :  { %v1369_v34 = vsel %vm870_vm3, %v13066_v36, %v13065_v42  ;;  %v2323_v25 = vadd.f32 %v8568_v55, %v2275_v7  ;;  %v2324_v62 = vadd.f32 %v8568_v55, %v2276_v53  ;;  %v13067_v37 = vrot.slane %v13006_v33, 1 }
 0x1c1   :  { %v8625_v51 = vadd.f32 %v1367_v63, %v13068_v0  ;;  %v1468_v31 = vadd.f32 %v1369_v34, %v13069_v56  ;;  %v1260_v7 = vadd.f32 %v1162_v6, %v628_v1  ;;  %v12550_v47 = vrot.slane %v8596_v35, 2  ;;  %v13074_v0 = vld [vmem:[#allocation23_spill] sm:$0xff] }
 0x1c2   :  { %v1164_v38 = vsel %vm870_vm3, %v1161_v20, %v13067_v37  ;;  %v2364_v29 = vmax.f32 %v2323_v25, 0.0  ;;  %v2365_v9 = vmax.f32 %v2324_v62, 0.0  ;;  %v1573_v18 = vrot.slane %v1057_v59, 2  ;;  %v13073_v37 = vld [vmem:[#allocation21_spill] sm:$0xff] }
 0x1c3   :  { %v1261_v60 = vadd.f32 %v1164_v38, %v629_v14  ;;  %v12549_v53 = vrot.slane %v8625_v51, 1  ;;  %v1777_v48 = vrot.slane %v1468_v31, 1  ;;  %v12548_v33 = vrot.slane %v8585_v30, 6 }
 0x1c4   :  { %v2405_v26 = vmin.f32 %v2364_v29, 6.0  ;;  %v2406_v28 = vmin.f32 %v2365_v9, 6.0  ;;  %v2188_v20 = vrot.slane %v810_v32, 6  ;;  %v1574_v13 = vsel %vm1527_vm4, %v12550_v47, %v1573_v18  ;;  %v13075_v9 = vld [vmem:[#allocation27_spill] sm:$0xff] }
 0x1c5   :  { %v13070_v40 = vrot.slane %v8440_v4, 2  ;;  %v1778_v59 = vsel %vm870_vm3, %v12549_v53, %v1777_v48  ;;  %v13071_v14 = vrot.slane %v8468_v50, 1  ;;  %v1672_v36 = vadd.f32 %v1574_v13, %v1015_v39  ;;  %v13080_v53 = vld [vmem:[#allocation48_spill] sm:$0xff] }
 0x1c6   :  { %v2474_v42 = vpack.c.bf16 %v2406_v28, %v2405_v26  ;;  %v8643_v32 = vadd.f32 %v1778_v59, %v1260_v7  ;;  %v2189_v4 = vsel %vm2142_vm5, %v12548_v33, %v2188_v20  ;;  %v13072_v62 = vrot.slane %v8433_v41, 6  ;;  %v13077_v28 = vld [vmem:[#allocation51_spill] sm:$0xff]  ;;  %v13079_v59 = vld [vmem:[#allocation57_spill] sm:$0xff] }
 0x1c7   :  { %v1576_v1 = vsel %vm1527_vm4, %v1573_v18, %v13070_v40  ;;  %v1780_v63 = vsel %vm870_vm3, %v1777_v48, %v13071_v14  ;;  %v432_v38 = vmul.f32 %v7055_v19, %v13073_v37  ;;  %v433_v39 = vmul.f32 %v7055_v19, %v13074_v0 }
 0x1c8   :  { %v1673_v34 = vadd.f32 %v1576_v1, %v1016_v5  ;;  %v1877_v25 = vadd.f32 %v1780_v63, %v1261_v60  ;;  %v2191_v6 = vsel %vm2142_vm5, %v2188_v20, %v13072_v62  ;;  %6334 = vmatpush3.bf16.msra.mxu1 %v2474_v42  ;;  %v12553_v50 = vrot.slane %v8643_v32, 3  ;;  %v13076_v60 = vld [vmem:[#allocation39_spill] sm:$0xff] }
 0x1c9   :  { %v8658_v5 = vmul.f32 %v7042_v12, %v13073_v37  ;;  %v478_v56 = vmul.f32 %v7042_v12, %v13074_v0  ;;  %v522_v41 = vmul.f32 %v7064_v23, %v13073_v37  ;;  %v523_v29 = vmul.f32 %v7064_v23, %v13074_v0 }
 0x1ca   :  { %v1982_v31 = vrot.slane %v1877_v25, 3  ;;  %v567_v7 = vmul.f32 %v12897_v16, %v13075_v9  ;;  %v568_v18 = vmul.f32 %v12897_v16, %v13076_v60  ;;  %v612_v48 = vmul.f32 %v12903_v61, %v13075_v9 }
 0x1cb   :  { %v613_v26 = vmul.f32 %v12903_v61, %v13076_v60  ;;  %v8676_v20 = vmul.f32 %v8241_v8, %v13077_v28  ;;  %v13078_v40 = vrot.slane %v8499_v22, 3  ;;  %v794_v14 = vmul.f32 %v8241_v8, %v13079_v59  ;;  %v13084_v22 = vld [vmem:[#allocation54_spill] sm:$0xff] }
 0x1cc   :  { %v1983_v13 = vsel %vm1936_vm6, %v12553_v50, %v1982_v31  ;;  %v12561_v63 = vrot.slane %v8658_v5, 1  ;;  %v884_v62 = vrot.slane %v478_v56, 1  ;;  %v8687_v33 = vadd.f32 %v567_v7, %v522_v41  ;;  %v13082_v50 = vld [vmem:[#allocation58_spill] sm:$0xff] }
 0x1cd   :  { %v1985_v1 = vsel %vm1936_vm6, %v1982_v31, %v13078_v40  ;;  %v2081_v42 = vadd.f32 %v1983_v13, %v1672_v36  ;;  %v1041_v28 = vadd.f32 %v568_v18, %v523_v29  ;;  %v12560_v47 = vrot.slane %v13080_v53, 1  ;;  %v13088_v18 = vld [vmem:[#allocation53_spill] sm:$0xff] }
 0x1ce   :  { %v2082_v25 = vadd.f32 %v1985_v1, %v1673_v34  ;;  %v1129_v11 = vrot.slane %v13081_v44, 1  ;;  %v13083_v10 = vrot.slane %v13082_v50, 1  ;;  %v13085_v3 = vrot.slane %v13084_v22, 1  ;;  %v13086_v34 = vld [vmem:[#allocation43_spill] sm:$0xff] }
 0x1cf   :  { %v2289_v40 = vadd.f32 %v2189_v4, %v2081_v42  ;;  %v885_v36 = vsel %vm870_vm3, %v12561_v63, %v884_v62  ;;  %v13087_v56 = vrot.slane %v13086_v34, 1  ;;  %v13089_v13 = vrot.slane %v13088_v18, 1  ;;  %v13106_v63 = vld [vmem:[#allocation103_spill] sm:$0xff] }
 0x1d0   :  { %v1335_v31 = vsel %vm870_vm3, %v13085_v3, %v13083_v10  ;;  %v2290_v59 = vadd.f32 %v2191_v6, %v2082_v25  ;;  %v999_v29 = vadd.f32 %v885_v36, %v432_v38  ;;  %v1130_v44 = vsel %vm870_vm3, %v12560_v47, %v1129_v11 }
 0x1d1   :  { %v887_v41 = vsel %vm870_vm3, %v884_v62, %v13087_v56  ;;  %v1132_v10 = vsel %vm870_vm3, %v1129_v11, %v13089_v13  ;;  %v2337_v3 = vadd.f32 %v8568_v55, %v2289_v40  ;;  %v1244_v6 = vadd.f32 %v1130_v44, %v612_v48 }
 0x1d2   :  { %v1000_v7 = vadd.f32 %v887_v41, %v433_v39  ;;  %v2338_v4 = vadd.f32 %v8568_v55, %v2290_v59  ;;  %v1245_v1 = vadd.f32 %v1132_v10, %v613_v26  ;;  %v13090_v42 = vrot.slane %v13031_v24, 1  ;;  %v13092_v39 = vld [vmem:[#allocation56_spill] sm:$0xff]  ;;  %v13093_v41 = vld [vmem:[#allocation63_spill] sm:$0xff] }
 0x1d3   :  { %v13091_v25 = vrot.slane %v13082_v50, 1  ;;  %v8716_v62 = vadd.f32 %v1335_v31, %v13092_v39  ;;  %v12558_v36 = vrot.slane %v8687_v33, 2  ;;  %v1541_v34 = vrot.slane %v1041_v28, 2  ;;  %v13097_v39 = vld [vmem:[#allocation90_spill] sm:$0xff] }
 0x1d4   :  { %v2378_v56 = vmax.f32 %v2337_v3, 0.0  ;;  %v2379_v11 = vmax.f32 %v2338_v4, 0.0  ;;  %v12556_v59 = vrot.slane %v8676_v20, 6  ;;  %v13094_v50 = vrot.slane %v13039_v2, 2 }
 0x1d5   :  { %v1337_v38 = vsel %vm870_vm3, %v13091_v25, %v13090_v42  ;;  %v1542_v24 = vsel %vm1527_vm4, %v12558_v36, %v1541_v34  ;;  %v12557_v26 = vrot.slane %v8716_v62, 1  ;;  %v2156_v31 = vrot.slane %v794_v14, 6  ;;  %v13096_v25 = vld [vmem:[#allocation87_spill] sm:$0xff] }
 0x1d6   :  { %v1452_v40 = vadd.f32 %v1337_v38, %v13093_v41  ;;  %v1544_v48 = vsel %vm1527_vm4, %v1541_v34, %v13094_v50  ;;  %v2419_v44 = vmin.f32 %v2378_v56, 6.0  ;;  %v2420_v18 = vmin.f32 %v2379_v11, 6.0 }
 0x1d7   :  { %v1656_v28 = vadd.f32 %v1542_v24, %v999_v29  ;;  %v1657_v13 = vadd.f32 %v1544_v48, %v1000_v7  ;;  %v2157_v3 = vsel %vm2142_vm5, %v12556_v59, %v2156_v31  ;;  %v13095_v4 = vrot.slane %v13042_v52, 6  ;;  %v13100_v59 = vld [vmem:[#allocation101_spill] sm:$0xff] }
 0x1d8   :  { %v1745_v10 = vrot.slane %v1452_v40, 1  ;;  %v446_v2 = vmul.f32 %v7055_v19, %v13096_v25  ;;  %v2481_v38 = vpack.c.bf16 %v2420_v18, %v2419_v44  ;;  %v447_v14 = vmul.f32 %v7055_v19, %v13097_v39 }
 0x1d9   :  { %v2159_v42 = vsel %vm2142_vm5, %v2156_v31, %v13095_v4  ;;  %v8740_v29 = vmul.f32 %v7042_v12, %v13096_v25  ;;  %v492_v7 = vmul.f32 %v7042_v12, %v13097_v39  ;;  %v13098_v34 = vrot.slane %v8513_v27, 1 }
 0x1da   :  { %v1746_v52 = vsel %vm870_vm3, %v12557_v26, %v1745_v10  ;;  %v536_v11 = vmul.f32 %v7064_v23, %v13096_v25  ;;  %v537_v41 = vmul.f32 %v7064_v23, %v13097_v39  ;;  %6335 = vmatprep.subr.bf16.mxu1 %v2481_v38  ;;  %v581_v50 = vmul.f32 %v12897_v16, %v13051_v54 }
 0x1db   :  { %v1748_v56 = vsel %vm870_vm3, %v1745_v10, %v13098_v34  ;;  %v8754_v40 = vadd.f32 %v1746_v52, %v1244_v6  ;;  %v582_v48 = vmul.f32 %v12897_v16, %v13052_v49  ;;  %v626_v27 = vmul.f32 %v12903_v61, %v13051_v54  ;;  %v13099_v34 = vld [vmem:[#allocation96_spill] sm:$0xff] }
 0x1dc   :  { %v1861_v24 = vadd.f32 %v1748_v56, %v1245_v1  ;;  %v627_v31 = vmul.f32 %v12903_v61, %v13052_v49  ;;  %v8766_v44 = vmul.f32 %v8241_v8, %v13000_v57  ;;  %v808_v6 = vmul.f32 %v8241_v8, %v12999_v17 }
 0x1dd   :  { %v12559_v1 = vrot.slane %v8754_v40, 3  ;;  %v12562_v10 = vrot.slane %v8740_v29, 1  ;;  %v912_v4 = vrot.slane %v492_v7, 1  ;;  %v8772_v38 = vadd.f32 %v581_v50, %v536_v11 }
 0x1de   :  { %v1950_v18 = vrot.slane %v1861_v24, 3  ;;  %v1055_v52 = vadd.f32 %v582_v48, %v537_v41  ;;  %v12567_v56 = vrot.slane %v13099_v34, 1  ;;  %v1157_v26 = vrot.slane %v13100_v59, 1 }
 0x1df   :  { %v13101_v36 = vrot.slane %v8556_v46, 3  ;;  %v913_v24 = vsel %vm870_vm3, %v12562_v10, %v912_v4  ;;  %v13102_v7 = vrot.slane %v8548_v43, 1  ;;  %v13103_v46 = vrot.slane %v13058_v45, 1 }
 0x1e0   :  { %v1951_v57 = vsel %vm1936_vm6, %v12559_v1, %v1950_v18  ;;  %v1013_v48 = vadd.f32 %v913_v24, %v446_v2  ;;  %v1158_v1 = vsel %vm870_vm3, %v12567_v56, %v1157_v26  ;;  %v13107_v10 = vrot.slane %v13106_v63, 1  ;;  %v13110_v24 = vld [vmem:[#allocation108_spill] sm:$0xff]  ;;  %v13120_v56 = vld [vmem:[#allocation50_spill] sm:$0xff] }
 0x1e1   :  { %v1953_v17 = vsel %vm1936_vm6, %v1950_v18, %v13101_v36  ;;  %v915_v11 = vsel %vm870_vm3, %v912_v4, %v13102_v7  ;;  %v2065_v41 = vadd.f32 %v1951_v57, %v1656_v28  ;;  %v1160_v36 = vsel %vm870_vm3, %v1157_v26, %v13103_v46  ;;  %v13104_v18 = vld [vmem:[#allocation110_spill] sm:$0xff] }
 0x1e2   :  { %v2066_v50 = vadd.f32 %v1953_v17, %v1657_v13  ;;  %v1014_v59 = vadd.f32 %v915_v11, %v447_v14  ;;  %v13105_v47 = vrot.slane %v13104_v18, 1  ;;  %v13108_v4 = vrot.slane %v13063_v21, 1  ;;  %v13111_v26 = vld [vmem:[#allocation114_spill] sm:$0xff] }
 0x1e3   :  { %v2273_v2 = vadd.f32 %v2157_v3, %v2065_v41  ;;  %v1258_v57 = vadd.f32 %v1158_v1, %v626_v27  ;;  %v1259_v17 = vadd.f32 %v1160_v36, %v627_v31  ;;  %v12566_v11 = vrot.slane %v8772_v38, 2 }
 0x1e4   :  { %v1363_v43 = vsel %vm870_vm3, %v13107_v10, %v13105_v47  ;;  %v13109_v28 = vmov %v13105_v47  ;;  %v2274_v14 = vadd.f32 %v2159_v42, %v2066_v50  ;;  %v1569_v46 = vrot.slane %v1055_v52, 2 }
 0x1e5   :  { %v1365_v13 = vsel %vm870_vm3, %v13109_v28, %v13108_v4  ;;  %v8805_v45 = vadd.f32 %v1363_v43, %v13110_v24  ;;  %v2321_v47 = vadd.f32 %v8568_v55, %v2273_v2  ;;  %v12564_v10 = vrot.slane %v8766_v44, 6  ;;  %v13115_v24 = vld [vmem:[#allocation17_spill] sm:$0xff] }
 0x1e6   :  { %v1466_v7 = vadd.f32 %v1365_v13, %v13111_v26  ;;  %v2322_v21 = vadd.f32 %v8568_v55, %v2274_v14  ;;  %v2184_v18 = vrot.slane %v808_v6, 6  ;;  %v1570_v3 = vsel %vm1527_vm4, %v12566_v11, %v1569_v46 }
 0x1e7   :  { %v13112_v42 = vrot.slane %v8596_v35, 2  ;;  %v12565_v31 = vrot.slane %v8805_v45, 1  ;;  %v2362_v41 = vmax.f32 %v2321_v47, 0.0  ;;  %v1670_v50 = vadd.f32 %v1570_v3, %v1013_v48 }
 0x1e8   :  { %v1773_v1 = vrot.slane %v1466_v7, 1  ;;  %v2363_v52 = vmax.f32 %v2322_v21, 0.0  ;;  %v13113_v6 = vrot.slane %v8625_v51, 1  ;;  %v2185_v35 = vsel %vm2142_vm5, %v12564_v10, %v2184_v18  ;;  %v13116_v7 = vld [vmem:[#allocation19_spill] sm:$0xff] }
 0x1e9   :  { %v1572_v27 = vsel %vm1527_vm4, %v1569_v46, %v13112_v42  ;;  %v13114_v28 = vrot.slane %v8585_v30, 6  ;;  %v2403_v2 = vmin.f32 %v2362_v41, 6.0  ;;  %v430_v26 = vmul.f32 %v7055_v19, %v13115_v24 }
 0x1ea   :  { %v1671_v36 = vadd.f32 %v1572_v27, %v1014_v59  ;;  %v1774_v43 = vsel %vm870_vm3, %v12565_v31, %v1773_v1  ;;  %v1776_v4 = vsel %vm870_vm3, %v1773_v1, %v13113_v6  ;;  %v2404_v14 = vmin.f32 %v2363_v52, 6.0  ;;  %v13119_v31 = vld [vmem:[#allocation46_spill] sm:$0xff] }
 0x1eb   :  { %v2187_v13 = vsel %vm2142_vm5, %v2184_v18, %v13114_v28  ;;  %v8831_v48 = vadd.f32 %v1774_v43, %v1258_v57  ;;  %v1875_v59 = vadd.f32 %v1776_v4, %v1259_v17  ;;  %v431_v51 = vmul.f32 %v7055_v19, %v13116_v7 }
 0x1ec   :  { %v8839_v46 = vmul.f32 %v7042_v12, %v13115_v24  ;;  %v476_v30 = vmul.f32 %v7042_v12, %v13116_v7  ;;  %v2473_v47 = vpack.c.bf16 %v2404_v14, %v2403_v2  ;;  %v520_v57 = vmul.f32 %v7064_v23, %v13115_v24 }
 0x1ed   :  { %v12563_v21 = vrot.slane %v8831_v48, 3  ;;  %v1978_v18 = vrot.slane %v1875_v59, 3  ;;  %v521_v17 = vmul.f32 %v7064_v23, %v13116_v7  ;;  %v565_v3 = vmul.f32 %v12897_v16, %v13073_v37 }
 0x1ee   :  { %v566_v42 = vmul.f32 %v12897_v16, %v13074_v0  ;;  %v610_v27 = vmul.f32 %v12903_v61, %v13073_v37  ;;  %6336 = vmatpush3.bf16.msra.mxu1 %v2473_v47  ;;  %v13117_v41 = vrot.slane %v8643_v32, 3  ;;  %v611_v43 = vmul.f32 %v12903_v61, %v13074_v0 }
 0x1ef   :  { %v1979_v1 = vsel %vm1936_vm6, %v12563_v21, %v1978_v18  ;;  %v8864_v6 = vmul.f32 %v8241_v8, %v13075_v9  ;;  %v792_v2 = vmul.f32 %v8241_v8, %v13076_v60  ;;  %v878_v14 = vrot.slane %v8839_v46, 1  ;;  %v13118_v21 = vld [vmem:[#allocation44_spill] sm:$0xff]  ;;  %v13160_v46 = vld [vmem:[#allocation31_spill] sm:$0xff] }
 0x1f0   :  { %v1981_v52 = vsel %vm1936_vm6, %v1978_v18, %v13117_v41  ;;  %v2079_v4 = vadd.f32 %v1979_v1, %v1670_v50  ;;  %v880_v59 = vrot.slane %v476_v30, 1  ;;  %v8869_v47 = vadd.f32 %v565_v3, %v520_v57 }
 0x1f1   :  { %v2080_v28 = vadd.f32 %v1981_v52, %v1671_v36  ;;  %v1039_v32 = vadd.f32 %v566_v42, %v521_v17  ;;  %v1123_v18 = vrot.slane %v13118_v21, 1  ;;  %v1125_v11 = vrot.slane %v13119_v31, 1 }
 0x1f2   :  { %v2287_v41 = vadd.f32 %v2185_v35, %v2079_v4  ;;  %v13121_v9 = vrot.slane %v13120_v56, 1  ;;  %v13123_v50 = vrot.slane %v13122_v58, 1  ;;  %v881_v8 = vsel %vm870_vm3, %v878_v14, %v880_v59  ;;  %v13129_v56 = vld [vmem:[#allocation55_spill] sm:$0xff] }
 0x1f3   :  { %v2288_v10 = vadd.f32 %v2187_v13, %v2080_v28  ;;  %v13124_v60 = vrot.slane %v8658_v5, 1  ;;  %v13125_v57 = vrot.slane %v13084_v22, 1  ;;  %v13127_v13 = vld [vmem:[#allocation49_spill] sm:$0xff]  ;;  %v997_v1 = vadd.f32 %v881_v8, %v430_v26 }
 0x1f4   :  { %v1331_v36 = vsel %vm870_vm3, %v13123_v50, %v13121_v9  ;;  %v13126_v35 = vmov %v13121_v9  ;;  %v2335_v3 = vadd.f32 %v8568_v55, %v2287_v41  ;;  %v1126_v5 = vsel %vm870_vm3, %v1123_v18, %v1125_v11 }
 0x1f5   :  { %v883_v30 = vsel %vm870_vm3, %v880_v59, %v13124_v60  ;;  %v1333_v31 = vsel %vm870_vm3, %v13126_v35, %v13125_v57  ;;  %v8890_v17 = vadd.f32 %v1331_v36, %v13127_v13  ;;  %v2336_v42 = vadd.f32 %v8568_v55, %v2288_v10 }
 0x1f6   :  { %v998_v52 = vadd.f32 %v883_v30, %v431_v51  ;;  %v13128_v4 = vrot.slane %v13080_v53, 1  ;;  %v1450_v28 = vadd.f32 %v1333_v31, %v13129_v56  ;;  %v1535_v59 = vrot.slane %v8869_v47, 2  ;;  %v13130_v53 = vld [vmem:[#allocation83_spill] sm:$0xff] }
 0x1f7   :  { %v2376_v9 = vmax.f32 %v2335_v3, 0.0  ;;  %v2377_v50 = vmax.f32 %v2336_v42, 0.0  ;;  %v1242_v36 = vadd.f32 %v1126_v5, %v610_v27  ;;  %v1537_v60 = vrot.slane %v1039_v32, 2 }
 0x1f8   :  { %v1128_v22 = vsel %vm870_vm3, %v1125_v11, %v13128_v4  ;;  %v12571_v10 = vrot.slane %v8890_v17, 1  ;;  %v1741_v26 = vrot.slane %v1450_v28, 1  ;;  %v12570_v51 = vrot.slane %v8864_v6, 6  ;;  %v13134_v28 = vld [vmem:[#allocation85_spill] sm:$0xff] }
 0x1f9   :  { %v1243_v41 = vadd.f32 %v1128_v22, %v611_v43  ;;  %v2417_v8 = vmin.f32 %v2376_v9, 6.0  ;;  %v2418_v30 = vmin.f32 %v2377_v50, 6.0  ;;  %v2152_v57 = vrot.slane %v792_v2, 6 }
 0x1fa   :  { %v444_v11 = vmul.f32 %v7055_v19, %v13130_v53  ;;  %v1538_v35 = vsel %vm1527_vm4, %v1535_v59, %v1537_v60  ;;  %v13131_v31 = vrot.slane %v8687_v33, 2  ;;  %v1742_v43 = vsel %vm870_vm3, %v12571_v10, %v1741_v26 }
 0x1fb   :  { %v13132_v32 = vrot.slane %v8716_v62, 1  ;;  %v2480_v2 = vpack.c.bf16 %v2418_v30, %v2417_v8  ;;  %v1654_v3 = vadd.f32 %v1538_v35, %v997_v1  ;;  %v8918_v5 = vadd.f32 %v1742_v43, %v1242_v36  ;;  %v8950_v30 = vld [vmem:[%s12747_s26 + $0x8] ss:$0 sm:$0xff] }
 0x1fc   :  { %v1540_v27 = vsel %vm1527_vm4, %v1537_v60, %v13131_v31  ;;  %v2153_v33 = vsel %vm2142_vm5, %v12570_v51, %v2152_v57  ;;  %v13133_v22 = vrot.slane %v8676_v20, 6  ;;  %v445_v9 = vmul.f32 %v7055_v19, %v13134_v28  ;;  %v13138_v51 = vld [vmem:[#allocation93_spill] sm:$0xff] }
 0x1fd   :  { %v1744_v13 = vsel %vm870_vm3, %v1741_v26, %v13132_v32  ;;  %v1655_v42 = vadd.f32 %v1540_v27, %v998_v52  ;;  %6337 = vmatprep.subr.bf16.mxu1 %v2480_v2  ;;  %v12569_v62 = vrot.slane %v8918_v5, 3  ;;  %v8931_v1 = vmul.f32 %v7042_v12, %v13130_v53 }
 0x1fe   :  { %v1859_v4 = vadd.f32 %v1744_v13, %v1243_v41  ;;  %v2155_v56 = vsel %vm2142_vm5, %v2152_v57, %v13133_v22  ;;  %v490_v52 = vmul.f32 %v7042_v12, %v13134_v28  ;;  %v534_v50 = vmul.f32 %v7064_v23, %v13130_v53 }
 0x1ff   :  { %v535_v20 = vmul.f32 %v7064_v23, %v13134_v28  ;;  %v579_v41 = vmul.f32 %v12897_v16, %v13096_v25  ;;  %v580_v60 = vmul.f32 %v12897_v16, %v13097_v39  ;;  %v624_v26 = vmul.f32 %v12903_v61, %v13096_v25 }
 0x200   :  { %v1946_v36 = vrot.slane %v1859_v4, 3  ;;  %v625_v8 = vmul.f32 %v12903_v61, %v13097_v39  ;;  %v8954_v57 = vmul.f32 %v8950_v30, %v13051_v54  ;;  %v806_v53 = vmul.f32 %v8950_v30, %v13052_v49 }
 0x201   :  { %v13135_v25 = vrot.slane %v8754_v40, 3  ;;  %v906_v27 = vrot.slane %v8931_v1, 1  ;;  %v908_v43 = vrot.slane %v490_v52, 1  ;;  %v8965_v2 = vadd.f32 %v579_v41, %v534_v50  ;;  %v13140_v41 = vld [vmem:[#allocation102_spill] sm:$0xff] }
 0x202   :  { %v1947_v35 = vsel %vm1936_vm6, %v12569_v62, %v1946_v36  ;;  %v1053_v54 = vadd.f32 %v580_v60, %v535_v20  ;;  %v13136_v4 = vrot.slane %v8740_v29, 1  ;;  %v13137_v62 = vld [vmem:[#allocation88_spill] sm:$0xff]  ;;  %v13139_v50 = vrot.slane %v13099_v34, 1  ;;  %v13142_v60 = vld [vmem:[#allocation94_spill] sm:$0xff] }
 0x203   :  { %v1949_v31 = vsel %vm1936_vm6, %v1946_v36, %v13135_v25  ;;  %v2063_v32 = vadd.f32 %v1947_v35, %v1654_v3  ;;  %v909_v49 = vsel %vm870_vm3, %v906_v27, %v908_v43  ;;  %v1151_v40 = vrot.slane %v13137_v62, 1 }
 0x204   :  { %v2064_v13 = vadd.f32 %v1949_v31, %v1655_v42  ;;  %v911_v22 = vsel %vm870_vm3, %v908_v43, %v13136_v4  ;;  %v1153_v36 = vrot.slane %v13138_v51, 1  ;;  %v1011_v52 = vadd.f32 %v909_v49, %v444_v11  ;;  %v13147_v49 = vld [vmem:[#allocation105_spill] sm:$0xff] }
 0x205   :  { %v2271_v25 = vadd.f32 %v2153_v33, %v2063_v32  ;;  %v1012_v3 = vadd.f32 %v911_v22, %v445_v9  ;;  %v13141_v29 = vrot.slane %v13140_v41, 1  ;;  %v13143_v35 = vrot.slane %v13142_v60, 1  ;;  %v13146_v32 = vld [vmem:[#allocation97_spill] sm:$0xff] }
 0x206   :  { %v2272_v10 = vadd.f32 %v2155_v56, %v2064_v13  ;;  %v1154_v42 = vsel %vm870_vm3, %v1151_v40, %v1153_v36  ;;  %v1156_v20 = vsel %vm870_vm3, %v1153_v36, %v13139_v50  ;;  %v13144_v51 = vrot.slane %v13106_v63, 1 }
 0x207   :  { %v1359_v31 = vsel %vm870_vm3, %v13143_v35, %v13141_v29  ;;  %v13145_v33 = vmov %v13141_v29  ;;  %v2319_v56 = vadd.f32 %v8568_v55, %v2271_v25  ;;  %v1256_v43 = vadd.f32 %v1154_v42, %v624_v26 }
 0x208   :  { %v1361_v11 = vsel %vm870_vm3, %v13145_v33, %v13144_v51  ;;  %v2320_v9 = vadd.f32 %v8568_v55, %v2272_v10  ;;  %v1257_v34 = vadd.f32 %v1156_v20, %v625_v8  ;;  %v8994_v13 = vadd.f32 %v1359_v31, %v13146_v32 }
 0x209   :  { %v1464_v4 = vadd.f32 %v1361_v11, %v13147_v49  ;;  %v1563_v22 = vrot.slane %v8965_v2, 2  ;;  %v1565_v36 = vrot.slane %v1053_v54, 2  ;;  %v2360_v50 = vmax.f32 %v2319_v56, 0.0 }
 0x20a   :  { %v2361_v63 = vmax.f32 %v2320_v9, 0.0  ;;  %v2178_v41 = vrot.slane %v8954_v57, 6  ;;  %v2180_v29 = vrot.slane %v806_v53, 6  ;;  %v13148_v10 = vrot.slane %v8772_v38, 2 }
 0x20b   :  { %v1566_v25 = vsel %vm1527_vm4, %v1563_v22, %v1565_v36  ;;  %v1767_v8 = vrot.slane %v8994_v13, 1  ;;  %v1769_v42 = vrot.slane %v1464_v4, 1  ;;  %v2401_v20 = vmin.f32 %v2360_v50, 6.0 }
 0x20c   :  { %v1568_v26 = vsel %vm1527_vm4, %v1565_v36, %v13148_v10  ;;  %v2402_v60 = vmin.f32 %v2361_v63, 6.0  ;;  %v1668_v35 = vadd.f32 %v1566_v25, %v1011_v52  ;;  %v13149_v53 = vrot.slane %v8805_v45, 1  ;;  %v13151_v36 = vld [vmem:[#allocation25_spill] sm:$0xff]  ;;  %v13153_v63 = vld [vmem:[#allocation24_spill] sm:$0xff] }
 0x20d   :  { %v1669_v54 = vadd.f32 %v1568_v26, %v1012_v3  ;;  %v1770_v31 = vsel %vm870_vm3, %v1767_v8, %v1769_v42  ;;  %v2181_v38 = vsel %vm2142_vm5, %v2178_v41, %v2180_v29  ;;  %v13150_v33 = vrot.slane %v8766_v44, 6  ;;  %v13156_v26 = vld [vmem:[#allocation29_spill] sm:$0xff] }
 0x20e   :  { %v1772_v51 = vsel %vm870_vm3, %v1769_v42, %v13149_v53  ;;  %v2472_v56 = vpack.c.bf16 %v2402_v60, %v2401_v20  ;;  %v9018_v9 = vadd.f32 %v1770_v31, %v1256_v43  ;;  %v563_v3 = vmul.f32 %v12897_v16, %v13115_v24  ;;  %v13157_v20 = vld [vmem:[#allocation30_spill] sm:$0xff]  ;;  %v13158_v31 = vld [vmem:[#allocation32_spill] sm:$0xff] }
 0x20f   :  { %v2183_v11 = vsel %vm2142_vm5, %v2180_v29, %v13150_v33  ;;  %v1873_v52 = vadd.f32 %v1772_v51, %v1257_v34  ;;  %v564_v45 = vmul.f32 %v12897_v16, %v13116_v7  ;;  %v608_v32 = vmul.f32 %v12903_v61, %v13115_v24 }
 0x210   :  { %v609_v49 = vmul.f32 %v12903_v61, %v13116_v7  ;;  %v9030_v44 = vmul.f32 %v8950_v30, %v13073_v37  ;;  %6338 = vmatpush3.bf16.msra.mxu1 %v2472_v56  ;;  %v1972_v43 = vrot.slane %v9018_v9, 3  ;;  %v790_v4 = vmul.f32 %v8950_v30, %v13074_v0 }
 0x211   :  { %v1974_v34 = vrot.slane %v1873_v52, 3  ;;  %v13152_v50 = vrot.slane %v13151_v36, 1  ;;  %v13154_v29 = vrot.slane %v13153_v63, 1  ;;  %v9047_v60 = vadd.f32 %v563_v3, %v13157_v20  ;;  %v13161_v52 = vld [vmem:[#allocation37_spill] sm:$0xff]  ;;  %v13163_v3 = vld [vmem:[#allocation36_spill] sm:$0xff] }
 0x212   :  { %v1037_v53 = vadd.f32 %v564_v45, %v13158_v31  ;;  %v13159_v51 = vrot.slane %v8831_v48, 3  ;;  %v1119_v36 = vrot.slane %v13161_v52, 1  ;;  %v13167_v31 = vrot.slane %v13122_v58, 1 }
 0x213   :  { %v877_v25 = vsel %vm870_vm3, %v13154_v29, %v13152_v50  ;;  %v13155_v10 = vmov %v13152_v50  ;;  %v1975_v0 = vsel %vm1936_vm6, %v1972_v43, %v1974_v34  ;;  %v13162_v29 = vld [vmem:[#allocation40_spill] sm:$0xff]  ;;  %v13172_v47 = vrot.slane %v8890_v17, 1 }
 0x214   :  { %v879_v37 = vsel %vm870_vm3, %v13155_v10, %v878_v14  ;;  %v995_v42 = vadd.f32 %v877_v25, %v13156_v26  ;;  %v1977_v33 = vsel %vm1936_vm6, %v1974_v34, %v13159_v51  ;;  %v2077_v14 = vadd.f32 %v1975_v0, %v1668_v35  ;;  %v13165_v26 = vld [vmem:[#allocation35_spill] sm:$0xff]  ;;  %v13169_v51 = vld [vmem:[#allocation45_spill] sm:$0xff] }
 0x215   :  { %v996_v56 = vadd.f32 %v879_v37, %v13160_v46  ;;  %v2078_v50 = vadd.f32 %v1977_v33, %v1669_v54  ;;  %v1121_v25 = vrot.slane %v13162_v29, 1  ;;  %v13164_v10 = vrot.slane %v13163_v3, 1 }
 0x216   :  { %v13166_v45 = vrot.slane %v13165_v26, 1  ;;  %v1531_v35 = vrot.slane %v9047_v60, 2  ;;  %v1533_v54 = vrot.slane %v1037_v53, 2  ;;  %v2285_v0 = vadd.f32 %v2181_v38, %v2077_v14 }
 0x217   :  { %v13168_v48 = vmov %v13164_v10  ;;  %v2286_v33 = vadd.f32 %v2183_v11, %v2078_v50  ;;  %v1122_v46 = vsel %vm870_vm3, %v1119_v36, %v1121_v25  ;;  %v1124_v58 = vsel %vm870_vm3, %v1121_v25, %v1123_v18 }
 0x218   :  { %v1327_v20 = vsel %vm870_vm3, %v13166_v45, %v13164_v10  ;;  %v1329_v34 = vsel %vm870_vm3, %v13168_v48, %v13167_v31  ;;  %v1240_v29 = vadd.f32 %v1122_v46, %v608_v32  ;;  %v1241_v3 = vadd.f32 %v1124_v58, %v609_v49  ;;  %v13170_v10 = vld [vmem:[#allocation47_spill] sm:$0xff]  ;;  %v13171_v48 = vld [vmem:[#allocation78_spill] sm:$0xff] }
 0x219   :  { %v9070_v37 = vadd.f32 %v1327_v20, %v13169_v51  ;;  %v1448_v45 = vadd.f32 %v1329_v34, %v13170_v10  ;;  %v1534_v20 = vsel %vm1527_vm4, %v1531_v35, %v1533_v54  ;;  %v2333_v53 = vadd.f32 %v8568_v55, %v2285_v0 }
 0x21a   :  { %v2334_v38 = vadd.f32 %v8568_v55, %v2286_v33  ;;  %v1536_v11 = vsel %vm1527_vm4, %v1533_v54, %v1535_v59  ;;  %v1652_v14 = vadd.f32 %v1534_v20, %v995_v42  ;;  %v2146_v49 = vrot.slane %v9030_v44, 6  ;;  %v13173_v42 = vld [vmem:[#allocation81_spill] sm:$0xff]  ;;  %v13214_v44 = vld [vmem:[#allocation162_spill] sm:$0xff] }
 0x21b   :  { %v1653_v21 = vadd.f32 %v1536_v11, %v996_v56  ;;  %v1735_v18 = vrot.slane %v9070_v37, 1  ;;  %v1737_v32 = vrot.slane %v1448_v45, 1  ;;  %v2374_v50 = vmax.f32 %v2333_v53, 0.0 }
 0x21c   :  { %v2375_v25 = vmax.f32 %v2334_v38, 0.0  ;;  %v2148_v31 = vrot.slane %v790_v4, 6  ;;  %v442_v34 = vmul.f32 %v7055_v19, %v13171_v48  ;;  %v443_v56 = vmul.f32 %v7055_v19, %v13173_v42 }
 0x21d   :  { %v1738_v51 = vsel %vm870_vm3, %v1735_v18, %v1737_v32  ;;  %v1740_v59 = vsel %vm870_vm3, %v1737_v32, %v13172_v47  ;;  %v488_v54 = vmul.f32 %v7042_v12, %v13173_v42  ;;  %v2415_v0 = vmin.f32 %v2374_v50, 6.0  ;;  %v13175_v50 = vld [vmem:[#allocation86_spill] sm:$0xff] }
 0x21e   :  { %v2416_v33 = vmin.f32 %v2375_v25, 6.0  ;;  %v9102_v4 = vadd.f32 %v1738_v51, %v1240_v29  ;;  %v1857_v46 = vadd.f32 %v1740_v59, %v1241_v3  ;;  %v2149_v58 = vsel %vm2142_vm5, %v2146_v49, %v2148_v31 }
 0x21f   :  { %v13174_v10 = vrot.slane %v8864_v6, 6  ;;  %v533_v45 = vmul.f32 %v7064_v23, %v13173_v42  ;;  %v578_v20 = vmul.f32 %v12897_v16, %v13134_v28  ;;  %v623_v3 = vmul.f32 %v12903_v61, %v13134_v28 }
 0x220   :  { %v2479_v53 = vpack.c.bf16 %v2416_v33, %v2415_v0  ;;  %v1940_v38 = vrot.slane %v9102_v4, 3  ;;  %v1942_v29 = vrot.slane %v1857_v46, 3  ;;  %v804_v11 = vmul.f32 %v8950_v30, %v13097_v39  ;;  %v13178_v39 = vld [vmem:[#allocation98_spill] sm:$0xff]  ;;  %v13180_v0 = vld [vmem:[#allocation79_spill] sm:$0xff] }
 0x221   :  { %v2151_v17 = vsel %vm2142_vm5, %v2148_v31, %v13174_v10  ;;  %v904_v32 = vrot.slane %v488_v54, 1  ;;  %v1051_v6 = vadd.f32 %v578_v20, %v533_v45  ;;  %v13176_v25 = vrot.slane %v13175_v50, 1 }
 0x222   :  { %6339 = vmatprep.subr.bf16.mxu1 %v2479_v53  ;;  %v1943_v48 = vsel %vm1936_vm6, %v1940_v38, %v1942_v29  ;;  %v13177_v51 = vrot.slane %v8918_v5, 3  ;;  %v13179_v59 = vrot.slane %v13178_v39, 1  ;;  %v13189_v39 = vld [vmem:[#allocation9_spill] sm:$0xff] }
 0x223   :  { %v1152_v31 = vsel %vm870_vm3, %v13176_v25, %v1151_v40  ;;  %v2061_v42 = vadd.f32 %v1943_v48, %v1652_v14  ;;  %v13181_v40 = vrot.slane %v13180_v0, 1  ;;  %v907_v46 = vsel %vm870_vm3, %v904_v32, %v906_v27  ;;  %v13182_v14 = vld [vmem:[#allocation84_spill] sm:$0xff]  ;;  %v13195_v0 = vld [vmem:[#allocation26_spill] sm:$0xff] }
 0x224   :  { %v1945_v28 = vsel %vm1936_vm6, %v1942_v29, %v13177_v51  ;;  %v1255_v47 = vadd.f32 %v1152_v31, %v623_v3  ;;  %v1768_v62 = vsel %vm870_vm3, %v13179_v59, %v1767_v8  ;;  %v1010_v10 = vadd.f32 %v907_v46, %v443_v56 }
 0x225   :  { %v2062_v54 = vadd.f32 %v1945_v28, %v1653_v21  ;;  %v905_v33 = vsel %vm870_vm3, %v13181_v40, %v904_v32  ;;  %v1561_v45 = vrot.slane %v1051_v6, 2  ;;  %v2269_v53 = vadd.f32 %v2149_v58, %v2061_v42  ;;  %v13186_v6 = vld [vmem:[#allocation89_spill] sm:$0xff] }
 0x226   :  { %v1009_v5 = vadd.f32 %v905_v33, %v442_v34  ;;  %v1871_v20 = vadd.f32 %v1768_v62, %v1255_v47  ;;  %v2176_v29 = vrot.slane %v804_v11, 6  ;;  %v787_v8 = vmul.f32 %v8950_v30, %v13115_v24  ;;  %v13184_v11 = vld [vmem:[#allocation104_spill] sm:$0xff] }
 0x227   :  { %v2270_v13 = vadd.f32 %v2151_v17, %v2062_v54  ;;  %v13183_v21 = vrot.slane %v13182_v14, 2  ;;  %v1564_v1 = vsel %vm1527_vm4, %v1561_v45, %v1563_v22  ;;  %v788_v27 = vmul.f32 %v8950_v30, %v13116_v7  ;;  %v13193_v54 = vld [vmem:[#allocation33_spill] sm:$0xff] }
 0x228   :  { %v1970_v50 = vrot.slane %v1871_v20, 3  ;;  %v2317_v34 = vadd.f32 %v8568_v55, %v2269_v53  ;;  %v1667_v17 = vadd.f32 %v1564_v1, %v1010_v10  ;;  %v13185_v24 = vrot.slane %v13184_v11, 3  ;;  %v13199_v20 = vld [vmem:[#allocation28_spill] sm:$0xff] }
 0x229   :  { %v1562_v3 = vsel %vm1527_vm4, %v13183_v21, %v1561_v45  ;;  %v2318_v56 = vadd.f32 %v8568_v55, %v2270_v13  ;;  %v13187_v22 = vrot.slane %v13186_v6, 6  ;;  %v2179_v7 = vsel %vm2142_vm5, %v2176_v29, %v2178_v41  ;;  %v13200_v13 = vld [vmem:[#allocation34_spill] sm:$0xff]  ;;  %v13202_v21 = vld [vmem:[#allocation41_spill] sm:$0xff] }
 0x22a   :  { %v1666_v58 = vadd.f32 %v1562_v3, %v1009_v5  ;;  %v1971_v32 = vsel %vm1936_vm6, %v13185_v24, %v1970_v50  ;;  %v1973_v2 = vsel %vm1936_vm6, %v1970_v50, %v1972_v43  ;;  %v2358_v31 = vmax.f32 %v2317_v34, 0.0  ;;  %v13191_v43 = vld [vmem:[#allocation15_spill] sm:$0xff]  ;;  %v13203_v34 = vld [vmem:[#allocation16_spill] sm:$0xff] }
 0x22b   :  { %v2177_v25 = vsel %vm2142_vm5, %v13187_v22, %v2176_v29  ;;  %v2359_v48 = vmax.f32 %v2318_v56, 0.0  ;;  %v2076_v28 = vadd.f32 %v1973_v2, %v1667_v17  ;;  %v13188_v47 = vrot.slane %v13153_v63, 1  ;;  %v13201_v29 = vld [vmem:[#allocation38_spill] sm:$0xff]  ;;  %v13208_v2 = vld [vmem:[#allocation12_spill] sm:$0xff] }
 0x22c   :  { %v2075_v51 = vadd.f32 %v1971_v32, %v1666_v58  ;;  %v13190_v59 = vrot.slane %v13189_v39, 1  ;;  %v13192_v62 = vrot.slane %v13191_v43, 1  ;;  %v13194_v57 = vrot.slane %v13193_v54, 1  ;;  %v13205_v58 = vld [vmem:[#allocation13_spill] sm:$0xff] }
 0x22d   :  { %v13196_v41 = vrot.slane %v13195_v0, 1  ;;  %v13197_v33 = vrot.slane %v13165_v26, 1  ;;  %v2399_v5 = vmin.f32 %v2358_v31, 6.0  ;;  %v2400_v10 = vmin.f32 %v2359_v48, 6.0 }
 0x22e   :  { %v875_v9 = vsel %vm870_vm3, %v13190_v59, %v13188_v47  ;;  %v1120_v42 = vsel %vm870_vm3, %v13192_v62, %v1119_v36  ;;  %v13198_v63 = vmov %v13194_v57  ;;  %v2283_v45 = vadd.f32 %v2177_v25, %v2075_v51 }
 0x22f   :  { %v1323_v40 = vsel %vm870_vm3, %v13196_v41, %v13194_v57  ;;  %v1325_v46 = vsel %vm870_vm3, %v13198_v63, %v13197_v33  ;;  %v2284_v52 = vadd.f32 %v2179_v7, %v2076_v28  ;;  %v994_v53 = vadd.f32 %v875_v9, %v13199_v20  ;;  %v13209_v9 = vld [vmem:[#allocation18_spill] sm:$0xff]  ;;  %v13211_v57 = vld [vmem:[#allocation139_spill] sm:$0xff] }
 0x230   :  { %v1239_v36 = vadd.f32 %v1120_v42, %v13200_v13  ;;  %v1445_v14 = vadd.f32 %v1323_v40, %v13201_v29  ;;  %v1446_v3 = vadd.f32 %v1325_v46, %v13202_v21  ;;  %v2471_v1 = vpack.c.bf16 %v2400_v10, %v2399_v5  ;;  %v13210_v42 = vld [vmem:[#allocation175_spill] sm:$0xff]  ;;  %v13213_v46 = vld [vmem:[#allocation157_spill] sm:$0xff]  ;;  %v13215_v20 = vld [vmem:[#allocation170_spill] sm:$0xff] }
 0x231   :  { %v2331_v50 = vadd.f32 %v8568_v55, %v2283_v45  ;;  %v2332_v26 = vadd.f32 %v8568_v55, %v2284_v52  ;;  %v13204_v56 = vrot.slane %v13203_v34, 2  ;;  %v13206_v17 = vrot.slane %v13205_v58, 2  ;;  %v13217_v13 = vld [vmem:[#allocation166_spill] sm:$0xff] }
 0x232   :  { %v1732_v22 = vrot.slane %v1445_v14, 1  ;;  %v1733_v25 = vrot.slane %v1446_v3, 1  ;;  %6340 = vmatpush3.bf16.msra.mxu1 %v2471_v1  ;;  %v2143_v51 = vrot.slane %v787_v8, 6  ;;  %v2144_v60 = vrot.slane %v788_v27, 6  ;;  %v13212_v27 = vld [vmem:[#allocation153_spill] sm:$0xff] }
 0x233   :  { %v1530_v11 = vsel %vm1527_vm4, %v13206_v17, %v13204_v56  ;;  %v13207_v24 = vmov %v13204_v56  ;;  %v2372_v7 = vmax.f32 %v2331_v50, 0.0  ;;  %v2373_v31 = vmax.f32 %v2332_v26, 0.0 }
 0x234   :  { %v1532_v32 = vsel %vm1527_vm4, %v13207_v24, %v1531_v35  ;;  %v1650_v6 = vadd.f32 %v1530_v11, %v13208_v2  ;;  %v1734_v28 = vsel %vm870_vm3, %v1732_v22, %v1733_v25  ;;  %v1736_v47 = vsel %vm870_vm3, %v1733_v25, %v1735_v18  ;;  %v13222_v22 = vld [vmem:[#allocation164_spill] sm:$0xff] }
 0x235   :  { %v1651_v48 = vadd.f32 %v1532_v32, %v994_v53  ;;  %v2355_v39 = vadd.f32 %v8568_v55, %v8407_v15  ;;  %v2413_v35 = vmin.f32 %v2372_v7, 6.0  ;;  %v2414_v59 = vmin.f32 %v2373_v31, 6.0  ;;  %v13221_v32 = vld [vmem:[#allocation169_spill] sm:$0xff] }
 0x236   :  { %v1854_v43 = vadd.f32 %v1734_v28, %v13209_v9  ;;  %v1855_v62 = vadd.f32 %v1736_v47, %v1239_v36  ;;  %v2012_v54 = vrot.slane %v13210_v42, 3  ;;  %v2014_v0 = vrot.slane %v13211_v57, 3 }
 0x237   :  { %v2145_v8 = vsel %vm2142_vm5, %v2143_v51, %v2144_v60  ;;  %v2396_v41 = vmax.f32 %v2355_v39, 0.0  ;;  %v2478_v40 = vpack.c.bf16 %v2414_v59, %v2413_v35  ;;  %v2147_v18 = vsel %vm2142_vm5, %v2144_v60, %v2146_v49  ;;  %v13224_v60 = vld [vmem:[#allocation174_spill] sm:$0xff] }
 0x238   :  { %v1937_v37 = vrot.slane %v1854_v43, 3  ;;  %v1938_v33 = vrot.slane %v1855_v62, 3  ;;  %v509_v63 = vmul.f32 %v7042_v12, %v13212_v27  ;;  %v510_v5 = vmul.f32 %v7042_v12, %v13213_v46  ;;  %v13226_v43 = vld [vmem:[#allocation151_spill] sm:$0xff] }
 0x239   :  { %v2437_v15 = vmin.f32 %v2396_v41, 6.0  ;;  %v554_v10 = vmul.f32 %v7064_v23, %v13212_v27  ;;  %6341 = vmatprep.subr.bf16.mxu1 %v2478_v40  ;;  %v599_v49 = vmul.f32 %v12897_v16, %v13214_v44  ;;  %v13216_v53 = vrot.slane %v13215_v20, 2  ;;  %v13227_v40 = vld [vmem:[#allocation148_spill] sm:$0xff] }
 0x23a   :  { %v1939_v45 = vsel %vm1936_vm6, %v1937_v37, %v1938_v33  ;;  %v1941_v52 = vsel %vm1936_vm6, %v1938_v33, %v1940_v38  ;;  %v13218_v36 = vrot.slane %v13217_v13, 2  ;;  %v946_v1 = vrot.slane %v509_v63, 1  ;;  %v13219_v38 = vld [vmem:[#allocation138_spill] sm:$0xff]  ;;  %v13228_v13 = vld [vmem:[#allocation172_spill] sm:$0xff] }
 0x23b   :  { %v2059_v14 = vadd.f32 %v1939_v45, %v1650_v6  ;;  %v2060_v21 = vadd.f32 %v1941_v52, %v1651_v48  ;;  %v2490_v3 = vpack.c.bf16 %v2437_v15, %v2437_v15  ;;  %v948_v50 = vrot.slane %v510_v5, 1 }
 0x23c   :  { %v1608_v29 = vsel %vm1527_vm4, %v13218_v36, %v13216_v53  ;;  %v9232_v26 = vadd.f32 %v599_v49, %v554_v10  ;;  %v2015_v4 = vsel %vm1936_vm6, %v2012_v54, %v2014_v0  ;;  %v13220_v34 = vrot.slane %v13219_v38, 3 }
 0x23d   :  { %v2267_v58 = vadd.f32 %v2145_v8, %v2059_v14  ;;  %v2268_v17 = vadd.f32 %v2147_v18, %v2060_v21  ;;  %v464_v11 = vmul.f32 %v7055_v19, %v13212_v27  ;;  %v465_v24 = vmul.f32 %v7055_v19, %v13213_v46 }
 0x23e   :  { %v2017_v56 = vsel %vm1936_vm6, %v2014_v0, %v13220_v34  ;;  %v1803_v2 = vrot.slane %v13221_v32, 1  ;;  %v949_v6 = vsel %vm870_vm3, %v946_v1, %v948_v50  ;;  %v13223_v25 = vrot.slane %v13222_v22, 1  ;;  %v13230_v34 = vld [vmem:[#allocation155_spill] sm:$0xff]  ;;  %v13231_v22 = vld [vmem:[#allocation158_spill] sm:$0xff] }
 0x23f   :  { %v1603_v31 = vrot.slane %v9232_v26, 2  ;;  %v2315_v48 = vadd.f32 %v8568_v55, %v2267_v58  ;;  %v2316_v51 = vadd.f32 %v8568_v55, %v2268_v17  ;;  %v1031_v28 = vadd.f32 %v949_v6, %v464_v11  ;;  %v9289_v58 = vld [vmem:[%s12321_s3] ss:$0 sm:$0xff]  ;;  %v6533_v6 = vld [vmem:[%s12322_s4 + $0x1c] ss:$12 sps:$4 sm:$0xff]  }
 0x240   :  { %v951_v7 = vsel %vm870_vm3, %v948_v50, %v13223_v25  ;;  %v2010_v39 = vrot.slane %v13224_v60, 3  ;;  %v2637_v35 = vsel %vm2142_vm5, %v2490_v3, 0  ;;  %v13225_v59 = vmov %v13218_v36  ;;  %v6530_v50 = vld [vmem:[%s12322_s4] ss:$12 sps:$4 sm:$0xff]  }
 0x241   :  { %v1032_v47 = vadd.f32 %v951_v7, %v465_v24  ;;  %v1606_v9 = vsel %vm1527_vm4, %v1603_v31, %v13225_v59  ;;  %v508_v62 = vmul.f32 %v7042_v12, %v13226_v43  ;;  %v2356_v57 = vmax.f32 %v2315_v48, 0.0 }
 0x242   :  { %v2357_v0 = vmax.f32 %v2316_v51, 0.0  ;;  %v1688_v8 = vadd.f32 %v1606_v9, %v1031_v28  ;;  %v9261_v55 = vmul.f32 %v7042_v12, %v13227_v40  ;;  %v553_v37 = vmul.f32 %v7064_v23, %v13226_v43  ;;  %v13233_v51 = vld [vmem:[#allocation171_spill] sm:$0xff] }
 0x243   :  { %v1689_v41 = vadd.f32 %v1608_v29, %v1032_v47  ;;  %v597_v33 = vmul.f32 %v12897_v16, %v13212_v27  ;;  %v598_v18 = vmul.f32 %v12897_v16, %v13213_v46  ;;  %v2397_v15 = vmin.f32 %v2356_v57, 6.0  ;;  %v13229_v29 = vld [vmem:[#allocation173_spill] sm:$0xff] }
 0x244   :  { %v2398_v63 = vmin.f32 %v2357_v0, 6.0  ;;  %v2097_v5 = vadd.f32 %v2015_v4, %v1688_v8  ;;  %v462_v45 = vmul.f32 %v7055_v19, %v13227_v40  ;;  %v463_v52 = vmul.f32 %v7055_v19, %v13226_v43 }
 0x245   :  { %v2098_v10 = vadd.f32 %v2017_v56, %v1689_v41  ;;  %v552_v49 = vmul.f32 %v7064_v23, %v13227_v40  ;;  %v944_v20 = vrot.slane %v508_v62, 1  ;;  %v1071_v21 = vadd.f32 %v598_v18, %v553_v37  ;;  %v13235_v41 = vld [vmem:[#allocation168_spill] sm:$0xff]  ;;  %v13237_v37 = vld [vmem:[#allocation165_spill] sm:$0xff] }
 0x246   :  { %v2470_v53 = vpack.c.bf16 %v2398_v63, %v2397_v15  ;;  %v2305_v36 = vadd.f32 %v13228_v13, %v2097_v5  ;;  %v642_v26 = vmul.f32 %v12903_v61, %v13212_v27  ;;  %v1187_v56 = vrot.slane %v13230_v34, 1  ;;  %v13239_v18 = vld [vmem:[#allocation161_spill] sm:$0xff]  ;;  %v13240_v13 = vld [vmem:[#allocation144_spill] sm:$0xff] }
 0x247   :  { %v2306_v14 = vadd.f32 %v13229_v29, %v2098_v10  ;;  %v947_v4 = vsel %vm870_vm3, %v944_v20, %v946_v1  ;;  %v9283_v38 = vadd.f32 %v597_v33, %v552_v49  ;;  %v9295_v24 = vmul.f32 %v8950_v30, %v13214_v44  ;;  %v13241_v29 = vld [vmem:[#allocation146_spill] sm:$0xff]  ;;  %v6539_v34 = vld [vmem:[%s12322_s4 + $0x4c] ss:$12 sps:$4 sm:$0xff]  }
 0x248   :  { %6342 = vmatpush3.bf16.msra.mxu1 %v2470_v53  ;;  %v2353_v17 = vadd.f32 %v9289_v58, %v2305_v36  ;;  %v942_v1 = vrot.slane %v9261_v55, 1  ;;  %v13232_v25 = vrot.slane %v13231_v22, 1  ;;  %v1601_v48 = vrot.slane %v1071_v21, 2 }
 0x249   :  { %v2354_v11 = vadd.f32 %v9289_v58, %v2306_v14  ;;  %6524 = vmatprep.subr.msk.bf16.mxu1 %vm2142_vm5, %v2490_v3  ;;  %v13234_v28 = vrot.slane %v13233_v51, 1  ;;  %v2013_v47 = vsel %vm1936_vm6, %v2010_v39, %v2012_v54  ;;  %v1030_v62 = vadd.f32 %v947_v4, %v463_v52 }
 0x24a   :  { %v1190_v7 = vsel %vm870_vm3, %v1187_v56, %v13232_v25  ;;  %v2394_v3 = vmax.f32 %v2353_v17, 0.0  ;;  %v945_v9 = vsel %vm870_vm3, %v942_v1, %v944_v20  ;;  %v1599_v0 = vrot.slane %v9283_v38, 2  ;;  %v6536_v25 = vld [vmem:[%s12322_s4 + $0x34] ss:$12 sps:$4 sm:$0xff]  }
 0x24b   :  { %v1806_v44 = vsel %vm870_vm3, %v1803_v2, %v13234_v28  ;;  %v2395_v59 = vmax.f32 %v2354_v11, 0.0  ;;  %2672 = vmatmul.mubr.bf16.vlgmr.msra.gmra.mxu1 %v6530_v50  ;;  %v1274_v57 = vadd.f32 %v1190_v7, %v642_v26  ;;  %v1604_v8 = vsel %vm1527_vm4, %v1601_v48, %v1603_v31 }
 0x24c   :  { %v13236_v55 = vrot.slane %v13235_v41, 6  ;;  %v13238_v33 = vrot.slane %v13237_v37, 6  ;;  %v1390_v15 = vrot.slane %v13239_v18, 1  ;;  %6499 = vmatpush3.bf16.msra.mxu1 %v2637_v35  ;;  %v2435_v54 = vmin.f32 %v2394_v3, 6.0  ;;  %2679 = vmatprep.mubr.bf16.mxu1 %v6533_v6  ;;  %v13244_v37 = vld [vmem:[#allocation150_spill] sm:$0xff] }
 0x24d   :  { %v2436_v63 = vmin.f32 %v2395_v59, 6.0  ;;  %v1687_v5 = vadd.f32 %v1604_v8, %v1030_v62  ;;  %v1029_v10 = vadd.f32 %v945_v9, %v462_v45  ;;  %v1602_v52 = vsel %vm1527_vm4, %v1599_v0, %v1601_v48  ;;  %v6535_v45 = vld [vmem:[%s12322_s4 + $0x18] ss:$12 sps:$4 sm:$0xff]   ;;  %v13243_v62 = vld [vmem:[#allocation152_spill] sm:$0xff] }
 0x24e   :  { %v2219_v42 = vsel %vm2142_vm5, %v13238_v33, %v13236_v55  ;;  %v9329_v49 = vadd.f32 %v1806_v44, %v1274_v57  ;;  %v2214_v31 = vrot.slane %v9295_v24, 6  ;;  %v460_v36 = vmul.f32 %v7055_v19, %v13240_v13  ;;  %v13245_v18 = vld [vmem:[#allocation154_spill] sm:$0xff] }
 0x24f   :  { %v2489_v20 = vpack.c.bf16 %v2436_v63, %v2435_v54  ;;  %v2096_v53 = vadd.f32 %v2013_v47, %v1687_v5  ;;  %v506_v35 = vmul.f32 %v7042_v12, %v13241_v29  ;;  %v9342_v21 = vmul.f32 %v7042_v12, %v13240_v13  ;;  %v13247_v5 = vld [vmem:[#allocation163_spill] sm:$0xff] }
 0x250   :  { %v2008_v14 = vrot.slane %v9329_v49, 3  ;;  %v595_v50 = vmul.f32 %v12897_v16, %v13227_v40  ;;  %v596_v26 = vmul.f32 %v12897_v16, %v13226_v43  ;;  %v1686_v4 = vadd.f32 %v1602_v52, %v1029_v10 }
 0x251   :  { %6500 = vmatprep.subr.bf16.mxu1 %v2489_v20  ;;  %v13242_v17 = vmov %v13238_v33  ;;  %v2304_v6 = vadd.f32 %v2219_v42, %v2096_v53  ;;  %v461_v22 = vmul.f32 %v7055_v19, %v13241_v29  ;;  %v550_v48 = vmul.f32 %v7064_v23, %v13240_v13 }
 0x252   :  { %v2217_v11 = vsel %vm2142_vm5, %v2214_v31, %v13242_v17  ;;  %6501 = vmatpush3.bf16.msra.mxu1 %v2489_v20  ;;  %v2011_v7 = vsel %vm1936_vm6, %v2008_v14, %v2010_v39  ;;  %v551_v51 = vmul.f32 %v7064_v23, %v13241_v29  ;;  %v940_v28 = vrot.slane %v506_v35, 1 }
 0x253   :  { %v2095_v44 = vadd.f32 %v2011_v7, %v1686_v4  ;;  %v2352_v47 = vadd.f32 %v9289_v58, %v2304_v6  ;;  %v640_v3 = vmul.f32 %v12903_v61, %v13227_v40  ;;  %v641_v60 = vmul.f32 %v12903_v61, %v13226_v43  ;;  %2680 = vmatmul.mubr.bf16.gmra.mxu1 %v6535_v45  ;;  %v13250_v45 = vld [vmem:[#allocation159_spill] sm:$0xff] }
 0x254   :  { %v938_v59 = vrot.slane %v9342_v21, 1  ;;  %v9373_v39 = vadd.f32 %v595_v50, %v550_v48  ;;  %v1069_v9 = vadd.f32 %v596_v26, %v551_v51  ;;  %v1185_v57 = vrot.slane %v13243_v62, 1  ;;  %2687 = vmatprep.mubr.bf16.mxu1 %v6536_v25 }
 0x255   :  { %v2303_v8 = vadd.f32 %v2217_v11, %v2095_v44  ;;  %v2393_v41 = vmax.f32 %v2352_v47, 0.0  ;;  %v9378_v55 = vmul.f32 %v8950_v30, %v13212_v27  ;;  %v1183_v33 = vrot.slane %v13244_v37, 1 }
 0x256   :  { %v941_v40 = vsel %vm870_vm3, %v938_v59, %v940_v28  ;;  %v943_v42 = vsel %vm870_vm3, %v940_v28, %v942_v1  ;;  %v13246_v54 = vrot.slane %v13245_v18, 1  ;;  %v13248_v10 = vrot.slane %v13247_v5, 1  ;;  %v13249_v1 = vld [vmem:[#allocation156_spill] sm:$0xff] }
 0x257   :  { %v2351_v27 = vadd.f32 %v9289_v58, %v2303_v8  ;;  %v822_v20 = vmul.f32 %v8950_v30, %v13213_v46  ;;  %v1186_v53 = vsel %vm870_vm3, %v1183_v33, %v1185_v57  ;;  %v1188_v13 = vsel %vm870_vm3, %v1185_v57, %v1187_v56  ;;  %v13251_v8 = vld [vmem:[#allocation143_spill] sm:$0xff] }
 0x258   :  { %v1391_v63 = vsel %vm870_vm3, %v13246_v54, %v1390_v15  ;;  %v1393_v52 = vsel %vm870_vm3, %v1390_v15, %v13248_v10  ;;  %v1595_v26 = vrot.slane %v9373_v39, 2  ;;  %v1597_v4 = vrot.slane %v1069_v9, 2  ;;  %v6538_v15 = vld [vmem:[%s12322_s4 + $0x30] ss:$12 sps:$4 sm:$0xff]  }
 0x259   :  { %v1479_v35 = vadd.f32 %v1391_v63, %v13249_v1  ;;  %v1480_v50 = vadd.f32 %v1393_v52, %v13250_v45  ;;  %v2392_v17 = vmax.f32 %v2351_v27, 0.0  ;;  %v2434_v11 = vmin.f32 %v2393_v41, 6.0  ;;  %v13254_v63 = vld [vmem:[#allocation160_spill] sm:$0xff]  ;;  %v13256_v10 = vld [vmem:[#allocation141_spill] sm:$0xff] }
 0x25a   :  { %v1027_v46 = vadd.f32 %v941_v40, %v460_v36  ;;  %v1028_v6 = vadd.f32 %v943_v42, %v461_v22  ;;  %v1272_v56 = vadd.f32 %v1186_v53, %v640_v3  ;;  %v1598_v25 = vsel %vm1527_vm4, %v1595_v26, %v1597_v4  ;;  %v13252_v40 = vld [vmem:[#allocation147_spill] sm:$0xff]  ;;  %v6542_v27 = vld [vmem:[%s12322_s4 + $0x64] ss:$12 sps:$4 sm:$0xff]  }
 0x25b   :  { %v1799_v7 = vrot.slane %v1479_v35, 1  ;;  %v1801_v48 = vrot.slane %v1480_v50, 1  ;;  %v2433_v51 = vmin.f32 %v2392_v17, 6.0  ;;  %v1273_v28 = vadd.f32 %v1188_v13, %v641_v60  ;;  %2688 = vmatmul.mubr.bf16.gmra.mxu1 %v6538_v15  ;;  %v13258_v13 = vld [vmem:[#allocation140_spill] sm:$0xff]  ;;  %v13259_v17 = vld [vmem:[#allocation145_spill] sm:$0xff] }
 0x25c   :  { %v1600_v44 = vsel %vm1527_vm4, %v1597_v4, %v1599_v0  ;;  %v2210_v47 = vrot.slane %v9378_v55, 6  ;;  %v1684_v39 = vadd.f32 %v1598_v25, %v1027_v46  ;;  %v2212_v3 = vrot.slane %v822_v20, 6  ;;  %2695 = vmatprep.mubr.bf16.mxu1 %v6539_v34 }
 0x25d   :  { %v1802_v36 = vsel %vm870_vm3, %v1799_v7, %v1801_v48  ;;  %v1804_v22 = vsel %vm870_vm3, %v1801_v48, %v1803_v2  ;;  %v2488_v9 = vpack.c.bf16 %v2434_v11, %v2433_v51  ;;  %v504_v60 = vmul.f32 %v7042_v12, %v13251_v8 }
 0x25e   :  { %v1888_v62 = vadd.f32 %v1802_v36, %v1272_v56  ;;  %v1889_v57 = vadd.f32 %v1804_v22, %v1273_v28  ;;  %v1685_v38 = vadd.f32 %v1600_v44, %v1028_v6  ;;  %v549_v0 = vmul.f32 %v7064_v23, %v13251_v8 }
 0x25f   :  { %v594_v41 = vmul.f32 %v12897_v16, %v13241_v29  ;;  %v639_v32 = vmul.f32 %v12903_v61, %v13241_v29  ;;  %6502 = vmatprep.subr.bf16.mxu1 %v2488_v9  ;;  %v936_v37 = vrot.slane %v504_v60, 1  ;;  %v13253_v42 = vrot.slane %v13252_v40, 1  ;;  %v6541_v61 = vld [vmem:[%s12322_s4 + $0x48] ss:$12 sps:$4 sm:$0xff]  }
 0x260   :  { %v2004_v2 = vrot.slane %v1888_v62, 3  ;;  %v2006_v55 = vrot.slane %v1889_v57, 3  ;;  %6503 = vmatpush3.bf16.msra.mxu1 %v2488_v9  ;;  %v820_v12 = vmul.f32 %v8950_v30, %v13226_v43  ;;  %v13255_v5 = vrot.slane %v13254_v63, 1  ;;  %v6553_v63 = vld [vmem:[%s12322_s4 + $0xa8] ss:$12 sps:$4 sm:$0x1f]  }
 0x261   :  { %v1184_v18 = vsel %vm870_vm3, %v13253_v42, %v1183_v33  ;;  %v1067_v54 = vadd.f32 %v594_v41, %v549_v0  ;;  %v13257_v52 = vrot.slane %v13256_v10, 1  ;;  %v939_v43 = vsel %vm870_vm3, %v936_v37, %v938_v59  ;;  %v6559_v10 = vld [vmem:[%s12322_s4 + $0x80] ss:$12 sps:$4 sm:$0xff]  }
 0x262   :  { %v1271_v23 = vadd.f32 %v1184_v18, %v639_v32  ;;  %v1800_v16 = vsel %vm870_vm3, %v13255_v5, %v1799_v7  ;;  %v2007_v29 = vsel %vm1936_vm6, %v2004_v2, %v2006_v55  ;;  %v2009_v33 = vsel %vm1936_vm6, %v2006_v55, %v2008_v14  ;;  %v13261_v7 = vld [vmem:[#allocation167_spill] sm:$0xff]  ;;  %v6547_v18 = vld [vmem:[%s12322_s4 + $0x78] ss:$12 sps:$4 sm:$0xff]  }
 0x263   :  { %v937_v30 = vsel %vm870_vm3, %v13257_v52, %v936_v37  ;;  %v2093_v20 = vadd.f32 %v2007_v29, %v1684_v39  ;;  %v2094_v53 = vadd.f32 %v2009_v33, %v1685_v38  ;;  %v458_v1 = vmul.f32 %v7055_v19, %v13258_v13  ;;  %2696 = vmatmul.mubr.bf16.gmra.mxu1 %v6541_v61  ;;  %v6554_v5 = vld [vmem:[%s12322_s4 + $0x8] ss:$12 sps:$4 sm:$0xff]   ;;  %v6556_v61 = vld [vmem:[%s12322_s4 + $0x38] ss:$12 sps:$4 sm:$0xff]   ;;  %v6557_v29 = vld [vmem:[%s12322_s4 + $0x50] ss:$12 sps:$4 sm:$0xff]  }
 0x264   :  { %v459_v49 = vmul.f32 %v7055_v19, %v13251_v8  ;;  %v2213_v14 = vsel %vm2142_vm5, %v2210_v47, %v2212_v3  ;;  %v2215_v21 = vsel %vm2142_vm5, %v2212_v3, %v2214_v31  ;;  %v1593_v35 = vrot.slane %v1067_v54, 2  ;;  %2703 = vmatprep.mubr.bf16.mxu1 %v6542_v27  ;;  %v13263_v3 = vld [vmem:[#allocation149_spill] sm:$0xff]  ;;  %v6558_v33 = vld [vmem:[%s12322_s4 + $0x68] ss:$12 sps:$4 sm:$0xff]  }
 0x265   :  { %v1887_v59 = vadd.f32 %v1800_v16, %v1271_v23  ;;  %v2301_v45 = vadd.f32 %v2213_v14, %v2093_v20  ;;  %v2302_v50 = vadd.f32 %v2215_v21, %v2094_v53  ;;  %v1025_v4 = vadd.f32 %v937_v30, %v458_v1  ;;  %v6545_v8 = vld [vmem:[%s12322_s4 + $0x7c] ss:$12 sps:$4 sm:$0xff]   ;;  %v6551_v23 = vld [vmem:[%s12322_s4 + $0xac] ss:$12 sps:$4 sm:$0x1f]  }
 0x266   :  { %v1026_v15 = vadd.f32 %v939_v43, %v459_v49  ;;  %v13260_v11 = vrot.slane %v13259_v17, 2  ;;  %v1596_v6 = vsel %vm1527_vm4, %v1593_v35, %v1595_v26  ;;  %v2208_v34 = vrot.slane %v820_v12, 6  ;;  %v6544_v26 = vld [vmem:[%s12322_s4 + $0x60] ss:$12 sps:$4 sm:$0xff]   ;;  %v6560_v52 = vld [vmem:[%s12322_s4 + $0x98] ss:$12 sps:$4 sm:$0xff]  }
 0x267   :  { %v2002_v19 = vrot.slane %v1887_v59, 3  ;;  %v2349_v24 = vadd.f32 %v9289_v58, %v2301_v45  ;;  %v2350_v31 = vadd.f32 %v9289_v58, %v2302_v50  ;;  %v13262_v48 = vrot.slane %v13261_v7, 3  ;;  %v6548_v12 = vld [vmem:[%s12322_s4 + $0x94] ss:$12 sps:$4 sm:$0xff]   ;;  %v6562_v43 = vld [vmem:[%s12323_s7 + $0x70] ss:$8 sps:$4 sm:$0xff]  }
 0x268   :  { %v1594_v46 = vsel %vm1527_vm4, %v13260_v11, %v1593_v35  ;;  %v1683_v25 = vadd.f32 %v1596_v6, %v1026_v15  ;;  %v13264_v9 = vrot.slane %v13263_v3, 6  ;;  %v2211_v57 = vsel %vm2142_vm5, %v2208_v34, %v2210_v47  ;;  %v6555_v16 = vld [vmem:[%s12322_s4 + $0x20] ss:$12 sps:$4 sm:$0xff]   ;;  %v6561_v30 = vld [vmem:[%s12322_s4 + $0xb0] ss:$12 sps:$4 sm:$0x1f]  }
 0x269   :  { %v1682_v56 = vadd.f32 %v1594_v46, %v1025_v4  ;;  %v2003_v51 = vsel %vm1936_vm6, %v13262_v48, %v2002_v19  ;;  %v2005_v28 = vsel %vm1936_vm6, %v2002_v19, %v2004_v2  ;;  %v2390_v44 = vmax.f32 %v2349_v24, 0.0  ;;  %v6564_v27 = vld [vmem:[%s12323_s7 + $0x74] ss:$8 sps:$4 sm:$0xff]   ;;  %v6565_v20 = vld [vmem:[%s12323_s7 + $0x60] ss:$8 sps:$4 sm:$0xff]  }
 0x26a   :  { %v2391_v39 = vmax.f32 %v2350_v31, 0.0  ;;  %v2092_v22 = vadd.f32 %v2005_v28, %v1683_v25  ;;  %v2209_v62 = vsel %vm2142_vm5, %v13264_v9, %v2208_v34  ;;  %v6567_v53 = vld [vmem:[%s12323_s7 + $0x64] ss:$8 sps:$4 sm:$0xff]   ;;  %v6570_v13 = vld [vmem:[%s12323_s7 + $0x54] ss:$8 sps:$4 sm:$0xff]   ;;  %v12572_v4 = vmov 0  }
 0x26b   :  { %v2091_v36 = vadd.f32 %v2003_v51, %v1682_v56  ;;  %v2431_v60 = vmin.f32 %v2390_v44, 6.0  ;;  %2704 = vmatmul.mubr.bf16.gmra.mxu1 %v6544_v26  ;;  %v6568_v1 = vld [vmem:[%s12323_s7 + $0x50] ss:$8 sps:$4 sm:$0xff]   ;;  %v6571_v49 = vld [vmem:[%s12323_s7 + $0x40] ss:$8 sps:$4 sm:$0xff]   ;;  %5307 = vmatprep.mubr.bf16.mxu0 %v12572_v4 }
 0x26c   :  { %v2432_v38 = vmin.f32 %v2391_v39, 6.0  ;;  %v2300_v41 = vadd.f32 %v2211_v57, %v2092_v22  ;;  %2711 = vmatprep.mubr.bf16.mxu1 %v6545_v8  ;;  %v6573_v14 = vld [vmem:[%s12323_s7 + $0x44] ss:$8 sps:$4 sm:$0xff]   ;;  %v6574_v21 = vld [vmem:[%s12323_s7 + $0x30] ss:$8 sps:$4 sm:$0xff]  }
 0x26d   :  { %v2299_v0 = vadd.f32 %v2209_v62, %v2091_v36  ;;  %v6576_v35 = vld [vmem:[%s12323_s7 + $0x34] ss:$8 sps:$4 sm:$0xff]   ;;  %v6577_v59 = vld [vmem:[%s12323_s7 + $0x20] ss:$8 sps:$4 sm:$0xff]   ;;  %v6579_v45 = vld [vmem:[%s12323_s7 + $0x24] ss:$8 sps:$4 sm:$0xff]  }
 0x26e   :  { %v2487_v32 = vpack.c.bf16 %v2432_v38, %v2431_v60  ;;  %v2348_v55 = vadd.f32 %v9289_v58, %v2300_v41  ;;  %v6582_v50 = vld [vmem:[%s12323_s7 + $0x14] ss:$8 sps:$4 sm:$0xff]   ;;  %v6580_v15 = vld [vmem:[%s12323_s7 + $0x10] ss:$8 sps:$4 sm:$0xff]   ;;  %v6585_v17 = vld [vmem:[%s12323_s7 + $0x4] ss:$8 sps:$4 sm:$0xff]  }
 0x26f   :  { %v2347_v2 = vadd.f32 %v9289_v58, %v2299_v0  ;;  %v6550_v58 = vld [vmem:[%s12322_s4 + $0x90] ss:$12 sps:$4 sm:$0xff]   ;;  %v6583_v11 = vld [vmem:[%s12323_s7] ss:$8 sps:$4 sm:$0xff]  }
 0x270   :  { %6504 = vmatprep.subr.bf16.mxu1 %v2487_v32  ;;  %v2389_v40 = vmax.f32 %v2348_v55, 0.0 }
 0x271   :  { %v2388_v37 = vmax.f32 %v2347_v2, 0.0  ;;  %6505 = vmatpush3.bf16.msra.mxu1 %v2487_v32 }
 0x272   :  { %v2430_v42 = vmin.f32 %v2389_v40, 6.0 }
 0x273   :  { %v2429_v47 = vmin.f32 %v2388_v37, 6.0  ;;  %2712 = vmatmul.mubr.bf16.gmra.mxu1 %v6547_v18 }
 0x274   :  { %2719 = vmatprep.mubr.bf16.mxu1 %v6548_v12 }
 0x275   :  { %v2486_v54 = vpack.c.bf16 %v2430_v42, %v2429_v47 }
 0x277   :  { %6506 = vmatprep.subr.bf16.mxu1 %v2486_v54 }
 0x278   :  { %6507 = vmatpush3.bf16.msra.mxu1 %v2486_v54 }
 0x279   :  { %3618 = vmatprep.subr.bf16.mxu1 %v6564_v27  ;;  %v13267_v27 = vld [vmem:[#allocation8_spill] sm:$0xff] }
 0x27b   :  { %2720 = vmatmul.mubr.bf16.gmra.mxu1 %v6550_v58 }
 0x27c   :  { %2727 = vmatprep.mubr.bf16.mxu1 %v6551_v23 }
 0x283   :  { %2728 = vmatmul.mubr.bf16.gmra.mxu1 %v6553_v63 }
 0x284   :  { %6508 = vmatprep.mubr.msk.bf16.mxu1 %vm2611_vm7, %v6554_v5 }
 0x28b   :  { %6509 = vmatmul.mubr.msk.bf16.vlgmr.msra.gmra.mxu1 %vm2611_vm7, %v6555_v16 }
 0x28c   :  { %6512 = vmatprep.mubr.msk.bf16.mxu1 %vm2611_vm7, %v6556_v61  ;;  %3619 = vmatpush1.bf16.msra.mxu1 %v6562_v43  ;;  %v2833_v61 = vld [vmem:[%s12324_s5] sm:$0xff] }
 0x28d   :  { %3620 = vmatprep.subr.bf16.mxu1 %v6567_v53 }
 0x290   :  { %3621 = vmatpush1.bf16.msra.mxu1 %v6565_v20  ;;  %v9603_v20 = vrot.slane %v2833_v61, %v13267_v27 }
 0x291   :  { %3622 = vmatprep.subr.bf16.mxu1 %v6570_v13  ;;  %v13268_v13 = vld [vmem:[#allocation6_spill] sm:$0xff] }
 0x293   :  { %6513 = vmatmul.mubr.msk.bf16.gmra.mxu1 %vm2611_vm7, %v6557_v29 }
 0x294   :  { %6516 = vmatprep.mubr.msk.bf16.mxu1 %vm2611_vm7, %v6558_v33  ;;  %3623 = vmatpush1.bf16.msra.mxu1 %v6568_v1  ;;  %v9606_v1 = vrot.slane %v2833_v61, %v13268_v13 }
 0x295   :  { %3624 = vmatprep.subr.bf16.mxu1 %v6573_v14 }
 0x298   :  { %3625 = vmatpush1.bf16.msra.mxu1 %v6571_v49  ;;  %v13269_v49 = vld [vmem:[#allocation11_spill] sm:$0xff] }
 0x299   :  { %3626 = vmatprep.subr.bf16.mxu1 %v6576_v35  ;;  %v9609_v14 = vrot.slane %v2833_v61, %v13269_v49 }
 0x29b   :  { %6517 = vmatmul.mubr.msk.bf16.gmra.mxu1 %vm2611_vm7, %v6559_v10  ;;  %v13265_v10 = vld [vmem:[#allocation4_spill] sm:$0xff] }
 0x29c   :  { %6520 = vmatprep.mubr.msk.bf16.mxu1 %vm2611_vm7, %v6560_v52  ;;  %3627 = vmatpush1.bf16.msra.mxu1 %v6574_v21  ;;  %v9597_v52 = vrot.slane %v2833_v61, %v13265_v10  ;;  %v13270_v21 = vld [vmem:[#allocation22_spill] sm:$0xff] }
 0x29d   :  { %3628 = vmatprep.subr.bf16.mxu1 %v6579_v45  ;;  %v9612_v35 = vrot.slane %v2833_v61, %v13270_v21 }
 0x2a0   :  { %3629 = vmatpush1.bf16.msra.mxu1 %v6577_v59  ;;  %v13271_v59 = vld [vmem:[#allocation20_spill] sm:$0xff] }
 0x2a1   :  { %3630 = vmatprep.subr.bf16.mxu1 %v6582_v50  ;;  %v9615_v45 = vrot.slane %v2833_v61, %v13271_v59 }
 0x2a3   :  { %6521 = vmatmul.mubr.msk.bf16.gmra.mxu1 %vm2611_vm7, %v6561_v30  ;;  %v13266_v30 = vld [vmem:[#allocation7_spill] sm:$0xff] }
 0x2a4   :  { %3650 = vmatprep.mubr.bf16.mxu1 %v12572_v4  ;;  %3631 = vmatpush1.bf16.msra.mxu1 %v6580_v15  ;;  %v9600_v43 = vrot.slane %v2833_v61, %v13266_v30 }
 0x2a5   :  { %3632 = vmatprep.subr.bf16.mxu1 %v6585_v17  ;;  %v13272_v17 = vld [vmem:[#allocation5_spill] sm:$0xff] }
 0x2a8   :  { %3633 = vmatpush1.bf16.msra.mxu1 %v6583_v11  ;;  %v9620_v11 = vrot.slane %v2833_v61, %v13272_v17 }
 0x30b   :  { %v6343_v46 = vpop.f32.mrf.mxu1 }
 0x30d   :  { %v6344_v6 = vpop.f32.mrf.mxu1 }
 0x30e   :  { %v6345_v19 = vadd.f32 %v6344_v6, %v6343_v46 }
 0x30f   :  { %v6346_v34 = vpop.f32.mrf.mxu1 }
 0x311   :  { %v6347_v24 = vpop.f32.mrf.mxu1 }
 0x312   :  { %v6348_v50 = vadd.f32 %v6347_v24, %v6346_v34  ;;  %v9633_v24 = vld [vmem:[%s12324_s5 + $0x8] ss:$0 sm:$0xff] }
 0x313   :  { %v6349_v31 = vpop.f32.mrf.mxu1 }
 0x315   :  { %v6350_v56 = vpop.f32.mrf.mxu1 }
 0x316   :  { %v6351_v25 = vadd.f32 %v6350_v56, %v6349_v31 }
 0x317   :  { %v6352_v7 = vpop.f32.mrf.mxu1 }
 0x319   :  { %v6353_v48 = vpop.f32.mrf.mxu1 }
 0x31a   :  { %v6354_v46 = vadd.f32 %v6353_v48, %v6352_v7 }
 0x31b   :  { %v6355_v51 = vpop.f32.mrf.mxu1 }
 0x31d   :  { %v6356_v28 = vpop.f32.mrf.mxu1 }
 0x31e   :  { %v6357_v6 = vadd.f32 %v6356_v28, %v6355_v51 }
 0x31f   :  { %v6358_v44 = vpop.f32.mrf.mxu1 }
 0x321   :  { %v6359_v39 = vpop.f32.mrf.mxu1 }
 0x322   :  { %v6360_v31 = vadd.f32 %v6359_v39, %v6358_v44 }
 0x323   :  { %v6361_v36 = vpop.f32.mrf.mxu1 }
 0x325   :  { %v6362_v22 = vpop.f32.mrf.mxu1 }
 0x326   :  { %v6363_v56 = vadd.f32 %v6362_v22, %v6361_v36 }
 0x327   :  { %v6364_v26 = vpop.f32.mrf.mxu1 }
 0x329   :  { %v6365_v3 = vpop.f32.mrf.mxu1 }
 0x32a   :  { %v9575_v9 = vadd.f32 %v6365_v3, %v6364_v26 }
 0x32b   :  { %v6367_v62 = vpop.f32.mrf.mxu1 }
 0x32d   :  { %v6368_v57 = vpop.f32.mrf.mxu1 }
 0x32e   :  { %v9577_v8 = vadd.f32 %v6368_v57, %v6367_v62 }
 0x32f   :  { %v6370_v60 = vpop.f32.mrf.mxu1 }
 0x331   :  { %v6371_v38 = vpop.f32.mrf.mxu1 }
 0x332   :  { %v9579_v0 = vadd.f32 %v6371_v38, %v6370_v60 }
 0x333   :  { %v6373_v41 = vpop.f32.mrf.mxu1 }
 0x335   :  { %v6374_v32 = vpop.f32.mrf.mxu1 }
 0x336   :  { %v9581_v2 = vadd.f32 %v6374_v32, %v6373_v41 }
 0x337   :  { %v6376_v55 = vpop.f32.mrf.mxu1 }
 0x339   :  { %v6377_v37 = vpop.f32.mrf.mxu1 }
 0x33a   :  { %v9583_v40 = vadd.f32 %v6377_v37, %v6376_v55 }
 0x33b   :  { %v6379_v47 = vpop.f32.mrf.mxu1 }
 0x33d   :  { %v6380_v42 = vpop.f32.mrf.mxu1 }
 0x33e   :  { %v9585_v18 = vadd.f32 %v6380_v42, %v6379_v47 }
 0x33f   :  { %v6382_v12 = vpop.f32.mrf.mxu1 }
 0x341   :  { %v6383_v54 = vpop.f32.mrf.mxu1 }
 0x342   :  { %v9587_v58 = vadd.f32 %v6383_v54, %v6382_v12 }
 0x343   :  { %v6385_v23 = vpop.f32.mrf.mxu1 }
 0x345   :  { %v6386_v63 = vpop.f32.mrf.mxu1 }
 0x346   :  { %v9589_v5 = vadd.f32 %v6386_v63, %v6385_v23 }
 0x347   :  { %v6388_v16 = vpop.f32.mrf.mxu1 }
 0x349   :  { %v6389_v29 = vpop.f32.mrf.mxu1 }
 0x34a   :  { %v9594_v33 = vadd.f32 %v6389_v29, %v6388_v16 }
 0x34b   :  { %v6510_v53 = vpop.f32.mrf.mxu1 }
 0x34c   :  { %v9617_v15 = vadd.f32 %v6510_v53, %v6351_v25 }
 0x34d   :  { %v2770_v26 = vpop.f32.mrf.mxu1 }
 0x34e   :  { %v2771_v3 = vadd.f32 %v6345_v19, %v2770_v26  ;;  %v9624_v62 = vmul.f32 %v9597_v52, %v9617_v15  ;;  %v2891_v57 = vmul.f32 %v9600_v43, %v9617_v15  ;;  %v2925_v34 = vmul.f32 %v9603_v20, %v9617_v15 }
 0x34f   :  { %v6511_v25 = vpop.f32.mrf.mxu1  ;;  %v2875_v7 = vmul.f32 %v9606_v1, %v9617_v15  ;;  %v2908_v19 = vmul.f32 %v9609_v14, %v9617_v15  ;;  %v9641_v48 = vmul.f32 %v9612_v35, %v9617_v15  ;;  %v9645_v51 = vmul.f32 %v9615_v45, %v9617_v15 }
 0x350   :  { %v2839_v28 = vmul.f32 %v9620_v11, %v2771_v3  ;;  %v2856_v44 = vmul.f32 %v9597_v52, %v2771_v3  ;;  %v2873_v39 = vmul.f32 %v9606_v1, %v2771_v3  ;;  %v9650_v36 = vadd.f32 %v6511_v25, %v6354_v46 }
 0x351   :  { %v2773_v22 = vpop.f32.mrf.mxu1  ;;  %v3081_v38 = vrot.slane %v2925_v34, 1  ;;  %v9655_v41 = vmul.f32 %v9633_v24, %v9617_v15  ;;  %v3145_v32 = vrot.slane %v9645_v51, 1 }
 0x352   :  { %v3003_v55 = vrot.slane %v2856_v44, 1  ;;  %v2774_v37 = vadd.f32 %v6348_v50, %v2773_v22  ;;  %v2892_v47 = vmul.f32 %v9600_v43, %v9650_v36  ;;  %v2909_v42 = vmul.f32 %v9609_v14, %v9650_v36 }
 0x353   :  { %v6514_v12 = vpop.f32.mrf.mxu1  ;;  %v2926_v54 = vmul.f32 %v9603_v20, %v9650_v36  ;;  %v2942_v23 = vmul.f32 %v9612_v35, %v9650_v36  ;;  %v2959_v63 = vmul.f32 %v9615_v45, %v9650_v36  ;;  %v9670_v16 = vmul.f32 %v9633_v24, %v9650_v36 }
 0x354   :  { %v2840_v61 = vmul.f32 %v9620_v11, %v2774_v37  ;;  %v2857_v29 = vmul.f32 %v9597_v52, %v2774_v37  ;;  %v2874_v53 = vmul.f32 %v9606_v1, %v2774_v37  ;;  %v2890_v50 = vmul.f32 %v9600_v43, %v2774_v37 }
 0x355   :  { %v2907_v46 = vmul.f32 %v9609_v14, %v2774_v37  ;;  %v2924_v26 = vmul.f32 %v9603_v20, %v2774_v37  ;;  %v9678_v3 = vadd.f32 %v6514_v12, %v6363_v56  ;;  %v2786_v34 = vpop.f32.mrf.mxu1  ;;  %v9680_v25 = vadd.f32 %v2892_v47, %v2875_v7 }
 0x356   :  { %v3004_v51 = vrot.slane %v2857_v29, 1  ;;  %v3054_v44 = vadd.f32 %v2890_v50, %v2873_v39  ;;  %v3055_v22 = vadd.f32 %v2891_v57, %v2874_v53  ;;  %v9682_v4 = vadd.f32 %v6357_v6, %v2786_v34 }
 0x357   :  { %v3080_v60 = vrot.slane %v2924_v26, 1  ;;  %v6515_v21 = vpop.f32.mrf.mxu1  ;;  %v9686_v49 = vmul.f32 %v9615_v45, %v9678_v3  ;;  %v3083_v59 = vrot.slane %v2926_v54, 1  ;;  %v3146_v27 = vrot.slane %v2959_v63, 1 }
 0x358   :  { %v3005_v37 = vsel %vm870_vm3, %v3003_v55, %v3004_v51  ;;  %v13273_v56 = vrot.slane %v9624_v62, 1  ;;  %v3211_v47 = vrot.slane %v3054_v44, 2  ;;  %v3212_v12 = vrot.slane %v3055_v22, 2 }
 0x359   :  { %v3082_v6 = vsel %vm870_vm3, %v3080_v60, %v3081_v38  ;;  %v9694_v57 = vadd.f32 %v6515_v21, %v9575_v9  ;;  %v2789_v29 = vpop.f32.mrf.mxu1  ;;  %v9698_v53 = vmul.f32 %v9603_v20, %v9682_v4  ;;  %v2943_v55 = vmul.f32 %v9612_v35, %v9682_v4 }
 0x35a   :  { %v3007_v7 = vsel %vm870_vm3, %v3004_v51, %v13273_v56  ;;  %v3118_v54 = vadd.f32 %v3082_v6, %v2907_v46  ;;  %v9700_v63 = vadd.f32 %v6360_v31, %v2789_v29  ;;  %v2960_v50 = vmul.f32 %v9615_v45, %v9682_v4 }
 0x35b   :  { %v3042_v39 = vadd.f32 %v3007_v7, %v2840_v61  ;;  %v6518_v61 = vpop.f32.mrf.mxu1  ;;  %v9708_v60 = vmul.f32 %v9633_v24, %v9682_v4  ;;  %v3041_v9 = vadd.f32 %v3005_v37, %v2839_v28  ;;  %v3084_v21 = vsel %vm870_vm3, %v3081_v38, %v3083_v59 }
 0x35c   :  { %v12581_v26 = vrot.slane %v9698_v53, 1  ;;  %v9713_v46 = vadd.f32 %v6518_v61, %v9581_v2  ;;  %v2944_v31 = vmul.f32 %v9612_v35, %v9700_v63  ;;  %v2961_v34 = vmul.f32 %v9615_v45, %v9700_v63 }
 0x35d   :  { %v3119_v51 = vadd.f32 %v3084_v21, %v2908_v19  ;;  %v2802_v44 = vpop.f32.mrf.mxu1  ;;  %v3147_v28 = vsel %vm870_vm3, %v3145_v32, %v3146_v27  ;;  %v3148_v38 = vrot.slane %v2960_v50, 1  ;;  %v12578_v37 = vrot.slane %v9686_v49, 1 }
 0x35e   :  { %v3086_v22 = vsel %vm870_vm3, %v3083_v59, %v12581_v26  ;;  %v9725_v2 = vadd.f32 %v9577_v8, %v2802_v44  ;;  %v3150_v7 = vrot.slane %v2961_v34, 1  ;;  %v3185_v6 = vadd.f32 %v3147_v28, %v9641_v48 }
 0x35f   :  { %v3120_v56 = vadd.f32 %v3086_v22, %v2909_v42  ;;  %v6519_v29 = vpop.f32.mrf.mxu1  ;;  %v3149_v19 = vsel %vm870_vm3, %v3146_v27, %v3148_v38  ;;  %v3213_v61 = vsel %vm1527_vm4, %v3211_v47, %v3212_v12  ;;  %v12577_v21 = vrot.slane %v9680_v25, 2 }
 0x360   :  { %v3404_v59 = vrot.slane %v9655_v41, 6  ;;  %v9733_v32 = vadd.f32 %v6519_v29, %v9583_v40  ;;  %v3151_v50 = vsel %vm870_vm3, %v3148_v38, %v3150_v7  ;;  %v3153_v8 = vsel %vm870_vm3, %v3150_v7, %v12578_v37 }
 0x361   :  { %v3186_v42 = vadd.f32 %v3149_v19, %v2942_v23  ;;  %v2805_v48 = vpop.f32.mrf.mxu1  ;;  %v3187_v34 = vadd.f32 %v3151_v50, %v2943_v55  ;;  %v9739_v44 = vadd.f32 %v3153_v8, %v2944_v31  ;;  %v3215_v27 = vsel %vm1527_vm4, %v3212_v12, %v12577_v21 }
 0x362   :  { %v3249_v47 = vadd.f32 %v3213_v61, %v3041_v9  ;;  %v9745_v41 = vadd.f32 %v9579_v0, %v2805_v48  ;;  %v3250_v40 = vadd.f32 %v3215_v27, %v3042_v39  ;;  %v3275_v22 = vrot.slane %v3185_v6, 1 }
 0x363   :  { %v3276_v28 = vrot.slane %v3186_v42, 1  ;;  %v6522_v38 = vpop.f32.mrf.mxu1  ;;  %v3278_v29 = vrot.slane %v3187_v34, 1  ;;  %v12575_v7 = vrot.slane %v9739_v44, 1  ;;  %v3405_v23 = vrot.slane %v9670_v16, 6 }
 0x364   :  { %v12576_v55 = vrot.slane %v9708_v60, 6  ;;  %v2827_v31 = vadd.f32 %v6522_v38, %v9589_v5  ;;  %v9754_v12 = vmul.f32 %v9620_v11, %v9617_v15  ;;  %v9758_v0 = vmul.f32 %v9620_v11, %v9650_v36 }
 0x365   :  { %v3277_v19 = vsel %vm870_vm3, %v3275_v22, %v3276_v28  ;;  %v2818_v39 = vpop.f32.mrf.mxu1  ;;  %v3279_v9 = vsel %vm870_vm3, %v3276_v28, %v3278_v29  ;;  %v3281_v16 = vsel %vm870_vm3, %v3278_v29, %v12575_v7  ;;  %v3406_v5 = vsel %vm2142_vm5, %v3404_v59, %v3405_v23  ;;  %v9830_v7 = vld [vmem:[%s12325_s6] ss:$0 sm:$0xff] }
 0x366   :  { %v3313_v6 = vadd.f32 %v3277_v19, %v3118_v54  ;;  %v2953_v61 = vmul.f32 %v9612_v35, %v2827_v31  ;;  %v2970_v50 = vmul.f32 %v9615_v45, %v2827_v31  ;;  %v9768_v15 = vmul.f32 %v9633_v24, %v2827_v31 }
 0x367   :  { %v9771_v8 = vadd.f32 %v9585_v18, %v2818_v39  ;;  %v6523_v42 = vpop.f32.mrf.mxu1  ;;  %v3314_v48 = vadd.f32 %v3279_v9, %v3119_v51  ;;  %v9773_v34 = vadd.f32 %v3281_v16, %v3120_v56  ;;  %v3408_v54 = vsel %vm2142_vm5, %v3405_v23, %v12576_v55 }
 0x368   :  { %13274 = vst [vmem:[#allocation142_spill] sm:$0xff] %v9768_v15  ;;  %v3339_v27 = vrot.slane %v3313_v6, 3  ;;  %v3168_v59 = vrot.slane %v2970_v50, 1  ;;  %v12579_v22 = vrot.slane %v9768_v15, 6  ;;  %v2830_v28 = vadd.f32 %v6523_v42, %v9594_v33 }
 0x369   :  { %v9782_v38 = vmul.f32 %v9615_v45, %v9771_v8  ;;  %v2821_v18 = vpop.f32.mrf.mxu1  ;;  %v3340_v29 = vrot.slane %v3314_v48, 3  ;;  %v12574_v51 = vrot.slane %v9773_v34, 3  ;;  %v2859_v56 = vmul.f32 %v9597_v52, %v9650_v36 }
 0x36a   :  { %v9789_v31 = vmul.f32 %v9597_v52, %v9682_v4  ;;  %v2971_v23 = vmul.f32 %v9615_v45, %v2830_v28  ;;  %v2989_v19 = vmul.f32 %v9633_v24, %v2830_v28  ;;  %v9794_v33 = vadd.f32 %v9587_v58, %v2821_v18 }
 0x36b   :  { %v12580_v39 = vrot.slane %v9782_v38, 1  ;;  %v3341_v9 = vsel %vm1936_vm6, %v3339_v27, %v3340_v29  ;;  %v3343_v16 = vsel %vm1936_vm6, %v3340_v29, %v12574_v51  ;;  %v2876_v6 = vmul.f32 %v9606_v1, %v9650_v36 }
 0x36c   :  { %13275 = vst [vmem:[#allocation14_spill] sm:$0xff] %v9794_v33  ;;  %v2877_v50 = vmul.f32 %v9606_v1, %v9682_v4  ;;  %v3170_v42 = vrot.slane %v2971_v23, 1  ;;  %v3429_v48 = vrot.slane %v2989_v19, 6  ;;  %v9807_v58 = vmul.f32 %v9600_v43, %v9794_v33 }
 0x36d   :  { %v9811_v28 = vmul.f32 %v9609_v14, %v9794_v33  ;;  %v9815_v27 = vmul.f32 %v9603_v20, %v9794_v33  ;;  %v2952_v36 = vmul.f32 %v9612_v35, %v9794_v33  ;;  %v2969_v18 = vmul.f32 %v9615_v45, %v9794_v33 }
 0x36e   :  { %13276 = vst [vmem:[#allocation91_spill] sm:$0xff] %v9807_v58  ;;  %v3377_v29 = vadd.f32 %v3341_v9, %v3249_v47  ;;  %v3171_v23 = vsel %vm870_vm3, %v3168_v59, %v3170_v42  ;;  %v9825_v19 = vsel %vm2142_vm5, %v12579_v22, %v3429_v48  ;;  %v3378_v51 = vadd.f32 %v3343_v16, %v3250_v40 }
 0x36f   :  { %13277 = vst [vmem:[#allocation127_spill] sm:$0xff] %v9811_v28  ;;  %13278 = vst [vmem:[#allocation129_spill] sm:$0xff] %v9815_v27  ;;  %v2893_v55 = vmul.f32 %v9600_v43, %v9682_v4  ;;  %v9834_v21 = vadd.f32 %v3171_v23, %v2953_v61  ;;  %v3166_v9 = vrot.slane %v2969_v18, 1  ;;  %v2894_v48 = vmul.f32 %v9600_v43, %v9700_v63 }
 0x370   :  { %13279 = vst [vmem:[#allocation123_spill] sm:$0xff] %v9825_v19  ;;  %v3444_v42 = vadd.f32 %v3406_v5, %v3377_v29  ;;  %v3445_v37 = vadd.f32 %v3408_v54, %v3378_v51  ;;  %v2910_v40 = vmul.f32 %v9609_v14, %v9682_v4  ;;  %v2911_v16 = vmul.f32 %v9609_v14, %v9700_v63 }
 0x371   :  { %13280 = vst [vmem:[#allocation137_spill] sm:$0xff] %v9834_v21  ;;  %v9847_v61 = vsel %vm870_vm3, %v12580_v39, %v3166_v9  ;;  %v3169_v18 = vsel %vm870_vm3, %v3166_v9, %v3168_v59  ;;  %v2928_v29 = vmul.f32 %v9603_v20, %v9700_v63  ;;  %v9858_v23 = vmul.f32 %v9603_v20, %v9678_v3 }
 0x372   :  { %v3464_v5 = vadd.f32 %v9830_v7, %v3444_v42  ;;  %v9851_v54 = vadd.f32 %v3169_v18, %v2952_v36  ;;  %v3465_v51 = vadd.f32 %v9830_v7, %v3445_v37  ;;  %v2945_v47 = vmul.f32 %v9612_v35, %v9678_v3 }
 0x373   :  { %v2946_v59 = vmul.f32 %v9612_v35, %v9694_v57  ;;  %v2963_v36 = vmul.f32 %v9615_v45, %v9694_v57  ;;  %v9869_v42 = vmul.f32 %v9615_v45, %v9725_v2  ;;  %v2979_v18 = vmul.f32 %v9633_v24, %v9700_v63 }
 0x374   :  { %13281 = vst [vmem:[#allocation112_spill] sm:$0xff] %v9851_v54  ;;  %v3477_v22 = vmax.f32 %v3464_v5, 0.0  ;;  %v3478_v37 = vmax.f32 %v3465_v51, 0.0  ;;  %v9875_v39 = vmul.f32 %v9633_v24, %v9678_v3  ;;  %v3008_v26 = vrot.slane %v2859_v56, 1 }
 0x375   :  { %v12590_v30 = vrot.slane %v9789_v31, 1  ;;  %v3057_v10 = vadd.f32 %v2893_v55, %v2876_v6  ;;  %v9878_v17 = vadd.f32 %v2894_v48, %v2877_v50  ;;  %v3087_v51 = vrot.slane %v2928_v29, 1 }
 0x376   :  { %v3490_v5 = vmin.f32 %v3477_v22, 6.0  ;;  %v3491_v13 = vmin.f32 %v3478_v37, 6.0  ;;  %v13282_v9 = vrot.slane %v9624_v62, 1  ;;  %v12589_v15 = vrot.slane %v9858_v23, 1 }
 0x377   :  { %v3011_v22 = vsel %vm870_vm3, %v3008_v26, %v12590_v30  ;;  %v3154_v21 = vrot.slane %v2963_v36, 1  ;;  %v13283_v55 = vrot.slane %v9698_v53, 1  ;;  %v13284_v48 = vrot.slane %v9686_v49, 1 }
 0x378   :  { %v3009_v19 = vsel %vm870_vm3, %v13282_v9, %v3008_v26  ;;  %v3519_v28 = vpack.c.bf16 %v3491_v13, %v3490_v5  ;;  %v3044_v37 = vadd.f32 %v3011_v22, %v9758_v0  ;;  %v3090_v62 = vsel %vm870_vm3, %v3087_v51, %v12589_v15 }
 0x379   :  { %v3043_v56 = vadd.f32 %v3009_v19, %v9754_v12  ;;  %v3088_v6 = vsel %vm870_vm3, %v13283_v55, %v3087_v51  ;;  %v3155_v26 = vsel %vm870_vm3, %v13284_v48, %v3154_v21  ;;  %v12588_v29 = vrot.slane %v9869_v42, 1 }
 0x37a   :  { %v3121_v50 = vadd.f32 %v3088_v6, %v2910_v40  ;;  %3651 = vmatmul.mubr.bf16.vlgmr.msra.gmra.mxu1 %v3519_v28  ;;  %v3122_v13 = vadd.f32 %v3090_v62, %v2911_v16  ;;  %v3189_v12 = vadd.f32 %v3155_v26, %v2945_v47  ;;  %v3216_v19 = vrot.slane %v3057_v10, 2 }
 0x37b   :  { %v12587_v0 = vrot.slane %v9878_v17, 2  ;;  %v13285_v53 = vmov 0   ;;  %v3157_v36 = vsel %vm870_vm3, %v3154_v21, %v12588_v29  ;;  %v3409_v9 = vrot.slane %v2979_v18, 6 }
 0x37c   :  { %3660 = vmatprep.mubr.bf16.mxu1 %v13285_v53  ;;  %v12585_v40 = vrot.slane %v9875_v39, 6  ;;  %v2843_v49 = vmul.f32 %v9620_v11, %v9682_v4  ;;  %v9907_v5 = vadd.f32 %v3157_v36, %v2946_v59  ;;  %v13286_v28 = vrot.slane %v9680_v25, 2 }
 0x37d   :  { %v3219_v47 = vsel %vm1527_vm4, %v3216_v19, %v12587_v0  ;;  %v3282_v16 = vrot.slane %v3189_v12, 1  ;;  %v13287_v21 = vrot.slane %v9708_v60, 6  ;;  %v13288_v59 = vrot.slane %v9739_v44, 1 }
 0x37e   :  { %v3217_v10 = vsel %vm1527_vm4, %v13286_v28, %v3216_v19  ;;  %v3252_v22 = vadd.f32 %v3219_v47, %v3044_v37  ;;  %v3412_v4 = vsel %vm2142_vm5, %v3409_v9, %v12585_v40  ;;  %v12586_v55 = vrot.slane %v9907_v5, 1 }
 0x37f   :  { %v3251_v51 = vadd.f32 %v3217_v10, %v3043_v56  ;;  %v3410_v18 = vsel %vm2142_vm5, %v13287_v21, %v3409_v9  ;;  %v3283_v25 = vsel %vm870_vm3, %v13288_v59, %v3282_v16  ;;  %v2844_v6 = vmul.f32 %v9620_v11, %v9700_v63 }
 0x380   :  { %v2861_v56 = vmul.f32 %v9597_v52, %v9700_v63  ;;  %v3316_v37 = vadd.f32 %v3283_v25, %v3121_v50  ;;  %v9931_v60 = vmul.f32 %v9597_v52, %v9678_v3  ;;  %v2878_v62 = vmul.f32 %v9606_v1, %v9700_v63 }
 0x381   :  { %v2879_v44 = vmul.f32 %v9606_v1, %v9678_v3  ;;  %v3285_v48 = vsel %vm870_vm3, %v3282_v16, %v12586_v55  ;;  %v2895_v26 = vmul.f32 %v9600_v43, %v9678_v3  ;;  %v2896_v50 = vmul.f32 %v9600_v43, %v9694_v57 }
 0x382   :  { %v2912_v12 = vmul.f32 %v9609_v14, %v9678_v3  ;;  %v9946_v19 = vadd.f32 %v3285_v48, %v3122_v13  ;;  %v3344_v36 = vrot.slane %v3316_v37, 3  ;;  %v2913_v63 = vmul.f32 %v9609_v14, %v9694_v57 }
 0x383   :  { %v2930_v9 = vmul.f32 %v9603_v20, %v9694_v57  ;;  %v9954_v28 = vmul.f32 %v9603_v20, %v9725_v2  ;;  %v2947_v10 = vmul.f32 %v9612_v35, %v9725_v2  ;;  %v2948_v47 = vmul.f32 %v9612_v35, %v9745_v41 }
 0x384   :  { %v2965_v13 = vmul.f32 %v9615_v45, %v9745_v41  ;;  %v13289_v16 = vrot.slane %v9773_v34, 3  ;;  %v3346_v59 = vrot.slane %v9946_v19, 3  ;;  %v9968_v25 = vmul.f32 %v9615_v45, %v9713_v46 }
 0x385   :  { %v2981_v37 = vmul.f32 %v9633_v24, %v9694_v57  ;;  %v9974_v40 = vmul.f32 %v9633_v24, %v9725_v2  ;;  %v3012_v55 = vrot.slane %v2861_v56, 1  ;;  %v3014_v0 = vrot.slane %v9931_v60, 1 }
 0x386   :  { %v3345_v21 = vsel %vm1936_vm6, %v13289_v16, %v3344_v36  ;;  %v3347_v34 = vsel %vm1936_vm6, %v3344_v36, %v3346_v59  ;;  %v3059_v16 = vadd.f32 %v2895_v26, %v2878_v62  ;;  %v9980_v29 = vadd.f32 %v2896_v50, %v2879_v44 }
 0x387   :  { %v3379_v48 = vadd.f32 %v3345_v21, %v3251_v51  ;;  %v3091_v15 = vrot.slane %v2930_v9, 1  ;;  %v3380_v30 = vadd.f32 %v3347_v34, %v3252_v22  ;;  %v13290_v58 = vrot.slane %v9789_v31, 1 }
 0x388   :  { %v3015_v56 = vsel %vm870_vm3, %v3012_v55, %v3014_v0  ;;  %v13291_v54 = vrot.slane %v9858_v23, 1  ;;  %v3093_v62 = vrot.slane %v9954_v28, 1  ;;  %v3158_v26 = vrot.slane %v2965_v13, 1 }
 0x389   :  { %v3446_v27 = vadd.f32 %v3410_v18, %v3379_v48  ;;  %v3013_v51 = vsel %vm870_vm3, %v13290_v58, %v3012_v55  ;;  %v3046_v33 = vadd.f32 %v3015_v56, %v2844_v6  ;;  %v3447_v44 = vadd.f32 %v3412_v4, %v3380_v30 }
 0x38a   :  { %v3045_v21 = vadd.f32 %v3013_v51, %v2843_v49  ;;  %v3092_v36 = vsel %vm870_vm3, %v13291_v54, %v3091_v15  ;;  %v3094_v31 = vsel %vm870_vm3, %v3091_v15, %v3093_v62  ;;  %v3160_v58 = vrot.slane %v9968_v25, 1 }
 0x38b   :  { %v3466_v22 = vadd.f32 %v9830_v7, %v3446_v27  ;;  %v3123_v18 = vadd.f32 %v3092_v36, %v2912_v12  ;;  %v3220_v55 = vrot.slane %v3059_v16, 2  ;;  %v3222_v49 = vrot.slane %v9980_v29, 2 }
 0x38c   :  { %v3467_v23 = vadd.f32 %v9830_v7, %v3447_v44  ;;  %v3124_v54 = vadd.f32 %v3094_v31, %v2913_v63  ;;  %v13292_v50 = vrot.slane %v9869_v42, 1  ;;  %v3161_v27 = vsel %vm870_vm3, %v3158_v26, %v3160_v58 }
 0x38d   :  { %v3479_v6 = vmax.f32 %v3466_v22, 0.0  ;;  %v13293_v15 = vrot.slane %v9878_v17, 2  ;;  %v3223_v9 = vsel %vm1527_vm4, %v3220_v55, %v3222_v49  ;;  %v10011_v63 = vadd.f32 %v3161_v27, %v2948_v47 }
 0x38e   :  { %v3159_v30 = vsel %vm870_vm3, %v13292_v50, %v3158_v26  ;;  %v3480_v13 = vmax.f32 %v3467_v23, 0.0  ;;  %v3254_v34 = vadd.f32 %v3223_v9, %v3046_v33  ;;  %v3413_v51 = vrot.slane %v2981_v37, 6 }
 0x38f   :  { %v3191_v4 = vadd.f32 %v3159_v30, %v2947_v10  ;;  %v3221_v12 = vsel %vm1527_vm4, %v13293_v15, %v3220_v55  ;;  %v3492_v48 = vmin.f32 %v3479_v6, 6.0  ;;  %v3415_v56 = vrot.slane %v9974_v40, 6 }
 0x390   :  { %v3253_v42 = vadd.f32 %v3221_v12, %v3045_v21  ;;  %v3493_v36 = vmin.f32 %v3480_v13, 6.0  ;;  %v3288_v10 = vrot.slane %v10011_v63, 1  ;;  %v2845_v17 = vmul.f32 %v9620_v11, %v9678_v3 }
 0x391   :  { %v3286_v16 = vrot.slane %v3191_v4, 1  ;;  %v2846_v44 = vmul.f32 %v9620_v11, %v9694_v57  ;;  %v13294_v22 = vrot.slane %v9907_v5, 1  ;;  %v13295_v21 = vrot.slane %v9875_v39, 6 }
 0x392   :  { %v3416_v37 = vsel %vm2142_vm5, %v3413_v51, %v3415_v56  ;;  %v2863_v26 = vmul.f32 %v9597_v52, %v9694_v57  ;;  %v3520_v31 = vpack.c.bf16 %v3493_v36, %v3492_v48  ;;  %v10035_v5 = vmul.f32 %v9597_v52, %v9725_v2 }
 0x393   :  { %v3287_v47 = vsel %vm870_vm3, %v13294_v22, %v3286_v16  ;;  %v3414_v33 = vsel %vm2142_vm5, %v13295_v21, %v3413_v51  ;;  %v3289_v3 = vsel %vm870_vm3, %v3286_v16, %v3288_v10  ;;  %v2880_v23 = vmul.f32 %v9606_v1, %v9694_v57 }
 0x394   :  { %v3318_v55 = vadd.f32 %v3287_v47, %v3123_v18  ;;  %v10037_v39 = vadd.f32 %v3289_v3, %v3124_v54  ;;  %v2881_v6 = vmul.f32 %v9606_v1, %v9725_v2  ;;  %v2897_v50 = vmul.f32 %v9600_v43, %v9725_v2  ;;  %3661 = vmatmul.mubr.bf16.gmra.mxu1 %v3520_v31 }
 0x395   :  { %v2898_v18 = vmul.f32 %v9600_v43, %v9745_v41  ;;  %v2914_v27 = vmul.f32 %v9609_v14, %v9725_v2  ;;  %v2915_v54 = vmul.f32 %v9609_v14, %v9745_v41  ;;  %3670 = vmatprep.mubr.bf16.mxu1 %v13285_v53  ;;  %v2932_v4 = vmul.f32 %v9603_v20, %v9745_v41 }
 0x396   :  { %v3348_v30 = vrot.slane %v3318_v55, 3  ;;  %v3350_v57 = vrot.slane %v10037_v39, 3  ;;  %v10057_v15 = vmul.f32 %v9603_v20, %v9713_v46  ;;  %v2949_v12 = vmul.f32 %v9612_v35, %v9713_v46 }
 0x397   :  { %v2950_v13 = vmul.f32 %v9612_v35, %v9733_v32  ;;  %v2967_v48 = vmul.f32 %v9615_v45, %v9733_v32  ;;  %v2983_v16 = vmul.f32 %v9633_v24, %v9745_v41  ;;  %v10075_v22 = vmul.f32 %v9633_v24, %v9713_v46 }
 0x398   :  { %v3349_v9 = vsel %vm1936_vm6, %v3346_v59, %v3348_v30  ;;  %v3351_v51 = vsel %vm1936_vm6, %v3348_v30, %v3350_v57  ;;  %v3016_v19 = vrot.slane %v2863_v26, 1  ;;  %v3018_v47 = vrot.slane %v10035_v5, 1 }
 0x399   :  { %v3381_v36 = vadd.f32 %v3349_v9, %v3253_v42  ;;  %v3382_v59 = vadd.f32 %v3351_v51, %v3254_v34  ;;  %v3061_v21 = vadd.f32 %v2897_v50, %v2880_v23  ;;  %v10078_v31 = vadd.f32 %v2898_v18, %v2881_v6 }
 0x39a   :  { %v3017_v3 = vsel %vm870_vm3, %v3014_v0, %v3016_v19  ;;  %v3095_v55 = vrot.slane %v2932_v4, 1  ;;  %v3097_v30 = vrot.slane %v10057_v15, 1  ;;  %v3019_v9 = vsel %vm870_vm3, %v3016_v19, %v3018_v47 }
 0x39b   :  { %v3448_v45 = vadd.f32 %v3414_v33, %v3381_v36  ;;  %v3449_v42 = vadd.f32 %v3416_v37, %v3382_v59  ;;  %v3047_v26 = vadd.f32 %v3017_v3, %v2845_v17  ;;  %v3162_v34 = vrot.slane %v2967_v48, 1 }
 0x39c   :  { %v3048_v23 = vadd.f32 %v3019_v9, %v2846_v44  ;;  %v3096_v33 = vsel %vm870_vm3, %v3093_v62, %v3095_v55  ;;  %v3098_v0 = vsel %vm870_vm3, %v3095_v55, %v3097_v30  ;;  %v13296_v18 = vrot.slane %v9782_v38, 1 }
 0x39d   :  { %v3468_v51 = vadd.f32 %v9830_v7, %v3448_v45  ;;  %v3469_v60 = vadd.f32 %v9830_v7, %v3449_v42  ;;  %v3125_v37 = vadd.f32 %v3096_v33, %v2914_v27  ;;  %v3126_v6 = vadd.f32 %v3098_v0, %v2915_v54 }
 0x39e   :  { %v3163_v17 = vsel %vm870_vm3, %v3160_v58, %v3162_v34  ;;  %v3165_v44 = vsel %vm870_vm3, %v3162_v34, %v13296_v18  ;;  %v3224_v4 = vrot.slane %v3061_v21, 2  ;;  %v3226_v36 = vrot.slane %v10078_v31, 2 }
 0x39f   :  { %v3481_v50 = vmax.f32 %v3468_v51, 0.0  ;;  %v3193_v28 = vadd.f32 %v3163_v17, %v2949_v12  ;;  %v3482_v62 = vmax.f32 %v3469_v60, 0.0  ;;  %v10101_v48 = vadd.f32 %v3165_v44, %v2950_v13 }
 0x3a0   :  { %v3417_v19 = vrot.slane %v2983_v16, 6  ;;  %v3225_v25 = vsel %vm1527_vm4, %v3222_v49, %v3224_v4  ;;  %v3419_v58 = vrot.slane %v10075_v22, 6  ;;  %v3227_v38 = vsel %vm1527_vm4, %v3224_v4, %v3226_v36 }
 0x3a1   :  { %v3494_v59 = vmin.f32 %v3481_v50, 6.0  ;;  %v3290_v27 = vrot.slane %v3193_v28, 1  ;;  %v3495_v54 = vmin.f32 %v3482_v62, 6.0  ;;  %v3255_v12 = vadd.f32 %v3225_v25, %v3047_v26 }
 0x3a2   :  { %v3292_v13 = vrot.slane %v10101_v48, 1  ;;  %v3256_v21 = vadd.f32 %v3227_v38, %v3048_v23  ;;  %v3418_v29 = vsel %vm2142_vm5, %v3415_v56, %v3417_v19  ;;  %v3420_v49 = vsel %vm2142_vm5, %v3417_v19, %v3419_v58 }
 0x3a3   :  { %v3291_v16 = vsel %vm870_vm3, %v3288_v10, %v3290_v27  ;;  %v3521_v45 = vpack.c.bf16 %v3495_v54, %v3494_v59  ;;  %v2847_v42 = vmul.f32 %v9620_v11, %v9725_v2  ;;  %v2848_v40 = vmul.f32 %v9620_v11, %v9745_v41 }
 0x3a4   :  { %v3293_v3 = vsel %vm870_vm3, %v3290_v27, %v3292_v13  ;;  %v3320_v55 = vadd.f32 %v3291_v16, %v3125_v37  ;;  %v2865_v56 = vmul.f32 %v9597_v52, %v9745_v41  ;;  %v10134_v10 = vmul.f32 %v9597_v52, %v9713_v46 }
 0x3a5   :  { %v10126_v63 = vadd.f32 %v3293_v3, %v3126_v6  ;;  %3671 = vmatmul.mubr.bf16.gmra.mxu1 %v3521_v45  ;;  %v2882_v26 = vmul.f32 %v9606_v1, %v9745_v41  ;;  %v2883_v2 = vmul.f32 %v9606_v1, %v9713_v46  ;;  %v2899_v34 = vmul.f32 %v9600_v43, %v9713_v46 }
 0x3a6   :  { %v3352_v9 = vrot.slane %v3320_v55, 3  ;;  %3680 = vmatprep.mubr.bf16.mxu1 %v13285_v53  ;;  %v2900_v23 = vmul.f32 %v9600_v43, %v9733_v32  ;;  %v2916_v33 = vmul.f32 %v9609_v14, %v9713_v46  ;;  %v2917_v0 = vmul.f32 %v9609_v14, %v9733_v32 }
 0x3a7   :  { %v3354_v51 = vrot.slane %v10126_v63, 3  ;;  %v2934_v60 = vmul.f32 %v9603_v20, %v9733_v32  ;;  %v10157_v37 = vmul.f32 %v9603_v20, %v9771_v8  ;;  %v2951_v6 = vmul.f32 %v9612_v35, %v9771_v8 }
 0x3a8   :  { %v3353_v41 = vsel %vm1936_vm6, %v3350_v57, %v3352_v9  ;;  %v2985_v18 = vmul.f32 %v9633_v24, %v9733_v32  ;;  %v10166_v39 = vmul.f32 %v9633_v24, %v9771_v8  ;;  %v3020_v44 = vrot.slane %v2865_v56, 1 }
 0x3a9   :  { %v3355_v17 = vsel %vm1936_vm6, %v3352_v9, %v3354_v51  ;;  %v3383_v50 = vadd.f32 %v3353_v41, %v3255_v12  ;;  %v3022_v28 = vrot.slane %v10134_v10, 1  ;;  %v3063_v4 = vadd.f32 %v2899_v34, %v2882_v26  ;;  %v13297_v34 = vld [vmem:[#allocation112_spill] sm:$0xff] }
 0x3aa   :  { %v3384_v57 = vadd.f32 %v3355_v17, %v3256_v21  ;;  %v10169_v62 = vadd.f32 %v2900_v23, %v2883_v2  ;;  %v3099_v19 = vrot.slane %v2934_v60, 1  ;;  %v3101_v35 = vrot.slane %v10157_v37, 1 }
 0x3ab   :  { %v3450_v20 = vadd.f32 %v3418_v29, %v3383_v50  ;;  %v3021_v25 = vsel %vm870_vm3, %v3018_v47, %v3020_v44  ;;  %v3023_v27 = vsel %vm870_vm3, %v3020_v44, %v3022_v28  ;;  %v3195_v54 = vadd.f32 %v9847_v61, %v2951_v6 }
 0x3ac   :  { %v3451_v59 = vadd.f32 %v3420_v49, %v3384_v57  ;;  %v3049_v12 = vadd.f32 %v3021_v25, %v2847_v42  ;;  %v3050_v21 = vadd.f32 %v3023_v27, %v2848_v40  ;;  %v3100_v16 = vsel %vm870_vm3, %v3097_v30, %v3099_v19  ;;  %v13299_v57 = vld [vmem:[#allocation14_spill] sm:$0xff] }
 0x3ad   :  { %v3470_v38 = vadd.f32 %v9830_v7, %v3450_v20  ;;  %v3102_v49 = vsel %vm870_vm3, %v3099_v19, %v3101_v35  ;;  %v3127_v45 = vadd.f32 %v3100_v16, %v2916_v33  ;;  %v3228_v5 = vrot.slane %v3063_v4, 2  ;;  %v13300_v19 = vld [vmem:[#allocation91_spill] sm:$0xff] }
 0x3ae   :  { %v3471_v29 = vadd.f32 %v9830_v7, %v3451_v59  ;;  %v3128_v47 = vadd.f32 %v3102_v49, %v2917_v0  ;;  %v3230_v55 = vrot.slane %v10169_v62, 2  ;;  %v3294_v63 = vrot.slane %v3195_v54, 1  ;;  %v13301_v59 = vld [vmem:[#allocation129_spill] sm:$0xff]  ;;  %v13303_v16 = vld [vmem:[#allocation127_spill] sm:$0xff] }
 0x3af   :  { %v3483_v3 = vmax.f32 %v3470_v38, 0.0  ;;  %v3229_v42 = vsel %vm1527_vm4, %v3226_v36, %v3228_v5  ;;  %v3421_v40 = vrot.slane %v2985_v18, 6  ;;  %v3423_v15 = vrot.slane %v10166_v39, 6 }
 0x3b0   :  { %v3484_v61 = vmax.f32 %v3471_v29, 0.0  ;;  %v3231_v56 = vsel %vm1527_vm4, %v3228_v5, %v3230_v55  ;;  %v3257_v10 = vadd.f32 %v3229_v42, %v3049_v12  ;;  %v3295_v9 = vsel %vm870_vm3, %v3292_v13, %v3294_v63 }
 0x3b1   :  { %v3496_v30 = vmin.f32 %v3483_v3, 6.0  ;;  %v3258_v2 = vadd.f32 %v3231_v56, %v3050_v21  ;;  %v13298_v23 = vrot.slane %v13297_v34, 1  ;;  %v3322_v31 = vadd.f32 %v3295_v9, %v3127_v45 }
 0x3b2   :  { %v3497_v26 = vmin.f32 %v3484_v61, 6.0  ;;  %v3422_v36 = vsel %vm2142_vm5, %v3419_v58, %v3421_v40  ;;  %v3424_v41 = vsel %vm2142_vm5, %v3421_v40, %v3423_v15  ;;  %v2849_v60 = vmul.f32 %v9620_v11, %v9713_v46 }
 0x3b3   :  { %v3297_v33 = vsel %vm870_vm3, %v3294_v63, %v13298_v23  ;;  %v3356_v37 = vrot.slane %v3322_v31, 3  ;;  %v2850_v13 = vmul.f32 %v9620_v11, %v9733_v32  ;;  %v2867_v6 = vmul.f32 %v9597_v52, %v9733_v32 }
 0x3b4   :  { %v3323_v0 = vadd.f32 %v3297_v33, %v3128_v47  ;;  %v3522_v48 = vpack.c.bf16 %v3497_v26, %v3496_v30  ;;  %v2868_v50 = vmul.f32 %v9597_v52, %v9771_v8  ;;  %v2884_v22 = vmul.f32 %v9606_v1, %v9733_v32  ;;  %v13305_v47 = vld [vmem:[#allocation137_spill] sm:$0xff] }
 0x3b5   :  { %v2885_v58 = vmul.f32 %v9606_v1, %v9771_v8  ;;  %v3357_v46 = vsel %vm1936_vm6, %v3354_v51, %v3356_v37  ;;  %v2901_v18 = vmul.f32 %v9600_v43, %v9771_v8  ;;  %v2918_v39 = vmul.f32 %v9609_v14, %v9771_v8 }
 0x3b6   :  { %v3358_v17 = vrot.slane %v3323_v0, 3  ;;  %3681 = vmatmul.mubr.bf16.gmra.mxu1 %v3522_v48  ;;  %v2987_v44 = vmul.f32 %v9633_v24, %v13299_v57  ;;  %v3385_v32 = vadd.f32 %v3357_v46, %v3257_v10  ;;  %v3024_v4 = vrot.slane %v2867_v6, 1 }
 0x3b7   :  { %3690 = vmatprep.mubr.bf16.mxu1 %v13285_v53  ;;  %v3026_v20 = vrot.slane %v2868_v50, 1  ;;  %v3065_v62 = vadd.f32 %v2901_v18, %v2884_v22  ;;  %v3066_v51 = vadd.f32 %v13300_v19, %v2885_v58  ;;  %v13302_v25 = vrot.slane %v13301_v59, 1 }
 0x3b8   :  { %v3359_v52 = vsel %vm1936_vm6, %v3356_v37, %v3358_v17  ;;  %v3452_v27 = vadd.f32 %v3422_v36, %v3385_v32  ;;  %v3025_v14 = vsel %vm870_vm3, %v3022_v28, %v3024_v4  ;;  %v13306_v63 = vrot.slane %v13305_v47, 1 }
 0x3b9   :  { %v3386_v1 = vadd.f32 %v3359_v52, %v3258_v2  ;;  %v3104_v43 = vsel %vm870_vm3, %v3101_v35, %v13302_v25  ;;  %v3027_v24 = vsel %vm870_vm3, %v3024_v4, %v3026_v20  ;;  %v3051_v12 = vadd.f32 %v3025_v14, %v2849_v60  ;;  %v13309_v60 = vld [vmem:[#allocation142_spill] sm:$0xff] }
 0x3ba   :  { %v3129_v54 = vadd.f32 %v3104_v43, %v2918_v39  ;;  %v3052_v21 = vadd.f32 %v3027_v24, %v2850_v13  ;;  %v13304_v29 = vmov %v13302_v25  ;;  %v3472_v45 = vadd.f32 %v9830_v7, %v3452_v27  ;;  %v3526_v25 = vld [vmem:[%s12326_s8] sm:$0x3]  ;;  %v13312_v43 = vld [vmem:[#allocation5_spill] sm:$0xff] }
 0x3bb   :  { %v3453_v38 = vadd.f32 %v3424_v41, %v3386_v1  ;;  %v3130_v49 = vadd.f32 %v13304_v29, %v13303_v16  ;;  %v3232_v5 = vrot.slane %v3065_v62, 2  ;;  %v3234_v3 = vrot.slane %v3066_v51, 2 }
 0x3bc   :  { %v13307_v35 = vmov %v13298_v23  ;;  %v13308_v40 = vmov %v13306_v63  ;;  %v3425_v56 = vrot.slane %v2987_v44, 6  ;;  %v3485_v10 = vmax.f32 %v3472_v45, 0.0  ;;  %v13311_v44 = vld [vmem:[#allocation123_spill] sm:$0xff] }
 0x3bd   :  { %v3299_v28 = vsel %vm870_vm3, %v13307_v35, %v13306_v63  ;;  %v3473_v61 = vadd.f32 %v9830_v7, %v3453_v38  ;;  %v3325_v30 = vadd.f32 %v13308_v40, %v3130_v49  ;;  %v3233_v9 = vsel %vm1527_vm4, %v3230_v55, %v3232_v5 }
 0x3be   :  { %v3324_v42 = vadd.f32 %v3299_v28, %v3129_v54  ;;  %v3235_v26 = vsel %vm1527_vm4, %v3232_v5, %v3234_v3  ;;  %v2851_v2 = vmul.f32 %v9620_v11, %v9771_v8  ;;  %v3259_v33 = vadd.f32 %v3233_v9, %v3051_v12 }
 0x3bf   :  { %v3486_v23 = vmax.f32 %v3473_v61, 0.0  ;;  %v3260_v34 = vadd.f32 %v3235_v26, %v3052_v21  ;;  %v3498_v0 = vmin.f32 %v3485_v10, 6.0  ;;  %v3362_v36 = vrot.slane %v3325_v30, 3 }
 0x3c0   :  { %v3360_v31 = vrot.slane %v3324_v42, 3  ;;  %v3426_v41 = vsel %vm2142_vm5, %v3423_v15, %v3425_v56  ;;  %v13310_v48 = vrot.slane %v13309_v60, 6  ;;  %v3053_v6 = vadd.f32 %v3026_v20, %v2851_v2 }
 0x3c1   :  { %v3499_v13 = vmin.f32 %v3486_v23, 6.0  ;;  %v10259_v27 = vrot.slane %v3526_v25, %v13312_v43 }
 0x3c2   :  { %v3428_v37 = vsel %vm2142_vm5, %v3425_v56, %v13310_v48  ;;  %v3361_v55 = vsel %vm1936_vm6, %v3358_v17, %v3360_v31  ;;  %v3363_v50 = vsel %vm1936_vm6, %v3360_v31, %v3362_v36  ;;  %v3261_v58 = vadd.f32 %v3234_v3, %v3053_v6 }
 0x3c3   :  { %v3387_v22 = vadd.f32 %v3361_v55, %v3259_v33  ;;  %v3523_v11 = vpack.c.bf16 %v3499_v13, %v3498_v0  ;;  %v3388_v8 = vadd.f32 %v3363_v50, %v3260_v34 }
 0x3c4   :  { %v3389_v39 = vadd.f32 %v3362_v36, %v3261_v58 }
 0x3c5   :  { %v3454_v46 = vadd.f32 %v3426_v41, %v3387_v22  ;;  %3691 = vmatmul.mubr.bf16.gmra.mxu1 %v3523_v11  ;;  %v3455_v18 = vadd.f32 %v3428_v37, %v3388_v8 }
 0x3c6   :  { %3700 = vmatprep.mubr.bf16.mxu1 %v13285_v53  ;;  %v3456_v52 = vadd.f32 %v13311_v44, %v3389_v39 }
 0x3c7   :  { %v3474_v15 = vadd.f32 %v9830_v7, %v3454_v46  ;;  %v3475_v57 = vadd.f32 %v9830_v7, %v3455_v18 }
 0x3c8   :  { %v3476_v4 = vadd.f32 %v9830_v7, %v3456_v52  ;;  %v13313_v7 = vld [vmem:[#allocation4_spill] sm:$0xff] }
 0x3c9   :  { %v3487_v17 = vmax.f32 %v3474_v15, 0.0  ;;  %v3488_v32 = vmax.f32 %v3475_v57, 0.0  ;;  %v10262_v14 = vrot.slane %v3526_v25, %v13313_v7 }
 0x3ca   :  { %v3489_v19 = vmax.f32 %v3476_v4, 0.0 }
 0x3cb   :  { %v3500_v20 = vmin.f32 %v3487_v17, 6.0  ;;  %v3501_v1 = vmin.f32 %v3488_v32, 6.0 }
 0x3cc   :  { %v3502_v51 = vmin.f32 %v3489_v19, 6.0 }
 0x3cd   :  { %v3524_v62 = vpack.c.bf16 %v3501_v1, %v3500_v20 }
 0x3ce   :  { %v3525_v59 = vpack.c.bf16 %v3502_v51, %v3502_v51 }
 0x3cf   :  { %3701 = vmatmul.mubr.bf16.gmra.mxu1 %v3524_v62 }
 0x3d0   :  { %3710 = vmatprep.mubr.bf16.mxu1 %v13285_v53 }
 0x3d7   :  { %3711 = vmatmul.mubr.bf16.gmra.mxu1 %v3525_v59 }
 0x3d8   :  { %3904 = vmatprep.mubr.bf16.mxu1 %v13285_v53 }
 0x43a   :  { %v3652_v24 = vpop.f32.mrf.mxu1 }
 0x43b   :  { %v3653_v54 = vadd.f32 %v3652_v24, %v10259_v27 }
 0x43c   :  { %v3654_v38 = vpop.f32.mrf.mxu1 }
 0x43d   :  { %v3655_v12 = vadd.f32 %v3654_v38, %v10262_v14  ;;  %v3719_v16 = vmax.f32 %v3653_v54, 0.0 }
 0x43e   :  { %v3656_v21 = vpop.f32.mrf.mxu1 }
 0x43f   :  { %v3657_v29 = vadd.f32 %v3656_v21, %v10259_v27  ;;  %v3720_v45 = vmax.f32 %v3655_v12, 0.0  ;;  %v10268_v47 = vmin.f32 %v3719_v16, 6.0 }
 0x440   :  { %v3658_v49 = vpop.f32.mrf.mxu1 }
 0x441   :  { %v3721_v5 = vmax.f32 %v3657_v29, 0.0  ;;  %v3659_v3 = vadd.f32 %v3658_v49, %v10262_v14  ;;  %v10272_v28 = vmin.f32 %v3720_v45, 6.0 }
 0x443   :  { %v10270_v63 = vmin.f32 %v3721_v5, 6.0  ;;  %v3722_v35 = vmax.f32 %v3659_v3, 0.0 }
 0x445   :  { %v3787_v61 = vpack.c.bf16 %v10270_v63, %v10268_v47  ;;  %v10276_v42 = vmin.f32 %v3722_v35, 6.0  ;;  %v6589_v47 = vld [vmem:[%s12327_s9 + $0x18] sm:$0xff]   ;;  %v6590_v63 = vld [vmem:[%s12327_s9 + $0x20] sm:$0xff]  }
 0x447   :  { %v3788_v40 = vpack.c.bf16 %v10276_v42, %v10272_v28  ;;  %v6588_v28 = vld [vmem:[%s12327_s9 + $0x10] sm:$0xff]  }
 0x448   :  { %v6592_v42 = vld [vmem:[%s12327_s9 + $0x30] sm:$0xff]  }
 0x454   :  { %v10280_v30 = vpop.f32.mrf.mxu1 }
 0x456   :  { %v10282_v56 = vpop.f32.mrf.mxu1 }
 0x458   :  { %v10284_v10 = vpop.f32.mrf.mxu1 }
 0x45a   :  { %v10286_v9 = vpop.f32.mrf.mxu1 }
 0x465   :  { %v10288_v26 = vpop.f32.mrf.mxu1 }
 0x467   :  { %v3674_v2 = vpop.f32.mrf.mxu1 }
 0x469   :  { %v3676_v23 = vpop.f32.mrf.mxu1 }
 0x46b   :  { %v3678_v33 = vpop.f32.mrf.mxu1 }
 0x46c   :  { %v3679_v5 = vadd.f32 %v3678_v33, %v10262_v14 }
 0x476   :  { %v3682_v34 = vpop.f32.mrf.mxu1 }
 0x478   :  { %v3684_v31 = vpop.f32.mrf.mxu1 }
 0x479   :  { %v3685_v16 = vadd.f32 %v3684_v31, %v10262_v14 }
 0x47a   :  { %v3686_v0 = vpop.f32.mrf.mxu1 }
 0x47b   :  { %v3687_v3 = vadd.f32 %v3686_v0, %v10259_v27  ;;  %v3677_v0 = vadd.f32 %v3676_v23, %v10259_v27 }
 0x47c   :  { %v3688_v36 = vpop.f32.mrf.mxu1 }
 0x47d   :  { %v3689_v62 = vadd.f32 %v3688_v36, %v10262_v14 }
 0x485   :  { %v3692_v41 = vpop.f32.mrf.mxu1 }
 0x486   :  { %v3693_v12 = vadd.f32 %v3692_v41, %v10259_v27  ;;  %v3683_v41 = vadd.f32 %v3682_v34, %v10259_v27  ;;  %v3673_v34 = vadd.f32 %v10288_v26, %v10259_v27  ;;  %v3663_v26 = vadd.f32 %v10280_v30, %v10259_v27 }
 0x487   :  { %v3694_v60 = vpop.f32.mrf.mxu1 }
 0x488   :  { %v3695_v32 = vadd.f32 %v3694_v60, %v10262_v14  ;;  %v3734_v60 = vmax.f32 %v3689_v62, 0.0  ;;  %v3727_v62 = vmax.f32 %v3673_v34, 0.0 }
 0x489   :  { %v3696_v48 = vpop.f32.mrf.mxu1 }
 0x48a   :  { %v3697_v19 = vadd.f32 %v3696_v48, %v10259_v27  ;;  %v3736_v29 = vmax.f32 %v3695_v32, 0.0 }
 0x48b   :  { %v3698_v37 = vpop.f32.mrf.mxu1 }
 0x48c   :  { %v3699_v39 = vadd.f32 %v3698_v37, %v10262_v14  ;;  %v3737_v35 = vmax.f32 %v3697_v19, 0.0  ;;  %v3762_v33 = vmin.f32 %v3736_v29, 6.0 }
 0x48e   :  { %v3738_v25 = vmax.f32 %v3699_v39, 0.0 }
 0x48f   :  { %v3702_v13 = vpop.f32.mrf.mxu1 }
 0x490   :  { %v3703_v52 = vadd.f32 %v3702_v13, %v10259_v27  ;;  %v3764_v48 = vmin.f32 %v3738_v25, 6.0 }
 0x491   :  { %v3704_v55 = vpop.f32.mrf.mxu1 }
 0x492   :  { %v3705_v8 = vadd.f32 %v3704_v55, %v10262_v14  ;;  %v3739_v21 = vmax.f32 %v3703_v52, 0.0  ;;  %v3735_v55 = vmax.f32 %v3693_v12, 0.0  ;;  %v3796_v39 = vpack.c.bf16 %v3764_v48, %v3762_v33 }
 0x493   :  { %v3706_v6 = vpop.f32.mrf.mxu1  ;;  %v3667_v52 = vadd.f32 %v10284_v10, %v10259_v27 }
 0x494   :  { %v3707_v46 = vadd.f32 %v3706_v6, %v10259_v27  ;;  %v3740_v4 = vmax.f32 %v3705_v8, 0.0  ;;  %v3765_v31 = vmin.f32 %v3739_v21, 6.0  ;;  %v3675_v6 = vadd.f32 %v3674_v2, %v10262_v14 }
 0x495   :  { %v3708_v50 = vpop.f32.mrf.mxu1  ;;  %v3665_v2 = vadd.f32 %v10282_v56, %v10262_v14  ;;  %v3725_v56 = vmax.f32 %v3667_v52, 0.0 }
 0x496   :  { %v3709_v22 = vadd.f32 %v3708_v50, %v10262_v14  ;;  %v3741_v51 = vmax.f32 %v3707_v46, 0.0  ;;  %v3766_v49 = vmin.f32 %v3740_v4, 6.0  ;;  %v3732_v50 = vmax.f32 %v3685_v16, 0.0 }
 0x497   :  { %v3712_v11 = vpop.f32.mrf.mxu1  ;;  %v3730_v46 = vmax.f32 %v3679_v5, 0.0  ;;  %v3751_v21 = vmin.f32 %v3725_v56, 6.0  ;;  %v3986_v5 = vld [vmem:[%s12328_s10 + $0x8] sm:$0xff] }
 0x498   :  { %v3713_v58 = vadd.f32 %v3712_v11, %v10259_v27  ;;  %v3742_v15 = vmax.f32 %v3709_v22, 0.0  ;;  %v3767_v36 = vmin.f32 %v3741_v51, 6.0  ;;  %v3733_v22 = vmax.f32 %v3687_v3, 0.0  ;;  %v3985_v3 = vld [vmem:[%s12328_s10] sm:$0xff] }
 0x499   :  { %v3714_v18 = vpop.f32.mrf.mxu1  ;;  %v3763_v11 = vmin.f32 %v3737_v35, 6.0  ;;  %v3758_v23 = vmin.f32 %v3732_v50, 6.0  ;;  %v3724_v51 = vmax.f32 %v3665_v2, 0.0  ;;  %v10371_v35 = vrot.slane %v3986_v5, %v13312_v43 }
 0x49a   :  { %v3743_v57 = vmax.f32 %v3713_v58, 0.0  ;;  %v3715_v44 = vadd.f32 %v3714_v18, %v10262_v14  ;;  %v3768_v24 = vmin.f32 %v3742_v15, 6.0  ;;  %v3797_v8 = vpack.c.bf16 %v3767_v36, %v3765_v31 }
 0x49b   :  { %v3716_v17 = vpop.f32.mrf.mxu1  ;;  %v3669_v58 = vadd.f32 %v10286_v9, %v10262_v14  ;;  %v3760_v18 = vmin.f32 %v3734_v60, 6.0  ;;  %v3731_v15 = vmax.f32 %v3683_v41, 0.0  ;;  %v3759_v9 = vmin.f32 %v3733_v22, 6.0  ;;  %v13314_v60 = vld [vmem:[#allocation6_spill] sm:$0xff] }
 0x49c   :  { %v3769_v20 = vmin.f32 %v3743_v57, 6.0  ;;  %v3744_v1 = vmax.f32 %v3715_v44, 0.0  ;;  %v3798_v37 = vpack.c.bf16 %v3768_v24, %v3766_v49  ;;  %v3761_v57 = vmin.f32 %v3735_v55, 6.0  ;;  %v6586_v49 = vld [vmem:[%s12327_s9] sm:$0xff]   ;;  %v13315_v55 = vld [vmem:[#allocation7_spill] sm:$0xff] }
 0x49d   :  { %v3717_v59 = vpop.f32.mrf.mxu1  ;;  %v3728_v44 = vmax.f32 %v3675_v6, 0.0  ;;  %v3729_v17 = vmax.f32 %v3677_v0, 0.0  ;;  %v3726_v4 = vmax.f32 %v3669_v58, 0.0  ;;  %v3757_v19 = vmin.f32 %v3731_v15, 6.0  ;;  %v13316_v6 = vld [vmem:[#allocation8_spill] sm:$0xff] }
 0x49e   :  { %v3799_v54 = vpack.c.bf16 %v3769_v20, %v3769_v20  ;;  %v3770_v38 = vmin.f32 %v3744_v1, 6.0  ;;  %v3795_v32 = vpack.c.bf16 %v3763_v11, %v3761_v57  ;;  %v3756_v20 = vmin.f32 %v3730_v46, 6.0 }
 0x49f   :  { %v3794_v1 = vpack.c.bf16 %v3760_v18, %v3758_v23  ;;  %v3754_v14 = vmin.f32 %v3728_v44, 6.0  ;;  %v3755_v59 = vmin.f32 %v3729_v17, 6.0  ;;  %v3793_v25 = vpack.c.bf16 %v3759_v9, %v3757_v19 }
 0x4a0   :  { %v3800_v45 = vpack.c.bf16 %v3770_v38, %v3770_v38  ;;  %v3867_v13 = vsel %vm2142_vm5, %v3799_v54, 0  ;;  %v3752_v24 = vmin.f32 %v3726_v4, 6.0  ;;  %v3723_v54 = vmax.f32 %v3663_v26, 0.0  ;;  %v13329_v4 = vld [vmem:[#allocation20_spill] sm:$0xff]  ;;  %v13331_v26 = vld [vmem:[#allocation11_spill] sm:$0xff] }
 0x4a1   :  { %v3792_v10 = vpack.c.bf16 %v3756_v20, %v3754_v14  ;;  %v3753_v38 = vmin.f32 %v3727_v62, 6.0  ;;  %v3750_v12 = vmin.f32 %v3724_v51, 6.0  ;;  %v10374_v36 = vrot.slane %v3986_v5, %v13313_v7  ;;  %v13335_v14 = vld [vmem:[#allocation22_spill] sm:$0xff] }
 0x4a2   :  { %6207 = vmatprep.subr.msk.bf16.mxu1 %vm2142_vm5, %v3800_v45  ;;  %v3749_v27 = vmin.f32 %v3723_v54, 6.0  ;;  %v6587_v45 = vld [vmem:[%s12327_s9 + $0x8] sm:$0xff]   ;;  %v10377_v48 = vrot.slane %v3986_v5, %v13314_v60  ;;  %v10383_v31 = vrot.slane %v3985_v3, %v13315_v55  ;;  %v10386_v50 = vrot.slane %v3985_v3, %v13316_v6 }
 0x4a3   :  { %3875 = vmatpush1.bf16.msra.mxu1 %v3867_v13  ;;  %v3791_v16 = vpack.c.bf16 %v3755_v59, %v3753_v38  ;;  %v3790_v29 = vpack.c.bf16 %v3752_v24, %v3750_v12  ;;  %v10380_v13 = vrot.slane %v3985_v3, %v13314_v60  ;;  %v10396_v11 = vrot.slane %v3985_v3, %v13313_v7 }
 0x4a4   :  { %3876 = vmatprep.subr.bf16.mxu1 %v3798_v37  ;;  %v3789_v30 = vpack.c.bf16 %v3751_v21, %v3749_v27  ;;  %v10401_v58 = vrot.slane %v3986_v5, %v13315_v55  ;;  %v10404_v46 = vrot.slane %v3985_v3, %v13312_v43  ;;  %v10423_v23 = vrot.slane %v3986_v5, %v13316_v6 }
 0x4a5   :  { %13319 = vst [vmem:[#allocation80_spill] sm:$0xff] %v10396_v11  ;;  %v10434_v20 = vrot.slane %v3986_v5, %v13329_v4  ;;  %v10441_v62 = vrot.slane %v3985_v3, %v13331_v26  ;;  %v10444_v19 = vrot.slane %v3986_v5, %v13331_v26  ;;  %v10449_v56 = vrot.slane %v3985_v3, %v13335_v14 }
 0x4a6   :  { %13321 = vst [vmem:[#allocation82_spill] sm:$0xff] %v10404_v46  ;;  %v10463_v54 = vrot.slane %v3986_v5, %v13335_v14 }
 0x4a7   :  { %3877 = vmatpush1.bf16.msra.mxu1 %v3797_v8  ;;  %13332 = vst [vmem:[#allocation118_spill] sm:$0xff] %v10441_v62  ;;  %13333 = vst [vmem:[#allocation119_spill] sm:$0xff] %v10444_v19 }
 0x4a8   :  { %3878 = vmatprep.subr.bf16.mxu1 %v3796_v39  ;;  %13336 = vst [vmem:[#allocation134_spill] sm:$0xff] %v10449_v56 }
 0x4ab   :  { %3879 = vmatpush1.bf16.msra.mxu1 %v3795_v32 }
 0x4ac   :  { %3880 = vmatprep.subr.bf16.mxu1 %v3794_v1 }
 0x4af   :  { %3881 = vmatpush1.bf16.msra.mxu1 %v3793_v25 }
 0x4b0   :  { %3882 = vmatprep.subr.bf16.mxu1 %v3792_v10  ;;  %v10460_v10 = vrot.slane %v3985_v3, %v13329_v4 }
 0x4b3   :  { %3883 = vmatpush1.bf16.msra.mxu1 %v3791_v16 }
 0x4b4   :  { %3884 = vmatprep.subr.bf16.mxu1 %v3790_v29 }
 0x4b7   :  { %3885 = vmatpush1.bf16.msra.mxu1 %v3789_v30 }
 0x4b8   :  { %3886 = vmatprep.subr.bf16.mxu1 %v3788_v40  ;;  %v6593_v40 = vld [vmem:[%s12327_s9 + $0x38] sm:$0x1f]  }
 0x4bb   :  { %3887 = vmatpush1.bf16.msra.mxu1 %v3787_v61  ;;  %v6591_v61 = vld [vmem:[%s12327_s9 + $0x28] sm:$0xff]  }
 0x4be   :  { %6208 = vmatmul.mubr.msk.bf16.vlgmr.msra.gmra.mxu1 %vm3841_vm8, %v6586_v49 }
 0x4bf   :  { %3914 = vmatprep.mubr.bf16.mxu1 %v13285_v53 }
 0x4c6   :  { %6209 = vmatmul.mubr.msk.bf16.gmra.mxu1 %vm3841_vm8, %v6587_v45 }
 0x4c7   :  { %3924 = vmatprep.mubr.bf16.mxu1 %v13285_v53 }
 0x4ce   :  { %6210 = vmatmul.mubr.msk.bf16.gmra.mxu1 %vm3841_vm8, %v6588_v28 }
 0x4cf   :  { %3934 = vmatprep.mubr.bf16.mxu1 %v13285_v53 }
 0x4d6   :  { %6211 = vmatmul.mubr.msk.bf16.gmra.mxu1 %vm3841_vm8, %v6589_v47 }
 0x4d7   :  { %3944 = vmatprep.mubr.bf16.mxu1 %v13285_v53 }
 0x4de   :  { %6212 = vmatmul.mubr.msk.bf16.gmra.mxu1 %vm3841_vm8, %v6590_v63 }
 0x4df   :  { %3954 = vmatprep.mubr.bf16.mxu1 %v13285_v53 }
 0x4e6   :  { %6213 = vmatmul.mubr.msk.bf16.gmra.mxu1 %vm3841_vm8, %v6591_v61 }
 0x4e7   :  { %3964 = vmatprep.mubr.bf16.mxu1 %v13285_v53 }
 0x4ee   :  { %6214 = vmatmul.mubr.msk.bf16.gmra.mxu1 %vm3841_vm8, %v6592_v42 }
 0x4ef   :  { %3974 = vmatprep.mubr.bf16.mxu1 %v13285_v53 }
 0x4f6   :  { %6215 = vmatmul.mubr.msk.bf16.gmra.mxu1 %vm3841_vm8, %v6593_v40 }
 0x57e   :  { %v3906_v37 = vpop.f32.mrf.mxu1 }
 0x57f   :  { %v4065_v18 = vmul.f32 %v10380_v13, %v3906_v37  ;;  %v10426_v52 = vmul.f32 %v10396_v11, %v3906_v37  ;;  %v10454_v25 = vmul.f32 %v10404_v46, %v3906_v37 }
 0x580   :  { %v3908_v41 = vpop.f32.mrf.mxu1 }
 0x581   :  { %v10389_v33 = vmul.f32 %v10371_v35, %v3908_v41  ;;  %v10392_v0 = vmul.f32 %v10374_v36, %v3908_v41  ;;  %v4066_v22 = vmul.f32 %v10377_v48, %v3908_v41  ;;  %13326 = vst [vmem:[#allocation111_spill] sm:$0xff] %v10426_v52  ;;  %13338 = vst [vmem:[#allocation132_spill] sm:$0xff] %v10454_v25 }
 0x582   :  { %v10398_v8 = vpop.f32.mrf.mxu1 }
 0x583   :  { %13317 = vst [vmem:[#allocation136_spill] sm:$0xff] %v10389_v33  ;;  %13318 = vst [vmem:[#allocation109_spill] sm:$0xff] %v10392_v0  ;;  %v4099_v39 = vmul.f32 %v10383_v31, %v10398_v8  ;;  %v10411_v34 = vmul.f32 %v10386_v50, %v10398_v8  ;;  %v10438_v1 = vmul.f32 %v10396_v11, %v10398_v8 }
 0x584   :  { %13320 = vst [vmem:[#allocation77_spill] sm:$0xff] %v10398_v8  ;;  %v3912_v15 = vpop.f32.mrf.mxu1  ;;  %v10469_v21 = vmul.f32 %v10380_v13, %v10398_v8  ;;  %v10479_v27 = vmul.f32 %v10441_v62, %v10398_v8 }
 0x585   :  { %13322 = vst [vmem:[#allocation117_spill] sm:$0xff] %v10411_v34  ;;  %v10414_v57 = vmul.f32 %v10371_v35, %v3912_v15  ;;  %v10417_v2 = vmul.f32 %v10374_v36, %v3912_v15  ;;  %v10420_v44 = vmul.f32 %v10377_v48, %v3912_v15  ;;  %v10428_v17 = vadd.f32 %v4099_v39, %v4065_v18 }
 0x586   :  { %v4100_v9 = vmul.f32 %v10401_v58, %v3912_v15  ;;  %v10431_v32 = vpop.f32.mrf.mxu1  ;;  %13330 = vst [vmem:[#allocation133_spill] sm:$0xff] %v10438_v1  ;;  %v10457_v24 = vmul.f32 %v10423_v23, %v3912_v15  ;;  %13340 = vst [vmem:[#allocation10_spill] sm:$0xff] %v10469_v21  ;;  %v10488_v28 = vmul.f32 %v10444_v19, %v3912_v15 }
 0x587   :  { %13323 = vst [vmem:[#allocation116_spill] sm:$0xff] %v10414_v57  ;;  %13324 = vst [vmem:[#allocation106_spill] sm:$0xff] %v10417_v2  ;;  %v10493_v63 = vmul.f32 %v10386_v50, %v10431_v32  ;;  %v10497_v61 = vmul.f32 %v10449_v56, %v10431_v32  ;;  %v10505_v3 = vmul.f32 %v10460_v10, %v10431_v32 }
 0x588   :  { %13325 = vst [vmem:[#allocation100_spill] sm:$0xff] %v10420_v44  ;;  %13327 = vst [vmem:[#allocation121_spill] sm:$0xff] %v10428_v17  ;;  %v10446_v51 = vadd.f32 %v4100_v9, %v4066_v22  ;;  %v10451_v59 = vpop.f32.mrf.mxu1 }
 0x589   :  { %13328 = vst [vmem:[#allocation128_spill] sm:$0xff] %v10431_v32  ;;  %13337 = vst [vmem:[#allocation130_spill] sm:$0xff] %v10451_v59  ;;  %v10473_v16 = vmul.f32 %v10434_v20, %v10451_v59  ;;  %v10520_v18 = vmul.f32 %v10371_v35, %v10451_v59  ;;  %v10524_v39 = vmul.f32 %v10374_v36, %v10451_v59 }
 0x58a   :  { %13334 = vst [vmem:[#allocation125_spill] sm:$0xff] %v10446_v51  ;;  %13339 = vst [vmem:[#allocation131_spill] sm:$0xff] %v10457_v24  ;;  %v10475_v29 = vpop.f32.mrf.mxu1  ;;  %v10534_v26 = vmul.f32 %v10377_v48, %v10451_v59 }
 0x58b   :  { %13341 = vst [vmem:[#allocation135_spill] sm:$0xff] %v10473_v16  ;;  %13342 = vst [vmem:[#allocation64_spill] sm:$0xff] %v10475_v29  ;;  %v10485_v45 = vmul.f32 %v10460_v10, %v10475_v29  ;;  %v10514_v6 = vmul.f32 %v10386_v50, %v10475_v29 }
 0x58c   :  { %13343 = vst [vmem:[#allocation60_spill] sm:$0xff] %v10479_v27  ;;  %13345 = vst [vmem:[#allocation74_spill] sm:$0xff] %v10488_v28  ;;  %v10499_v42 = vpop.f32.mrf.mxu1 }
 0x58d   :  { %13344 = vst [vmem:[#allocation59_spill] sm:$0xff] %v10485_v45  ;;  %13346 = vst [vmem:[#allocation66_spill] sm:$0xff] %v10493_v63  ;;  %v10509_v37 = vmul.f32 %v10434_v20, %v10499_v42  ;;  %v10548_v15 = vmul.f32 %v10371_v35, %v10499_v42  ;;  %v10552_v30 = vmul.f32 %v10374_v36, %v10499_v42 }
 0x58e   :  { %13347 = vst [vmem:[#allocation70_spill] sm:$0xff] %v10497_v61  ;;  %13348 = vst [vmem:[#allocation65_spill] sm:$0xff] %v10499_v42  ;;  %v10516_v22 = vpop.f32.mrf.mxu1  ;;  %v10564_v9 = vmul.f32 %v10377_v48, %v10499_v42  ;;  %v10568_v40 = vmul.f32 %v10401_v58, %v10499_v42  ;;  %v10624_v52 = vmul.f32 %v10444_v19, %v10499_v42 }
 0x58f   :  { %13349 = vst [vmem:[#allocation75_spill] sm:$0xff] %v10505_v3  ;;  %13350 = vst [vmem:[#allocation68_spill] sm:$0xff] %v10509_v37  ;;  %v10530_v4 = vmul.f32 %v10460_v10, %v10516_v22  ;;  %v10538_v14 = vmul.f32 %v10386_v50, %v10516_v22  ;;  %v10542_v49 = vmul.f32 %v10449_v56, %v10516_v22 }
 0x590   :  { %13351 = vst [vmem:[#allocation62_spill] sm:$0xff] %v10514_v6  ;;  %13352 = vst [vmem:[#allocation69_spill] sm:$0xff] %v10516_v22  ;;  %v10544_v38 = vpop.f32.mrf.mxu1  ;;  %v10560_v41 = vmul.f32 %v10396_v11, %v10516_v22  ;;  %v10583_v53 = vmul.f32 %v10404_v46, %v10516_v22  ;;  %v10596_v8 = vmul.f32 %v10380_v13, %v10516_v22 }
 0x591   :  { %13353 = vst [vmem:[#allocation73_spill] sm:$0xff] %v10520_v18  ;;  %13354 = vst [vmem:[#allocation72_spill] sm:$0xff] %v10524_v39  ;;  %v10556_v5 = vmul.f32 %v10434_v20, %v10544_v38  ;;  %v10575_v55 = vmul.f32 %v10371_v35, %v10544_v38  ;;  %v10579_v60 = vmul.f32 %v10374_v36, %v10544_v38 }
 0x592   :  { %13355 = vst [vmem:[#allocation71_spill] sm:$0xff] %v10530_v4  ;;  %13356 = vst [vmem:[#allocation76_spill] sm:$0xff] %v10534_v26  ;;  %v10571_v47 = vpop.f32.mrf.mxu1  ;;  %v10592_v12 = vmul.f32 %v10377_v48, %v10544_v38  ;;  %v10620_v25 = vmul.f32 %v10401_v58, %v10544_v38 }
 0x593   :  { %13357 = vst [vmem:[#allocation61_spill] sm:$0xff] %v10538_v14  ;;  %13358 = vst [vmem:[#allocation67_spill] sm:$0xff] %v10542_v49  ;;  %v10588_v7 = vmul.f32 %v10460_v10, %v10571_v47  ;;  %v10600_v27 = vmul.f32 %v10386_v50, %v10571_v47  ;;  %v10604_v34 = vmul.f32 %v10449_v56, %v10571_v47 }
 0x594   :  { %13359 = vst [vmem:[#allocation92_spill] sm:$0xff] %v10544_v38  ;;  %13360 = vst [vmem:[#allocation95_spill] sm:$0xff] %v10548_v15  ;;  %v10606_v43 = vpop.f32.mrf.mxu1 }
 0x595   :  { %13361 = vst [vmem:[#allocation99_spill] sm:$0xff] %v10552_v30  ;;  %13362 = vst [vmem:[#allocation124_spill] sm:$0xff] %v10556_v5  ;;  %v10612_v63 = vmul.f32 %v10434_v20, %v10606_v43  ;;  %v10616_v21 = vmul.f32 %v10374_v36, %v10606_v43  ;;  %v10631_v45 = vmul.f32 %v10371_v35, %v10606_v43 }
 0x596   :  { %13363 = vst [vmem:[#allocation107_spill] sm:$0xff] %v10560_v41  ;;  %13364 = vst [vmem:[#allocation113_spill] sm:$0xff] %v10564_v9  ;;  %v10627_v1 = vpop.f32.mrf.mxu1  ;;  %v10635_v3 = vmul.f32 %v10377_v48, %v10606_v43  ;;  %v10639_v17 = vmul.f32 %v10401_v58, %v10606_v43  ;;  %v10648_v61 = vmul.f32 %v10444_v19, %v10606_v43 }
 0x597   :  { %13365 = vst [vmem:[#allocation122_spill] sm:$0xff] %v10568_v40  ;;  %13366 = vst [vmem:[#allocation115_spill] sm:$0xff] %v10571_v47  ;;  %v10644_v28 = vmul.f32 %v10460_v10, %v10627_v1  ;;  %v10652_v16 = vmul.f32 %v10423_v23, %v10606_v43  ;;  %v10656_v37 = vmul.f32 %v10386_v50, %v10627_v1 }
 0x598   :  { %13367 = vst [vmem:[#allocation120_spill] sm:$0xff] %v10575_v55  ;;  %13368 = vst [vmem:[#allocation126_spill] sm:$0xff] %v10579_v60  ;;  %v10660_v24 = vmul.f32 %v10449_v56, %v10627_v1  ;;  %v10662_v51 = vpop.f32.mrf.mxu1  ;;  %v10666_v57 = vmul.f32 %v10404_v46, %v10627_v1  ;;  %v10670_v33 = vmul.f32 %v10396_v11, %v10627_v1 }
 0x599   :  { %13369 = vst [vmem:[#allocation21_spill] sm:$0xff] %v10583_v53  ;;  %13370 = vst [vmem:[#allocation23_spill] sm:$0xff] %v10588_v7  ;;  %v10674_v44 = vmul.f32 %v10434_v20, %v10662_v51  ;;  %v10678_v0 = vmul.f32 %v10374_v36, %v10662_v51  ;;  %v10682_v2 = vmul.f32 %v10380_v13, %v10627_v1 }
 0x59a   :  { %13371 = vst [vmem:[#allocation27_spill] sm:$0xff] %v10592_v12  ;;  %13372 = vst [vmem:[#allocation39_spill] sm:$0xff] %v10596_v8  ;;  %v10686_v49 = vpop.f32.mrf.mxu1  ;;  %v10690_v4 = vmul.f32 %v10371_v35, %v10662_v51  ;;  %v10694_v7 = vmul.f32 %v10377_v48, %v10662_v51  ;;  %v10708_v59 = vmul.f32 %v10444_v19, %v10662_v51 }
 0x59b   :  { %13373 = vst [vmem:[#allocation51_spill] sm:$0xff] %v10600_v27  ;;  %13374 = vst [vmem:[#allocation57_spill] sm:$0xff] %v10604_v34  ;;  %v10700_v22 = vmul.f32 %v10386_v50, %v10686_v49  ;;  %v10704_v34 = vmul.f32 %v10401_v58, %v10662_v51  ;;  %v10712_v29 = vmul.f32 %v10460_v10, %v10686_v49 }
 0x59c   :  { %13375 = vst [vmem:[#allocation48_spill] sm:$0xff] %v10606_v43  ;;  %13376 = vst [vmem:[#allocation52_spill] sm:$0xff] %v10612_v63  ;;  %v10714_v32 = vpop.f32.mrf.mxu1  ;;  %v10719_v14 = vmul.f32 %v10404_v46, %v10686_v49  ;;  %v10739_v6 = vmul.f32 %v10380_v13, %v10686_v49 }
 0x59d   :  { %13377 = vst [vmem:[#allocation58_spill] sm:$0xff] %v10616_v21  ;;  %13378 = vst [vmem:[#allocation54_spill] sm:$0xff] %v10620_v25  ;;  %v10727_v15 = vmul.f32 %v10434_v20, %v10714_v32  ;;  %v10731_v18 = vmul.f32 %v10371_v35, %v10714_v32  ;;  %v10735_v5 = vmul.f32 %v10374_v36, %v10714_v32 }
 0x59e   :  { %13379 = vst [vmem:[#allocation43_spill] sm:$0xff] %v10624_v52  ;;  %13380 = vst [vmem:[#allocation53_spill] sm:$0xff] %v10627_v1  ;;  %v10723_v52 = vmul.f32 %v10396_v11, %v10686_v49  ;;  %v10741_v63 = vpop.f32.mrf.mxu1  ;;  %v10745_v25 = vmul.f32 %v10377_v48, %v10714_v32  ;;  %v10749_v9 = vmul.f32 %v10401_v58, %v10714_v32 }
 0x59f   :  { %13381 = vst [vmem:[#allocation56_spill] sm:$0xff] %v10631_v45  ;;  %13382 = vst [vmem:[#allocation63_spill] sm:$0xff] %v10635_v3  ;;  %v10753_v40 = vmul.f32 %v10444_v19, %v10714_v32  ;;  %v10757_v26 = vmul.f32 %v10423_v23, %v10714_v32  ;;  %v10762_v39 = vmul.f32 %v10386_v50, %v10741_v63 }
 0x5a0   :  { %13383 = vst [vmem:[#allocation87_spill] sm:$0xff] %v10639_v17  ;;  %13384 = vst [vmem:[#allocation90_spill] sm:$0xff] %v10644_v28  ;;  %v10766_v43 = vmul.f32 %v10449_v56, %v10741_v63  ;;  %v10770_v42 = vmul.f32 %v10460_v10, %v10741_v63  ;;  %v10772_v38 = vpop.f32.mrf.mxu1  ;;  %v10780_v30 = vmul.f32 %v10396_v11, %v10741_v63 }
 0x5a1   :  { %13385 = vst [vmem:[#allocation96_spill] sm:$0xff] %v10648_v61  ;;  %13386 = vst [vmem:[#allocation101_spill] sm:$0xff] %v10652_v16  ;;  %v10784_v53 = vmul.f32 %v10380_v13, %v10741_v63  ;;  %v10794_v27 = vmul.f32 %v10371_v35, %v10772_v38  ;;  %v10798_v8 = vmul.f32 %v10374_v36, %v10772_v38 }
 0x5a2   :  { %13387 = vst [vmem:[#allocation110_spill] sm:$0xff] %v10656_v37  ;;  %13388 = vst [vmem:[#allocation103_spill] sm:$0xff] %v10660_v24  ;;  %v10776_v24 = vmul.f32 %v10404_v46, %v10741_v63  ;;  %v10790_v37 = vmul.f32 %v10434_v20, %v10772_v38  ;;  %v10800_v1 = vpop.f32.mrf.mxu1  ;;  %v10804_v47 = vmul.f32 %v10377_v48, %v10772_v38 }
 0x5a3   :  { %13389 = vst [vmem:[#allocation108_spill] sm:$0xff] %v10662_v51  ;;  %13390 = vst [vmem:[#allocation114_spill] sm:$0xff] %v10666_v57  ;;  %v10809_v41 = vmul.f32 %v10401_v58, %v10772_v38  ;;  %v10818_v61 = vmul.f32 %v10386_v50, %v10800_v1  ;;  %v10826_v28 = vmul.f32 %v10460_v10, %v10800_v1 }
 0x5a4   :  { %13391 = vst [vmem:[#allocation17_spill] sm:$0xff] %v10670_v33  ;;  %13392 = vst [vmem:[#allocation19_spill] sm:$0xff] %v10674_v44  ;;  %v10822_v44 = vmul.f32 %v10449_v56, %v10800_v1  ;;  %v10833_v45 = vmul.f32 %v10404_v46, %v10800_v1  ;;  %v10841_v55 = vmul.f32 %v10380_v13, %v10800_v1 }
 0x5a5   :  { %13393 = vst [vmem:[#allocation44_spill] sm:$0xff] %v10678_v0  ;;  %13394 = vst [vmem:[#allocation46_spill] sm:$0xff] %v10682_v2 }
 0x5a6   :  { %13395 = vst [vmem:[#allocation50_spill] sm:$0xff] %v10686_v49  ;;  %13396 = vst [vmem:[#allocation42_spill] sm:$0xff] %v10690_v4 }
 0x5a7   :  { %13397 = vst [vmem:[#allocation49_spill] sm:$0xff] %v10694_v7  ;;  %13398 = vst [vmem:[#allocation55_spill] sm:$0xff] %v10700_v22 }
 0x5a8   :  { %13399 = vst [vmem:[#allocation83_spill] sm:$0xff] %v10704_v34  ;;  %13400 = vst [vmem:[#allocation85_spill] sm:$0xff] %v10708_v59  ;;  %v10837_v59 = vmul.f32 %v10396_v11, %v10800_v1 }
 0x5a9   :  { %13401 = vst [vmem:[#allocation88_spill] sm:$0xff] %v10712_v29  ;;  %13402 = vst [vmem:[#allocation93_spill] sm:$0xff] %v10714_v32  ;;  %v10813_v29 = vmul.f32 %v10444_v19, %v10772_v38 }
 0x5aa   :  { %13403 = vst [vmem:[#allocation102_spill] sm:$0xff] %v10719_v14  ;;  %13404 = vst [vmem:[#allocation94_spill] sm:$0xff] %v10723_v52 }
 0x5ab   :  { %13405 = vst [vmem:[#allocation97_spill] sm:$0xff] %v10727_v15  ;;  %13406 = vst [vmem:[#allocation105_spill] sm:$0xff] %v10731_v18  ;;  %v10828_v15 = vpop.f32.mrf.mxu1 }
 0x5ac   :  { %13407 = vst [vmem:[#allocation25_spill] sm:$0xff] %v10735_v5  ;;  %13408 = vst [vmem:[#allocation24_spill] sm:$0xff] %v10739_v6  ;;  %v10846_v3 = vmul.f32 %v10434_v20, %v10828_v15  ;;  %v10850_v16 = vmul.f32 %v10371_v35, %v10828_v15  ;;  %v10854_v17 = vmul.f32 %v10374_v36, %v10828_v15 }
 0x5ad   :  { %13409 = vst [vmem:[#allocation29_spill] sm:$0xff] %v10741_v63  ;;  %13410 = vst [vmem:[#allocation30_spill] sm:$0xff] %v10745_v25  ;;  %v10856_v12 = vpop.f32.mrf.mxu1  ;;  %v10860_v60 = vmul.f32 %v10377_v48, %v10828_v15  ;;  %v10864_v34 = vmul.f32 %v10401_v58, %v10828_v15  ;;  %v10868_v21 = vmul.f32 %v10444_v19, %v10828_v15 }
 0x5ae   :  { %13411 = vst [vmem:[#allocation32_spill] sm:$0xff] %v10749_v9  ;;  %13412 = vst [vmem:[#allocation31_spill] sm:$0xff] %v10753_v40  ;;  %v10872_v32 = vmul.f32 %v10423_v23, %v10828_v15  ;;  %v10891_v14 = vmul.f32 %v10404_v46, %v10856_v12  ;;  %v10895_v51 = vmul.f32 %v10396_v11, %v10856_v12 }
 0x5af   :  { %13413 = vst [vmem:[#allocation37_spill] sm:$0xff] %v10757_v26  ;;  %13414 = vst [vmem:[#allocation40_spill] sm:$0xff] %v10762_v39  ;;  %v10899_v57 = vmul.f32 %v10380_v13, %v10856_v12 }
 0x5b0   :  { %13415 = vst [vmem:[#allocation36_spill] sm:$0xff] %v10766_v43  ;;  %13416 = vst [vmem:[#allocation35_spill] sm:$0xff] %v10770_v42  ;;  %v10881_v43 = vmul.f32 %v10449_v56, %v10856_v12  ;;  %v10885_v42 = vmul.f32 %v10460_v10, %v10856_v12 }
 0x5b1   :  { %13417 = vst [vmem:[#allocation45_spill] sm:$0xff] %v10772_v38  ;;  %13418 = vst [vmem:[#allocation47_spill] sm:$0xff] %v10776_v24 }
 0x5b2   :  { %13419 = vst [vmem:[#allocation78_spill] sm:$0xff] %v10780_v30  ;;  %13420 = vst [vmem:[#allocation81_spill] sm:$0xff] %v10784_v53 }
 0x5b3   :  { %13421 = vst [vmem:[#allocation86_spill] sm:$0xff] %v10790_v37  ;;  %13422 = vst [vmem:[#allocation98_spill] sm:$0xff] %v10794_v27 }
 0x5b4   :  { %13423 = vst [vmem:[#allocation79_spill] sm:$0xff] %v10798_v8  ;;  %13424 = vst [vmem:[#allocation84_spill] sm:$0xff] %v10800_v1 }
 0x5b5   :  { %13425 = vst [vmem:[#allocation104_spill] sm:$0xff] %v10804_v47  ;;  %13426 = vst [vmem:[#allocation89_spill] sm:$0xff] %v10809_v41 }
 0x5b6   :  { %13427 = vst [vmem:[#allocation9_spill] sm:$0xff] %v10813_v29  ;;  %13428 = vst [vmem:[#allocation15_spill] sm:$0xff] %v10818_v61 }
 0x5b7   :  { %13429 = vst [vmem:[#allocation33_spill] sm:$0xff] %v10822_v44  ;;  %13430 = vst [vmem:[#allocation26_spill] sm:$0xff] %v10826_v28  ;;  %v10877_v44 = vmul.f32 %v10386_v50, %v10856_v12  ;;  %v10887_v28 = vpop.f32.mrf.mxu1 }
 0x5b8   :  { %13431 = vst [vmem:[#allocation28_spill] sm:$0xff] %v10828_v15  ;;  %13432 = vst [vmem:[#allocation34_spill] sm:$0xff] %v10833_v45  ;;  %v10905_v22 = vmul.f32 %v10434_v20, %v10887_v28  ;;  %v10909_v6 = vmul.f32 %v10371_v35, %v10887_v28  ;;  %v10913_v2 = vmul.f32 %v10374_v36, %v10887_v28 }
 0x5b9   :  { %13433 = vst [vmem:[#allocation38_spill] sm:$0xff] %v10837_v59  ;;  %13434 = vst [vmem:[#allocation41_spill] sm:$0xff] %v10841_v55  ;;  %v10915_v52 = vpop.f32.mrf.mxu1  ;;  %v10919_v63 = vmul.f32 %v10377_v48, %v10887_v28  ;;  %v10924_v33 = vmul.f32 %v10401_v58, %v10887_v28  ;;  %v10928_v49 = vmul.f32 %v10444_v19, %v10887_v28  ;;  %v11038_v59 = vld [vmem:[%s12328_s10 + $0x10] ss:$0 sm:$0xff] }
 0x5ba   :  { %13435 = vst [vmem:[#allocation16_spill] sm:$0xff] %v10846_v3  ;;  %13436 = vst [vmem:[#allocation13_spill] sm:$0xff] %v10850_v16  ;;  %v10933_v40 = vmul.f32 %v10449_v56, %v10915_v52  ;;  %v10937_v37 = vmul.f32 %v10460_v10, %v10915_v52  ;;  %v4153_v39 = vmul.f32 %v10441_v62, %v10915_v52 }
 0x5bb   :  { %13437 = vst [vmem:[#allocation12_spill] sm:$0xff] %v10854_v17  ;;  %13438 = vst [vmem:[#allocation18_spill] sm:$0xff] %v10856_v12  ;;  %v10941_v3 = vpop.f32.mrf.mxu1  ;;  %v10945_v26 = vmul.f32 %v10386_v50, %v10915_v52  ;;  %v10950_v29 = vmul.f32 %v10404_v46, %v10915_v52  ;;  %v10954_v25 = vmul.f32 %v10396_v11, %v10915_v52 }
 0x5bc   :  { %13439 = vst [vmem:[#allocation175_spill] sm:$0xff] %v10860_v60  ;;  %13440 = vst [vmem:[#allocation139_spill] sm:$0xff] %v10864_v34  ;;  %v10959_v7 = vmul.f32 %v10434_v20, %v10941_v3  ;;  %v10963_v18 = vmul.f32 %v10371_v35, %v10941_v3  ;;  %v10967_v41 = vmul.f32 %v10374_v36, %v10941_v3 }
 0x5bd   :  { %13441 = vst [vmem:[#allocation153_spill] sm:$0xff] %v10868_v21  ;;  %13442 = vst [vmem:[#allocation157_spill] sm:$0xff] %v10872_v32  ;;  %v10969_v4 = vpop.f32.mrf.mxu1  ;;  %v10974_v5 = vmul.f32 %v10377_v48, %v10941_v3  ;;  %v10978_v9 = vmul.f32 %v10401_v58, %v10941_v3  ;;  %v10982_v15 = vmul.f32 %v10444_v19, %v10941_v3 }
 0x5be   :  { %13443 = vst [vmem:[#allocation162_spill] sm:$0xff] %v10877_v44  ;;  %13444 = vst [vmem:[#allocation170_spill] sm:$0xff] %v10881_v43  ;;  %v10989_v0 = vmul.f32 %v10460_v10, %v10969_v4  ;;  %v10993_v43 = vmul.f32 %v10386_v50, %v10969_v4  ;;  %v11003_v38 = vmul.f32 %v10404_v46, %v10969_v4 }
 0x5bf   :  { %13445 = vst [vmem:[#allocation166_spill] sm:$0xff] %v10885_v42  ;;  %13446 = vst [vmem:[#allocation138_spill] sm:$0xff] %v10887_v28  ;;  %v10995_v42 = vpop.f32.mrf.mxu1  ;;  %v11007_v45 = vmul.f32 %v10396_v11, %v10969_v4  ;;  %v11011_v24 = vmul.f32 %v10380_v13, %v10969_v4 }
 0x5c0   :  { %13447 = vst [vmem:[#allocation169_spill] sm:$0xff] %v10891_v14  ;;  %13448 = vst [vmem:[#allocation164_spill] sm:$0xff] %v10895_v51  ;;  %v4090_v61 = vmul.f32 %v10377_v48, %v10995_v42  ;;  %v4222_v30 = vmul.f32 %v10463_v54, %v10995_v42  ;;  %v11020_v46 = vmul.f32 %v10434_v20, %v10995_v42  ;;  %v4521_v11 = vrot.slane %v10993_v43, 1 }
 0x5c1   :  { %13449 = vst [vmem:[#allocation174_spill] sm:$0xff] %v10899_v57  ;;  %13450 = vst [vmem:[#allocation151_spill] sm:$0xff] %v10905_v22  ;;  %v3970_v55 = vpop.f32.mrf.mxu1  ;;  %v11025_v53 = vmul.f32 %v10371_v35, %v10995_v42  ;;  %v11029_v44 = vmul.f32 %v10374_v36, %v10995_v42  ;;  %v11033_v48 = vmul.f32 %v10444_v19, %v10995_v42 }
 0x5c2   :  { %13451 = vst [vmem:[#allocation148_spill] sm:$0xff] %v10924_v33  ;;  %13452 = vst [vmem:[#allocation172_spill] sm:$0xff] %v10928_v49  ;;  %v11041_v12 = vmul.f32 %v10383_v31, %v3970_v55  ;;  %v4157_v43 = vmul.f32 %v10441_v62, %v3970_v55  ;;  %v4191_v35 = vmul.f32 %v10386_v50, %v3970_v55  ;;  %v11057_v50 = vld [vmem:[%s12328_s10 + $0x18] ss:$0 sm:$0xff] }
 0x5c3   :  { %13453 = vst [vmem:[#allocation173_spill] sm:$0xff] %v10933_v40  ;;  %13454 = vst [vmem:[#allocation155_spill] sm:$0xff] %v10937_v37  ;;  %v4221_v40 = vmul.f32 %v10449_v56, %v10969_v4  ;;  %v10999_v37 = vmul.f32 %v10441_v62, %v10969_v4  ;;  %v4257_v1 = vmul.f32 %v10460_v10, %v3970_v55  ;;  %v3972_v49 = vpop.f32.mrf.mxu1 }
 0x5c4   :  { %13455 = vst [vmem:[#allocation158_spill] sm:$0xff] %v10945_v26  ;;  %13456 = vst [vmem:[#allocation171_spill] sm:$0xff] %v10950_v29  ;;  %v11047_v36 = vmul.f32 %v11038_v59, %v3970_v55  ;;  %v4223_v22 = vmul.f32 %v10449_v56, %v3970_v55  ;;  %v4525_v33 = vrot.slane %v4191_v35, 1  ;;  %v4124_v62 = vmul.f32 %v10401_v58, %v3972_v49 }
 0x5c5   :  { %13457 = vst [vmem:[#allocation168_spill] sm:$0xff] %v10959_v7  ;;  %13458 = vst [vmem:[#allocation165_spill] sm:$0xff] %v10989_v0  ;;  %v13461_v7 = vrot.slane %v10945_v26, 1  ;;  %v4651_v60 = vrot.slane %v4257_v1, 1  ;;  %v4158_v16 = vmul.f32 %v10444_v19, %v3972_v49  ;;  %v4192_v21 = vmul.f32 %v10423_v23, %v3972_v49 }
 0x5c6   :  { %13459 = vst [vmem:[#allocation161_spill] sm:$0xff] %v11020_v46  ;;  %13460 = vst [vmem:[#allocation144_spill] sm:$0xff] %v11047_v36  ;;  %v4258_v55 = vmul.f32 %v10434_v20, %v3972_v49  ;;  %v11065_v26 = vmul.f32 %v11057_v50, %v3972_v49  ;;  %v13462_v1 = vrot.slane %v10989_v0, 1  ;;  %v11070_v47 = vadd.f32 %v4124_v62, %v4090_v61 }
 0x5c7   :  { %v4522_v32 = vsel %vm870_vm3, %v13461_v7, %v4521_v11  ;;  %v3976_v7 = vpop.f32.mrf.mxu1  ;;  %v4527_v34 = vrot.slane %v4192_v21, 1  ;;  %v4224_v57 = vmul.f32 %v10463_v54, %v3972_v49  ;;  %v13463_v61 = vrot.slane %v11020_v46, 1 }
 0x5c8   :  { %v4652_v35 = vsel %vm870_vm3, %v13462_v1, %v4651_v60  ;;  %v4225_v27 = vmul.f32 %v10449_v56, %v3976_v7  ;;  %v4259_v19 = vmul.f32 %v10460_v10, %v3976_v7  ;;  %v4653_v17 = vrot.slane %v4258_v55, 1 }
 0x5c9   :  { %v11074_v8 = vadd.f32 %v4652_v35, %v4221_v40  ;;  %v4295_v28 = vmul.f32 %v11038_v59, %v3976_v7  ;;  %v3978_v29 = vpop.f32.mrf.mxu1  ;;  %v4575_v14 = vadd.f32 %v4522_v32, %v4153_v39  ;;  %v13464_v39 = vrot.slane %v11047_v36, 6 }
 0x5ca   :  { %v4655_v51 = vrot.slane %v4259_v19, 1  ;;  %v4226_v0 = vmul.f32 %v10463_v54, %v3978_v29  ;;  %v4654_v1 = vsel %vm870_vm3, %v13463_v61, %v4653_v17  ;;  %v4260_v40 = vmul.f32 %v10434_v20, %v3978_v29 }
 0x5cb   :  { %v5173_v56 = vrot.slane %v4295_v28, 6  ;;  %v3980_v21 = vpop.f32.mrf.mxu1  ;;  %v11084_v55 = vadd.f32 %v4654_v1, %v4222_v30  ;;  %v11088_v32 = vmul.f32 %v11057_v50, %v3978_v29  ;;  %v4579_v29 = vadd.f32 %v4525_v33, %v4157_v43 }
 0x5cc   :  { %v4656_v7 = vsel %vm870_vm3, %v4651_v60, %v4655_v51  ;;  %v4261_v19 = vmul.f32 %v10460_v10, %v3980_v21  ;;  %v4657_v61 = vrot.slane %v4260_v40, 1  ;;  %v4297_v28 = vmul.f32 %v11038_v59, %v3980_v21 }
 0x5cd   :  { %v4711_v49 = vadd.f32 %v4656_v7, %v4223_v22  ;;  %v11094_v35 = vsel %vm2142_vm5, %v13464_v39, %v5173_v56  ;;  %v3982_v62 = vpop.f32.mrf.mxu1  ;;  %v4526_v60 = vsel %vm870_vm3, %v4521_v11, %v4525_v33  ;;  %v4190_v40 = vmul.f32 %v10423_v23, %v10995_v42 }
 0x5ce   :  { %v4658_v10 = vsel %vm870_vm3, %v4653_v17, %v4657_v61  ;;  %v4577_v22 = vadd.f32 %v4526_v60, %v10999_v37  ;;  %v4659_v7 = vrot.slane %v4261_v19, 1  ;;  %v5177_v39 = vrot.slane %v4297_v28, 6 }
 0x5cf   :  { %v4911_v46 = vrot.slane %v4711_v49, 1  ;;  %v4712_v36 = vadd.f32 %v4658_v10, %v4224_v57  ;;  %v4262_v21 = vmul.f32 %v10434_v20, %v3982_v62  ;;  %v13465_v30 = vrot.slane %v11074_v8, 1 }
 0x5d0   :  { %v4660_v11 = vsel %vm870_vm3, %v4655_v51, %v4659_v7  ;;  %v4298_v33 = vmul.f32 %v11057_v50, %v3982_v62  ;;  %v4373_v17 = vrot.slane %v11029_v44, 1  ;;  %v5178_v19 = vsel %vm2142_vm5, %v5173_v56, %v5177_v39 }
 0x5d1   :  { %v4912_v1 = vsel %vm870_vm3, %v13465_v30, %v4911_v46  ;;  %v4913_v37 = vrot.slane %v4712_v36, 1  ;;  %v4713_v57 = vadd.f32 %v4660_v11, %v4225_v27  ;;  %v4523_v28 = vrot.slane %v4190_v40, 1 }
 0x5d2   :  { %v11111_v43 = vadd.f32 %v4912_v1, %v4575_v14  ;;  %v4426_v49 = vadd.f32 %v4373_v17, %v11025_v53  ;;  %v4580_v20 = vadd.f32 %v4527_v34, %v4158_v16  ;;  %v4661_v60 = vrot.slane %v4262_v21, 1 }
 0x5d3   :  { %v13466_v30 = vrot.slane %v11084_v55, 1  ;;  %v4915_v62 = vrot.slane %v4713_v57, 1  ;;  %v4789_v44 = vrot.slane %v11070_v47, 2  ;;  %v4528_v14 = vsel %vm870_vm3, %v4523_v28, %v4527_v34 }
 0x5d4   :  { %v5035_v10 = vrot.slane %v11111_v43, 3  ;;  %v4662_v27 = vsel %vm870_vm3, %v4657_v61, %v4661_v60  ;;  %v5179_v36 = vrot.slane %v4298_v33, 6  ;;  %v4371_v56 = vrot.slane %v11007_v45, 1 }
 0x5d5   :  { %v4914_v51 = vsel %vm870_vm3, %v13466_v30, %v4913_v37  ;;  %v4916_v53 = vsel %vm870_vm3, %v4911_v46, %v4915_v62  ;;  %v11124_v16 = vadd.f32 %v4915_v62, %v4579_v29  ;;  %v4578_v1 = vadd.f32 %v4528_v14, %v11033_v48 }
 0x5d6   :  { %v4714_v7 = vadd.f32 %v4662_v27, %v4226_v0  ;;  %v11127_v39 = vadd.f32 %v4916_v53, %v4577_v22  ;;  %v4842_v40 = vadd.f32 %v4789_v44, %v4426_v49  ;;  %v13467_v21 = vrot.slane %v11088_v32, 6 }
 0x5d7   :  { %v4425_v34 = vadd.f32 %v4371_v56, %v11003_v38  ;;  %v11137_v46 = vadd.f32 %v11041_v12, %v11011_v24  ;;  %v5043_v29 = vrot.slane %v11124_v16, 3  ;;  %v4122_v0 = vmul.f32 %v10401_v58, %v10995_v42 }
 0x5d8   :  { %v5180_v47 = vsel %vm2142_vm5, %v13467_v21, %v5179_v36  ;;  %v4917_v61 = vrot.slane %v4714_v7, 1  ;;  %v5039_v48 = vrot.slane %v11127_v39, 3  ;;  %v11145_v22 = vmul.f32 %v10423_v23, %v10941_v3 }
 0x5d9   :  { %v11149_v11 = vmul.f32 %v11057_v50, %v10995_v42  ;;  %v4369_v38 = vrot.slane %v10967_v41, 1  ;;  %v4787_v33 = vrot.slane %v11137_v46, 2  ;;  %v11156_v57 = vadd.f32 %v10978_v9, %v10919_v63 }
 0x5da   :  { %v4918_v24 = vsel %vm870_vm3, %v4913_v37, %v4917_v61  ;;  %v4970_v12 = vadd.f32 %v4917_v61, %v4580_v20  ;;  %v13468_v60 = vrot.slane %v10913_v2, 1  ;;  %v4450_v42 = vadd.f32 %v4122_v0, %v10974_v5 }
 0x5db   :  { %v4968_v49 = vadd.f32 %v4918_v24, %v4578_v1  ;;  %v4374_v62 = vsel %vm870_vm3, %v4369_v38, %v4373_v17  ;;  %v4841_v41 = vadd.f32 %v4787_v33, %v4425_v34  ;;  %v4519_v63 = vrot.slane %v11145_v22, 1 }
 0x5dc   :  { %v4370_v30 = vsel %vm870_vm3, %v13468_v60, %v4369_v38  ;;  %v5045_v14 = vrot.slane %v4970_v12, 3  ;;  %v4424_v20 = vadd.f32 %v4374_v62, %v10963_v18  ;;  %v4781_v9 = vrot.slane %v11156_v57, 2  ;;  %v13470_v62 = vld [vmem:[#allocation174_spill] sm:$0xff] }
 0x5dd   :  { %v4422_v37 = vadd.f32 %v4370_v30, %v10909_v6  ;;  %v4785_v27 = vrot.slane %v4450_v42, 2  ;;  %v5041_v36 = vrot.slane %v4968_v49, 3  ;;  %v5097_v17 = vadd.f32 %v5043_v29, %v4841_v41  ;;  %v6603_v57 = vld [vmem:[%s12330_s13 + $0xc4] ss:$16 sps:$4 sm:$0xff]  }
 0x5de   :  { %v5098_v53 = vadd.f32 %v5045_v14, %v4842_v40  ;;  %v5167_v5 = vrot.slane %v11149_v11, 6  ;;  %v5171_v1 = vrot.slane %v11065_v26, 6  ;;  %v4524_v6 = vsel %vm870_vm3, %v4519_v63, %v4523_v28 }
 0x5df   :  { %v4786_v18 = vsel %vm1527_vm4, %v4781_v9, %v4785_v27  ;;  %v4790_v7 = vsel %vm1527_vm4, %v4785_v27, %v4789_v44  ;;  %v5046_v39 = vsel %vm1936_vm6, %v5041_v36, %v5045_v14  ;;  %v5231_v21 = vadd.f32 %v5178_v19, %v5097_v17  ;;  %v13473_v17 = vld [vmem:[#allocation169_spill] sm:$0xff] }
 0x5e0   :  { %v5232_v40 = vadd.f32 %v5180_v47, %v5098_v53  ;;  %v4576_v34 = vadd.f32 %v4524_v6, %v10982_v15  ;;  %v4838_v61 = vadd.f32 %v4786_v18, %v4422_v37  ;;  %v4840_v0 = vadd.f32 %v4790_v7, %v4424_v20  ;;  %v13471_v37 = vld [vmem:[#allocation164_spill] sm:$0xff]  ;;  %v13474_v6 = vld [vmem:[#allocation171_spill] sm:$0xff] }
 0x5e1   :  { %v5172_v26 = vsel %vm2142_vm5, %v5167_v5, %v5171_v1  ;;  %v13469_v28 = vrot.slane %v11088_v32, 6  ;;  %v4087_v24 = vmul.f32 %v10380_v13, %v10915_v52  ;;  %v5247_v12 = vpack.c.bf16 %v5231_v21, %v5231_v21 }
 0x5e2   :  { %v5248_v44 = vpack.c.bf16 %v5232_v40, %v5232_v40  ;;  %v11190_v49 = vadd.f32 %v4914_v51, %v4576_v34  ;;  %v4119_v15 = vmul.f32 %v10383_v31, %v10915_v52  ;;  %v5096_v19 = vadd.f32 %v5046_v39, %v4840_v0 }
 0x5e3   :  { %v5176_v38 = vsel %vm2142_vm5, %v5171_v1, %v13469_v28  ;;  %v4121_v47 = vmul.f32 %v10383_v31, %v10969_v4  ;;  %v11198_v60 = vmul.f32 %v11038_v59, %v10969_v4  ;;  %v4367_v32 = vrot.slane %v10954_v25, 1 }
 0x5e4   :  { %6219 = vmatprep.subr.msk.bf16.mxu0 %vm2142_vm5, %v5248_v44  ;;  %v5270_v30 = vsel %vm2142_vm5, %v5247_v12, 0  ;;  %v5037_v51 = vrot.slane %v11190_v49, 3  ;;  %v11205_v42 = vadd.f32 %v4119_v15, %v13470_v62  ;;  %v5040_v14 = vsel %vm1936_vm6, %v5035_v10, %v5039_v48 }
 0x5e5   :  { %5278 = vmatpush1.bf16.msra.mxu0 %v5270_v30  ;;  %v5230_v41 = vadd.f32 %v5176_v38, %v5096_v19  ;;  %v13472_v4 = vrot.slane %v13471_v37, 1  ;;  %v4372_v25 = vsel %vm870_vm3, %v4367_v32, %v4371_v56  ;;  %v4449_v27 = vadd.f32 %v4121_v47, %v4087_v24  ;;  %v13475_v56 = vld [vmem:[#allocation138_spill] sm:$0xff]  ;;  %v13480_v47 = vld [vmem:[#allocation79_spill] sm:$0xff] }
 0x5e6   :  { %v5042_v53 = vsel %vm1936_vm6, %v5037_v51, %v5041_v36  ;;  %v4423_v18 = vadd.f32 %v4372_v25, %v13474_v6  ;;  %v4779_v7 = vrot.slane %v11205_v42, 2  ;;  %v5044_v21 = vsel %vm1936_vm6, %v5039_v48, %v5043_v29  ;;  %v13476_v48 = vld [vmem:[#allocation144_spill] sm:$0xff]  ;;  %v13487_v6 = vld [vmem:[#allocation13_spill] sm:$0xff] }
 0x5e7   :  { %v4368_v20 = vsel %vm870_vm3, %v13472_v4, %v4367_v32  ;;  %v5094_v39 = vadd.f32 %v5042_v53, %v4838_v61  ;;  %v4783_v40 = vrot.slane %v4449_v27, 2  ;;  %v5165_v45 = vrot.slane %v11198_v60, 6  ;;  %v13485_v27 = vld [vmem:[#allocation104_spill] sm:$0xff]  ;;  %v13486_v53 = vld [vmem:[#allocation139_spill] sm:$0xff] }
 0x5e8   :  { %v4421_v1 = vadd.f32 %v4368_v20, %v13473_v17  ;;  %v4186_v34 = vmul.f32 %v10423_v23, %v13475_v56  ;;  %v4218_v36 = vmul.f32 %v10463_v54, %v13475_v56  ;;  %v4220_v0 = vmul.f32 %v10463_v54, %v10941_v3  ;;  %v13484_v20 = vld [vmem:[#allocation98_spill] sm:$0xff] }
 0x5e9   :  { %v11234_v28 = vmul.f32 %v11057_v50, %v13475_v56  ;;  %v5228_v61 = vadd.f32 %v5172_v26, %v5094_v39  ;;  %v4784_v16 = vsel %vm1527_vm4, %v4779_v7, %v4783_v40  ;;  %v4788_v29 = vsel %vm1527_vm4, %v4783_v40, %v4787_v33  ;;  %v13478_v26 = vld [vmem:[#allocation12_spill] sm:$0xff]  ;;  %v13488_v39 = vld [vmem:[#allocation175_spill] sm:$0xff] }
 0x5ea   :  { %v13477_v38 = vrot.slane %v13476_v48, 6  ;;  %v4837_v44 = vadd.f32 %v4784_v16, %v4421_v1  ;;  %v4839_v12 = vadd.f32 %v4788_v29, %v4423_v18  ;;  %v4290_v15 = vmul.f32 %v11057_v50, %v10941_v3  ;;  %v13489_v40 = vld [vmem:[#allocation148_spill] sm:$0xff]  ;;  %v13493_v48 = vld [vmem:[#allocation151_spill] sm:$0xff] }
 0x5eb   :  { %v13479_v19 = vrot.slane %v13478_v26, 1  ;;  %v13481_v32 = vrot.slane %v13480_v47, 1  ;;  %v5246_v46 = vpack.c.bf16 %v5230_v41, %v5228_v61  ;;  %v13482_v33 = vrot.slane %v10913_v2, 1  ;;  %v13490_v41 = vld [vmem:[#allocation157_spill] sm:$0xff]  ;;  %v13491_v16 = vld [vmem:[#allocation168_spill] sm:$0xff] }
 0x5ec   :  { %v5170_v24 = vsel %vm2142_vm5, %v5165_v45, %v13477_v38  ;;  %v11262_v17 = vadd.f32 %v13486_v53, %v13485_v27  ;;  %v5093_v3 = vadd.f32 %v5040_v14, %v4837_v44  ;;  %v5095_v1 = vadd.f32 %v5044_v21, %v4839_v12  ;;  %v13499_v27 = vld [vmem:[#allocation172_spill] sm:$0xff] }
 0x5ed   :  { %v4362_v30 = vsel %vm870_vm3, %v13481_v32, %v13479_v19  ;;  %v13483_v62 = vmov %v13479_v19  ;;  %v4446_v56 = vadd.f32 %v13489_v40, %v13488_v39  ;;  %5279 = vmatprep.subr.bf16.mxu0 %v5246_v46  ;;  %v4511_v2 = vrot.slane %v13490_v41, 1  ;;  %v13495_v19 = vld [vmem:[#allocation161_spill] sm:$0xff]  ;;  %v6627_v60 = vld [vmem:[%s12330_s13 + $0x44] ss:$16 sps:$4 sm:$0xff]  }
 0x5ee   :  { %v4366_v4 = vsel %vm870_vm3, %v13483_v62, %v13482_v33  ;;  %v4418_v25 = vadd.f32 %v4362_v30, %v13484_v20  ;;  %v4515_v61 = vrot.slane %v4186_v34, 1  ;;  %v13492_v29 = vrot.slane %v13491_v16, 1  ;;  %v6595_v34 = vld [vmem:[%s12330_s13 + $0xe0] ss:$16 sps:$4 sm:$0xff]   ;;  %v6639_v41 = vld [vmem:[%s12330_s13 + $0x4] ss:$16 sps:$4 sm:$0xff]  }
 0x5ef   :  { %v4420_v18 = vadd.f32 %v4366_v4, %v13487_v6  ;;  %v13494_v38 = vrot.slane %v13493_v48, 1  ;;  %v13496_v32 = vrot.slane %v13495_v19, 1  ;;  %v5227_v44 = vadd.f32 %v5170_v24, %v5093_v3 }
 0x5f0   :  { %v13497_v14 = vmov %v13492_v29  ;;  %v5229_v12 = vadd.f32 %v11094_v35, %v5095_v1  ;;  %v4516_v33 = vsel %vm870_vm3, %v4511_v2, %v4515_v61  ;;  %v4520_v62 = vsel %vm870_vm3, %v4515_v61, %v4519_v63  ;;  %v6597_v35 = vld [vmem:[%s12330_s13 + $0xe4] ss:$16 sps:$4 sm:$0xff]  }
 0x5f1   :  { %v4646_v26 = vsel %vm870_vm3, %v13494_v38, %v13492_v29  ;;  %v4650_v21 = vsel %vm870_vm3, %v13497_v14, %v13496_v32  ;;  %v4773_v4 = vrot.slane %v11262_v17, 2  ;;  %v4777_v24 = vrot.slane %v4446_v56, 2  ;;  %5734 = vmatprep.subr.bf16.mxu1 %v6597_v35  ;;  %v13500_v61 = vld [vmem:[#allocation84_spill] sm:$0xff] }
 0x5f2   :  { %v11279_v30 = vadd.f32 %v4646_v26, %v4218_v36  ;;  %v4708_v46 = vadd.f32 %v4650_v21, %v4220_v0  ;;  %v5245_v36 = vpack.c.bf16 %v5229_v12, %v5227_v44  ;;  %v13498_v0 = vld [vmem:[#allocation153_spill] sm:$0xff]  ;;  %v4574_v53 = vadd.f32 %v4520_v62, %v13499_v27  ;;  %5735 = vmatpush1.bf16.msra.mxu1 %v6595_v34  ;;  %v6601_v29 = vld [vmem:[%s12330_s13 + $0xc0] ss:$16 sps:$4 sm:$0xff]  }
 0x5f3   :  { %v4572_v20 = vadd.f32 %v4516_v33, %v13498_v0  ;;  %v4778_v22 = vsel %vm1527_vm4, %v4773_v4, %v4777_v24  ;;  %v4782_v63 = vsel %vm1527_vm4, %v4777_v24, %v4781_v9  ;;  %v5159_v6 = vrot.slane %v11234_v28, 6  ;;  %v13503_v26 = vld [vmem:[#allocation118_spill] sm:$0xff]  ;;  %5736 = vmatprep.subr.bf16.mxu1 %v6603_v57  ;;  %v13505_v24 = vld [vmem:[#allocation81_spill] sm:$0xff] }
 0x5f4   :  { %v4901_v3 = vrot.slane %v11279_v30, 1  ;;  %v4905_v1 = vrot.slane %v4708_v46, 1  ;;  %5280 = vmatpush1.bf16.msra.mxu0 %v5245_v36  ;;  %v4834_v39 = vadd.f32 %v4778_v22, %v4418_v25  ;;  %v4836_v40 = vadd.f32 %v4782_v63, %v4420_v18  ;;  %v13502_v18 = vld [vmem:[#allocation18_spill] sm:$0xff]  ;;  %v13506_v36 = vld [vmem:[#allocation41_spill] sm:$0xff] }
 0x5f5   :  { %v5163_v56 = vrot.slane %v4290_v15, 6  ;;  %v4115_v16 = vmul.f32 %v10383_v31, %v13500_v61  ;;  %v13501_v25 = vrot.slane %v11084_v55, 1  ;;  %v4117_v38 = vmul.f32 %v10383_v31, %v13502_v18  ;;  %v6609_v55 = vld [vmem:[%s12330_s13 + $0xa4] ss:$16 sps:$4 sm:$0xff]   ;;  %v6637_v17 = vld [vmem:[%s12330_s13] ss:$16 sps:$4 sm:$0xff]  }
 0x5f6   :  { %v4906_v9 = vsel %vm870_vm3, %v4901_v3, %v4905_v1  ;;  %v4149_v19 = vmul.f32 %v13503_v26, %v13500_v61  ;;  %v4151_v12 = vmul.f32 %v13503_v26, %v13502_v18  ;;  %v11337_v46 = vmul.f32 %v11038_v59, %v13502_v18  ;;  %v13504_v33 = vld [vmem:[#allocation38_spill] sm:$0xff]  ;;  %5737 = vmatpush1.bf16.msra.mxu1 %v6601_v29 }
 0x5f7   :  { %v4910_v15 = vsel %vm870_vm3, %v4905_v1, %v13501_v25  ;;  %v11322_v32 = vadd.f32 %v4906_v9, %v4572_v20  ;;  %v5164_v21 = vsel %vm2142_vm5, %v5159_v6, %v5163_v56  ;;  %v5168_v44 = vsel %vm2142_vm5, %v5163_v56, %v5167_v5  ;;  %v6607_v20 = vld [vmem:[%s12330_s13 + $0xa0] ss:$16 sps:$4 sm:$0xff]   ;;  %v13510_v1 = vld [vmem:[#allocation15_spill] sm:$0xff]  ;;  %5738 = vmatprep.subr.bf16.mxu1 %v6609_v55  ;;  %v6615_v29 = vld [vmem:[%s12330_s13 + $0x84] ss:$16 sps:$4 sm:$0xff]  }
 0x5f8   :  { %v4964_v14 = vadd.f32 %v4910_v15, %v4574_v53  ;;  %v4289_v34 = vmul.f32 %v11038_v59, %v10915_v52  ;;  %v4359_v62 = vrot.slane %v13504_v33, 1  ;;  %v11344_v35 = vadd.f32 %v4115_v16, %v13505_v24  ;;  %v13507_v27 = vld [vmem:[#allocation78_spill] sm:$0xff] }
 0x5f9   :  { %v12724_v11 = vrot.slane %v11322_v32, 3  ;;  %v4445_v0 = vadd.f32 %v4117_v38, %v13506_v36  ;;  %v13508_v53 = vrot.slane %v13507_v27, 1  ;;  %v13509_v52 = vrot.slane %v13471_v37, 1  ;;  %v13511_v57 = vld [vmem:[#allocation162_spill] sm:$0xff]  ;;  %v13512_v37 = vld [vmem:[#allocation47_spill] sm:$0xff] }
 0x5fa   :  { %v5033_v5 = vrot.slane %v4964_v14, 3  ;;  %v4509_v56 = vrot.slane %v13510_v1, 1  ;;  %v4513_v16 = vrot.slane %v13511_v57, 1  ;;  %v13513_v18 = vld [vmem:[#allocation34_spill] sm:$0xff]  ;;  %v13516_v57 = vld [vmem:[#allocation155_spill] sm:$0xff]  ;;  %5739 = vmatpush1.bf16.msra.mxu1 %v6607_v20  ;;  %v5157_v20 = vrot.slane %v11337_v46, 6 }
 0x5fb   :  { %v4360_v22 = vsel %vm870_vm3, %v13508_v53, %v4359_v62  ;;  %v4364_v63 = vsel %vm870_vm3, %v4359_v62, %v13509_v52  ;;  %v13514_v62 = vld [vmem:[#allocation158_spill] sm:$0xff]  ;;  %v13517_v49 = vrot.slane %v13516_v57, 1  ;;  %5740 = vmatprep.subr.bf16.mxu1 %v6615_v29  ;;  %v13568_v1 = vld [vmem:[#allocation36_spill] sm:$0xff] }
 0x5fc   :  { %v5034_v9 = vsel %vm1936_vm6, %v12724_v11, %v5033_v5  ;;  %v5038_v25 = vsel %vm1936_vm6, %v5033_v5, %v5037_v51  ;;  %v4417_v15 = vadd.f32 %v4360_v22, %v13512_v37  ;;  %v4419_v38 = vadd.f32 %v4364_v63, %v13513_v18  ;;  %v13518_v11 = vld [vmem:[#allocation166_spill] sm:$0xff]  ;;  %v13520_v22 = vld [vmem:[#allocation165_spill] sm:$0xff] }
 0x5fd   :  { %v5090_v14 = vadd.f32 %v5034_v9, %v4834_v39  ;;  %v5092_v33 = vadd.f32 %v5038_v25, %v4836_v40  ;;  %v4514_v55 = vsel %vm870_vm3, %v4509_v56, %v4513_v16  ;;  %v13515_v24 = vrot.slane %v13514_v62, 1  ;;  %v6613_v9 = vld [vmem:[%s12330_s13 + $0x80] ss:$16 sps:$4 sm:$0xff]   ;;  %v13524_v37 = vld [vmem:[#allocation173_spill] sm:$0xff]  ;;  %v6645_v30 = vld [vmem:[%s12330_s13 + $0x1e4] ss:$16 sps:$4 sm:$0xff]  }
 0x5fe   :  { %v4571_v53 = vadd.f32 %v4514_v55, %v4149_v19  ;;  %v13519_v51 = vrot.slane %v13518_v11, 1  ;;  %v13521_v63 = vrot.slane %v13520_v22, 1  ;;  %v13522_v39 = vmov %v13517_v49  ;;  %v6621_v55 = vld [vmem:[%s12330_s13 + $0x64] ss:$16 sps:$4 sm:$0xff]   ;;  %5741 = vmatpush1.bf16.msra.mxu1 %v6613_v9  ;;  %v6655_v46 = vld [vmem:[%s12330_s13 + $0x1a0] ss:$16 sps:$4 sm:$0xff]  }
 0x5ff   :  { %v4518_v36 = vsel %vm870_vm3, %v4513_v16, %v13515_v24  ;;  %v5224_v16 = vadd.f32 %v5164_v21, %v5090_v14  ;;  %v5226_v19 = vadd.f32 %v5168_v44, %v5092_v33  ;;  %v4771_v62 = vrot.slane %v11344_v35, 2  ;;  %v13525_v14 = vld [vmem:[#allocation45_spill] sm:$0xff]  ;;  %5742 = vmatprep.subr.bf16.mxu1 %v6621_v55 }
 0x600   :  { %v4573_v52 = vadd.f32 %v4518_v36, %v4151_v12  ;;  %v4644_v5 = vsel %vm870_vm3, %v13519_v51, %v13517_v49  ;;  %v4648_v40 = vsel %vm870_vm3, %v13522_v39, %v13521_v63  ;;  %v13523_v12 = vld [vmem:[#allocation170_spill] sm:$0xff]  ;;  %v4775_v24 = vrot.slane %v4445_v0, 2 }
 0x601   :  { %v11389_v25 = vadd.f32 %v4644_v5, %v13523_v12  ;;  %v4707_v18 = vadd.f32 %v4648_v40, %v13524_v37  ;;  %v5161_v36 = vrot.slane %v4289_v34, 6  ;;  %v5244_v57 = vpack.c.bf16 %v5226_v19, %v5224_v16  ;;  %v6619_v51 = vld [vmem:[%s12330_s13 + $0x60] ss:$16 sps:$4 sm:$0xff]   ;;  %v13528_v16 = vld [vmem:[#allocation25_spill] sm:$0xff] }
 0x602   :  { %v4182_v33 = vmul.f32 %v10423_v23, %v13525_v14  ;;  %v4776_v29 = vsel %vm1527_vm4, %v4771_v62, %v4775_v24  ;;  %v4780_v49 = vsel %vm1527_vm4, %v4775_v24, %v4779_v7  ;;  %v13526_v7 = vrot.slane %v11074_v8, 1  ;;  %v13530_v12 = vld [vmem:[#allocation44_spill] sm:$0xff]  ;;  %5743 = vmatpush1.bf16.msra.mxu1 %v6619_v51 }
 0x603   :  { %v12726_v21 = vrot.slane %v11389_v25, 1  ;;  %v4903_v44 = vrot.slane %v4707_v18, 1  ;;  %v5162_v0 = vsel %vm2142_vm5, %v5157_v20, %v5161_v36  ;;  %v5166_v34 = vsel %vm2142_vm5, %v5161_v36, %v5165_v45  ;;  %5281 = vmatprep.subr.bf16.mxu0 %v5244_v57  ;;  %v13534_v57 = vld [vmem:[#allocation42_spill] sm:$0xff]  ;;  %5744 = vmatprep.subr.bf16.mxu1 %v6627_v60 }
 0x604   :  { %v4833_v5 = vadd.f32 %v4776_v29, %v4417_v15  ;;  %v4835_v22 = vadd.f32 %v4780_v49, %v4419_v38  ;;  %v4214_v40 = vmul.f32 %v10463_v54, %v13525_v14  ;;  %v13527_v15 = vld [vmem:[#allocation28_spill] sm:$0xff]  ;;  %v11432_v9 = vmul.f32 %v11057_v50, %v13525_v14  ;;  %v13535_v14 = vld [vmem:[#allocation105_spill] sm:$0xff] }
 0x605   :  { %v4904_v42 = vsel %vm870_vm3, %v12726_v21, %v4903_v44  ;;  %v4908_v63 = vsel %vm870_vm3, %v4903_v44, %v13526_v7  ;;  %v4216_v38 = vmul.f32 %v10463_v54, %v13527_v15  ;;  %v4286_v8 = vmul.f32 %v11057_v50, %v13527_v15  ;;  %v6625_v49 = vld [vmem:[%s12330_s13 + $0x40] ss:$16 sps:$4 sm:$0xff]   ;;  %v13539_v15 = vld [vmem:[#allocation89_spill] sm:$0xff] }
 0x606   :  { %v11424_v45 = vadd.f32 %v4904_v42, %v4571_v53  ;;  %v4963_v39 = vadd.f32 %v4908_v63, %v4573_v52  ;;  %v13529_v19 = vrot.slane %v13528_v16, 1  ;;  %v13531_v53 = vrot.slane %v13530_v12, 1  ;;  %v13536_v42 = vld [vmem:[#allocation49_spill] sm:$0xff]  ;;  %v13537_v7 = vld [vmem:[#allocation32_spill] sm:$0xff]  ;;  %5745 = vmatpush1.bf16.msra.mxu1 %v6625_v49 }
 0x607   :  { %v13532_v37 = vrot.slane %v13480_v47, 1  ;;  %v11454_v63 = vadd.f32 %v13537_v7, %v13536_v42  ;;  %v13538_v47 = vld [vmem:[#allocation30_spill] sm:$0xff]  ;;  %v13548_v21 = vld [vmem:[#allocation9_spill] sm:$0xff] }
 0x608   :  { %v4354_v52 = vsel %vm870_vm3, %v13531_v53, %v13529_v19  ;;  %v13533_v18 = vmov %v13529_v19  ;;  %v12725_v55 = vrot.slane %v11424_v45, 3  ;;  %v5031_v36 = vrot.slane %v4963_v39, 3  ;;  %v13540_v19 = vld [vmem:[#allocation37_spill] sm:$0xff]  ;;  %v6633_v39 = vld [vmem:[%s12330_s13 + $0x24] ss:$16 sps:$4 sm:$0xff]  }
 0x609   :  { %v4358_v24 = vsel %vm870_vm3, %v13533_v18, %v13532_v37  ;;  %v4414_v44 = vadd.f32 %v4354_v52, %v13534_v57  ;;  %v4442_v16 = vadd.f32 %v13539_v15, %v13538_v47  ;;  %v4503_v53 = vrot.slane %v13540_v19, 1  ;;  %v13541_v18 = vld [vmem:[#allocation16_spill] sm:$0xff]  ;;  %v13543_v57 = vld [vmem:[#allocation86_spill] sm:$0xff]  ;;  %5746 = vmatprep.subr.bf16.mxu1 %v6633_v39 }
 0x60a   :  { %v4416_v29 = vadd.f32 %v4358_v24, %v13535_v14  ;;  %v4507_v37 = vrot.slane %v4182_v33, 1  ;;  %v5032_v51 = vsel %vm1936_vm6, %v12725_v55, %v5031_v36  ;;  %v5036_v52 = vsel %vm1936_vm6, %v5031_v36, %v5035_v10  ;;  %v13547_v36 = vld [vmem:[#allocation31_spill] sm:$0xff] }
 0x60b   :  { %v13542_v24 = vrot.slane %v13541_v18, 1  ;;  %v13544_v14 = vrot.slane %v13543_v57, 1  ;;  %v13545_v33 = vrot.slane %v13493_v48, 1  ;;  %v5089_v47 = vadd.f32 %v5032_v51, %v4833_v5  ;;  %v6631_v5 = vld [vmem:[%s12330_s13 + $0x20] ss:$16 sps:$4 sm:$0xff]  }
 0x60c   :  { %v5091_v15 = vadd.f32 %v5036_v52, %v4835_v22  ;;  %v4508_v43 = vsel %vm870_vm3, %v4503_v53, %v4507_v37  ;;  %v4512_v10 = vsel %vm870_vm3, %v4507_v37, %v4511_v2  ;;  %v4765_v52 = vrot.slane %v11454_v63, 2  ;;  %5747 = vmatpush1.bf16.msra.mxu1 %v6631_v5  ;;  %v13553_v5 = vld [vmem:[#allocation24_spill] sm:$0xff] }
 0x60d   :  { %v4638_v42 = vsel %vm870_vm3, %v13544_v14, %v13542_v24  ;;  %v13546_v60 = vmov %v13542_v24  ;;  %v4568_v55 = vadd.f32 %v4508_v43, %v13547_v36  ;;  %v4570_v24 = vadd.f32 %v4512_v10, %v13548_v21  ;;  %5748 = vmatprep.subr.bf16.mxu1 %v6639_v41  ;;  %v13551_v10 = vld [vmem:[#allocation94_spill] sm:$0xff] }
 0x60e   :  { %v4642_v7 = vsel %vm870_vm3, %v13546_v60, %v13545_v33  ;;  %v11486_v14 = vadd.f32 %v4638_v42, %v4214_v40  ;;  %v5223_v22 = vadd.f32 %v5162_v0, %v5089_v47  ;;  %v5225_v51 = vadd.f32 %v5166_v34, %v5091_v15  ;;  %v6643_v41 = vld [vmem:[%s12330_s13 + $0x1e0] ss:$16 sps:$4 sm:$0xff]  }
 0x60f   :  { %v4704_v48 = vadd.f32 %v4642_v7, %v4216_v38  ;;  %v4769_v18 = vrot.slane %v4442_v16, 2  ;;  %v5151_v40 = vrot.slane %v11432_v9, 6  ;;  %v5155_v38 = vrot.slane %v4286_v8, 6  ;;  %v13549_v16 = vld [vmem:[#allocation50_spill] sm:$0xff] }
 0x610   :  { %v4893_v2 = vrot.slane %v11486_v14, 1  ;;  %v5243_v49 = vpack.c.bf16 %v5225_v51, %v5223_v22  ;;  %v4111_v37 = vmul.f32 %v10383_v31, %v13549_v16  ;;  %v4285_v43 = vmul.f32 %v11038_v59, %v13500_v61  ;;  %v13554_v51 = vld [vmem:[#allocation55_spill] sm:$0xff]  ;;  %5749 = vmatpush1.bf16.msra.mxu1 %v6637_v17  ;;  %v6651_v17 = vld [vmem:[%s12330_s13 + $0x1c4] ss:$16 sps:$4 sm:$0xff]  }
 0x611   :  { %v4897_v21 = vrot.slane %v4704_v48, 1  ;;  %v4770_v0 = vsel %vm1527_vm4, %v4765_v52, %v4769_v18  ;;  %v4774_v34 = vsel %vm1527_vm4, %v4769_v18, %v4773_v4  ;;  %v4351_v36 = vrot.slane %v13551_v10, 1  ;;  %5750 = vmatprep.subr.bf16.mxu1 %v6645_v30 }
 0x612   :  { %v4830_v39 = vadd.f32 %v4770_v0, %v4414_v44  ;;  %v4832_v42 = vadd.f32 %v4774_v34, %v4416_v29  ;;  %5282 = vmatpush1.bf16.msra.mxu0 %v5243_v49  ;;  %v5156_v44 = vsel %vm2142_vm5, %v5151_v40, %v5155_v38  ;;  %v5160_v29 = vsel %vm2142_vm5, %v5155_v38, %v5159_v6  ;;  %v13557_v0 = vld [vmem:[#allocation17_spill] sm:$0xff] }
 0x613   :  { %v4898_v33 = vsel %vm870_vm3, %v4893_v2, %v4897_v21  ;;  %v4902_v8 = vsel %vm870_vm3, %v4897_v21, %v4901_v3  ;;  %v13550_v3 = vld [vmem:[#allocation29_spill] sm:$0xff]  ;;  %v4501_v18 = vrot.slane %v13554_v51, 1  ;;  %v13555_v21 = vld [vmem:[#allocation40_spill] sm:$0xff]  ;;  %v13556_v61 = vrot.slane %v11322_v32, 3  ;;  %v13561_v32 = vld [vmem:[#allocation102_spill] sm:$0xff] }
 0x614   :  { %v11514_v4 = vadd.f32 %v4898_v33, %v4568_v55  ;;  %v4960_v60 = vadd.f32 %v4902_v8, %v4570_v24  ;;  %v4113_v7 = vmul.f32 %v10383_v31, %v13550_v3  ;;  %v4145_v55 = vmul.f32 %v13503_v26, %v13549_v16  ;;  %v13552_v24 = vld [vmem:[#allocation46_spill] sm:$0xff]  ;;  %5751 = vmatpush2.bf16.msra.mxu1 %v6643_v41 }
 0x615   :  { %v4147_v47 = vmul.f32 %v13503_v26, %v13550_v3  ;;  %v11533_v15 = vmul.f32 %v11038_v59, %v13550_v3  ;;  %v11540_v48 = vadd.f32 %v4111_v37, %v13552_v24  ;;  %v4505_v38 = vrot.slane %v13555_v21, 1  ;;  %5752 = vmatprep.subr.bf16.mxu1 %v6651_v17  ;;  %v6657_v41 = vld [vmem:[%s12330_s13 + $0x1a4] ss:$16 sps:$4 sm:$0xff]  }
 0x616   :  { %v5021_v28 = vrot.slane %v11514_v4, 3  ;;  %v5025_v6 = vrot.slane %v4960_v60, 3  ;;  %v4441_v22 = vadd.f32 %v4113_v7, %v13553_v5  ;;  %v13558_v34 = vrot.slane %v13557_v0, 1  ;;  %v13560_v7 = vld [vmem:[#allocation114_spill] sm:$0xff]  ;;  %v13564_v5 = vld [vmem:[#allocation35_spill] sm:$0xff] }
 0x617   :  { %v13559_v33 = vrot.slane %v13507_v27, 1  ;;  %v4510_v27 = vsel %vm870_vm3, %v4505_v38, %v4509_v56  ;;  %v13565_v21 = vrot.slane %v13564_v5, 1  ;;  %v13569_v56 = vld [vmem:[#allocation33_spill] sm:$0xff]  ;;  %v11745_v4 = vld [vmem:[%s12328_s10 + $0x10] ss:$0 sm:$0xff] }
 0x618   :  { %v5026_v59 = vsel %vm1936_vm6, %v5021_v28, %v5025_v6  ;;  %v5030_v49 = vsel %vm1936_vm6, %v5025_v6, %v13556_v61  ;;  %v4352_v37 = vsel %vm870_vm3, %v13558_v34, %v4351_v36  ;;  %v4506_v6 = vsel %vm870_vm3, %v4501_v18, %v4505_v38 }
 0x619   :  { %v4356_v8 = vsel %vm870_vm3, %v4351_v36, %v13559_v33  ;;  %v5086_v60 = vadd.f32 %v5026_v59, %v4830_v39  ;;  %v5088_v3 = vadd.f32 %v5030_v49, %v4832_v42  ;;  %v4413_v10 = vadd.f32 %v4352_v37, %v13560_v7  ;;  %v13562_v36 = vld [vmem:[#allocation26_spill] sm:$0xff] }
 0x61a   :  { %v4415_v24 = vadd.f32 %v4356_v8, %v13561_v32  ;;  %v13563_v30 = vrot.slane %v13562_v36, 1  ;;  %v13566_v39 = vrot.slane %v13518_v11, 1  ;;  %v4567_v37 = vadd.f32 %v4506_v6, %v4145_v55  ;;  %v6649_v11 = vld [vmem:[%s12330_s13 + $0x1c0] ss:$16 sps:$4 sm:$0xff]  }
 0x61b   :  { %v5220_v49 = vadd.f32 %v5156_v44, %v5086_v60  ;;  %v5222_v34 = vadd.f32 %v5160_v29, %v5088_v3  ;;  %v4569_v33 = vadd.f32 %v4510_v27, %v4147_v47  ;;  %v4763_v7 = vrot.slane %v11540_v48, 2  ;;  %v13570_v55 = vld [vmem:[#allocation108_spill] sm:$0xff]  ;;  %5753 = vmatpush2.bf16.msra.mxu1 %v6649_v11  ;;  %v13579_v11 = vld [vmem:[#allocation27_spill] sm:$0xff] }
 0x61c   :  { %v4636_v61 = vsel %vm870_vm3, %v13565_v21, %v13563_v30  ;;  %v13567_v42 = vmov %v13563_v30  ;;  %v4767_v32 = vrot.slane %v4441_v22, 2  ;;  %v12732_v44 = vrot.slane %v11533_v15, 6  ;;  %5754 = vmatprep.subr.bf16.mxu1 %v6657_v41 }
 0x61d   :  { %v4640_v59 = vsel %vm870_vm3, %v13567_v42, %v13566_v39  ;;  %v11582_v8 = vadd.f32 %v4636_v61, %v13568_v1  ;;  %v5242_v36 = vpack.c.bf16 %v5222_v34, %v5220_v49  ;;  %v5153_v29 = vrot.slane %v4285_v43, 6  ;;  %v13573_v49 = vld [vmem:[#allocation58_spill] sm:$0xff] }
 0x61e   :  { %v4703_v38 = vadd.f32 %v4640_v59, %v13569_v56  ;;  %v4178_v47 = vmul.f32 %v10423_v23, %v13570_v55  ;;  %v4768_v22 = vsel %vm1527_vm4, %v4763_v7, %v4767_v32  ;;  %v4772_v60 = vsel %vm1527_vm4, %v4767_v32, %v4771_v62  ;;  %v6663_v59 = vld [vmem:[%s12330_s13 + $0x184] ss:$16 sps:$4 sm:$0xff]  }
 0x61f   :  { %v4891_v17 = vrot.slane %v11582_v8, 1  ;;  %5283 = vmatprep.subr.bf16.mxu0 %v5242_v36  ;;  %v4829_v43 = vadd.f32 %v4768_v22, %v4413_v10  ;;  %v4831_v6 = vadd.f32 %v4772_v60, %v4415_v24  ;;  %v5154_v27 = vsel %vm2142_vm5, %v12732_v44, %v5153_v29  ;;  %v13572_v24 = vld [vmem:[#allocation93_spill] sm:$0xff]  ;;  %v13575_v1 = vld [vmem:[#allocation126_spill] sm:$0xff]  ;;  %v13580_v36 = vld [vmem:[#allocation87_spill] sm:$0xff]  ;;  %5755 = vmatpush2.bf16.msra.mxu1 %v6655_v46 }
 0x620   :  { %v4895_v3 = vrot.slane %v4703_v38, 1  ;;  %v5158_v30 = vsel %vm2142_vm5, %v5153_v29, %v5157_v20  ;;  %v13571_v62 = vrot.slane %v11389_v25, 1  ;;  %v4210_v10 = vmul.f32 %v10463_v54, %v13570_v55  ;;  %v13581_v29 = vld [vmem:[#allocation63_spill] sm:$0xff]  ;;  %5756 = vmatprep.subr.bf16.mxu1 %v6663_v59 }
 0x621   :  { %v4212_v61 = vmul.f32 %v10463_v54, %v13572_v24  ;;  %v11625_v42 = vmul.f32 %v11057_v50, %v13570_v55  ;;  %v4282_v25 = vmul.f32 %v11057_v50, %v13572_v24  ;;  %v13574_v34 = vrot.slane %v13573_v49, 1  ;;  %v13582_v55 = vld [vmem:[#allocation83_spill] sm:$0xff]  ;;  %v13585_v24 = vld [vmem:[#allocation101_spill] sm:$0xff] }
 0x622   :  { %v4896_v35 = vsel %vm870_vm3, %v4891_v17, %v4895_v3  ;;  %v4900_v21 = vsel %vm870_vm3, %v4895_v3, %v13571_v62  ;;  %v13576_v56 = vrot.slane %v13575_v1, 1  ;;  %v11644_v50 = vadd.f32 %v13580_v36, %v13579_v11  ;;  %v13583_v3 = vld [vmem:[#allocation120_spill] sm:$0xff]  ;;  %v13586_v49 = vld [vmem:[#allocation97_spill] sm:$0xff] }
 0x623   :  { %v11621_v20 = vadd.f32 %v4896_v35, %v4567_v37  ;;  %v4959_v39 = vadd.f32 %v4900_v21, %v4569_v33  ;;  %v13577_v33 = vrot.slane %v13530_v12, 1  ;;  %v13578_v38 = vmov %v13574_v34  ;;  %v13584_v62 = vld [vmem:[#allocation56_spill] sm:$0xff] }
 0x624   :  { %v4346_v37 = vsel %vm870_vm3, %v13576_v56, %v13574_v34  ;;  %v4438_v41 = vadd.f32 %v13582_v55, %v13581_v29  ;;  %v12733_v12 = vrot.slane %v13585_v24, 1  ;;  %v4499_v34 = vrot.slane %v4178_v47, 1 }
 0x625   :  { %v4350_v32 = vsel %vm870_vm3, %v13578_v38, %v13577_v33  ;;  %v5019_v22 = vrot.slane %v11621_v20, 3  ;;  %v5023_v60 = vrot.slane %v4959_v39, 3  ;;  %v4410_v35 = vadd.f32 %v4346_v37, %v13583_v3  ;;  %v13588_v33 = vld [vmem:[#allocation19_spill] sm:$0xff]  ;;  %v6661_v39 = vld [vmem:[%s12330_s13 + $0x180] ss:$16 sps:$4 sm:$0xff]  }
 0x626   :  { %v4412_v21 = vadd.f32 %v4350_v32, %v13584_v62  ;;  %v13587_v56 = vrot.slane %v13586_v49, 1  ;;  %v13589_v38 = vrot.slane %v13588_v33, 1  ;;  %v13590_v36 = vrot.slane %v13543_v57, 1  ;;  %5757 = vmatpush2.bf16.msra.mxu1 %v6661_v39 }
 0x627   :  { %v5024_v47 = vsel %vm1936_vm6, %v5019_v22, %v5023_v60  ;;  %v13592_v37 = vrot.slane %v11424_v45, 3  ;;  %v4500_v46 = vsel %vm870_vm3, %v12733_v12, %v4499_v34 }
 0x628   :  { %v4630_v11 = vsel %vm870_vm3, %v13589_v38, %v13587_v56  ;;  %v13591_v29 = vmov %v13587_v56  ;;  %v5085_v62 = vadd.f32 %v5024_v47, %v4829_v43  ;;  %v4504_v56 = vsel %vm870_vm3, %v4499_v34, %v4503_v53  ;;  %v13593_v38 = vld [vmem:[#allocation96_spill] sm:$0xff] }
 0x629   :  { %v4634_v55 = vsel %vm870_vm3, %v13591_v29, %v13590_v36  ;;  %v5028_v32 = vsel %vm1936_vm6, %v5023_v60, %v13592_v37  ;;  %v11671_v3 = vadd.f32 %v4630_v11, %v4210_v10  ;;  %v4564_v36 = vadd.f32 %v4500_v46, %v13593_v38  ;;  %v13594_v29 = vld [vmem:[#allocation85_spill] sm:$0xff]  ;;  %v13596_v37 = vld [vmem:[#allocation88_spill] sm:$0xff]  ;;  %v13599_v46 = vld [vmem:[#allocation82_spill] sm:$0xff] }
 0x62a   :  { %v4700_v57 = vadd.f32 %v4634_v55, %v4212_v61  ;;  %v5087_v49 = vadd.f32 %v5028_v32, %v4831_v6  ;;  %v4566_v45 = vadd.f32 %v4504_v56, %v13594_v29  ;;  %v12730_v60 = vrot.slane %v11644_v50, 2  ;;  %v13600_v38 = vld [vmem:[#allocation53_spill] sm:$0xff] }
 0x62b   :  { %v4761_v10 = vrot.slane %v4438_v41, 2  ;;  %v5219_v11 = vadd.f32 %v5154_v27, %v5085_v62  ;;  %v12728_v43 = vrot.slane %v11671_v3, 1  ;;  %v12727_v53 = vrot.slane %v11625_v42, 6  ;;  %v13598_v62 = vld [vmem:[#allocation80_spill] sm:$0xff] }
 0x62c   :  { %v5221_v61 = vadd.f32 %v5158_v30, %v5087_v49  ;;  %v4889_v6 = vrot.slane %v4700_v57, 1  ;;  %v5147_v34 = vrot.slane %v4282_v25, 6  ;;  %v13595_v30 = vld [vmem:[#allocation134_spill] sm:$0xff]  ;;  %v4627_v32 = vrot.slane %v13596_v37, 1  ;;  %v13597_v57 = vld [vmem:[#allocation115_spill] sm:$0xff] }
 0x62d   :  { %v4762_v59 = vsel %vm1527_vm4, %v12730_v60, %v4761_v10  ;;  %v4766_v19 = vsel %vm1527_vm4, %v4761_v10, %v4765_v52  ;;  %v4211_v39 = vmul.f32 %v13595_v30, %v13549_v16  ;;  %v4041_v49 = vmul.f32 %v13598_v62, %v13597_v57 }
 0x62e   :  { %v5241_v55 = vpack.c.bf16 %v5221_v61, %v5219_v11  ;;  %v4826_v47 = vadd.f32 %v4762_v59, %v4410_v35  ;;  %v4828_v41 = vadd.f32 %v4766_v19, %v4412_v21  ;;  %v4890_v27 = vsel %vm870_vm3, %v12728_v43, %v4889_v6  ;;  %v13601_v11 = vld [vmem:[#allocation39_spill] sm:$0xff] }
 0x62f   :  { %v4894_v63 = vsel %vm870_vm3, %v4889_v6, %v4893_v2  ;;  %v11699_v52 = vadd.f32 %v4890_v27, %v4564_v36  ;;  %v5148_v35 = vsel %vm2142_vm5, %v12727_v53, %v5147_v34  ;;  %v5152_v21 = vsel %vm2142_vm5, %v5147_v34, %v5151_v40  ;;  %v13602_v59 = vld [vmem:[#allocation51_spill] sm:$0xff]  ;;  %v13603_v27 = vld [vmem:[#allocation110_spill] sm:$0xff] }
 0x630   :  { %5284 = vmatpush1.bf16.msra.mxu0 %v5241_v55  ;;  %v4956_v25 = vadd.f32 %v4894_v63, %v4566_v45  ;;  %v4007_v14 = vmul.f32 %v13599_v46, %v13597_v57  ;;  %v4075_v2 = vmul.f32 %v10380_v13, %v13597_v57  ;;  %v4107_v56 = vmul.f32 %v10383_v31, %v13597_v57  ;;  %v13604_v63 = vld [vmem:[#allocation90_spill] sm:$0xff] }
 0x631   :  { %v4109_v36 = vmul.f32 %v10383_v31, %v13600_v38  ;;  %v12729_v29 = vrot.slane %v11699_v52, 3  ;;  %v4141_v40 = vmul.f32 %v13503_v26, %v13597_v57  ;;  %v4143_v45 = vmul.f32 %v13503_v26, %v13600_v38 }
 0x632   :  { %v5017_v9 = vrot.slane %v4956_v25, 3  ;;  %v4343_v10 = vrot.slane %v4041_v49, 1  ;;  %v11723_v61 = vadd.f32 %v4107_v56, %v13601_v11  ;;  %v12731_v19 = vrot.slane %v13602_v59, 1  ;;  %v13606_v11 = vld [vmem:[#allocation107_spill] sm:$0xff] }
 0x633   :  { %v4437_v6 = vadd.f32 %v4109_v36, %v4075_v2  ;;  %v4497_v37 = vrot.slane %v13603_v27, 1  ;;  %v13605_v25 = vrot.slane %v13604_v63, 1  ;;  %v13607_v2 = vrot.slane %v13606_v11, 1 }
 0x634   :  { %v5018_v34 = vsel %vm1936_vm6, %v12729_v29, %v5017_v9  ;;  %v5022_v55 = vsel %vm1936_vm6, %v5017_v9, %v5021_v28  ;;  %v13608_v43 = vrot.slane %v13557_v0, 1  ;;  %v11749_v28 = vmul.f32 %v11745_v4, %v13600_v38 }
 0x635   :  { %v4628_v49 = vsel %vm870_vm3, %v13605_v25, %v4627_v32  ;;  %v5082_v53 = vadd.f32 %v5018_v34, %v4826_v47  ;;  %v5084_v56 = vadd.f32 %v5022_v55, %v4828_v41  ;;  %v4344_v36 = vsel %vm870_vm3, %v13607_v2, %v4343_v10  ;;  %v13611_v25 = vld [vmem:[#allocation103_spill] sm:$0xff] }
 0x636   :  { %v4348_v29 = vsel %vm870_vm3, %v4343_v10, %v13608_v43  ;;  %v4281_v47 = vmul.f32 %v11745_v4, %v13549_v16  ;;  %v4498_v41 = vsel %vm870_vm3, %v12731_v19, %v4497_v37  ;;  %v4502_v0 = vsel %vm870_vm3, %v4497_v37, %v4501_v18  ;;  %v13609_v10 = vld [vmem:[#allocation21_spill] sm:$0xff] }
 0x637   :  { %v5216_v43 = vadd.f32 %v5148_v35, %v5082_v53  ;;  %v5218_v9 = vadd.f32 %v5152_v21, %v5084_v56  ;;  %v4409_v34 = vadd.f32 %v4344_v36, %v13609_v10  ;;  %v4411_v55 = vadd.f32 %v4348_v29, %v4007_v14  ;;  %v13612_v29 = vld [vmem:[#allocation92_spill] sm:$0xff]  ;;  %v11796_v56 = vld [vmem:[%s12328_s10 + $0x18] ss:$0 sm:$0xff] }
 0x638   :  { %v13610_v27 = vrot.slane %v13564_v5, 1  ;;  %v11764_v2 = vadd.f32 %v4628_v49, %v13611_v25  ;;  %v4755_v16 = vrot.slane %v11723_v61, 2  ;;  %v4759_v60 = vrot.slane %v4437_v6, 2  ;;  %v13614_v6 = vld [vmem:[#allocation65_spill] sm:$0xff]  ;;  %v13618_v10 = vld [vmem:[#allocation76_spill] sm:$0xff] }
 0x639   :  { %v5240_v19 = vpack.c.bf16 %v5218_v9, %v5216_v43  ;;  %v4563_v44 = vadd.f32 %v4498_v41, %v4141_v40  ;;  %v4565_v51 = vadd.f32 %v4502_v0, %v4143_v45  ;;  %v5141_v53 = vrot.slane %v11749_v28, 6  ;;  %v13613_v40 = vld [vmem:[#allocation119_spill] sm:$0xff]  ;;  %v13616_v0 = vld [vmem:[#allocation72_spill] sm:$0xff] }
 0x63a   :  { %v4632_v38 = vsel %vm870_vm3, %v4627_v32, %v13610_v27  ;;  %v4760_v18 = vsel %vm1527_vm4, %v4755_v16, %v4759_v60  ;;  %v4764_v5 = vsel %vm1527_vm4, %v4759_v60, %v4763_v7  ;;  %v5145_v32 = vrot.slane %v4281_v47, 6  ;;  %v13617_v43 = vld [vmem:[#allocation99_spill] sm:$0xff]  ;;  %v13620_v27 = vld [vmem:[#allocation113_spill] sm:$0xff] }
 0x63b   :  { %v4699_v12 = vadd.f32 %v4632_v38, %v4211_v39  ;;  %5285 = vmatprep.subr.bf16.mxu0 %v5240_v19  ;;  %v4825_v35 = vadd.f32 %v4760_v18, %v4409_v34  ;;  %v12735_v21 = vrot.slane %v11764_v2, 1  ;;  %v4140_v45 = vmul.f32 %v13613_v40, %v13612_v29  ;;  %v13615_v19 = vld [vmem:[#allocation48_spill] sm:$0xff]  ;;  %v13619_v34 = vld [vmem:[#allocation122_spill] sm:$0xff] }
 0x63c   :  { %v4827_v39 = vadd.f32 %v4764_v5, %v4411_v55  ;;  %v11779_v37 = vmul.f32 %v10423_v23, %v13614_v6  ;;  %v4174_v48 = vmul.f32 %v10423_v23, %v13612_v29  ;;  %v4206_v7 = vmul.f32 %v10463_v54, %v13612_v29  ;;  %v13621_v38 = vld [vmem:[#allocation54_spill] sm:$0xff] }
 0x63d   :  { %v4887_v14 = vrot.slane %v4699_v12, 1  ;;  %v4208_v49 = vmul.f32 %v10463_v54, %v13615_v19  ;;  %v11800_v36 = vmul.f32 %v11796_v56, %v13612_v29  ;;  %v4278_v8 = vmul.f32 %v11796_v56, %v13615_v19 }
 0x63e   :  { %v4337_v9 = vrot.slane %v13617_v43, 1  ;;  %v11810_v55 = vadd.f32 %v13619_v34, %v13618_v10  ;;  %v4434_v25 = vadd.f32 %v13621_v38, %v13620_v27  ;;  %v4487_v18 = vrot.slane %v11779_v37, 1 }
 0x63f   :  { %v4888_v60 = vsel %vm870_vm3, %v12735_v21, %v4887_v14  ;;  %v4892_v12 = vsel %vm870_vm3, %v4887_v14, %v4891_v17  ;;  %v12734_v17 = vrot.slane %v13616_v0, 1  ;;  %v13622_v14 = vld [vmem:[#allocation52_spill] sm:$0xff]  ;;  %v13626_v10 = vrot.slane %v13575_v1, 1  ;;  %v13630_v21 = vld [vmem:[#allocation95_spill] sm:$0xff] }
 0x640   :  { %v11802_v47 = vadd.f32 %v4888_v60, %v4563_v44  ;;  %v4955_v41 = vadd.f32 %v4892_v12, %v4565_v51  ;;  %v4491_v51 = vrot.slane %v4174_v48, 1  ;;  %v13623_v29 = vrot.slane %v13622_v14, 1  ;;  %v13624_v60 = vld [vmem:[#allocation124_spill] sm:$0xff] }
 0x641   :  { %v13625_v12 = vrot.slane %v13624_v60, 1  ;;  %v4338_v43 = vsel %vm870_vm3, %v12734_v17, %v4337_v9  ;;  %v4342_v34 = vsel %vm870_vm3, %v4337_v9, %v13626_v10  ;;  %v13627_v27 = vrot.slane %v13588_v33, 1  ;;  %v13629_v17 = vld [vmem:[#allocation73_spill] sm:$0xff] }
 0x642   :  { %v5011_v44 = vrot.slane %v11802_v47, 3  ;;  %v5015_v5 = vrot.slane %v4955_v41, 3  ;;  %v13628_v38 = vmov %v13623_v29  ;;  %v4406_v1 = vadd.f32 %v4338_v43, %v13629_v17 }
 0x643   :  { %v4622_v19 = vsel %vm870_vm3, %v13625_v12, %v13623_v29  ;;  %v4626_v48 = vsel %vm870_vm3, %v13628_v38, %v13627_v27  ;;  %v4408_v9 = vadd.f32 %v4342_v34, %v13630_v21  ;;  %v4492_v14 = vsel %vm870_vm3, %v4487_v18, %v4491_v51 }
 0x644   :  { %v11832_v41 = vadd.f32 %v4622_v19, %v4206_v7  ;;  %v5016_v29 = vsel %vm1936_vm6, %v5011_v44, %v5015_v5  ;;  %v5020_v12 = vsel %vm1936_vm6, %v5015_v5, %v5019_v22  ;;  %v13631_v7 = vrot.slane %v13585_v24, 1  ;;  %v13633_v5 = vld [vmem:[#allocation43_spill] sm:$0xff] }
 0x645   :  { %v5081_v10 = vadd.f32 %v5016_v29, %v4825_v35  ;;  %v5083_v33 = vadd.f32 %v5020_v12, %v4827_v39  ;;  %v5146_v20 = vsel %vm2142_vm5, %v5141_v53, %v5145_v32  ;;  %v13632_v22 = vrot.slane %v11533_v15, 6 }
 0x646   :  { %v4496_v19 = vsel %vm870_vm3, %v4491_v51, %v13631_v7  ;;  %v4560_v21 = vadd.f32 %v4492_v14, %v13633_v5  ;;  %v4696_v35 = vadd.f32 %v4626_v48, %v4208_v49  ;;  %v12739_v34 = vrot.slane %v11810_v55, 2 }
 0x647   :  { %v5150_v17 = vsel %vm2142_vm5, %v5145_v32, %v13632_v22  ;;  %v5215_v39 = vadd.f32 %v5146_v20, %v5081_v10  ;;  %v4753_v27 = vrot.slane %v4434_v25, 2  ;;  %v4562_v38 = vadd.f32 %v4496_v19, %v4140_v45  ;;  %v13636_v19 = vld [vmem:[#allocation128_spill] sm:$0xff] }
 0x648   :  { %v5217_v43 = vadd.f32 %v5150_v17, %v5083_v33  ;;  %v12738_v24 = vrot.slane %v11832_v41, 1  ;;  %v4881_v51 = vrot.slane %v4696_v35, 1  ;;  %v5139_v29 = vrot.slane %v4278_v8, 6  ;;  %v13637_v20 = vld [vmem:[#allocation64_spill] sm:$0xff] }
 0x649   :  { %v4754_v15 = vsel %vm1527_vm4, %v12739_v34, %v4753_v27  ;;  %v13634_v32 = vrot.slane %v11644_v50, 2  ;;  %v12737_v49 = vrot.slane %v11800_v36, 6  ;;  %v13635_v25 = vrot.slane %v11671_v3, 1 }
 0x64a   :  { %v5239_v12 = vpack.c.bf16 %v5217_v43, %v5215_v39  ;;  %v4822_v48 = vadd.f32 %v4754_v15, %v4406_v1  ;;  %v4882_v45 = vsel %vm870_vm3, %v12738_v24, %v4881_v51  ;;  %v4001_v50 = vmul.f32 %v13599_v46, %v13636_v19  ;;  %v13639_v43 = vld [vmem:[#allocation69_spill] sm:$0xff] }
 0x64b   :  { %v4758_v14 = vsel %vm1527_vm4, %v4753_v27, %v13634_v32  ;;  %v4886_v8 = vsel %vm870_vm3, %v4881_v51, %v13635_v25  ;;  %v11870_v33 = vadd.f32 %v4882_v45, %v4560_v21  ;;  %v4003_v22 = vmul.f32 %v13599_v46, %v13637_v20  ;;  %v13643_v24 = vld [vmem:[#allocation61_spill] sm:$0xff] }
 0x64c   :  { %v4824_v10 = vadd.f32 %v4758_v14, %v4408_v9  ;;  %5286 = vmatpush1.bf16.msra.mxu0 %v5239_v12  ;;  %v4952_v7 = vadd.f32 %v4886_v8, %v4562_v38  ;;  %v5140_v1 = vsel %vm2142_vm5, %v12737_v49, %v5139_v29  ;;  %v13638_v9 = vrot.slane %v11625_v42, 6  ;;  %v13642_v49 = vld [vmem:[#allocation62_spill] sm:$0xff] }
 0x64d   :  { %v11884_v17 = vmul.f32 %v13598_v62, %v13636_v19  ;;  %v4037_v5 = vmul.f32 %v13598_v62, %v13637_v20  ;;  %v12736_v21 = vrot.slane %v11870_v33, 3  ;;  %v4103_v39 = vmul.f32 %v10383_v31, %v13637_v20 }
 0x64e   :  { %v5144_v3 = vsel %vm2142_vm5, %v5139_v29, %v13638_v9  ;;  %v5009_v35 = vrot.slane %v4952_v7, 3  ;;  %v4105_v27 = vmul.f32 %v10383_v31, %v13639_v43  ;;  %v4069_v42 = vmul.f32 %v10380_v13, %v13636_v19 }
 0x64f   :  { %v4071_v38 = vmul.f32 %v10380_v13, %v13637_v20  ;;  %v4137_v51 = vmul.f32 %v13503_v26, %v13637_v20  ;;  %v4139_v62 = vmul.f32 %v13503_v26, %v13639_v43  ;;  %v13640_v12 = vrot.slane %v11699_v52, 3 }
 0x650   :  { %v5010_v29 = vsel %vm1936_vm6, %v12736_v21, %v5009_v35  ;;  %v4331_v32 = vrot.slane %v11884_v17, 1  ;;  %v4335_v14 = vrot.slane %v4037_v5, 1  ;;  %v11908_v13 = vadd.f32 %v4103_v39, %v4069_v42  ;;  %v13644_v39 = vld [vmem:[#allocation23_spill] sm:$0xff] }
 0x651   :  { %v5014_v15 = vsel %vm1936_vm6, %v5009_v35, %v13640_v12  ;;  %v5078_v45 = vadd.f32 %v5010_v29, %v4822_v48  ;;  %v4433_v8 = vadd.f32 %v4105_v27, %v4071_v38  ;;  %v13641_v9 = vrot.slane %v13606_v11, 1  ;;  %v13646_v42 = vld [vmem:[#allocation71_spill] sm:$0xff] }
 0x652   :  { %v5080_v25 = vadd.f32 %v5014_v15, %v4824_v10  ;;  %v4336_v7 = vsel %vm870_vm3, %v4331_v32, %v4335_v14  ;;  %v4485_v52 = vrot.slane %v13642_v49, 1  ;;  %v4489_v35 = vrot.slane %v13643_v24, 1 }
 0x653   :  { %v4340_v21 = vsel %vm870_vm3, %v4335_v14, %v13641_v9  ;;  %v5212_v12 = vadd.f32 %v5140_v1, %v5078_v45  ;;  %v11920_v48 = vmul.f32 %v11745_v4, %v13639_v43  ;;  %v4277_v10 = vmul.f32 %v11745_v4, %v13597_v57  ;;  %v13651_v14 = vld [vmem:[#allocation67_spill] sm:$0xff] }
 0x654   :  { %v5214_v34 = vadd.f32 %v5144_v3, %v5080_v25  ;;  %v4405_v5 = vadd.f32 %v4336_v7, %v4001_v50  ;;  %v4490_v11 = vsel %vm870_vm3, %v4485_v52, %v4489_v35  ;;  %v13645_v27 = vrot.slane %v13644_v39, 1  ;;  %v13652_v7 = vld [vmem:[#allocation57_spill] sm:$0xff] }
 0x655   :  { %v13647_v38 = vrot.slane %v13646_v42, 1  ;;  %v13648_v1 = vrot.slane %v13604_v63, 1  ;;  %v4407_v15 = vadd.f32 %v4340_v21, %v4003_v22  ;;  %v13650_v57 = vrot.slane %v13602_v59, 1  ;;  %v13653_v22 = vld [vmem:[#allocation130_spill] sm:$0xff] }
 0x656   :  { %v13649_v3 = vmov %v13645_v27  ;;  %v5238_v29 = vpack.c.bf16 %v5214_v34, %v5212_v12  ;;  %v4559_v25 = vadd.f32 %v4490_v11, %v4137_v51  ;;  %v5133_v39 = vrot.slane %v11920_v48, 6  ;;  %v6606_v48 = vld [vmem:[%s12330_s13 + $0xcc] ss:$16 sps:$4 sm:$0xff]  }
 0x657   :  { %v4620_v24 = vsel %vm870_vm3, %v13647_v38, %v13645_v27  ;;  %v4624_v43 = vsel %vm870_vm3, %v13649_v3, %v13648_v1  ;;  %v4494_v50 = vsel %vm870_vm3, %v4489_v35, %v13650_v57  ;;  %v4747_v27 = vrot.slane %v11908_v13, 2 }
 0x658   :  { %v11941_v45 = vadd.f32 %v4620_v24, %v13651_v14  ;;  %v4695_v9 = vadd.f32 %v4624_v43, %v13652_v7  ;;  %v4751_v38 = vrot.slane %v4433_v8, 2  ;;  %5287 = vmatprep.subr.bf16.mxu0 %v5238_v29  ;;  %v5137_v34 = vrot.slane %v4277_v10, 6  ;;  %v13655_v43 = vld [vmem:[#allocation106_spill] sm:$0xff]  ;;  %v13657_v29 = vld [vmem:[#allocation109_spill] sm:$0xff]  ;;  %v13661_v7 = vld [vmem:[#allocation100_spill] sm:$0xff] }
 0x659   :  { %v4102_v59 = vmul.f32 %v10401_v58, %v13653_v22  ;;  %v4170_v8 = vmul.f32 %v10423_v23, %v13653_v22  ;;  %v4561_v12 = vadd.f32 %v4494_v50, %v4139_v62  ;;  %v4136_v10 = vmul.f32 %v13613_v40, %v13653_v22 }
 0x65a   :  { %v4875_v63 = vrot.slane %v11941_v45, 1  ;;  %v4752_v21 = vsel %vm1527_vm4, %v4747_v27, %v4751_v38  ;;  %v4756_v51 = vsel %vm1527_vm4, %v4751_v38, %v4755_v16  ;;  %v4879_v35 = vrot.slane %v4695_v9, 1 }
 0x65b   :  { %v4821_v11 = vadd.f32 %v4752_v21, %v4405_v5  ;;  %v4823_v24 = vadd.f32 %v4756_v51, %v4407_v15  ;;  %v13654_v1 = vrot.slane %v11764_v2, 1  ;;  %v5138_v16 = vsel %vm2142_vm5, %v5133_v39, %v5137_v34  ;;  %v13662_v51 = vld [vmem:[#allocation136_spill] sm:$0xff] }
 0x65c   :  { %v4880_v58 = vsel %vm870_vm3, %v4875_v63, %v4879_v35  ;;  %v4202_v23 = vmul.f32 %v10463_v54, %v13653_v22  ;;  %v4204_v40 = vmul.f32 %v10463_v54, %v13614_v6  ;;  %v4274_v3 = vmul.f32 %v11796_v56, %v13614_v6 }
 0x65d   :  { %v4884_v61 = vsel %vm870_vm3, %v4879_v35, %v13654_v1  ;;  %v11970_v62 = vadd.f32 %v4880_v58, %v4559_v25  ;;  %v13656_v2 = vrot.slane %v13655_v43, 1  ;;  %v13658_v15 = vrot.slane %v13657_v29, 1  ;;  %v13663_v35 = vld [vmem:[#allocation116_spill] sm:$0xff]  ;;  %v13664_v58 = vld [vmem:[#allocation131_spill] sm:$0xff] }
 0x65e   :  { %v4951_v5 = vadd.f32 %v4884_v61, %v4561_v12  ;;  %v13659_v50 = vrot.slane %v13616_v0, 1  ;;  %v4430_v9 = vadd.f32 %v4102_v59, %v13661_v7  ;;  %v4483_v38 = vrot.slane %v4170_v8, 1  ;;  %v13666_v43 = vld [vmem:[#allocation68_spill] sm:$0xff]  ;;  %v13668_v29 = vld [vmem:[#allocation135_spill] sm:$0xff] }
 0x65f   :  { %v4330_v57 = vsel %vm870_vm3, %v13658_v15, %v13656_v2  ;;  %v13660_v14 = vmov %v13656_v2  ;;  %v5003_v54 = vrot.slane %v11970_v62, 3  ;;  %v13665_v1 = vrot.slane %v13664_v58, 1  ;;  %v6594_v62 = vld [vmem:[%s12329_s12] sm:$0xff]  }
 0x660   :  { %v4334_v25 = vsel %vm870_vm3, %v13660_v14, %v13659_v50  ;;  %v5007_v21 = vrot.slane %v4951_v5, 3  ;;  %v4402_v6 = vadd.f32 %v4330_v57, %v13662_v51  ;;  %v4488_v0 = vsel %vm870_vm3, %v4483_v38, %v4487_v18  ;;  %v13672_v51 = vld [vmem:[#allocation74_spill] sm:$0xff] }
 0x661   :  { %v4404_v12 = vadd.f32 %v4334_v25, %v13663_v35  ;;  %v4484_v61 = vsel %vm870_vm3, %v13665_v1, %v4483_v38  ;;  %v13667_v2 = vrot.slane %v13666_v43, 1  ;;  %v13669_v59 = vrot.slane %v13668_v29, 1 }
 0x662   :  { %v13670_v5 = vrot.slane %v13624_v60, 1  ;;  %v5008_v50 = vsel %vm1936_vm6, %v5003_v54, %v5007_v21  ;;  %v5012_v37 = vsel %vm1936_vm6, %v5007_v21, %v5011_v44  ;;  %v5142_v18 = vsel %vm2142_vm5, %v5137_v34, %v5141_v53  ;;  %v13673_v21 = vld [vmem:[#allocation125_spill] sm:$0xff] }
 0x663   :  { %v4614_v8 = vsel %vm870_vm3, %v13669_v59, %v13667_v2  ;;  %v13671_v15 = vmov %v13667_v2  ;;  %v4272_v14 = vmul.f32 %v11796_v56, %v13653_v22  ;;  %v5077_v60 = vadd.f32 %v5008_v50, %v4821_v11 }
 0x664   :  { %v4618_v57 = vsel %vm870_vm3, %v13671_v15, %v13670_v5  ;;  %v5079_v25 = vadd.f32 %v5012_v37, %v4823_v24  ;;  %v4690_v7 = vadd.f32 %v4614_v8, %v4202_v23  ;;  %v4556_v35 = vadd.f32 %v4484_v61, %v13672_v51  ;;  %v13681_v15 = vld [vmem:[#allocation111_spill] sm:$0xff] }
 0x665   :  { %v4692_v38 = vadd.f32 %v4618_v57, %v4204_v40  ;;  %v4558_v58 = vadd.f32 %v4488_v0, %v4136_v10  ;;  %v4745_v1 = vrot.slane %v4430_v9, 2  ;;  %v5131_v43 = vrot.slane %v4274_v3, 6  ;;  %v13676_v40 = vld [vmem:[#allocation121_spill] sm:$0xff]  ;;  %v13677_v9 = vld [vmem:[#allocation75_spill] sm:$0xff] }
 0x666   :  { %v5211_v2 = vadd.f32 %v5138_v16, %v5077_v60  ;;  %v5213_v47 = vadd.f32 %v5142_v18, %v5079_v25  ;;  %v4872_v29 = vrot.slane %v4690_v7, 1  ;;  %v13674_v28 = vrot.slane %v13673_v21, 2  ;;  %v13685_v25 = vld [vmem:[#allocation10_spill] sm:$0xff] }
 0x667   :  { %v4873_v44 = vrot.slane %v4692_v38, 1  ;;  %v13675_v34 = vrot.slane %v11810_v55, 2  ;;  %v5130_v22 = vrot.slane %v4272_v14, 6  ;;  %v4101_v11 = vmul.f32 %v10383_v31, %v13636_v19  ;;  %v13684_v14 = vld [vmem:[#allocation132_spill] sm:$0xff]  ;;  %v13686_v38 = vld [vmem:[#allocation66_spill] sm:$0xff] }
 0x668   :  { %v4746_v53 = vsel %vm1527_vm4, %v13674_v28, %v4745_v1  ;;  %v5237_v24 = vpack.c.bf16 %v5213_v47, %v5211_v2  ;;  %v4741_v3 = vrot.slane %v13676_v40, 2  ;;  %v4609_v61 = vrot.slane %v13677_v9, 1  ;;  %v13695_v9 = vld [vmem:[#allocation60_spill] sm:$0xff] }
 0x669   :  { %v4750_v56 = vsel %vm1527_vm4, %v4745_v1, %v13675_v34  ;;  %v4818_v10 = vadd.f32 %v4746_v53, %v4402_v6  ;;  %v4874_v16 = vsel %vm870_vm3, %v4872_v29, %v4873_v44  ;;  %v13678_v0 = vrot.slane %v11832_v41, 1  ;;  %v13679_v6 = vld [vmem:[#allocation133_spill] sm:$0xff] }
 0x66a   :  { %v4820_v23 = vadd.f32 %v4750_v56, %v4404_v12  ;;  %v4946_v55 = vadd.f32 %v4874_v16, %v4556_v35  ;;  %v4203_v8 = vmul.f32 %v13595_v30, %v13637_v20  ;;  %5288 = vmatpush1.bf16.msra.mxu0 %v5237_v24  ;;  %v5132_v31 = vsel %vm2142_vm5, %v5130_v22, %v5131_v43  ;;  %v13687_v35 = vld [vmem:[#allocation59_spill] sm:$0xff]  ;;  %v13693_v22 = vld [vmem:[#allocation117_spill] sm:$0xff] }
 0x66b   :  { %v4878_v59 = vsel %vm870_vm3, %v4873_v44, %v13678_v0  ;;  %v13680_v12 = vrot.slane %v13679_v6, 1  ;;  %v13682_v57 = vrot.slane %v13681_v15, 1  ;;  %v13683_v18 = vrot.slane %v11800_v36, 6 }
 0x66c   :  { %v4948_v5 = vadd.f32 %v4878_v59, %v4558_v58  ;;  %v5000_v37 = vrot.slane %v4946_v55, 3  ;;  %v4429_v7 = vadd.f32 %v4101_v11, %v13685_v25  ;;  %v4480_v51 = vrot.slane %v13686_v38, 1  ;;  %v6600_v25 = vld [vmem:[%s12330_s13 + $0xec] ss:$16 sps:$4 sm:$0xff]   ;;  %v6610_v38 = vld [vmem:[%s12330_s13 + $0xa8] ss:$16 sps:$4 sm:$0xff]  }
 0x66d   :  { %v4327_v50 = vsel %vm870_vm3, %v13682_v57, %v13680_v12  ;;  %v5136_v41 = vsel %vm2142_vm5, %v5131_v43, %v13683_v18  ;;  %v13688_v58 = vrot.slane %v13687_v35, 1  ;;  %v13689_v2 = vrot.slane %v13646_v42, 1  ;;  %v13691_v43 = vld [vmem:[#allocation70_spill] sm:$0xff]  ;;  %v6616_v35 = vld [vmem:[%s12330_s13 + $0x88] ss:$16 sps:$4 sm:$0xff]  }
 0x66e   :  { %v4401_v60 = vadd.f32 %v4327_v50, %v13684_v14  ;;  %v5001_v30 = vrot.slane %v4948_v5, 3  ;;  %v4135_v36 = vmul.f32 %v13503_v26, %v13636_v19  ;;  %v4742_v28 = vrot.slane %v4429_v7, 2 }
 0x66f   :  { %v4611_v1 = vsel %vm870_vm3, %v4609_v61, %v13688_v58  ;;  %v13690_v47 = vmov %v13688_v58  ;;  %v13692_v34 = vrot.slane %v11870_v33, 3  ;;  %v13694_v11 = vrot.slane %v13693_v22, 1  ;;  %v6624_v58 = vld [vmem:[%s12330_s13 + $0x6c] ss:$16 sps:$4 sm:$0xff]   ;;  %v6658_v22 = vld [vmem:[%s12330_s13 + $0x1a8] ss:$16 sps:$4 sm:$0xff]  }
 0x670   :  { %v4616_v29 = vsel %vm870_vm3, %v13690_v47, %v13689_v2  ;;  %v4689_v44 = vadd.f32 %v4611_v1, %v13691_v43  ;;  %v5002_v53 = vsel %vm1936_vm6, %v5000_v37, %v5001_v30  ;;  %v4486_v24 = vsel %vm870_vm3, %v4480_v51, %v4485_v52  ;;  %v6622_v1 = vld [vmem:[%s12330_s13 + $0x68] ss:$16 sps:$4 sm:$0xff]   ;;  %v6630_v2 = vld [vmem:[%s12330_s13 + $0x4c] ss:$16 sps:$4 sm:$0xff]  }
 0x671   :  { %v4691_v21 = vadd.f32 %v4616_v29, %v4203_v8  ;;  %v5006_v56 = vsel %vm1936_vm6, %v5001_v30, %v13692_v34  ;;  %v4481_v42 = vsel %vm870_vm3, %v13694_v11, %v4480_v51  ;;  %v5074_v16 = vadd.f32 %v5002_v53, %v4818_v10  ;;  %v6612_v30 = vld [vmem:[%s12330_s13 + $0xac] ss:$16 sps:$4 sm:$0xff]   ;;  %v6628_v47 = vld [vmem:[%s12330_s13 + $0x48] ss:$16 sps:$4 sm:$0xff]  }
 0x672   :  { %v5076_v26 = vadd.f32 %v5006_v56, %v4820_v23  ;;  %v4273_v40 = vmul.f32 %v11745_v4, %v13637_v20  ;;  %v4555_v61 = vadd.f32 %v4481_v42, %v13695_v9  ;;  %v13696_v33 = vmov %v13680_v12  ;;  %v13697_v23 = vld [vmem:[#allocation77_spill] sm:$0xff]  ;;  %v6673_v9 = vld [vmem:[%s12330_s13 + $0x140] ss:$16 sps:$4 sm:$0xff]  }
 0x673   :  { %v4332_v0 = vsel %vm870_vm3, %v13696_v33, %v4331_v32  ;;  %v4743_v59 = vsel %vm1527_vm4, %v4741_v3, %v4742_v28  ;;  %v4869_v55 = vrot.slane %v4689_v44, 1  ;;  %v4870_v8 = vrot.slane %v4691_v21, 1  ;;  %v6618_v51 = vld [vmem:[%s12330_s13 + $0x8c] ss:$16 sps:$4 sm:$0xff]   ;;  %v6640_v44 = vld [vmem:[%s12330_s13 + $0x8] ss:$16 sps:$4 sm:$0xff]  }
 0x674   :  { %v5208_v49 = vadd.f32 %v5132_v31, %v5074_v16  ;;  %v5210_v5 = vadd.f32 %v5136_v41, %v5076_v26  ;;  %v4557_v52 = vadd.f32 %v4486_v24, %v4135_v36  ;;  %v4817_v10 = vadd.f32 %v4743_v59, %v4401_v60  ;;  %v6636_v29 = vld [vmem:[%s12330_s13 + $0x2c] ss:$16 sps:$4 sm:$0xff]   ;;  %v6634_v36 = vld [vmem:[%s12330_s13 + $0x28] ss:$16 sps:$4 sm:$0xff]   ;;  %v6667_v24 = vld [vmem:[%s12330_s13 + $0x160] ss:$16 sps:$4 sm:$0xff]  }
 0x675   :  { %v3999_v12 = vmul.f32 %v13599_v46, %v13697_v23  ;;  %v4271_v20 = vmul.f32 %v11745_v4, %v13636_v19  ;;  %v4871_v17 = vsel %vm870_vm3, %v4869_v55, %v4870_v8  ;;  %v4876_v32 = vsel %vm870_vm3, %v4870_v8, %v4875_v63  ;;  %v6642_v43 = vld [vmem:[%s12330_s13 + $0xc] ss:$16 sps:$4 sm:$0xff]   ;;  %v6652_v34 = vld [vmem:[%s12330_s13 + $0x1c8] ss:$16 sps:$4 sm:$0xff]   ;;  %v6669_v16 = vld [vmem:[%s12330_s13 + $0x164] ss:$16 sps:$4 sm:$0xff]  }
 0x676   :  { %v5236_v6 = vpack.c.bf16 %v5210_v5, %v5208_v49  ;;  %v4748_v3 = vsel %vm1527_vm4, %v4742_v28, %v4747_v27  ;;  %v4945_v31 = vadd.f32 %v4871_v17, %v4555_v61  ;;  %v4947_v15 = vadd.f32 %v4876_v32, %v4557_v52  ;;  %v6648_v21 = vld [vmem:[%s12330_s13 + $0x1ec] ss:$16 sps:$4 sm:$0xff]   ;;  %v6646_v28 = vld [vmem:[%s12330_s13 + $0x1e8] ss:$16 sps:$4 sm:$0xff]   ;;  %5758 = vmatprep.subr.bf16.mxu1 %v6669_v16  ;;  %v6675_v61 = vld [vmem:[%s12330_s13 + $0x144] ss:$16 sps:$4 sm:$0xff]  }
 0x677   :  { %v4403_v57 = vadd.f32 %v4332_v0, %v3999_v12  ;;  %v5128_v37 = vrot.slane %v4273_v40, 6  ;;  %v5127_v45 = vrot.slane %v4271_v20, 6  ;;  %v6654_v53 = vld [vmem:[%s12330_s13 + $0x1cc] ss:$16 sps:$4 sm:$0xff]   ;;  %v6664_v42 = vld [vmem:[%s12330_s13 + $0x188] ss:$16 sps:$4 sm:$0xff]   ;;  %5759 = vmatpush2.bf16.msra.mxu1 %v6667_v24 }
 0x678   :  { %5289 = vmatprep.subr.bf16.mxu0 %v5236_v6  ;;  %v4997_v50 = vrot.slane %v4945_v31, 3  ;;  %v4998_v46 = vrot.slane %v4947_v15, 3  ;;  %v6660_v56 = vld [vmem:[%s12330_s13 + $0x1ac] ss:$16 sps:$4 sm:$0xff]   ;;  %v6670_v26 = vld [vmem:[%s12330_s13 + $0x168] ss:$16 sps:$4 sm:$0xff]   ;;  %5760 = vmatprep.subr.bf16.mxu1 %v6675_v61 }
 0x679   :  { %v4819_v18 = vadd.f32 %v4748_v3, %v4403_v57  ;;  %v5129_v13 = vsel %vm2142_vm5, %v5127_v45, %v5128_v37  ;;  %v5134_v27 = vsel %vm2142_vm5, %v5128_v37, %v5133_v39  ;;  %v6604_v39 = vld [vmem:[%s12330_s13 + $0xc8] ss:$16 sps:$4 sm:$0xff]   ;;  %v6666_v11 = vld [vmem:[%s12330_s13 + $0x18c] ss:$16 sps:$4 sm:$0xff]   ;;  %v6681_v59 = vld [vmem:[%s12330_s13 + $0x124] ss:$16 sps:$4 sm:$0xff]  }
 0x67a   :  { %v4999_v4 = vsel %vm1936_vm6, %v4997_v50, %v4998_v46  ;;  %v5004_v19 = vsel %vm1936_vm6, %v4998_v46, %v5003_v54  ;;  %v6598_v54 = vld [vmem:[%s12330_s13 + $0xe8] ss:$16 sps:$4 sm:$0xff]   ;;  %v6672_v40 = vld [vmem:[%s12330_s13 + $0x16c] ss:$16 sps:$4 sm:$0xff]   ;;  %v6679_v55 = vld [vmem:[%s12330_s13 + $0x120] ss:$16 sps:$4 sm:$0xff]  }
 0x67b   :  { %v5073_v63 = vadd.f32 %v4999_v4, %v4817_v10  ;;  %v5075_v41 = vadd.f32 %v5004_v19, %v4819_v18  ;;  %v6676_v33 = vld [vmem:[%s12330_s13 + $0x148] ss:$16 sps:$4 sm:$0xff]   ;;  %v6678_v0 = vld [vmem:[%s12330_s13 + $0x14c] ss:$16 sps:$4 sm:$0xff]   ;;  %5761 = vmatpush2.bf16.msra.mxu1 %v6673_v9  ;;  %v6687_v5 = vld [vmem:[%s12330_s13 + $0x104] ss:$16 sps:$4 sm:$0xff]  }
 0x67c   :  { %v6684_v8 = vld [vmem:[%s12330_s13 + $0x12c] ss:$16 sps:$4 sm:$0xff]   ;;  %5762 = vmatprep.subr.bf16.mxu1 %v6681_v59  ;;  %v6682_v49 = vld [vmem:[%s12330_s13 + $0x128] ss:$16 sps:$4 sm:$0xff]   ;;  %v6685_v10 = vld [vmem:[%s12330_s13 + $0x100] ss:$16 sps:$4 sm:$0xff]  }
 0x67d   :  { %v5207_v14 = vadd.f32 %v5129_v13, %v5073_v63  ;;  %v5209_v60 = vadd.f32 %v5134_v27, %v5075_v41  ;;  %v6690_v52 = vld [vmem:[%s12330_s13 + $0x10c] ss:$16 sps:$4 sm:$0xff]   ;;  %v6688_v23 = vld [vmem:[%s12330_s13 + $0x108] ss:$16 sps:$4 sm:$0xff]   ;;  %v5249_v12 = vld [vmem:[%s12331_s11] sm:$0x3] }
 0x67e   :  { %v13698_v20 = vld [vmem:[#allocation4_spill] sm:$0xff]  ;;  %v13699_v32 = vld [vmem:[#allocation5_spill] sm:$0xff] }
 0x67f   :  { %v5235_v7 = vpack.c.bf16 %v5209_v60, %v5207_v14  ;;  %5763 = vmatpush2.bf16.msra.mxu1 %v6679_v55  ;;  %v5258_v17 = vrot.slane %v5249_v12, %v13698_v20  ;;  %v5254_v6 = vrot.slane %v5249_v12, %v13699_v32 }
 0x680   :  { %5764 = vmatprep.subr.bf16.mxu1 %v6687_v5 }
 0x681   :  { %5290 = vmatpush1.bf16.msra.mxu0 %v5235_v7  ;;  %v13700_v7 = vmov 0  }
 0x682   :  { %5777 = vmatprep.subr.bf16.mxu0 %v6600_v25 }
 0x683   :  { %5765 = vmatpush2.bf16.msra.mxu1 %v6685_v10 }
 0x684   :  { %6220 = vmatmul.mubr.msk.bf16.vlgmr.msra.gmra.mxu0 %vm3841_vm8, %v6594_v62  ;;  %v6691_v62 = vld [vmem:[%s12332_s15 + $0x60] ss:$16 sps:$4 sm:$0xff]  }
 0x685   :  { %5778 = vmatpush1.bf16.msra.mxu0 %v6598_v54  ;;  %v6693_v54 = vld [vmem:[%s12332_s15 + $0x64] ss:$16 sps:$4 sm:$0xff]  }
 0x686   :  { %5779 = vmatprep.subr.bf16.mxu0 %v6606_v48  ;;  %v6694_v48 = vld [vmem:[%s12332_s15 + $0x68] ss:$16 sps:$4 sm:$0xff]   ;;  %6038 = vmatprep.subr.bf16.mxu1 %v6693_v54  ;;  %v6703_v54 = vld [vmem:[%s12332_s15 + $0x20] ss:$16 sps:$4 sm:$0xff]  }
 0x689   :  { %5780 = vmatpush1.bf16.msra.mxu0 %v6604_v39  ;;  %v6696_v39 = vld [vmem:[%s12332_s15 + $0x6c] ss:$16 sps:$4 sm:$0xff]  }
 0x68a   :  { %5781 = vmatprep.subr.bf16.mxu0 %v6612_v30  ;;  %v5392_v30 = vld [vmem:[%s12333_s14] sm:$0xf] }
 0x68d   :  { %5782 = vmatpush1.bf16.msra.mxu0 %v6610_v38  ;;  %v5397_v38 = vrot.slane %v5392_v30, %v13699_v32 }
 0x68e   :  { %5783 = vmatprep.subr.bf16.mxu0 %v6618_v51  ;;  %v13701_v51 = vld [vmem:[#allocation6_spill] sm:$0xff] }
 0x691   :  { %5784 = vmatpush1.bf16.msra.mxu0 %v6616_v35  ;;  %v5405_v35 = vrot.slane %v5392_v30, %v13701_v51  ;;  %v6708_v51 = vld [vmem:[%s12332_s15 + $0x2c] ss:$16 sps:$4 sm:$0xff]  }
 0x692   :  { %5785 = vmatprep.subr.bf16.mxu0 %v6624_v58  ;;  %v5401_v58 = vrot.slane %v5392_v30, %v13698_v20 }
 0x695   :  { %5786 = vmatpush1.bf16.msra.mxu0 %v6622_v1  ;;  %v13702_v1 = vld [vmem:[#allocation7_spill] sm:$0xff] }
 0x696   :  { %5787 = vmatprep.subr.bf16.mxu0 %v6630_v2  ;;  %v5409_v2 = vrot.slane %v5392_v30, %v13702_v1  ;;  %v6711_v1 = vld [vmem:[%s12332_s15 + $0x4] ss:$16 sps:$4 sm:$0xff]  }
 0x699   :  { %5788 = vmatpush1.bf16.msra.mxu0 %v6628_v47 }
 0x69a   :  { %5789 = vmatprep.subr.bf16.mxu0 %v6636_v29 }
 0x69d   :  { %5790 = vmatpush1.bf16.msra.mxu0 %v6634_v36 }
 0x69e   :  { %5791 = vmatprep.subr.bf16.mxu0 %v6642_v43 }
 0x6a1   :  { %5792 = vmatpush1.bf16.msra.mxu0 %v6640_v44 }
 0x6a2   :  { %5793 = vmatprep.subr.bf16.mxu0 %v6648_v21 }
 0x6a5   :  { %5794 = vmatpush2.bf16.msra.mxu0 %v6646_v28 }
 0x6a6   :  { %5795 = vmatprep.subr.bf16.mxu0 %v6654_v53 }
 0x6a9   :  { %5796 = vmatpush2.bf16.msra.mxu0 %v6652_v34 }
 0x6aa   :  { %5797 = vmatprep.subr.bf16.mxu0 %v6660_v56 }
 0x6ad   :  { %5798 = vmatpush2.bf16.msra.mxu0 %v6658_v22 }
 0x6ae   :  { %5799 = vmatprep.subr.bf16.mxu0 %v6666_v11 }
 0x6b1   :  { %5800 = vmatpush2.bf16.msra.mxu0 %v6664_v42 }
 0x6b2   :  { %5801 = vmatprep.subr.bf16.mxu0 %v6672_v40 }
 0x6b5   :  { %5802 = vmatpush2.bf16.msra.mxu0 %v6670_v26 }
 0x6b6   :  { %5803 = vmatprep.subr.bf16.mxu0 %v6678_v0 }
 0x6b9   :  { %5804 = vmatpush2.bf16.msra.mxu0 %v6676_v33 }
 0x6ba   :  { %5805 = vmatprep.subr.bf16.mxu0 %v6684_v8 }
 0x6bd   :  { %5806 = vmatpush2.bf16.msra.mxu0 %v6682_v49 }
 0x6be   :  { %5807 = vmatprep.subr.bf16.mxu0 %v6690_v52 }
 0x6c1   :  { %5808 = vmatpush2.bf16.msra.mxu0 %v6688_v23 }
 0x6c2   :  { %6079 = vmatprep.subr.bf16.mxu0 %v6696_v39 }
 0x744   :  { %v5309_v3 = vpop.f32.mrf.mxu0 }
 0x745   :  { %v5310_v57 = vadd.f32 %v5309_v3, %v5254_v6 }
 0x746   :  { %v5311_v31 = vpop.f32.mrf.mxu0 }
 0x747   :  { %v5312_v15 = vadd.f32 %v5311_v31, %v5258_v17  ;;  %v5318_v45 = vmax.f32 %v5310_v57, 0.0 }
 0x748   :  { %v5313_v50 = vpop.f32.mrf.mxu0 }
 0x749   :  { %v5314_v46 = vadd.f32 %v5313_v50, %v5254_v6  ;;  %v5319_v18 = vmax.f32 %v5312_v15, 0.0  ;;  %v5322_v14 = vmin.f32 %v5318_v45, 6.0  ;;  %v6700_v45 = vld [vmem:[%s12332_s15 + $0x48] ss:$16 sps:$4 sm:$0xff]  }
 0x74a   :  { %v5315_v37 = vpop.f32.mrf.mxu0 }
 0x74b   :  { %v5320_v4 = vmax.f32 %v5314_v46, 0.0  ;;  %v5316_v19 = vadd.f32 %v5315_v37, %v5258_v17  ;;  %v5323_v13 = vmin.f32 %v5319_v18, 6.0  ;;  %v6697_v37 = vld [vmem:[%s12332_s15 + $0x40] ss:$16 sps:$4 sm:$0xff]   ;;  %v6699_v18 = vld [vmem:[%s12332_s15 + $0x44] ss:$16 sps:$4 sm:$0xff]  }
 0x74d   :  { %v5321_v63 = vmax.f32 %v5316_v19, 0.0  ;;  %v5324_v41 = vmin.f32 %v5320_v4, 6.0 }
 0x74f   :  { %v5325_v27 = vmin.f32 %v5321_v63, 6.0  ;;  %v5390_v25 = vpack.c.bf16 %v5324_v41, %v5322_v14  ;;  %v6702_v63 = vld [vmem:[%s12332_s15 + $0x4c] ss:$16 sps:$4 sm:$0xff]  }
 0x751   :  { %v5391_v60 = vpack.c.bf16 %v5325_v27, %v5323_v13 }
 0x753   :  { %5766 = vmatprep.mubr.bf16.mxu1 %v5391_v60  ;;  %5809 = vmatprep.mubr.bf16.mxu0 %v5391_v60 }
 0x754   :  { %5767 = vmatmul.mubr.bf16.vlgmr.msra.gmra.mxu1 %v5390_v25  ;;  %5810 = vmatmul.mubr.bf16.vlgmr.msra.gmra.mxu0 %v5390_v25 }
 0x755   :  { %6062 = vmatprep.mubr.bf16.mxu1 %v13700_v7  ;;  %6103 = vmatprep.mubr.bf16.mxu0 %v13700_v7  ;;  %v6724_v7 = vmov 1966171168  }
 0x756   :  { %6039 = vmatpush1.bf16.msra.mxu1 %v6691_v62  ;;  %6080 = vmatpush1.bf16.msra.mxu0 %v6694_v48  ;;  %v5876_v62 = vunpack.c.l.s4 %v6724_v7  ;;  %v6705_v48 = vld [vmem:[%s12332_s15 + $0x24] ss:$16 sps:$4 sm:$0xff]  }
 0x757   :  { %6040 = vmatprep.subr.bf16.mxu1 %v6699_v18  ;;  %6081 = vmatprep.subr.bf16.mxu0 %v6702_v63 }
 0x75a   :  { %6041 = vmatpush1.bf16.msra.mxu1 %v6697_v37  ;;  %6082 = vmatpush1.bf16.msra.mxu0 %v6700_v45 }
 0x75b   :  { %6042 = vmatprep.subr.bf16.mxu1 %v6705_v48  ;;  %6083 = vmatprep.subr.bf16.mxu0 %v6708_v51 }
 0x75e   :  { %6043 = vmatpush1.bf16.msra.mxu1 %v6703_v54 }
 0x75f   :  { %6044 = vmatprep.subr.bf16.mxu1 %v6711_v1 }
 0x814   :  { %v5768_v47 = vpop.f32.mrf.mxu1  ;;  %v5811_v29 = vpop.f32.mrf.mxu0 }
 0x815   :  { %v5769_v36 = vadd.f32 %v5768_v47, %v5397_v38  ;;  %v5812_v43 = vadd.f32 %v5811_v29, %v5405_v35 }
 0x816   :  { %v5770_v44 = vpop.f32.mrf.mxu1  ;;  %v5813_v21 = vpop.f32.mrf.mxu0 }
 0x817   :  { %v5771_v28 = vadd.f32 %v5770_v44, %v5401_v58  ;;  %v5814_v53 = vadd.f32 %v5813_v21, %v5409_v2  ;;  %v5820_v22 = vmax.f32 %v5769_v36, 0.0  ;;  %v5822_v11 = vmax.f32 %v5812_v43, 0.0  ;;  %v6709_v36 = vld [vmem:[%s12332_s15] ss:$16 sps:$4 sm:$0xff]  }
 0x818   :  { %v5772_v34 = vpop.f32.mrf.mxu1  ;;  %v5815_v56 = vpop.f32.mrf.mxu0  ;;  %v5877_v44 = vunpack.c.0.s8 %v5876_v62  ;;  %6045 = vmatpush1.bf16.msra.mxu1 %v6709_v36 }
 0x819   :  { %v5773_v42 = vadd.f32 %v5772_v34, %v5397_v38  ;;  %v5816_v24 = vadd.f32 %v5815_v56, %v5405_v35  ;;  %v5821_v40 = vmax.f32 %v5771_v28, 0.0  ;;  %v5823_v9 = vmax.f32 %v5814_v53, 0.0  ;;  %v6706_v38 = vld [vmem:[%s12332_s15 + $0x28] ss:$16 sps:$4 sm:$0xff]  }
 0x81a   :  { %v5774_v16 = vpop.f32.mrf.mxu1  ;;  %v5817_v26 = vpop.f32.mrf.mxu0  ;;  %v5828_v49 = vmin.f32 %v5820_v22, 6.0  ;;  %v5830_v5 = vmin.f32 %v5822_v11, 6.0  ;;  %6084 = vmatpush1.bf16.msra.mxu0 %v6706_v38  ;;  %v6712_v28 = vld [vmem:[%s12332_s15 + $0x8] ss:$16 sps:$4 sm:$0xff]  }
 0x81b   :  { %v5775_v61 = vadd.f32 %v5774_v16, %v5401_v58  ;;  %v5818_v33 = vadd.f32 %v5817_v26, %v5409_v2  ;;  %v5824_v0 = vmax.f32 %v5773_v42, 0.0  ;;  %v5826_v59 = vmax.f32 %v5816_v24, 0.0  ;;  %v6714_v2 = vld [vmem:[%s12332_s15 + $0xc] ss:$16 sps:$4 sm:$0xff]  }
 0x81c   :  { %v5829_v23 = vmin.f32 %v5821_v40, 6.0  ;;  %v5831_v12 = vmin.f32 %v5823_v9, 6.0  ;;  %6085 = vmatprep.subr.bf16.mxu0 %v6714_v2  ;;  %v13703_v16 = vld [vmem:[#allocation3_spill] sm:$0xff] }
 0x81d   :  { %v5825_v55 = vmax.f32 %v5775_v61, 0.0  ;;  %v5827_v8 = vmax.f32 %v5818_v33, 0.0  ;;  %v5832_v52 = vmin.f32 %v5824_v0, 6.0  ;;  %v5834_v10 = vmin.f32 %v5826_v59, 6.0 }
 0x81e   :  { %v5880_v26 = vsub.s32 %v5877_v44, %v13703_v16  ;;  %6086 = vmatpush1.bf16.msra.mxu0 %v6712_v28 }
 0x81f   :  { %v5833_v20 = vmin.f32 %v5825_v55, 6.0  ;;  %v5835_v17 = vmin.f32 %v5827_v8, 6.0  ;;  %v5836_v32 = vadd.f32 %v5832_v52, %v5828_v49  ;;  %v5850_v6 = vadd.f32 %v5834_v10, %v5830_v5 }
 0x820   :  { %v13704_v55 = vlaneseq }
 0x821   :  { %v5843_v3 = vadd.f32 %v5833_v20, %v5829_v23  ;;  %v5857_v31 = vadd.f32 %v5835_v17, %v5831_v12  ;;  %v5837_v15 = vrot.slane %v5836_v32, 4  ;;  %v5851_v57 = vrot.slane %v5850_v6, 4  ;;  %v5942_v20 = vld [vmem:[%s12335_s16] sm:$0xff]  ;;  %v5944_v17 = vld [vmem:[%s12335_s16 + $0x10] sm:$0xff] }
 0x822   :  { %vm5900_vm10 = vcmp.lt.s32.totalorder %v13704_v55, 512 }
 0x823   :  { %v5844_v50 = vrot.slane %v5843_v3, 4  ;;  %v5858_v46 = vrot.slane %v5857_v31, 4  ;;  %v5838_v4 = vadd.f32 %v5837_v15, %v5836_v32  ;;  %v5852_v19 = vadd.f32 %v5851_v57, %v5850_v6 }
 0x825   :  { %v5845_v41 = vadd.f32 %v5844_v50, %v5843_v3  ;;  %v5859_v13 = vadd.f32 %v5858_v46, %v5857_v31  ;;  %v5839_v27 = vrot.slane %v5838_v4, 2  ;;  %v5853_v14 = vrot.slane %v5852_v19, 2  ;;  %v5943_v3 = vld [vmem:[%s12335_s16 + $0x8] sm:$0xff]  ;;  %v5945_v31 = vld [vmem:[%s12335_s16 + $0x18] sm:$0xff] }
 0x827   :  { %v5846_v60 = vrot.slane %v5845_v41, 2  ;;  %v5860_v25 = vrot.slane %v5859_v13, 2  ;;  %v5854_v39 = vadd.f32 %v5853_v14, %v5852_v19  ;;  %v5840_v30 = vadd.f32 %v5839_v27, %v5838_v4 }
 0x829   :  { %v5861_v35 = vadd.f32 %v5860_v25, %v5859_v13  ;;  %v5847_v58 = vadd.f32 %v5846_v60, %v5845_v41  ;;  %v5855_v47 = vrot.slane %v5854_v39, 1  ;;  %v5841_v29 = vrot.slane %v5840_v30, 1 }
 0x82b   :  { %v5862_v43 = vrot.slane %v5861_v35, 1  ;;  %v5848_v21 = vrot.slane %v5847_v58, 1  ;;  %v5856_v53 = vadd.f32 %v5855_v47, %v5854_v39  ;;  %v5842_v34 = vadd.f32 %v5841_v29, %v5840_v30 }
 0x82d   :  { %v5863_v56 = vadd.f32 %v5862_v43, %v5861_v35  ;;  %v5849_v22 = vadd.f32 %v5848_v21, %v5847_v58  ;;  %v5867_v11 = vmul.f32 0.0625, %v5856_v53  ;;  %v5865_v42 = vmul.f32 0.0625, %v5842_v34 }
 0x82f   :  { %v5868_v24 = vmul.f32 0.0625, %v5863_v56  ;;  %v5866_v40 = vmul.f32 0.0625, %v5849_v22  ;;  %5915 = vrot.lane.b32.xlu1 %v5867_v11, %s6725_s28  ;;  %5914 = vst.msk [vmem:[#allocation2 + $0x4] sm:$0x1] %vm5903_vm9, %v5867_v11  ;;  %5905 = vrot.lane.b32.xlu0 %v5865_v42, %s6725_s28  ;;  %5904 = vst.msk [vmem:[#allocation2] sm:$0x1] %vm5903_vm9, %v5865_v42 }
 0x831   :  { %5919 = vst.msk [vmem:[#allocation2 + $0x6] sm:$0x1] %vm5903_vm9, %v5868_v24  ;;  %v5874_v9 = vcombine.low %v5867_v11, %v5868_v24  ;;  %5909 = vst.msk [vmem:[#allocation2 + $0x2] sm:$0x1] %vm5903_vm9, %v5866_v40  ;;  %v5873_v61 = vcombine.low %v5865_v42, %v5866_v40 }
 0x833   :  { %v5888_v33 = vrot.slane %v5874_v9, %v5880_v26  ;;  %v5881_v0 = vrot.slane %v5873_v61, %v5880_v26  ;;  %5920 = vrot.lane.b32.xlu1 %v5868_v24, %s6725_s28  ;;  %5910 = vrot.lane.b32.xlu0 %v5866_v40, %s6725_s28 }
 0x835   :  { %v5889_v59 = vcombine.low %v5881_v0, %v5888_v33 }
 0x837   :  { %v5896_v8 = vrot.slane %v5889_v59, %v5880_v26 }
 0x839   :  { %5902 = vst.msk [vmem:[%s12334_s18] sm:$0xf] %vm5900_vm10, %v5896_v8 }
 0x8a1   :  { %v5916_v49 = vpop.permute.xlu1 %5915  ;;  %v5906_v5 = vpop.permute.xlu0 %5905 }
 0x8a2   :  { %5918 = vst.msk [vmem:[#allocation2 + $0x5] sm:$0x1] %vm5903_vm9, %v5916_v49  ;;  %5908 = vst.msk [vmem:[#allocation2 + $0x1] sm:$0x1] %vm5903_vm9, %v5906_v5 }
 0x8a5   :  { %v5921_v52 = vpop.permute.xlu1 %5920  ;;  %v5911_v10 = vpop.permute.xlu0 %5910 }
 0x8a6   :  { %5923 = vst.msk [vmem:[#allocation2 + $0x7] sm:$0x1] %vm5903_vm9, %v5921_v52  ;;  %5913 = vst.msk [vmem:[#allocation2 + $0x3] sm:$0x1] %vm5903_vm9, %v5911_v10 }
 0x8ad   :  { %v5924_v23 = vld [vmem:[#allocation2] sm:$0xff] }
 0x8ae   :  { %v5941_v12 = vpack.c.bf16 %v5924_v23, %v5924_v23 }
 0x8b0   :  { %6301 = vmatmul.mubr.msk.bf16.vlgmr.msra.gmra.mxu1 %vm6026_vm11, %v5941_v12  ;;  %6302 = vmatmul.mubr.msk.bf16.vlgmr.msra.gmra.mxu0 %vm6026_vm11, %v5941_v12 }
 0x970   :  { %v6064_v32 = vpop.f32.mrf.mxu1  ;;  %v6105_v6 = vpop.f32.mrf.mxu0 }
 0x971   :  { %v6065_v15 = vadd.f32 %v6064_v32, %v5942_v20  ;;  %v6106_v57 = vadd.f32 %v6105_v6, %v5944_v17 }
 0x972   :  { %v6066_v50 = vpop.f32.mrf.mxu1  ;;  %v6107_v46 = vpop.f32.mrf.mxu0 }
 0x973   :  { %6112 = vst [vmem:[%s12336_s17] sm:$0xff] %v6065_v15  ;;  %6114 = vst [vmem:[%s12336_s17 + $0x10] sm:$0xff] %v6106_v57  ;;  %v6067_v37 = vadd.f32 %v6066_v50, %v5943_v3  ;;  %v6108_v18 = vadd.f32 %v6107_v46, %v5945_v31 }
 0x974   :  { %v6068_v4 = vpop.f32.mrf.mxu1  ;;  %v6109_v19 = vpop.f32.mrf.mxu0 }
 0x975   :  { %6113 = vst [vmem:[%s12336_s17 + $0x8] sm:$0xff] %v6067_v37  ;;  %6115 = vst [vmem:[%s12336_s17 + $0x18] sm:$0xff] %v6108_v18 }
 0x976   :  { %v6069_v45 = vpop.f32.mrf.mxu1  ;;  %v6110_v63 = vpop.f32.mrf.mxu0 }

</bundles_post_ra>
